<compile_context>
chip_gen: v7x
topology: tpu7x:2x2x1
jax: 0.10.0
libtpu: 0.0.40
codegen_flags: <defaults>
</compile_context>

<pallas_src>
import functools

import jax
import jax.numpy as jnp
from jax.experimental import pallas as pl
from jax.experimental.pallas import tpu as pltpu

NUM_CLASSES = 80
LANE = 128
_TAPS_2x2 = ((0, 0), (0, 1), (1, 0), (1, 1))
_VMEM_LIMIT = 32 * 1024 * 1024


def _round_up(x, m):
    return (x + m - 1) // m * m


# ---------------------------------------------------------------------------
# Kernel 1: generic stride-1 "tap" conv (in-kernel im2col), per-image grid.
#   x_ref : (1, Hin, Win, Cin)  bf16   (already spatially padded as needed)
#   w_ref : (T, Cin, Cout)      bf16   (one (Cin,Cout) matrix per tap)
#   b_ref : (1, Cout)           f32
#   o_ref : (1, Ho, Wo, Cout)   out dtype (bf16 for intermediate layers)
# ---------------------------------------------------------------------------
def _tap_conv_kernel(x_ref, w_ref, b_ref, o_ref, *, taps, Ho, Wo, relu):
    bias = b_ref[...]                                    # (1, Cout) f32
    for ho in range(Ho):
        acc = jnp.zeros((Wo, o_ref.shape[-1]), jnp.float32)
        for t, (ki, kj) in enumerate(taps):
            a = x_ref[0, ho + ki, kj:kj + Wo, :]         # (Wo, Cin) bf16
            acc = acc + jnp.dot(a, w_ref[t],
                                preferred_element_type=jnp.float32)
        acc = acc + bias
        if relu:
            acc = jnp.maximum(acc, 0.0)
        o_ref[0, ho, :, :] = acc.astype(o_ref.dtype)


def tap_conv(x, w_taps, bias, *, taps, out_hw, relu, out_dtype):
    B, Hin, Win, Cin = x.shape
    T, Ck, Cout = w_taps.shape
    Ho, Wo = out_hw
    assert T == len(taps) and Ck == Cin

    kernel = functools.partial(_tap_conv_kernel, taps=tuple(taps),
                               Ho=Ho, Wo=Wo, relu=relu)
    return pl.pallas_call(
        kernel,
        grid_spec=pltpu.PrefetchScalarGridSpec(
            num_scalar_prefetch=0,
            grid=(B,),                                   # batch-parallel
            in_specs=[
                pl.BlockSpec((1, Hin, Win, Cin), lambda b: (b, 0, 0, 0)),
                pl.BlockSpec((T, Cin, Cout), lambda b: (0, 0, 0)),
                pl.BlockSpec((1, Cout), lambda b: (0, 0)),
            ],
            out_specs=pl.BlockSpec((1, Ho, Wo, Cout), lambda b: (b, 0, 0, 0)),
        ),
        out_shape=jax.ShapeDtypeStruct((B, Ho, Wo, Cout), out_dtype),
        compiler_params=pltpu.CompilerParams(
            dimension_semantics=("parallel",),
            vmem_limit_bytes=_VMEM_LIMIT,
        ),
    )(x, w_taps, bias)


# ---------------------------------------------------------------------------
# Kernel 2: fused 1x1 neck (+ReLU) + 3x3 stride-1 pad-1 head, per-image grid.
# The neck activation is written (spatially zero-padded) into a VMEM scratch
# and never leaves the chip; the head does its 9 taps directly on it.
# ---------------------------------------------------------------------------
def _neck_head_kernel(x_ref, wn_ref, bn_ref, wh_ref, bh_ref, o_ref, npad_ref,
                      *, Ho, Wo):
    # zero border (and stale contents) of the padded neck buffer
    npad_ref[...] = jnp.zeros_like(npad_ref)

    bn = bn_ref[...]                                     # (1, Cn)  f32
    for ho in range(Ho):
        a = x_ref[0, ho, :, :]                           # (Wo, Cin) bf16
        n = jnp.dot(a, wn_ref[...],
                    preferred_element_type=jnp.float32) + bn
        n = jnp.maximum(n, 0.0)
        npad_ref[ho + 1, 1:1 + Wo, :] = n.astype(npad_ref.dtype)

    bh = bh_ref[...]                                     # (1, Chp) f32
    for ho in range(Ho):
        acc = jnp.zeros((Wo, o_ref.shape[-1]), jnp.float32)
        for t in range(9):
            ki, kj = t // 3, t % 3
            a = npad_ref[ho + ki, kj:kj + Wo, :]         # (Wo, Cn) bf16
            acc = acc + jnp.dot(a, wh_ref[t],
                                preferred_element_type=jnp.float32)
        o_ref[0, ho, :, :] = (acc + bh).astype(o_ref.dtype)


def neck_head(x, wn, bn, wh, bh):
    B, Ho, Wo, Cin = x.shape
    Cn = wn.shape[1]
    Chp = wh.shape[2]

    kernel = functools.partial(_neck_head_kernel, Ho=Ho, Wo=Wo)
    return pl.pallas_call(
        kernel,
        grid_spec=pltpu.PrefetchScalarGridSpec(
            num_scalar_prefetch=0,
            grid=(B,),                                   # batch-parallel
            in_specs=[
                pl.BlockSpec((1, Ho, Wo, Cin), lambda b: (b, 0, 0, 0)),
                pl.BlockSpec((Cin, Cn), lambda b: (0, 0)),
                pl.BlockSpec((1, Cn), lambda b: (0, 0)),
                pl.BlockSpec((9, Cn, Chp), lambda b: (0, 0, 0)),
                pl.BlockSpec((1, Chp), lambda b: (0, 0)),
            ],
            out_specs=pl.BlockSpec((1, Ho, Wo, Chp), lambda b: (b, 0, 0, 0)),
            scratch_shapes=[pltpu.VMEM((Ho + 2, Wo + 2, Cn), jnp.bfloat16)],
        ),
        out_shape=jax.ShapeDtypeStruct((B, Ho, Wo, Chp), jnp.float32),
        compiler_params=pltpu.CompilerParams(
            dimension_semantics=("parallel",),
            vmem_limit_bytes=_VMEM_LIMIT,
        ),
    )(x, wn, bn, wh, bh)


# ---------------------------------------------------------------------------
# One-time weight packing (BN fold, transpose, zero-pad, bf16 cast, stride-2
# rewrite to space-to-depth taps).  Runs ONCE, never per forward.
# ---------------------------------------------------------------------------
def fold_bn(w_oihw, gamma, beta, mean, var, eps=1e-5):
    """Fold a frozen BatchNorm2d (eval mode, per `freeze_bn`) into the conv."""
    scale = gamma / jnp.sqrt(var + eps)
    return w_oihw * scale[:, None, None, None], beta - mean * scale


def _pack_bias(bias, cout_p):
    return jnp.zeros((1, cout_p), jnp.float32).at[0, :bias.shape[0]].set(bias)


def _pack_s2d_conv_weight(w_oihw, bias, cin_p, cout_p):
    """3x3 stride-2 pad-1 conv -> 2x2-tap stride-1 conv over a space-to-depth
    input whose per-pixel channel count is cin_p (channel order (dy,dx,c))."""
    Cout, Cin, KH, KW = w_oihw.shape
    w2 = jnp.zeros((4, 4 * cin_p, cout_p), jnp.float32)
    for bi in range(2):
        for bj in range(2):
            for dy in range(2):
                for dx in range(2):
                    ki, kj = 2 * bi + dy, 2 * bj + dx
                    if ki >= KH or kj >= KW:
                        continue
                    w2 = w2.at[
                        bi * 2 + bj,
                        (dy * 2 + dx) * cin_p:(dy * 2 + dx) * cin_p + Cin,
                        :Cout].set(w_oihw[:, :, ki, kj].T)
    return w2.astype(jnp.bfloat16), _pack_bias(bias, cout_p)


def _pack_s1_conv_weight(w_oihw, bias, cin_p, cout_p):
    """KxK stride-1 conv -> per-tap (cin_p, cout_p) matrices."""
    Cout, Cin, KH, KW = w_oihw.shape
    wt = jnp.zeros((KH * KW, cin_p, cout_p), jnp.float32)
    for ki in range(KH):
        for kj in range(KW):
            wt = wt.at[ki * KW + kj, :Cin, :Cout].set(w_oihw[:, :, ki, kj].T)
    return wt.astype(jnp.bfloat16), _pack_bias(bias, cout_p)


def init_params(key, in_ch=4, num_classes=80):
    ks = jax.random.split(key, 4)

    def w(k, shape, fan_in):
        return jax.random.normal(k, shape, jnp.float32) * (1.0 / jnp.sqrt(fan_in))

    p = {}
    # backbone stage 1: in_ch -> 16, stride 2
    p["bb1_w"] = w(ks[0], (16, in_ch, 3, 3), in_ch * 9)
    p["bb1_bn"] = (jnp.ones(16), jnp.zeros(16), jnp.zeros(16), jnp.ones(16))
    # backbone stage 2: 16 -> 32, stride 2
    p["bb2_w"] = w(ks[1], (32, 16, 3, 3), 16 * 9)
    p["bb2_bn"] = (jnp.ones(32), jnp.zeros(32), jnp.zeros(32), jnp.ones(32))
    # neck: 1x1 conv, backbone.out_planes(=32) -> 256
    p["neck_w"] = w(ks[2], (256, 32, 1, 1), 32)
    p["neck_b"] = jnp.zeros(256)
    # head: 3x3 conv, 256 -> num_classes
    p["head_w"] = w(ks[3], (num_classes, 256, 3, 3), 256 * 9)
    p["head_b"] = jnp.zeros(num_classes)
    return p


def prepare_inference_params(params):
    """Fold frozen BN + pre-pack every weight for the kernels, ONCE."""
    w1, b1 = fold_bn(params["bb1_w"], *params["bb1_bn"])
    w2, b2 = fold_bn(params["bb2_w"], *params["bb2_bn"])

    c_in = w1.shape[1]                        # raw input channels (4)
    c1p = _round_up(w1.shape[0], LANE)        # 16  -> 128 (lane-dense stores)
    c2p = _round_up(w2.shape[0], LANE)        # 32  -> 128
    cn = params["neck_w"].shape[0]            # 256 (already lane multiple)
    chp = _round_up(params["head_w"].shape[0], LANE)   # 80 -> 128

    bb1_w, bb1_b = _pack_s2d_conv_weight(w1, b1, cin_p=c_in, cout_p=c1p)
    bb2_w, bb2_b = _pack_s2d_conv_weight(w2, b2, cin_p=c1p, cout_p=c2p)

    neck_w = jnp.zeros((c2p, cn), jnp.float32).at[
        :params["neck_w"].shape[1], :].set(params["neck_w"][:, :, 0, 0].T)
    neck_b = params["neck_b"].reshape(1, cn).astype(jnp.float32)

    head_w, head_b = _pack_s1_conv_weight(params["head_w"], params["head_b"],
                                          cin_p=cn, cout_p=chp)

    return {
        "bb1_w": bb1_w, "bb1_b": bb1_b,
        "bb2_w": bb2_w, "bb2_b": bb2_b,
        "neck_w": neck_w.astype(jnp.bfloat16), "neck_b": neck_b,
        "head_w": head_w, "head_b": head_b,
    }


# ---------------------------------------------------------------------------
# Forward pass (eval mode: Model.forward(imgs) without targets)
# ---------------------------------------------------------------------------
def _space_to_depth(x):
    """(B, H, W, C) -> (B, H/2, W/2, 4C), channel order (dy, dx, c)."""
    B, H, W, C = x.shape
    x = x.reshape(B, H // 2, 2, W // 2, 2, C)
    x = jnp.transpose(x, (0, 1, 3, 2, 4, 5))
    return x.reshape(B, H // 2, W // 2, 4 * C)


@jax.jit
def model_forward(fp, imgs_nchw):
    x = jnp.transpose(imgs_nchw, (0, 2, 3, 1)).astype(jnp.bfloat16)   # NHWC

    # backbone stage 1: 3x3/s2 (+folded BN) + ReLU, run as a 2x2-tap stride-1
    # conv over the space-to-depth'd, spatially padded input -> taps in-kernel.
    xp = _space_to_depth(jnp.pad(x, ((0, 0), (1, 1), (1, 1), (0, 0))))
    _, hb1, wb1, _ = xp.shape
    x1 = tap_conv(xp, fp["bb1_w"], fp["bb1_b"], taps=_TAPS_2x2,
                  out_hw=(hb1 - 1, wb1 - 1), relu=True, out_dtype=jnp.bfloat16)

    # backbone stage 2 (same scheme; x1 keeps its lane-padded channels)
    x1p = _space_to_depth(jnp.pad(x1, ((0, 0), (1, 1), (1, 1), (0, 0))))
    _, hb2, wb2, _ = x1p.shape
    x2 = tap_conv(x1p, fp["bb2_w"], fp["bb2_b"], taps=_TAPS_2x2,
                  out_hw=(hb2 - 1, wb2 - 1), relu=True, out_dtype=jnp.bfloat16)

    # fused neck (1x1 + ReLU) + head (3x3 s1 p1): neck output never hits HBM
    logits = neck_head(x2, fp["neck_w"], fp["neck_b"],
                       fp["head_w"], fp["head_b"])

    logits = logits[..., :NUM_CLASSES]                    # single final slice
    return jnp.transpose(logits, (0, 3, 1, 2))            # NHWC -> NCHW


# ---------------------------------------------------------------------------
# Pure-JAX f32 reference (for correctness check only)
# ---------------------------------------------------------------------------
def _reference_forward(raw, imgs):
    def conv(x, w, b, stride, pad):
        y = jax.lax.conv_general_dilated(
            x, w, window_strides=(stride, stride),
            padding=[(pad, pad), (pad, pad)],
            dimension_numbers=("NCHW", "OIHW", "NCHW"))
        return y + b[None, :, None, None]

    w1, b1 = fold_bn(raw["bb1_w"], *raw["bb1_bn"])
    w2, b2 = fold_bn(raw["bb2_w"], *raw["bb2_bn"])
    x = jax.nn.relu(conv(imgs, w1, b1, 2, 1))
    x = jax.nn.relu(conv(x, w2, b2, 2, 1))
    x = jax.nn.relu(conv(x, raw["neck_w"][:, :, :, :], raw["neck_b"], 1, 0))
    return conv(x, raw["head_w"], raw["head_b"], 1, 1)


# ---------------------------------------------------------------------------
if __name__ == "__main__":
    key = jax.random.PRNGKey(0)
    k_params, k_imgs = jax.random.split(key)

    raw_params = init_params(k_params, in_ch=4, num_classes=NUM_CLASSES)
    infer_params = prepare_inference_params(raw_params)
    imgs = jax.random.normal(k_imgs, (2, 4, 16, 16), jnp.float32)   # NCHW

    out = model_forward(infer_params, imgs)
    jax.block_until_ready(out)

    assert out.shape == (2, NUM_CLASSES, 4, 4), out.shape
    assert bool(jnp.all(jnp.isfinite(out)))

    ref = _reference_forward(raw_params, imgs)
    max_err = float(jnp.max(jnp.abs(out.astype(jnp.float32) - ref)))
    assert max_err < 0.5, f"max abs err vs f32 reference: {max_err}"

    print("KERNEL_OK")
</pallas_src>

<mosaic_0001>
module attributes {stable_mosaic.version = 11 : i64} {
  func.func @_tap_conv_kernel(%arg0: i32, %arg1: memref<1x9x9x16xbf16, #tpu.memory_space<vmem>>, %arg2: memref<4x16x128xbf16, #tpu.memory_space<vmem>>, %arg3: memref<1x128xf32, #tpu.memory_space<vmem>>, %arg4: memref<1x8x8x128xbf16, #tpu.memory_space<vmem>>) attributes {dimension_semantics = [#tpu.dimension_semantics<parallel>], iteration_bounds = array<i64: 2>, scalar_prefetch = 0 : i64, scratch_operands = 0 : i64, tpu.core_type = #tpu.core_type<tc>, window_params = [{transform_indices = @transform_0, window_bounds = array<i64: 1, 9, 9, 16>}, {pipeline_mode = #tpu.pipeline_mode<synchronous>, transform_indices = @transform_1, window_bounds = array<i64: 4, 16, 128>}, {pipeline_mode = #tpu.pipeline_mode<synchronous>, transform_indices = @transform_2, window_bounds = array<i64: 1, 128>}, {transform_indices = @transform_3, window_bounds = array<i64: 1, 8, 8, 128>}]} {
    %c0 = arith.constant 0 : index
    %c0_0 = arith.constant 0 : index
    %0 = vector.load %arg3[%c0, %c0_0] : memref<1x128xf32, #tpu.memory_space<vmem>>, vector<1x128xf32>
    %cst = arith.constant 0.000000e+00 : f32
    %1 = vector.broadcast %cst : f32 to vector<8x128xf32>
    %c0_1 = arith.constant 0 : index
    %c0_2 = arith.constant 0 : index
    %c0_3 = arith.constant 0 : index
    %c0_4 = arith.constant 0 : index
    %2 = vector.load %arg1[%c0_1, %c0_2, %c0_3, %c0_4] : memref<1x9x9x16xbf16, #tpu.memory_space<vmem>>, vector<1x1x8x16xbf16>
    %3 = vector.shape_cast %2 : vector<1x1x8x16xbf16> to vector<8x16xbf16>
    %c0_5 = arith.constant 0 : index
    %c0_6 = arith.constant 0 : index
    %c0_7 = arith.constant 0 : index
    %4 = vector.load %arg2[%c0_5, %c0_6, %c0_7] : memref<4x16x128xbf16, #tpu.memory_space<vmem>>, vector<1x16x128xbf16>
    %5 = vector.shape_cast %4 : vector<1x16x128xbf16> to vector<16x128xbf16>
    %cst_8 = arith.constant dense<0.000000e+00> : vector<8x128xf32>
    %6 = tpu.matmul %3, %5, %cst_8 {dimension_numbers = #tpu.dot_dimension_numbers<[1], [0], [0], [1], [0, 0, 1, 1], [], []>} : vector<8x16xbf16>, vector<16x128xbf16>, vector<8x128xf32> -> vector<8x128xf32>
    %7 = arith.addf %1, %6 : vector<8x128xf32>
    %c0_9 = arith.constant 0 : index
    %c0_10 = arith.constant 0 : index
    %c1 = arith.constant 1 : index
    %c0_11 = arith.constant 0 : index
    %8 = vector.load %arg1[%c0_9, %c0_10, %c1, %c0_11] : memref<1x9x9x16xbf16, #tpu.memory_space<vmem>>, vector<1x1x8x16xbf16>
    %9 = vector.shape_cast %8 : vector<1x1x8x16xbf16> to vector<8x16xbf16>
    %c1_12 = arith.constant 1 : index
    %c0_13 = arith.constant 0 : index
    %c0_14 = arith.constant 0 : index
    %10 = vector.load %arg2[%c1_12, %c0_13, %c0_14] : memref<4x16x128xbf16, #tpu.memory_space<vmem>>, vector<1x16x128xbf16>
    %11 = vector.shape_cast %10 : vector<1x16x128xbf16> to vector<16x128xbf16>
    %cst_15 = arith.constant dense<0.000000e+00> : vector<8x128xf32>
    %12 = tpu.matmul %9, %11, %cst_15 {dimension_numbers = #tpu.dot_dimension_numbers<[1], [0], [0], [1], [0, 0, 1, 1], [], []>} : vector<8x16xbf16>, vector<16x128xbf16>, vector<8x128xf32> -> vector<8x128xf32>
    %13 = arith.addf %7, %12 : vector<8x128xf32>
    %c0_16 = arith.constant 0 : index
    %c1_17 = arith.constant 1 : index
    %c0_18 = arith.constant 0 : index
    %c0_19 = arith.constant 0 : index
    %14 = vector.load %arg1[%c0_16, %c1_17, %c0_18, %c0_19] : memref<1x9x9x16xbf16, #tpu.memory_space<vmem>>, vector<1x1x8x16xbf16>
    %15 = vector.shape_cast %14 : vector<1x1x8x16xbf16> to vector<8x16xbf16>
    %c2 = arith.constant 2 : index
    %c0_20 = arith.constant 0 : index
    %c0_21 = arith.constant 0 : index
    %16 = vector.load %arg2[%c2, %c0_20, %c0_21] : memref<4x16x128xbf16, #tpu.memory_space<vmem>>, vector<1x16x128xbf16>
    %17 = vector.shape_cast %16 : vector<1x16x128xbf16> to vector<16x128xbf16>
    %cst_22 = arith.constant dense<0.000000e+00> : vector<8x128xf32>
    %18 = tpu.matmul %15, %17, %cst_22 {dimension_numbers = #tpu.dot_dimension_numbers<[1], [0], [0], [1], [0, 0, 1, 1], [], []>} : vector<8x16xbf16>, vector<16x128xbf16>, vector<8x128xf32> -> vector<8x128xf32>
    %19 = arith.addf %13, %18 : vector<8x128xf32>
    %c0_23 = arith.constant 0 : index
    %c1_24 = arith.constant 1 : index
    %c1_25 = arith.constant 1 : index
    %c0_26 = arith.constant 0 : index
    %20 = vector.load %arg1[%c0_23, %c1_24, %c1_25, %c0_26] : memref<1x9x9x16xbf16, #tpu.memory_space<vmem>>, vector<1x1x8x16xbf16>
    %21 = vector.shape_cast %20 : vector<1x1x8x16xbf16> to vector<8x16xbf16>
    %c3 = arith.constant 3 : index
    %c0_27 = arith.constant 0 : index
    %c0_28 = arith.constant 0 : index
    %22 = vector.load %arg2[%c3, %c0_27, %c0_28] : memref<4x16x128xbf16, #tpu.memory_space<vmem>>, vector<1x16x128xbf16>
    %23 = vector.shape_cast %22 : vector<1x16x128xbf16> to vector<16x128xbf16>
    %cst_29 = arith.constant dense<0.000000e+00> : vector<8x128xf32>
    %24 = tpu.matmul %21, %23, %cst_29 {dimension_numbers = #tpu.dot_dimension_numbers<[1], [0], [0], [1], [0, 0, 1, 1], [], []>} : vector<8x16xbf16>, vector<16x128xbf16>, vector<8x128xf32> -> vector<8x128xf32>
    %25 = arith.addf %19, %24 : vector<8x128xf32>
    %26 = vector.broadcast %0 : vector<1x128xf32> to vector<8x128xf32>
    %27 = arith.addf %25, %26 : vector<8x128xf32>
    %cst_30 = arith.constant 0.000000e+00 : f32
    %28 = vector.broadcast %cst_30 : f32 to vector<8x128xf32>
    %29 = arith.maximumf %27, %28 : vector<8x128xf32>
    %30 = arith.truncf %29 : vector<8x128xf32> to vector<8x128xbf16>
    %c0_31 = arith.constant 0 : index
    %c0_32 = arith.constant 0 : index
    %c0_33 = arith.constant 0 : index
    %c0_34 = arith.constant 0 : index
    %31 = vector.load %arg4[%c0_31, %c0_32, %c0_33, %c0_34] : memref<1x8x8x128xbf16, #tpu.memory_space<vmem>>, vector<1x1x8x128xbf16>
    %32 = vector.shape_cast %31 : vector<1x1x8x128xbf16> to vector<8x128xbf16>
    %33 = vector.shape_cast %30 : vector<8x128xbf16> to vector<1x1x8x128xbf16>
    tpu.vector_store %arg4[%c0_31, %c0_32, %c0_33, %c0_34], %33 {strides = array<i32>} : memref<1x8x8x128xbf16, #tpu.memory_space<vmem>>, vector<1x1x8x128xbf16>,
    %cst_35 = arith.constant 0.000000e+00 : f32
    %34 = vector.broadcast %cst_35 : f32 to vector<8x128xf32>
    %c0_36 = arith.constant 0 : index
    %c1_37 = arith.constant 1 : index
    %c0_38 = arith.constant 0 : index
    %c0_39 = arith.constant 0 : index
    %35 = vector.load %arg1[%c0_36, %c1_37, %c0_38, %c0_39] : memref<1x9x9x16xbf16, #tpu.memory_space<vmem>>, vector<1x1x8x16xbf16>
    %36 = vector.shape_cast %35 : vector<1x1x8x16xbf16> to vector<8x16xbf16>
    %c0_40 = arith.constant 0 : index
    %c0_41 = arith.constant 0 : index
    %c0_42 = arith.constant 0 : index
    %37 = vector.load %arg2[%c0_40, %c0_41, %c0_42] : memref<4x16x128xbf16, #tpu.memory_space<vmem>>, vector<1x16x128xbf16>
    %38 = vector.shape_cast %37 : vector<1x16x128xbf16> to vector<16x128xbf16>
    %cst_43 = arith.constant dense<0.000000e+00> : vector<8x128xf32>
    %39 = tpu.matmul %36, %38, %cst_43 {dimension_numbers = #tpu.dot_dimension_numbers<[1], [0], [0], [1], [0, 0, 1, 1], [], []>} : vector<8x16xbf16>, vector<16x128xbf16>, vector<8x128xf32> -> vector<8x128xf32>
    %40 = arith.addf %34, %39 : vector<8x128xf32>
    %c0_44 = arith.constant 0 : index
    %c1_45 = arith.constant 1 : index
    %c1_46 = arith.constant 1 : index
    %c0_47 = arith.constant 0 : index
    %41 = vector.load %arg1[%c0_44, %c1_45, %c1_46, %c0_47] : memref<1x9x9x16xbf16, #tpu.memory_space<vmem>>, vector<1x1x8x16xbf16>
    %42 = vector.shape_cast %41 : vector<1x1x8x16xbf16> to vector<8x16xbf16>
    %c1_48 = arith.constant 1 : index
    %c0_49 = arith.constant 0 : index
    %c0_50 = arith.constant 0 : index
    %43 = vector.load %arg2[%c1_48, %c0_49, %c0_50] : memref<4x16x128xbf16, #tpu.memory_space<vmem>>, vector<1x16x128xbf16>
    %44 = vector.shape_cast %43 : vector<1x16x128xbf16> to vector<16x128xbf16>
    %cst_51 = arith.constant dense<0.000000e+00> : vector<8x128xf32>
    %45 = tpu.matmul %42, %44, %cst_51 {dimension_numbers = #tpu.dot_dimension_numbers<[1], [0], [0], [1], [0, 0, 1, 1], [], []>} : vector<8x16xbf16>, vector<16x128xbf16>, vector<8x128xf32> -> vector<8x128xf32>
    %46 = arith.addf %40, %45 : vector<8x128xf32>
    %c0_52 = arith.constant 0 : index
    %c2_53 = arith.constant 2 : index
    %c0_54 = arith.constant 0 : index
    %c0_55 = arith.constant 0 : index
    %47 = vector.load %arg1[%c0_52, %c2_53, %c0_54, %c0_55] : memref<1x9x9x16xbf16, #tpu.memory_space<vmem>>, vector<1x1x8x16xbf16>
    %48 = vector.shape_cast %47 : vector<1x1x8x16xbf16> to vector<8x16xbf16>
    %c2_56 = arith.constant 2 : index
    %c0_57 = arith.constant 0 : index
    %c0_58 = arith.constant 0 : index
    %49 = vector.load %arg2[%c2_56, %c0_57, %c0_58] : memref<4x16x128xbf16, #tpu.memory_space<vmem>>, vector<1x16x128xbf16>
    %50 = vector.shape_cast %49 : vector<1x16x128xbf16> to vector<16x128xbf16>
    %cst_59 = arith.constant dense<0.000000e+00> : vector<8x128xf32>
    %51 = tpu.matmul %48, %50, %cst_59 {dimension_numbers = #tpu.dot_dimension_numbers<[1], [0], [0], [1], [0, 0, 1, 1], [], []>} : vector<8x16xbf16>, vector<16x128xbf16>, vector<8x128xf32> -> vector<8x128xf32>
    %52 = arith.addf %46, %51 : vector<8x128xf32>
    %c0_60 = arith.constant 0 : index
    %c2_61 = arith.constant 2 : index
    %c1_62 = arith.constant 1 : index
    %c0_63 = arith.constant 0 : index
    %53 = vector.load %arg1[%c0_60, %c2_61, %c1_62, %c0_63] : memref<1x9x9x16xbf16, #tpu.memory_space<vmem>>, vector<1x1x8x16xbf16>
    %54 = vector.shape_cast %53 : vector<1x1x8x16xbf16> to vector<8x16xbf16>
    %c3_64 = arith.constant 3 : index
    %c0_65 = arith.constant 0 : index
    %c0_66 = arith.constant 0 : index
    %55 = vector.load %arg2[%c3_64, %c0_65, %c0_66] : memref<4x16x128xbf16, #tpu.memory_space<vmem>>, vector<1x16x128xbf16>
    %56 = vector.shape_cast %55 : vector<1x16x128xbf16> to vector<16x128xbf16>
    %cst_67 = arith.constant dense<0.000000e+00> : vector<8x128xf32>
    %57 = tpu.matmul %54, %56, %cst_67 {dimension_numbers = #tpu.dot_dimension_numbers<[1], [0], [0], [1], [0, 0, 1, 1], [], []>} : vector<8x16xbf16>, vector<16x128xbf16>, vector<8x128xf32> -> vector<8x128xf32>
    %58 = arith.addf %52, %57 : vector<8x128xf32>
    %59 = vector.broadcast %0 : vector<1x128xf32> to vector<8x128xf32>
    %60 = arith.addf %58, %59 : vector<8x128xf32>
    %cst_68 = arith.constant 0.000000e+00 : f32
    %61 = vector.broadcast %cst_68 : f32 to vector<8x128xf32>
    %62 = arith.maximumf %60, %61 : vector<8x128xf32>
    %63 = arith.truncf %62 : vector<8x128xf32> to vector<8x128xbf16>
    %c0_69 = arith.constant 0 : index
    %c1_70 = arith.constant 1 : index
    %c0_71 = arith.constant 0 : index
    %c0_72 = arith.constant 0 : index
    %64 = vector.load %arg4[%c0_69, %c1_70, %c0_71, %c0_72] : memref<1x8x8x128xbf16, #tpu.memory_space<vmem>>, vector<1x1x8x128xbf16>
    %65 = vector.shape_cast %64 : vector<1x1x8x128xbf16> to vector<8x128xbf16>
    %66 = vector.shape_cast %63 : vector<8x128xbf16> to vector<1x1x8x128xbf16>
    tpu.vector_store %arg4[%c0_69, %c1_70, %c0_71, %c0_72], %66 {strides = array<i32>} : memref<1x8x8x128xbf16, #tpu.memory_space<vmem>>, vector<1x1x8x128xbf16>,
    %cst_73 = arith.constant 0.000000e+00 : f32
    %67 = vector.broadcast %cst_73 : f32 to vector<8x128xf32>
    %c0_74 = arith.constant 0 : index
    %c2_75 = arith.constant 2 : index
    %c0_76 = arith.constant 0 : index
    %c0_77 = arith.constant 0 : index
    %68 = vector.load %arg1[%c0_74, %c2_75, %c0_76, %c0_77] : memref<1x9x9x16xbf16, #tpu.memory_space<vmem>>, vector<1x1x8x16xbf16>
    %69 = vector.shape_cast %68 : vector<1x1x8x16xbf16> to vector<8x16xbf16>
    %c0_78 = arith.constant 0 : index
    %c0_79 = arith.constant 0 : index
    %c0_80 = arith.constant 0 : index
    %70 = vector.load %arg2[%c0_78, %c0_79, %c0_80] : memref<4x16x128xbf16, #tpu.memory_space<vmem>>, vector<1x16x128xbf16>
    %71 = vector.shape_cast %70 : vector<1x16x128xbf16> to vector<16x128xbf16>
    %cst_81 = arith.constant dense<0.000000e+00> : vector<8x128xf32>
    %72 = tpu.matmul %69, %71, %cst_81 {dimension_numbers = #tpu.dot_dimension_numbers<[1], [0], [0], [1], [0, 0, 1, 1], [], []>} : vector<8x16xbf16>, vector<16x128xbf16>, vector<8x128xf32> -> vector<8x128xf32>
    %73 = arith.addf %67, %72 : vector<8x128xf32>
    %c0_82 = arith.constant 0 : index
    %c2_83 = arith.constant 2 : index
    %c1_84 = arith.constant 1 : index
    %c0_85 = arith.constant 0 : index
    %74 = vector.load %arg1[%c0_82, %c2_83, %c1_84, %c0_85] : memref<1x9x9x16xbf16, #tpu.memory_space<vmem>>, vector<1x1x8x16xbf16>
    %75 = vector.shape_cast %74 : vector<1x1x8x16xbf16> to vector<8x16xbf16>
    %c1_86 = arith.constant 1 : index
    %c0_87 = arith.constant 0 : index
    %c0_88 = arith.constant 0 : index
    %76 = vector.load %arg2[%c1_86, %c0_87, %c0_88] : memref<4x16x128xbf16, #tpu.memory_space<vmem>>, vector<1x16x128xbf16>
    %77 = vector.shape_cast %76 : vector<1x16x128xbf16> to vector<16x128xbf16>
    %cst_89 = arith.constant dense<0.000000e+00> : vector<8x128xf32>
    %78 = tpu.matmul %75, %77, %cst_89 {dimension_numbers = #tpu.dot_dimension_numbers<[1], [0], [0], [1], [0, 0, 1, 1], [], []>} : vector<8x16xbf16>, vector<16x128xbf16>, vector<8x128xf32> -> vector<8x128xf32>
    %79 = arith.addf %73, %78 : vector<8x128xf32>
    %c0_90 = arith.constant 0 : index
    %c3_91 = arith.constant 3 : index
    %c0_92 = arith.constant 0 : index
    %c0_93 = arith.constant 0 : index
    %80 = vector.load %arg1[%c0_90, %c3_91, %c0_92, %c0_93] : memref<1x9x9x16xbf16, #tpu.memory_space<vmem>>, vector<1x1x8x16xbf16>
    %81 = vector.shape_cast %80 : vector<1x1x8x16xbf16> to vector<8x16xbf16>
    %c2_94 = arith.constant 2 : index
    %c0_95 = arith.constant 0 : index
    %c0_96 = arith.constant 0 : index
    %82 = vector.load %arg2[%c2_94, %c0_95, %c0_96] : memref<4x16x128xbf16, #tpu.memory_space<vmem>>, vector<1x16x128xbf16>
    %83 = vector.shape_cast %82 : vector<1x16x128xbf16> to vector<16x128xbf16>
    %cst_97 = arith.constant dense<0.000000e+00> : vector<8x128xf32>
    %84 = tpu.matmul %81, %83, %cst_97 {dimension_numbers = #tpu.dot_dimension_numbers<[1], [0], [0], [1], [0, 0, 1, 1], [], []>} : vector<8x16xbf16>, vector<16x128xbf16>, vector<8x128xf32> -> vector<8x128xf32>
    %85 = arith.addf %79, %84 : vector<8x128xf32>
    %c0_98 = arith.constant 0 : index
    %c3_99 = arith.constant 3 : index
    %c1_100 = arith.constant 1 : index
    %c0_101 = arith.constant 0 : index
    %86 = vector.load %arg1[%c0_98, %c3_99, %c1_100, %c0_101] : memref<1x9x9x16xbf16, #tpu.memory_space<vmem>>, vector<1x1x8x16xbf16>
    %87 = vector.shape_cast %86 : vector<1x1x8x16xbf16> to vector<8x16xbf16>
    %c3_102 = arith.constant 3 : index
    %c0_103 = arith.constant 0 : index
    %c0_104 = arith.constant 0 : index
    %88 = vector.load %arg2[%c3_102, %c0_103, %c0_104] : memref<4x16x128xbf16, #tpu.memory_space<vmem>>, vector<1x16x128xbf16>
    %89 = vector.shape_cast %88 : vector<1x16x128xbf16> to vector<16x128xbf16>
    %cst_105 = arith.constant dense<0.000000e+00> : vector<8x128xf32>
    %90 = tpu.matmul %87, %89, %cst_105 {dimension_numbers = #tpu.dot_dimension_numbers<[1], [0], [0], [1], [0, 0, 1, 1], [], []>} : vector<8x16xbf16>, vector<16x128xbf16>, vector<8x128xf32> -> vector<8x128xf32>
    %91 = arith.addf %85, %90 : vector<8x128xf32>
    %92 = vector.broadcast %0 : vector<1x128xf32> to vector<8x128xf32>
    %93 = arith.addf %91, %92 : vector<8x128xf32>
    %cst_106 = arith.constant 0.000000e+00 : f32
    %94 = vector.broadcast %cst_106 : f32 to vector<8x128xf32>
    %95 = arith.maximumf %93, %94 : vector<8x128xf32>
    %96 = arith.truncf %95 : vector<8x128xf32> to vector<8x128xbf16>
    %c0_107 = arith.constant 0 : index
    %c2_108 = arith.constant 2 : index
    %c0_109 = arith.constant 0 : index
    %c0_110 = arith.constant 0 : index
    %97 = vector.load %arg4[%c0_107, %c2_108, %c0_109, %c0_110] : memref<1x8x8x128xbf16, #tpu.memory_space<vmem>>, vector<1x1x8x128xbf16>
    %98 = vector.shape_cast %97 : vector<1x1x8x128xbf16> to vector<8x128xbf16>
    %99 = vector.shape_cast %96 : vector<8x128xbf16> to vector<1x1x8x128xbf16>
    tpu.vector_store %arg4[%c0_107, %c2_108, %c0_109, %c0_110], %99 {strides = array<i32>} : memref<1x8x8x128xbf16, #tpu.memory_space<vmem>>, vector<1x1x8x128xbf16>,
    %cst_111 = arith.constant 0.000000e+00 : f32
    %100 = vector.broadcast %cst_111 : f32 to vector<8x128xf32>
    %c0_112 = arith.constant 0 : index
    %c3_113 = arith.constant 3 : index
    %c0_114 = arith.constant 0 : index
    %c0_115 = arith.constant 0 : index
    %101 = vector.load %arg1[%c0_112, %c3_113, %c0_114, %c0_115] : memref<1x9x9x16xbf16, #tpu.memory_space<vmem>>, vector<1x1x8x16xbf16>
    %102 = vector.shape_cast %101 : vector<1x1x8x16xbf16> to vector<8x16xbf16>
    %c0_116 = arith.constant 0 : index
    %c0_117 = arith.constant 0 : index
    %c0_118 = arith.constant 0 : index
    %103 = vector.load %arg2[%c0_116, %c0_117, %c0_118] : memref<4x16x128xbf16, #tpu.memory_space<vmem>>, vector<1x16x128xbf16>
    %104 = vector.shape_cast %103 : vector<1x16x128xbf16> to vector<16x128xbf16>
    %cst_119 = arith.constant dense<0.000000e+00> : vector<8x128xf32>
    %105 = tpu.matmul %102, %104, %cst_119 {dimension_numbers = #tpu.dot_dimension_numbers<[1], [0], [0], [1], [0, 0, 1, 1], [], []>} : vector<8x16xbf16>, vector<16x128xbf16>, vector<8x128xf32> -> vector<8x128xf32>
    %106 = arith.addf %100, %105 : vector<8x128xf32>
    %c0_120 = arith.constant 0 : index
    %c3_121 = arith.constant 3 : index
    %c1_122 = arith.constant 1 : index
    %c0_123 = arith.constant 0 : index
    %107 = vector.load %arg1[%c0_120, %c3_121, %c1_122, %c0_123] : memref<1x9x9x16xbf16, #tpu.memory_space<vmem>>, vector<1x1x8x16xbf16>
    %108 = vector.shape_cast %107 : vector<1x1x8x16xbf16> to vector<8x16xbf16>
    %c1_124 = arith.constant 1 : index
    %c0_125 = arith.constant 0 : index
    %c0_126 = arith.constant 0 : index
    %109 = vector.load %arg2[%c1_124, %c0_125, %c0_126] : memref<4x16x128xbf16, #tpu.memory_space<vmem>>, vector<1x16x128xbf16>
    %110 = vector.shape_cast %109 : vector<1x16x128xbf16> to vector<16x128xbf16>
    %cst_127 = arith.constant dense<0.000000e+00> : vector<8x128xf32>
    %111 = tpu.matmul %108, %110, %cst_127 {dimension_numbers = #tpu.dot_dimension_numbers<[1], [0], [0], [1], [0, 0, 1, 1], [], []>} : vector<8x16xbf16>, vector<16x128xbf16>, vector<8x128xf32> -> vector<8x128xf32>
    %112 = arith.addf %106, %111 : vector<8x128xf32>
    %c0_128 = arith.constant 0 : index
    %c4 = arith.constant 4 : index
    %c0_129 = arith.constant 0 : index
    %c0_130 = arith.constant 0 : index
    %113 = vector.load %arg1[%c0_128, %c4, %c0_129, %c0_130] : memref<1x9x9x16xbf16, #tpu.memory_space<vmem>>, vector<1x1x8x16xbf16>
    %114 = vector.shape_cast %113 : vector<1x1x8x16xbf16> to vector<8x16xbf16>
    %c2_131 = arith.constant 2 : index
    %c0_132 = arith.constant 0 : index
    %c0_133 = arith.constant 0 : index
    %115 = vector.load %arg2[%c2_131, %c0_132, %c0_133] : memref<4x16x128xbf16, #tpu.memory_space<vmem>>, vector<1x16x128xbf16>
    %116 = vector.shape_cast %115 : vector<1x16x128xbf16> to vector<16x128xbf16>
    %cst_134 = arith.constant dense<0.000000e+00> : vector<8x128xf32>
    %117 = tpu.matmul %114, %116, %cst_134 {dimension_numbers = #tpu.dot_dimension_numbers<[1], [0], [0], [1], [0, 0, 1, 1], [], []>} : vector<8x16xbf16>, vector<16x128xbf16>, vector<8x128xf32> -> vector<8x128xf32>
    %118 = arith.addf %112, %117 : vector<8x128xf32>
    %c0_135 = arith.constant 0 : index
    %c4_136 = arith.constant 4 : index
    %c1_137 = arith.constant 1 : index
    %c0_138 = arith.constant 0 : index
    %119 = vector.load %arg1[%c0_135, %c4_136, %c1_137, %c0_138] : memref<1x9x9x16xbf16, #tpu.memory_space<vmem>>, vector<1x1x8x16xbf16>
    %120 = vector.shape_cast %119 : vector<1x1x8x16xbf16> to vector<8x16xbf16>
    %c3_139 = arith.constant 3 : index
    %c0_140 = arith.constant 0 : index
    %c0_141 = arith.constant 0 : index
    %121 = vector.load %arg2[%c3_139, %c0_140, %c0_141] : memref<4x16x128xbf16, #tpu.memory_space<vmem>>, vector<1x16x128xbf16>
    %122 = vector.shape_cast %121 : vector<1x16x128xbf16> to vector<16x128xbf16>
    %cst_142 = arith.constant dense<0.000000e+00> : vector<8x128xf32>
    %123 = tpu.matmul %120, %122, %cst_142 {dimension_numbers = #tpu.dot_dimension_numbers<[1], [0], [0], [1], [0, 0, 1, 1], [], []>} : vector<8x16xbf16>, vector<16x128xbf16>, vector<8x128xf32> -> vector<8x128xf32>
    %124 = arith.addf %118, %123 : vector<8x128xf32>
    %125 = vector.broadcast %0 : vector<1x128xf32> to vector<8x128xf32>
    %126 = arith.addf %124, %125 : vector<8x128xf32>
    %cst_143 = arith.constant 0.000000e+00 : f32
    %127 = vector.broadcast %cst_143 : f32 to vector<8x128xf32>
    %128 = arith.maximumf %126, %127 : vector<8x128xf32>
    %129 = arith.truncf %128 : vector<8x128xf32> to vector<8x128xbf16>
    %c0_144 = arith.constant 0 : index
    %c3_145 = arith.constant 3 : index
    %c0_146 = arith.constant 0 : index
    %c0_147 = arith.constant 0 : index
    %130 = vector.load %arg4[%c0_144, %c3_145, %c0_146, %c0_147] : memref<1x8x8x128xbf16, #tpu.memory_space<vmem>>, vector<1x1x8x128xbf16>
    %131 = vector.shape_cast %130 : vector<1x1x8x128xbf16> to vector<8x128xbf16>
    %132 = vector.shape_cast %129 : vector<8x128xbf16> to vector<1x1x8x128xbf16>
    tpu.vector_store %arg4[%c0_144, %c3_145, %c0_146, %c0_147], %132 {strides = array<i32>} : memref<1x8x8x128xbf16, #tpu.memory_space<vmem>>, vector<1x1x8x128xbf16>,
    %cst_148 = arith.constant 0.000000e+00 : f32
    %133 = vector.broadcast %cst_148 : f32 to vector<8x128xf32>
    %c0_149 = arith.constant 0 : index
    %c4_150 = arith.constant 4 : index
    %c0_151 = arith.constant 0 : index
    %c0_152 = arith.constant 0 : index
    %134 = vector.load %arg1[%c0_149, %c4_150, %c0_151, %c0_152] : memref<1x9x9x16xbf16, #tpu.memory_space<vmem>>, vector<1x1x8x16xbf16>
    %135 = vector.shape_cast %134 : vector<1x1x8x16xbf16> to vector<8x16xbf16>
    %c0_153 = arith.constant 0 : index
    %c0_154 = arith.constant 0 : index
    %c0_155 = arith.constant 0 : index
    %136 = vector.load %arg2[%c0_153, %c0_154, %c0_155] : memref<4x16x128xbf16, #tpu.memory_space<vmem>>, vector<1x16x128xbf16>
    %137 = vector.shape_cast %136 : vector<1x16x128xbf16> to vector<16x128xbf16>
    %cst_156 = arith.constant dense<0.000000e+00> : vector<8x128xf32>
    %138 = tpu.matmul %135, %137, %cst_156 {dimension_numbers = #tpu.dot_dimension_numbers<[1], [0], [0], [1], [0, 0, 1, 1], [], []>} : vector<8x16xbf16>, vector<16x128xbf16>, vector<8x128xf32> -> vector<8x128xf32>
    %139 = arith.addf %133, %138 : vector<8x128xf32>
    %c0_157 = arith.constant 0 : index
    %c4_158 = arith.constant 4 : index
    %c1_159 = arith.constant 1 : index
    %c0_160 = arith.constant 0 : index
    %140 = vector.load %arg1[%c0_157, %c4_158, %c1_159, %c0_160] : memref<1x9x9x16xbf16, #tpu.memory_space<vmem>>, vector<1x1x8x16xbf16>
    %141 = vector.shape_cast %140 : vector<1x1x8x16xbf16> to vector<8x16xbf16>
    %c1_161 = arith.constant 1 : index
    %c0_162 = arith.constant 0 : index
    %c0_163 = arith.constant 0 : index
    %142 = vector.load %arg2[%c1_161, %c0_162, %c0_163] : memref<4x16x128xbf16, #tpu.memory_space<vmem>>, vector<1x16x128xbf16>
    %143 = vector.shape_cast %142 : vector<1x16x128xbf16> to vector<16x128xbf16>
    %cst_164 = arith.constant dense<0.000000e+00> : vector<8x128xf32>
    %144 = tpu.matmul %141, %143, %cst_164 {dimension_numbers = #tpu.dot_dimension_numbers<[1], [0], [0], [1], [0, 0, 1, 1], [], []>} : vector<8x16xbf16>, vector<16x128xbf16>, vector<8x128xf32> -> vector<8x128xf32>
    %145 = arith.addf %139, %144 : vector<8x128xf32>
    %c0_165 = arith.constant 0 : index
    %c5 = arith.constant 5 : index
    %c0_166 = arith.constant 0 : index
    %c0_167 = arith.constant 0 : index
    %146 = vector.load %arg1[%c0_165, %c5, %c0_166, %c0_167] : memref<1x9x9x16xbf16, #tpu.memory_space<vmem>>, vector<1x1x8x16xbf16>
    %147 = vector.shape_cast %146 : vector<1x1x8x16xbf16> to vector<8x16xbf16>
    %c2_168 = arith.constant 2 : index
    %c0_169 = arith.constant 0 : index
    %c0_170 = arith.constant 0 : index
    %148 = vector.load %arg2[%c2_168, %c0_169, %c0_170] : memref<4x16x128xbf16, #tpu.memory_space<vmem>>, vector<1x16x128xbf16>
    %149 = vector.shape_cast %148 : vector<1x16x128xbf16> to vector<16x128xbf16>
    %cst_171 = arith.constant dense<0.000000e+00> : vector<8x128xf32>
    %150 = tpu.matmul %147, %149, %cst_171 {dimension_numbers = #tpu.dot_dimension_numbers<[1], [0], [0], [1], [0, 0, 1, 1], [], []>} : vector<8x16xbf16>, vector<16x128xbf16>, vector<8x128xf32> -> vector<8x128xf32>
    %151 = arith.addf %145, %150 : vector<8x128xf32>
    %c0_172 = arith.constant 0 : index
    %c5_173 = arith.constant 5 : index
    %c1_174 = arith.constant 1 : index
    %c0_175 = arith.constant 0 : index
    %152 = vector.load %arg1[%c0_172, %c5_173, %c1_174, %c0_175] : memref<1x9x9x16xbf16, #tpu.memory_space<vmem>>, vector<1x1x8x16xbf16>
    %153 = vector.shape_cast %152 : vector<1x1x8x16xbf16> to vector<8x16xbf16>
    %c3_176 = arith.constant 3 : index
    %c0_177 = arith.constant 0 : index
    %c0_178 = arith.constant 0 : index
    %154 = vector.load %arg2[%c3_176, %c0_177, %c0_178] : memref<4x16x128xbf16, #tpu.memory_space<vmem>>, vector<1x16x128xbf16>
    %155 = vector.shape_cast %154 : vector<1x16x128xbf16> to vector<16x128xbf16>
    %cst_179 = arith.constant dense<0.000000e+00> : vector<8x128xf32>
    %156 = tpu.matmul %153, %155, %cst_179 {dimension_numbers = #tpu.dot_dimension_numbers<[1], [0], [0], [1], [0, 0, 1, 1], [], []>} : vector<8x16xbf16>, vector<16x128xbf16>, vector<8x128xf32> -> vector<8x128xf32>
    %157 = arith.addf %151, %156 : vector<8x128xf32>
    %158 = vector.broadcast %0 : vector<1x128xf32> to vector<8x128xf32>
    %159 = arith.addf %157, %158 : vector<8x128xf32>
    %cst_180 = arith.constant 0.000000e+00 : f32
    %160 = vector.broadcast %cst_180 : f32 to vector<8x128xf32>
    %161 = arith.maximumf %159, %160 : vector<8x128xf32>
    %162 = arith.truncf %161 : vector<8x128xf32> to vector<8x128xbf16>
    %c0_181 = arith.constant 0 : index
    %c4_182 = arith.constant 4 : index
    %c0_183 = arith.constant 0 : index
    %c0_184 = arith.constant 0 : index
    %163 = vector.load %arg4[%c0_181, %c4_182, %c0_183, %c0_184] : memref<1x8x8x128xbf16, #tpu.memory_space<vmem>>, vector<1x1x8x128xbf16>
    %164 = vector.shape_cast %163 : vector<1x1x8x128xbf16> to vector<8x128xbf16>
    %165 = vector.shape_cast %162 : vector<8x128xbf16> to vector<1x1x8x128xbf16>
    tpu.vector_store %arg4[%c0_181, %c4_182, %c0_183, %c0_184], %165 {strides = array<i32>} : memref<1x8x8x128xbf16, #tpu.memory_space<vmem>>, vector<1x1x8x128xbf16>,
    %cst_185 = arith.constant 0.000000e+00 : f32
    %166 = vector.broadcast %cst_185 : f32 to vector<8x128xf32>
    %c0_186 = arith.constant 0 : index
    %c5_187 = arith.constant 5 : index
    %c0_188 = arith.constant 0 : index
    %c0_189 = arith.constant 0 : index
    %167 = vector.load %arg1[%c0_186, %c5_187, %c0_188, %c0_189] : memref<1x9x9x16xbf16, #tpu.memory_space<vmem>>, vector<1x1x8x16xbf16>
    %168 = vector.shape_cast %167 : vector<1x1x8x16xbf16> to vector<8x16xbf16>
    %c0_190 = arith.constant 0 : index
    %c0_191 = arith.constant 0 : index
    %c0_192 = arith.constant 0 : index
    %169 = vector.load %arg2[%c0_190, %c0_191, %c0_192] : memref<4x16x128xbf16, #tpu.memory_space<vmem>>, vector<1x16x128xbf16>
    %170 = vector.shape_cast %169 : vector<1x16x128xbf16> to vector<16x128xbf16>
    %cst_193 = arith.constant dense<0.000000e+00> : vector<8x128xf32>
    %171 = tpu.matmul %168, %170, %cst_193 {dimension_numbers = #tpu.dot_dimension_numbers<[1], [0], [0], [1], [0, 0, 1, 1], [], []>} : vector<8x16xbf16>, vector<16x128xbf16>, vector<8x128xf32> -> vector<8x128xf32>
    %172 = arith.addf %166, %171 : vector<8x128xf32>
    %c0_194 = arith.constant 0 : index
    %c5_195 = arith.constant 5 : index
    %c1_196 = arith.constant 1 : index
    %c0_197 = arith.constant 0 : index
    %173 = vector.load %arg1[%c0_194, %c5_195, %c1_196, %c0_197] : memref<1x9x9x16xbf16, #tpu.memory_space<vmem>>, vector<1x1x8x16xbf16>
    %174 = vector.shape_cast %173 : vector<1x1x8x16xbf16> to vector<8x16xbf16>
    %c1_198 = arith.constant 1 : index
    %c0_199 = arith.constant 0 : index
    %c0_200 = arith.constant 0 : index
    %175 = vector.load %arg2[%c1_198, %c0_199, %c0_200] : memref<4x16x128xbf16, #tpu.memory_space<vmem>>, vector<1x16x128xbf16>
    %176 = vector.shape_cast %175 : vector<1x16x128xbf16> to vector<16x128xbf16>
    %cst_201 = arith.constant dense<0.000000e+00> : vector<8x128xf32>
    %177 = tpu.matmul %174, %176, %cst_201 {dimension_numbers = #tpu.dot_dimension_numbers<[1], [0], [0], [1], [0, 0, 1, 1], [], []>} : vector<8x16xbf16>, vector<16x128xbf16>, vector<8x128xf32> -> vector<8x128xf32>
    %178 = arith.addf %172, %177 : vector<8x128xf32>
    %c0_202 = arith.constant 0 : index
    %c6 = arith.constant 6 : index
    %c0_203 = arith.constant 0 : index
    %c0_204 = arith.constant 0 : index
    %179 = vector.load %arg1[%c0_202, %c6, %c0_203, %c0_204] : memref<1x9x9x16xbf16, #tpu.memory_space<vmem>>, vector<1x1x8x16xbf16>
    %180 = vector.shape_cast %179 : vector<1x1x8x16xbf16> to vector<8x16xbf16>
    %c2_205 = arith.constant 2 : index
    %c0_206 = arith.constant 0 : index
    %c0_207 = arith.constant 0 : index
    %181 = vector.load %arg2[%c2_205, %c0_206, %c0_207] : memref<4x16x128xbf16, #tpu.memory_space<vmem>>, vector<1x16x128xbf16>
    %182 = vector.shape_cast %181 : vector<1x16x128xbf16> to vector<16x128xbf16>
    %cst_208 = arith.constant dense<0.000000e+00> : vector<8x128xf32>
    %183 = tpu.matmul %180, %182, %cst_208 {dimension_numbers = #tpu.dot_dimension_numbers<[1], [0], [0], [1], [0, 0, 1, 1], [], []>} : vector<8x16xbf16>, vector<16x128xbf16>, vector<8x128xf32> -> vector<8x128xf32>
    %184 = arith.addf %178, %183 : vector<8x128xf32>
    %c0_209 = arith.constant 0 : index
    %c6_210 = arith.constant 6 : index
    %c1_211 = arith.constant 1 : index
    %c0_212 = arith.constant 0 : index
    %185 = vector.load %arg1[%c0_209, %c6_210, %c1_211, %c0_212] : memref<1x9x9x16xbf16, #tpu.memory_space<vmem>>, vector<1x1x8x16xbf16>
    %186 = vector.shape_cast %185 : vector<1x1x8x16xbf16> to vector<8x16xbf16>
    %c3_213 = arith.constant 3 : index
    %c0_214 = arith.constant 0 : index
    %c0_215 = arith.constant 0 : index
    %187 = vector.load %arg2[%c3_213, %c0_214, %c0_215] : memref<4x16x128xbf16, #tpu.memory_space<vmem>>, vector<1x16x128xbf16>
    %188 = vector.shape_cast %187 : vector<1x16x128xbf16> to vector<16x128xbf16>
    %cst_216 = arith.constant dense<0.000000e+00> : vector<8x128xf32>
    %189 = tpu.matmul %186, %188, %cst_216 {dimension_numbers = #tpu.dot_dimension_numbers<[1], [0], [0], [1], [0, 0, 1, 1], [], []>} : vector<8x16xbf16>, vector<16x128xbf16>, vector<8x128xf32> -> vector<8x128xf32>
    %190 = arith.addf %184, %189 : vector<8x128xf32>
    %191 = vector.broadcast %0 : vector<1x128xf32> to vector<8x128xf32>
    %192 = arith.addf %190, %191 : vector<8x128xf32>
    %cst_217 = arith.constant 0.000000e+00 : f32
    %193 = vector.broadcast %cst_217 : f32 to vector<8x128xf32>
    %194 = arith.maximumf %192, %193 : vector<8x128xf32>
    %195 = arith.truncf %194 : vector<8x128xf32> to vector<8x128xbf16>
    %c0_218 = arith.constant 0 : index
    %c5_219 = arith.constant 5 : index
    %c0_220 = arith.constant 0 : index
    %c0_221 = arith.constant 0 : index
    %196 = vector.load %arg4[%c0_218, %c5_219, %c0_220, %c0_221] : memref<1x8x8x128xbf16, #tpu.memory_space<vmem>>, vector<1x1x8x128xbf16>
    %197 = vector.shape_cast %196 : vector<1x1x8x128xbf16> to vector<8x128xbf16>
    %198 = vector.shape_cast %195 : vector<8x128xbf16> to vector<1x1x8x128xbf16>
    tpu.vector_store %arg4[%c0_218, %c5_219, %c0_220, %c0_221], %198 {strides = array<i32>} : memref<1x8x8x128xbf16, #tpu.memory_space<vmem>>, vector<1x1x8x128xbf16>,
    %cst_222 = arith.constant 0.000000e+00 : f32
    %199 = vector.broadcast %cst_222 : f32 to vector<8x128xf32>
    %c0_223 = arith.constant 0 : index
    %c6_224 = arith.constant 6 : index
    %c0_225 = arith.constant 0 : index
    %c0_226 = arith.constant 0 : index
    %200 = vector.load %arg1[%c0_223, %c6_224, %c0_225, %c0_226] : memref<1x9x9x16xbf16, #tpu.memory_space<vmem>>, vector<1x1x8x16xbf16>
    %201 = vector.shape_cast %200 : vector<1x1x8x16xbf16> to vector<8x16xbf16>
    %c0_227 = arith.constant 0 : index
    %c0_228 = arith.constant 0 : index
    %c0_229 = arith.constant 0 : index
    %202 = vector.load %arg2[%c0_227, %c0_228, %c0_229] : memref<4x16x128xbf16, #tpu.memory_space<vmem>>, vector<1x16x128xbf16>
    %203 = vector.shape_cast %202 : vector<1x16x128xbf16> to vector<16x128xbf16>
    %cst_230 = arith.constant dense<0.000000e+00> : vector<8x128xf32>
    %204 = tpu.matmul %201, %203, %cst_230 {dimension_numbers = #tpu.dot_dimension_numbers<[1], [0], [0], [1], [0, 0, 1, 1], [], []>} : vector<8x16xbf16>, vector<16x128xbf16>, vector<8x128xf32> -> vector<8x128xf32>
    %205 = arith.addf %199, %204 : vector<8x128xf32>
    %c0_231 = arith.constant 0 : index
    %c6_232 = arith.constant 6 : index
    %c1_233 = arith.constant 1 : index
    %c0_234 = arith.constant 0 : index
    %206 = vector.load %arg1[%c0_231, %c6_232, %c1_233, %c0_234] : memref<1x9x9x16xbf16, #tpu.memory_space<vmem>>, vector<1x1x8x16xbf16>
    %207 = vector.shape_cast %206 : vector<1x1x8x16xbf16> to vector<8x16xbf16>
    %c1_235 = arith.constant 1 : index
    %c0_236 = arith.constant 0 : index
    %c0_237 = arith.constant 0 : index
    %208 = vector.load %arg2[%c1_235, %c0_236, %c0_237] : memref<4x16x128xbf16, #tpu.memory_space<vmem>>, vector<1x16x128xbf16>
    %209 = vector.shape_cast %208 : vector<1x16x128xbf16> to vector<16x128xbf16>
    %cst_238 = arith.constant dense<0.000000e+00> : vector<8x128xf32>
    %210 = tpu.matmul %207, %209, %cst_238 {dimension_numbers = #tpu.dot_dimension_numbers<[1], [0], [0], [1], [0, 0, 1, 1], [], []>} : vector<8x16xbf16>, vector<16x128xbf16>, vector<8x128xf32> -> vector<8x128xf32>
    %211 = arith.addf %205, %210 : vector<8x128xf32>
    %c0_239 = arith.constant 0 : index
    %c7 = arith.constant 7 : index
    %c0_240 = arith.constant 0 : index
    %c0_241 = arith.constant 0 : index
    %212 = vector.load %arg1[%c0_239, %c7, %c0_240, %c0_241] : memref<1x9x9x16xbf16, #tpu.memory_space<vmem>>, vector<1x1x8x16xbf16>
    %213 = vector.shape_cast %212 : vector<1x1x8x16xbf16> to vector<8x16xbf16>
    %c2_242 = arith.constant 2 : index
    %c0_243 = arith.constant 0 : index
    %c0_244 = arith.constant 0 : index
    %214 = vector.load %arg2[%c2_242, %c0_243, %c0_244] : memref<4x16x128xbf16, #tpu.memory_space<vmem>>, vector<1x16x128xbf16>
    %215 = vector.shape_cast %214 : vector<1x16x128xbf16> to vector<16x128xbf16>
    %cst_245 = arith.constant dense<0.000000e+00> : vector<8x128xf32>
    %216 = tpu.matmul %213, %215, %cst_245 {dimension_numbers = #tpu.dot_dimension_numbers<[1], [0], [0], [1], [0, 0, 1, 1], [], []>} : vector<8x16xbf16>, vector<16x128xbf16>, vector<8x128xf32> -> vector<8x128xf32>
    %217 = arith.addf %211, %216 : vector<8x128xf32>
    %c0_246 = arith.constant 0 : index
    %c7_247 = arith.constant 7 : index
    %c1_248 = arith.constant 1 : index
    %c0_249 = arith.constant 0 : index
    %218 = vector.load %arg1[%c0_246, %c7_247, %c1_248, %c0_249] : memref<1x9x9x16xbf16, #tpu.memory_space<vmem>>, vector<1x1x8x16xbf16>
    %219 = vector.shape_cast %218 : vector<1x1x8x16xbf16> to vector<8x16xbf16>
    %c3_250 = arith.constant 3 : index
    %c0_251 = arith.constant 0 : index
    %c0_252 = arith.constant 0 : index
    %220 = vector.load %arg2[%c3_250, %c0_251, %c0_252] : memref<4x16x128xbf16, #tpu.memory_space<vmem>>, vector<1x16x128xbf16>
    %221 = vector.shape_cast %220 : vector<1x16x128xbf16> to vector<16x128xbf16>
    %cst_253 = arith.constant dense<0.000000e+00> : vector<8x128xf32>
    %222 = tpu.matmul %219, %221, %cst_253 {dimension_numbers = #tpu.dot_dimension_numbers<[1], [0], [0], [1], [0, 0, 1, 1], [], []>} : vector<8x16xbf16>, vector<16x128xbf16>, vector<8x128xf32> -> vector<8x128xf32>
    %223 = arith.addf %217, %222 : vector<8x128xf32>
    %224 = vector.broadcast %0 : vector<1x128xf32> to vector<8x128xf32>
    %225 = arith.addf %223, %224 : vector<8x128xf32>
    %cst_254 = arith.constant 0.000000e+00 : f32
    %226 = vector.broadcast %cst_254 : f32 to vector<8x128xf32>
    %227 = arith.maximumf %225, %226 : vector<8x128xf32>
    %228 = arith.truncf %227 : vector<8x128xf32> to vector<8x128xbf16>
    %c0_255 = arith.constant 0 : index
    %c6_256 = arith.constant 6 : index
    %c0_257 = arith.constant 0 : index
    %c0_258 = arith.constant 0 : index
    %229 = vector.load %arg4[%c0_255, %c6_256, %c0_257, %c0_258] : memref<1x8x8x128xbf16, #tpu.memory_space<vmem>>, vector<1x1x8x128xbf16>
    %230 = vector.shape_cast %229 : vector<1x1x8x128xbf16> to vector<8x128xbf16>
    %231 = vector.shape_cast %228 : vector<8x128xbf16> to vector<1x1x8x128xbf16>
    tpu.vector_store %arg4[%c0_255, %c6_256, %c0_257, %c0_258], %231 {strides = array<i32>} : memref<1x8x8x128xbf16, #tpu.memory_space<vmem>>, vector<1x1x8x128xbf16>,
    %cst_259 = arith.constant 0.000000e+00 : f32
    %232 = vector.broadcast %cst_259 : f32 to vector<8x128xf32>
    %c0_260 = arith.constant 0 : index
    %c7_261 = arith.constant 7 : index
    %c0_262 = arith.constant 0 : index
    %c0_263 = arith.constant 0 : index
    %233 = vector.load %arg1[%c0_260, %c7_261, %c0_262, %c0_263] : memref<1x9x9x16xbf16, #tpu.memory_space<vmem>>, vector<1x1x8x16xbf16>
    %234 = vector.shape_cast %233 : vector<1x1x8x16xbf16> to vector<8x16xbf16>
    %c0_264 = arith.constant 0 : index
    %c0_265 = arith.constant 0 : index
    %c0_266 = arith.constant 0 : index
    %235 = vector.load %arg2[%c0_264, %c0_265, %c0_266] : memref<4x16x128xbf16, #tpu.memory_space<vmem>>, vector<1x16x128xbf16>
    %236 = vector.shape_cast %235 : vector<1x16x128xbf16> to vector<16x128xbf16>
    %cst_267 = arith.constant dense<0.000000e+00> : vector<8x128xf32>
    %237 = tpu.matmul %234, %236, %cst_267 {dimension_numbers = #tpu.dot_dimension_numbers<[1], [0], [0], [1], [0, 0, 1, 1], [], []>} : vector<8x16xbf16>, vector<16x128xbf16>, vector<8x128xf32> -> vector<8x128xf32>
    %238 = arith.addf %232, %237 : vector<8x128xf32>
    %c0_268 = arith.constant 0 : index
    %c7_269 = arith.constant 7 : index
    %c1_270 = arith.constant 1 : index
    %c0_271 = arith.constant 0 : index
    %239 = vector.load %arg1[%c0_268, %c7_269, %c1_270, %c0_271] : memref<1x9x9x16xbf16, #tpu.memory_space<vmem>>, vector<1x1x8x16xbf16>
    %240 = vector.shape_cast %239 : vector<1x1x8x16xbf16> to vector<8x16xbf16>
    %c1_272 = arith.constant 1 : index
    %c0_273 = arith.constant 0 : index
    %c0_274 = arith.constant 0 : index
    %241 = vector.load %arg2[%c1_272, %c0_273, %c0_274] : memref<4x16x128xbf16, #tpu.memory_space<vmem>>, vector<1x16x128xbf16>
    %242 = vector.shape_cast %241 : vector<1x16x128xbf16> to vector<16x128xbf16>
    %cst_275 = arith.constant dense<0.000000e+00> : vector<8x128xf32>
    %243 = tpu.matmul %240, %242, %cst_275 {dimension_numbers = #tpu.dot_dimension_numbers<[1], [0], [0], [1], [0, 0, 1, 1], [], []>} : vector<8x16xbf16>, vector<16x128xbf16>, vector<8x128xf32> -> vector<8x128xf32>
    %244 = arith.addf %238, %243 : vector<8x128xf32>
    %c0_276 = arith.constant 0 : index
    %c8 = arith.constant 8 : index
    %c0_277 = arith.constant 0 : index
    %c0_278 = arith.constant 0 : index
    %245 = vector.load %arg1[%c0_276, %c8, %c0_277, %c0_278] : memref<1x9x9x16xbf16, #tpu.memory_space<vmem>>, vector<1x1x8x16xbf16>
    %246 = vector.shape_cast %245 : vector<1x1x8x16xbf16> to vector<8x16xbf16>
    %c2_279 = arith.constant 2 : index
    %c0_280 = arith.constant 0 : index
    %c0_281 = arith.constant 0 : index
    %247 = vector.load %arg2[%c2_279, %c0_280, %c0_281] : memref<4x16x128xbf16, #tpu.memory_space<vmem>>, vector<1x16x128xbf16>
    %248 = vector.shape_cast %247 : vector<1x16x128xbf16> to vector<16x128xbf16>
    %cst_282 = arith.constant dense<0.000000e+00> : vector<8x128xf32>
    %249 = tpu.matmul %246, %248, %cst_282 {dimension_numbers = #tpu.dot_dimension_numbers<[1], [0], [0], [1], [0, 0, 1, 1], [], []>} : vector<8x16xbf16>, vector<16x128xbf16>, vector<8x128xf32> -> vector<8x128xf32>
    %250 = arith.addf %244, %249 : vector<8x128xf32>
    %c0_283 = arith.constant 0 : index
    %c8_284 = arith.constant 8 : index
    %c1_285 = arith.constant 1 : index
    %c0_286 = arith.constant 0 : index
    %251 = vector.load %arg1[%c0_283, %c8_284, %c1_285, %c0_286] : memref<1x9x9x16xbf16, #tpu.memory_space<vmem>>, vector<1x1x8x16xbf16>
    %252 = vector.shape_cast %251 : vector<1x1x8x16xbf16> to vector<8x16xbf16>
    %c3_287 = arith.constant 3 : index
    %c0_288 = arith.constant 0 : index
    %c0_289 = arith.constant 0 : index
    %253 = vector.load %arg2[%c3_287, %c0_288, %c0_289] : memref<4x16x128xbf16, #tpu.memory_space<vmem>>, vector<1x16x128xbf16>
    %254 = vector.shape_cast %253 : vector<1x16x128xbf16> to vector<16x128xbf16>
    %cst_290 = arith.constant dense<0.000000e+00> : vector<8x128xf32>
    %255 = tpu.matmul %252, %254, %cst_290 {dimension_numbers = #tpu.dot_dimension_numbers<[1], [0], [0], [1], [0, 0, 1, 1], [], []>} : vector<8x16xbf16>, vector<16x128xbf16>, vector<8x128xf32> -> vector<8x128xf32>
    %256 = arith.addf %250, %255 : vector<8x128xf32>
    %257 = vector.broadcast %0 : vector<1x128xf32> to vector<8x128xf32>
    %258 = arith.addf %256, %257 : vector<8x128xf32>
    %cst_291 = arith.constant 0.000000e+00 : f32
    %259 = vector.broadcast %cst_291 : f32 to vector<8x128xf32>
    %260 = arith.maximumf %258, %259 : vector<8x128xf32>
    %261 = arith.truncf %260 : vector<8x128xf32> to vector<8x128xbf16>
    %c0_292 = arith.constant 0 : index
    %c7_293 = arith.constant 7 : index
    %c0_294 = arith.constant 0 : index
    %c0_295 = arith.constant 0 : index
    %262 = vector.load %arg4[%c0_292, %c7_293, %c0_294, %c0_295] : memref<1x8x8x128xbf16, #tpu.memory_space<vmem>>, vector<1x1x8x128xbf16>
    %263 = vector.shape_cast %262 : vector<1x1x8x128xbf16> to vector<8x128xbf16>
    %264 = vector.shape_cast %261 : vector<8x128xbf16> to vector<1x1x8x128xbf16>
    tpu.vector_store %arg4[%c0_292, %c7_293, %c0_294, %c0_295], %264 {strides = array<i32>} : memref<1x8x8x128xbf16, #tpu.memory_space<vmem>>, vector<1x1x8x128xbf16>,
    return
  }
  func.func @transform_0(%arg0: i32) -> (i32, i32, i32, i32) {
    %c0_i32 = arith.constant 0 : i32
    %c0_i32_0 = arith.constant 0 : i32
    %c0_i32_1 = arith.constant 0 : i32
    %c0_i32_2 = arith.constant 0 : i32
    return %arg0, %c0_i32, %c0_i32_0, %c0_i32_1 : i32, i32, i32, i32
  }
  func.func @transform_1(%arg0: i32) -> (i32, i32, i32) {
    %c0_i32 = arith.constant 0 : i32
    %c0_i32_0 = arith.constant 0 : i32
    %c0_i32_1 = arith.constant 0 : i32
    %c0_i32_2 = arith.constant 0 : i32
    return %c0_i32, %c0_i32_0, %c0_i32_1 : i32, i32, i32
  }
  func.func @transform_2(%arg0: i32) -> (i32, i32) {
    %c0_i32 = arith.constant 0 : i32
    %c0_i32_0 = arith.constant 0 : i32
    %c0_i32_1 = arith.constant 0 : i32
    return %c0_i32, %c0_i32_0 : i32, i32
  }
  func.func @transform_3(%arg0: i32) -> (i32, i32, i32, i32) {
    %c0_i32 = arith.constant 0 : i32
    %c0_i32_0 = arith.constant 0 : i32
    %c0_i32_1 = arith.constant 0 : i32
    %c0_i32_2 = arith.constant 0 : i32
    return %arg0, %c0_i32, %c0_i32_0, %c0_i32_1 : i32, i32, i32, i32
  }
}

module attributes {stable_mosaic.version = 11 : i64} {
  func.func @_tap_conv_kernel(%arg0: i32, %arg1: memref<1x5x5x512xbf16, #tpu.memory_space<vmem>>, %arg2: memref<4x512x128xbf16, #tpu.memory_space<vmem>>, %arg3: memref<1x128xf32, #tpu.memory_space<vmem>>, %arg4: memref<1x4x4x128xbf16, #tpu.memory_space<vmem>>) attributes {dimension_semantics = [#tpu.dimension_semantics<parallel>], iteration_bounds = array<i64: 2>, scalar_prefetch = 0 : i64, scratch_operands = 0 : i64, tpu.core_type = #tpu.core_type<tc>, window_params = [{transform_indices = @transform_0, window_bounds = array<i64: 1, 5, 5, 512>}, {pipeline_mode = #tpu.pipeline_mode<synchronous>, transform_indices = @transform_1, window_bounds = array<i64: 4, 512, 128>}, {pipeline_mode = #tpu.pipeline_mode<synchronous>, transform_indices = @transform_2, window_bounds = array<i64: 1, 128>}, {transform_indices = @transform_3, window_bounds = array<i64: 1, 4, 4, 128>}]} {
    %c0 = arith.constant 0 : index
    %c0_0 = arith.constant 0 : index
    %0 = vector.load %arg3[%c0, %c0_0] : memref<1x128xf32, #tpu.memory_space<vmem>>, vector<1x128xf32>
    %cst = arith.constant 0.000000e+00 : f32
    %1 = vector.broadcast %cst : f32 to vector<4x128xf32>
    %c0_1 = arith.constant 0 : index
    %c0_2 = arith.constant 0 : index
    %c0_3 = arith.constant 0 : index
    %c0_4 = arith.constant 0 : index
    %2 = vector.load %arg1[%c0_1, %c0_2, %c0_3, %c0_4] : memref<1x5x5x512xbf16, #tpu.memory_space<vmem>>, vector<1x1x4x512xbf16>
    %3 = vector.shape_cast %2 : vector<1x1x4x512xbf16> to vector<4x512xbf16>
    %c0_5 = arith.constant 0 : index
    %c0_6 = arith.constant 0 : index
    %c0_7 = arith.constant 0 : index
    %4 = vector.load %arg2[%c0_5, %c0_6, %c0_7] : memref<4x512x128xbf16, #tpu.memory_space<vmem>>, vector<1x512x128xbf16>
    %5 = vector.shape_cast %4 : vector<1x512x128xbf16> to vector<512x128xbf16>
    %cst_8 = arith.constant dense<0.000000e+00> : vector<4x128xf32>
    %6 = tpu.matmul %3, %5, %cst_8 {dimension_numbers = #tpu.dot_dimension_numbers<[1], [0], [0], [1], [0, 0, 1, 1], [], []>} : vector<4x512xbf16>, vector<512x128xbf16>, vector<4x128xf32> -> vector<4x128xf32>
    %7 = arith.addf %1, %6 : vector<4x128xf32>
    %c0_9 = arith.constant 0 : index
    %c0_10 = arith.constant 0 : index
    %c1 = arith.constant 1 : index
    %c0_11 = arith.constant 0 : index
    %8 = vector.load %arg1[%c0_9, %c0_10, %c1, %c0_11] : memref<1x5x5x512xbf16, #tpu.memory_space<vmem>>, vector<1x1x4x512xbf16>
    %9 = vector.shape_cast %8 : vector<1x1x4x512xbf16> to vector<4x512xbf16>
    %c1_12 = arith.constant 1 : index
    %c0_13 = arith.constant 0 : index
    %c0_14 = arith.constant 0 : index
    %10 = vector.load %arg2[%c1_12, %c0_13, %c0_14] : memref<4x512x128xbf16, #tpu.memory_space<vmem>>, vector<1x512x128xbf16>
    %11 = vector.shape_cast %10 : vector<1x512x128xbf16> to vector<512x128xbf16>
    %cst_15 = arith.constant dense<0.000000e+00> : vector<4x128xf32>
    %12 = tpu.matmul %9, %11, %cst_15 {dimension_numbers = #tpu.dot_dimension_numbers<[1], [0], [0], [1], [0, 0, 1, 1], [], []>} : vector<4x512xbf16>, vector<512x128xbf16>, vector<4x128xf32> -> vector<4x128xf32>
    %13 = arith.addf %7, %12 : vector<4x128xf32>
    %c0_16 = arith.constant 0 : index
    %c1_17 = arith.constant 1 : index
    %c0_18 = arith.constant 0 : index
    %c0_19 = arith.constant 0 : index
    %14 = vector.load %arg1[%c0_16, %c1_17, %c0_18, %c0_19] : memref<1x5x5x512xbf16, #tpu.memory_space<vmem>>, vector<1x1x4x512xbf16>
    %15 = vector.shape_cast %14 : vector<1x1x4x512xbf16> to vector<4x512xbf16>
    %c2 = arith.constant 2 : index
    %c0_20 = arith.constant 0 : index
    %c0_21 = arith.constant 0 : index
    %16 = vector.load %arg2[%c2, %c0_20, %c0_21] : memref<4x512x128xbf16, #tpu.memory_space<vmem>>, vector<1x512x128xbf16>
    %17 = vector.shape_cast %16 : vector<1x512x128xbf16> to vector<512x128xbf16>
    %cst_22 = arith.constant dense<0.000000e+00> : vector<4x128xf32>
    %18 = tpu.matmul %15, %17, %cst_22 {dimension_numbers = #tpu.dot_dimension_numbers<[1], [0], [0], [1], [0, 0, 1, 1], [], []>} : vector<4x512xbf16>, vector<512x128xbf16>, vector<4x128xf32> -> vector<4x128xf32>
    %19 = arith.addf %13, %18 : vector<4x128xf32>
    %c0_23 = arith.constant 0 : index
    %c1_24 = arith.constant 1 : index
    %c1_25 = arith.constant 1 : index
    %c0_26 = arith.constant 0 : index
    %20 = vector.load %arg1[%c0_23, %c1_24, %c1_25, %c0_26] : memref<1x5x5x512xbf16, #tpu.memory_space<vmem>>, vector<1x1x4x512xbf16>
    %21 = vector.shape_cast %20 : vector<1x1x4x512xbf16> to vector<4x512xbf16>
    %c3 = arith.constant 3 : index
    %c0_27 = arith.constant 0 : index
    %c0_28 = arith.constant 0 : index
    %22 = vector.load %arg2[%c3, %c0_27, %c0_28] : memref<4x512x128xbf16, #tpu.memory_space<vmem>>, vector<1x512x128xbf16>
    %23 = vector.shape_cast %22 : vector<1x512x128xbf16> to vector<512x128xbf16>
    %cst_29 = arith.constant dense<0.000000e+00> : vector<4x128xf32>
    %24 = tpu.matmul %21, %23, %cst_29 {dimension_numbers = #tpu.dot_dimension_numbers<[1], [0], [0], [1], [0, 0, 1, 1], [], []>} : vector<4x512xbf16>, vector<512x128xbf16>, vector<4x128xf32> -> vector<4x128xf32>
    %25 = arith.addf %19, %24 : vector<4x128xf32>
    %26 = vector.broadcast %0 : vector<1x128xf32> to vector<4x128xf32>
    %27 = arith.addf %25, %26 : vector<4x128xf32>
    %cst_30 = arith.constant 0.000000e+00 : f32
    %28 = vector.broadcast %cst_30 : f32 to vector<4x128xf32>
    %29 = arith.maximumf %27, %28 : vector<4x128xf32>
    %30 = arith.truncf %29 : vector<4x128xf32> to vector<4x128xbf16>
    %c0_31 = arith.constant 0 : index
    %c0_32 = arith.constant 0 : index
    %c0_33 = arith.constant 0 : index
    %c0_34 = arith.constant 0 : index
    %31 = vector.load %arg4[%c0_31, %c0_32, %c0_33, %c0_34] : memref<1x4x4x128xbf16, #tpu.memory_space<vmem>>, vector<1x1x4x128xbf16>
    %32 = vector.shape_cast %31 : vector<1x1x4x128xbf16> to vector<4x128xbf16>
    %33 = vector.shape_cast %30 : vector<4x128xbf16> to vector<1x1x4x128xbf16>
    tpu.vector_store %arg4[%c0_31, %c0_32, %c0_33, %c0_34], %33 {strides = array<i32>} : memref<1x4x4x128xbf16, #tpu.memory_space<vmem>>, vector<1x1x4x128xbf16>,
    %cst_35 = arith.constant 0.000000e+00 : f32
    %34 = vector.broadcast %cst_35 : f32 to vector<4x128xf32>
    %c0_36 = arith.constant 0 : index
    %c1_37 = arith.constant 1 : index
    %c0_38 = arith.constant 0 : index
    %c0_39 = arith.constant 0 : index
    %35 = vector.load %arg1[%c0_36, %c1_37, %c0_38, %c0_39] : memref<1x5x5x512xbf16, #tpu.memory_space<vmem>>, vector<1x1x4x512xbf16>
    %36 = vector.shape_cast %35 : vector<1x1x4x512xbf16> to vector<4x512xbf16>
    %c0_40 = arith.constant 0 : index
    %c0_41 = arith.constant 0 : index
    %c0_42 = arith.constant 0 : index
    %37 = vector.load %arg2[%c0_40, %c0_41, %c0_42] : memref<4x512x128xbf16, #tpu.memory_space<vmem>>, vector<1x512x128xbf16>
    %38 = vector.shape_cast %37 : vector<1x512x128xbf16> to vector<512x128xbf16>
    %cst_43 = arith.constant dense<0.000000e+00> : vector<4x128xf32>
    %39 = tpu.matmul %36, %38, %cst_43 {dimension_numbers = #tpu.dot_dimension_numbers<[1], [0], [0], [1], [0, 0, 1, 1], [], []>} : vector<4x512xbf16>, vector<512x128xbf16>, vector<4x128xf32> -> vector<4x128xf32>
    %40 = arith.addf %34, %39 : vector<4x128xf32>
    %c0_44 = arith.constant 0 : index
    %c1_45 = arith.constant 1 : index
    %c1_46 = arith.constant 1 : index
    %c0_47 = arith.constant 0 : index
    %41 = vector.load %arg1[%c0_44, %c1_45, %c1_46, %c0_47] : memref<1x5x5x512xbf16, #tpu.memory_space<vmem>>, vector<1x1x4x512xbf16>
    %42 = vector.shape_cast %41 : vector<1x1x4x512xbf16> to vector<4x512xbf16>
    %c1_48 = arith.constant 1 : index
    %c0_49 = arith.constant 0 : index
    %c0_50 = arith.constant 0 : index
    %43 = vector.load %arg2[%c1_48, %c0_49, %c0_50] : memref<4x512x128xbf16, #tpu.memory_space<vmem>>, vector<1x512x128xbf16>
    %44 = vector.shape_cast %43 : vector<1x512x128xbf16> to vector<512x128xbf16>
    %cst_51 = arith.constant dense<0.000000e+00> : vector<4x128xf32>
    %45 = tpu.matmul %42, %44, %cst_51 {dimension_numbers = #tpu.dot_dimension_numbers<[1], [0], [0], [1], [0, 0, 1, 1], [], []>} : vector<4x512xbf16>, vector<512x128xbf16>, vector<4x128xf32> -> vector<4x128xf32>
    %46 = arith.addf %40, %45 : vector<4x128xf32>
    %c0_52 = arith.constant 0 : index
    %c2_53 = arith.constant 2 : index
    %c0_54 = arith.constant 0 : index
    %c0_55 = arith.constant 0 : index
    %47 = vector.load %arg1[%c0_52, %c2_53, %c0_54, %c0_55] : memref<1x5x5x512xbf16, #tpu.memory_space<vmem>>, vector<1x1x4x512xbf16>
    %48 = vector.shape_cast %47 : vector<1x1x4x512xbf16> to vector<4x512xbf16>
    %c2_56 = arith.constant 2 : index
    %c0_57 = arith.constant 0 : index
    %c0_58 = arith.constant 0 : index
    %49 = vector.load %arg2[%c2_56, %c0_57, %c0_58] : memref<4x512x128xbf16, #tpu.memory_space<vmem>>, vector<1x512x128xbf16>
    %50 = vector.shape_cast %49 : vector<1x512x128xbf16> to vector<512x128xbf16>
    %cst_59 = arith.constant dense<0.000000e+00> : vector<4x128xf32>
    %51 = tpu.matmul %48, %50, %cst_59 {dimension_numbers = #tpu.dot_dimension_numbers<[1], [0], [0], [1], [0, 0, 1, 1], [], []>} : vector<4x512xbf16>, vector<512x128xbf16>, vector<4x128xf32> -> vector<4x128xf32>
    %52 = arith.addf %46, %51 : vector<4x128xf32>
    %c0_60 = arith.constant 0 : index
    %c2_61 = arith.constant 2 : index
    %c1_62 = arith.constant 1 : index
    %c0_63 = arith.constant 0 : index
    %53 = vector.load %arg1[%c0_60, %c2_61, %c1_62, %c0_63] : memref<1x5x5x512xbf16, #tpu.memory_space<vmem>>, vector<1x1x4x512xbf16>
    %54 = vector.shape_cast %53 : vector<1x1x4x512xbf16> to vector<4x512xbf16>
    %c3_64 = arith.constant 3 : index
    %c0_65 = arith.constant 0 : index
    %c0_66 = arith.constant 0 : index
    %55 = vector.load %arg2[%c3_64, %c0_65, %c0_66] : memref<4x512x128xbf16, #tpu.memory_space<vmem>>, vector<1x512x128xbf16>
    %56 = vector.shape_cast %55 : vector<1x512x128xbf16> to vector<512x128xbf16>
    %cst_67 = arith.constant dense<0.000000e+00> : vector<4x128xf32>
    %57 = tpu.matmul %54, %56, %cst_67 {dimension_numbers = #tpu.dot_dimension_numbers<[1], [0], [0], [1], [0, 0, 1, 1], [], []>} : vector<4x512xbf16>, vector<512x128xbf16>, vector<4x128xf32> -> vector<4x128xf32>
    %58 = arith.addf %52, %57 : vector<4x128xf32>
    %59 = vector.broadcast %0 : vector<1x128xf32> to vector<4x128xf32>
    %60 = arith.addf %58, %59 : vector<4x128xf32>
    %cst_68 = arith.constant 0.000000e+00 : f32
    %61 = vector.broadcast %cst_68 : f32 to vector<4x128xf32>
    %62 = arith.maximumf %60, %61 : vector<4x128xf32>
    %63 = arith.truncf %62 : vector<4x128xf32> to vector<4x128xbf16>
    %c0_69 = arith.constant 0 : index
    %c1_70 = arith.constant 1 : index
    %c0_71 = arith.constant 0 : index
    %c0_72 = arith.constant 0 : index
    %64 = vector.load %arg4[%c0_69, %c1_70, %c0_71, %c0_72] : memref<1x4x4x128xbf16, #tpu.memory_space<vmem>>, vector<1x1x4x128xbf16>
    %65 = vector.shape_cast %64 : vector<1x1x4x128xbf16> to vector<4x128xbf16>
    %66 = vector.shape_cast %63 : vector<4x128xbf16> to vector<1x1x4x128xbf16>
    tpu.vector_store %arg4[%c0_69, %c1_70, %c0_71, %c0_72], %66 {strides = array<i32>} : memref<1x4x4x128xbf16, #tpu.memory_space<vmem>>, vector<1x1x4x128xbf16>,
    %cst_73 = arith.constant 0.000000e+00 : f32
    %67 = vector.broadcast %cst_73 : f32 to vector<4x128xf32>
    %c0_74 = arith.constant 0 : index
    %c2_75 = arith.constant 2 : index
    %c0_76 = arith.constant 0 : index
    %c0_77 = arith.constant 0 : index
    %68 = vector.load %arg1[%c0_74, %c2_75, %c0_76, %c0_77] : memref<1x5x5x512xbf16, #tpu.memory_space<vmem>>, vector<1x1x4x512xbf16>
    %69 = vector.shape_cast %68 : vector<1x1x4x512xbf16> to vector<4x512xbf16>
    %c0_78 = arith.constant 0 : index
    %c0_79 = arith.constant 0 : index
    %c0_80 = arith.constant 0 : index
    %70 = vector.load %arg2[%c0_78, %c0_79, %c0_80] : memref<4x512x128xbf16, #tpu.memory_space<vmem>>, vector<1x512x128xbf16>
    %71 = vector.shape_cast %70 : vector<1x512x128xbf16> to vector<512x128xbf16>
    %cst_81 = arith.constant dense<0.000000e+00> : vector<4x128xf32>
    %72 = tpu.matmul %69, %71, %cst_81 {dimension_numbers = #tpu.dot_dimension_numbers<[1], [0], [0], [1], [0, 0, 1, 1], [], []>} : vector<4x512xbf16>, vector<512x128xbf16>, vector<4x128xf32> -> vector<4x128xf32>
    %73 = arith.addf %67, %72 : vector<4x128xf32>
    %c0_82 = arith.constant 0 : index
    %c2_83 = arith.constant 2 : index
    %c1_84 = arith.constant 1 : index
    %c0_85 = arith.constant 0 : index
    %74 = vector.load %arg1[%c0_82, %c2_83, %c1_84, %c0_85] : memref<1x5x5x512xbf16, #tpu.memory_space<vmem>>, vector<1x1x4x512xbf16>
    %75 = vector.shape_cast %74 : vector<1x1x4x512xbf16> to vector<4x512xbf16>
    %c1_86 = arith.constant 1 : index
    %c0_87 = arith.constant 0 : index
    %c0_88 = arith.constant 0 : index
    %76 = vector.load %arg2[%c1_86, %c0_87, %c0_88] : memref<4x512x128xbf16, #tpu.memory_space<vmem>>, vector<1x512x128xbf16>
    %77 = vector.shape_cast %76 : vector<1x512x128xbf16> to vector<512x128xbf16>
    %cst_89 = arith.constant dense<0.000000e+00> : vector<4x128xf32>
    %78 = tpu.matmul %75, %77, %cst_89 {dimension_numbers = #tpu.dot_dimension_numbers<[1], [0], [0], [1], [0, 0, 1, 1], [], []>} : vector<4x512xbf16>, vector<512x128xbf16>, vector<4x128xf32> -> vector<4x128xf32>
    %79 = arith.addf %73, %78 : vector<4x128xf32>
    %c0_90 = arith.constant 0 : index
    %c3_91 = arith.constant 3 : index
    %c0_92 = arith.constant 0 : index
    %c0_93 = arith.constant 0 : index
    %80 = vector.load %arg1[%c0_90, %c3_91, %c0_92, %c0_93] : memref<1x5x5x512xbf16, #tpu.memory_space<vmem>>, vector<1x1x4x512xbf16>
    %81 = vector.shape_cast %80 : vector<1x1x4x512xbf16> to vector<4x512xbf16>
    %c2_94 = arith.constant 2 : index
    %c0_95 = arith.constant 0 : index
    %c0_96 = arith.constant 0 : index
    %82 = vector.load %arg2[%c2_94, %c0_95, %c0_96] : memref<4x512x128xbf16, #tpu.memory_space<vmem>>, vector<1x512x128xbf16>
    %83 = vector.shape_cast %82 : vector<1x512x128xbf16> to vector<512x128xbf16>
    %cst_97 = arith.constant dense<0.000000e+00> : vector<4x128xf32>
    %84 = tpu.matmul %81, %83, %cst_97 {dimension_numbers = #tpu.dot_dimension_numbers<[1], [0], [0], [1], [0, 0, 1, 1], [], []>} : vector<4x512xbf16>, vector<512x128xbf16>, vector<4x128xf32> -> vector<4x128xf32>
    %85 = arith.addf %79, %84 : vector<4x128xf32>
    %c0_98 = arith.constant 0 : index
    %c3_99 = arith.constant 3 : index
    %c1_100 = arith.constant 1 : index
    %c0_101 = arith.constant 0 : index
    %86 = vector.load %arg1[%c0_98, %c3_99, %c1_100, %c0_101] : memref<1x5x5x512xbf16, #tpu.memory_space<vmem>>, vector<1x1x4x512xbf16>
    %87 = vector.shape_cast %86 : vector<1x1x4x512xbf16> to vector<4x512xbf16>
    %c3_102 = arith.constant 3 : index
    %c0_103 = arith.constant 0 : index
    %c0_104 = arith.constant 0 : index
    %88 = vector.load %arg2[%c3_102, %c0_103, %c0_104] : memref<4x512x128xbf16, #tpu.memory_space<vmem>>, vector<1x512x128xbf16>
    %89 = vector.shape_cast %88 : vector<1x512x128xbf16> to vector<512x128xbf16>
    %cst_105 = arith.constant dense<0.000000e+00> : vector<4x128xf32>
    %90 = tpu.matmul %87, %89, %cst_105 {dimension_numbers = #tpu.dot_dimension_numbers<[1], [0], [0], [1], [0, 0, 1, 1], [], []>} : vector<4x512xbf16>, vector<512x128xbf16>, vector<4x128xf32> -> vector<4x128xf32>
    %91 = arith.addf %85, %90 : vector<4x128xf32>
    %92 = vector.broadcast %0 : vector<1x128xf32> to vector<4x128xf32>
    %93 = arith.addf %91, %92 : vector<4x128xf32>
    %cst_106 = arith.constant 0.000000e+00 : f32
    %94 = vector.broadcast %cst_106 : f32 to vector<4x128xf32>
    %95 = arith.maximumf %93, %94 : vector<4x128xf32>
    %96 = arith.truncf %95 : vector<4x128xf32> to vector<4x128xbf16>
    %c0_107 = arith.constant 0 : index
    %c2_108 = arith.constant 2 : index
    %c0_109 = arith.constant 0 : index
    %c0_110 = arith.constant 0 : index
    %97 = vector.load %arg4[%c0_107, %c2_108, %c0_109, %c0_110] : memref<1x4x4x128xbf16, #tpu.memory_space<vmem>>, vector<1x1x4x128xbf16>
    %98 = vector.shape_cast %97 : vector<1x1x4x128xbf16> to vector<4x128xbf16>
    %99 = vector.shape_cast %96 : vector<4x128xbf16> to vector<1x1x4x128xbf16>
    tpu.vector_store %arg4[%c0_107, %c2_108, %c0_109, %c0_110], %99 {strides = array<i32>} : memref<1x4x4x128xbf16, #tpu.memory_space<vmem>>, vector<1x1x4x128xbf16>,
    %cst_111 = arith.constant 0.000000e+00 : f32
    %100 = vector.broadcast %cst_111 : f32 to vector<4x128xf32>
    %c0_112 = arith.constant 0 : index
    %c3_113 = arith.constant 3 : index
    %c0_114 = arith.constant 0 : index
    %c0_115 = arith.constant 0 : index
    %101 = vector.load %arg1[%c0_112, %c3_113, %c0_114, %c0_115] : memref<1x5x5x512xbf16, #tpu.memory_space<vmem>>, vector<1x1x4x512xbf16>
    %102 = vector.shape_cast %101 : vector<1x1x4x512xbf16> to vector<4x512xbf16>
    %c0_116 = arith.constant 0 : index
    %c0_117 = arith.constant 0 : index
    %c0_118 = arith.constant 0 : index
    %103 = vector.load %arg2[%c0_116, %c0_117, %c0_118] : memref<4x512x128xbf16, #tpu.memory_space<vmem>>, vector<1x512x128xbf16>
    %104 = vector.shape_cast %103 : vector<1x512x128xbf16> to vector<512x128xbf16>
    %cst_119 = arith.constant dense<0.000000e+00> : vector<4x128xf32>
    %105 = tpu.matmul %102, %104, %cst_119 {dimension_numbers = #tpu.dot_dimension_numbers<[1], [0], [0], [1], [0, 0, 1, 1], [], []>} : vector<4x512xbf16>, vector<512x128xbf16>, vector<4x128xf32> -> vector<4x128xf32>
    %106 = arith.addf %100, %105 : vector<4x128xf32>
    %c0_120 = arith.constant 0 : index
    %c3_121 = arith.constant 3 : index
    %c1_122 = arith.constant 1 : index
    %c0_123 = arith.constant 0 : index
    %107 = vector.load %arg1[%c0_120, %c3_121, %c1_122, %c0_123] : memref<1x5x5x512xbf16, #tpu.memory_space<vmem>>, vector<1x1x4x512xbf16>
    %108 = vector.shape_cast %107 : vector<1x1x4x512xbf16> to vector<4x512xbf16>
    %c1_124 = arith.constant 1 : index
    %c0_125 = arith.constant 0 : index
    %c0_126 = arith.constant 0 : index
    %109 = vector.load %arg2[%c1_124, %c0_125, %c0_126] : memref<4x512x128xbf16, #tpu.memory_space<vmem>>, vector<1x512x128xbf16>
    %110 = vector.shape_cast %109 : vector<1x512x128xbf16> to vector<512x128xbf16>
    %cst_127 = arith.constant dense<0.000000e+00> : vector<4x128xf32>
    %111 = tpu.matmul %108, %110, %cst_127 {dimension_numbers = #tpu.dot_dimension_numbers<[1], [0], [0], [1], [0, 0, 1, 1], [], []>} : vector<4x512xbf16>, vector<512x128xbf16>, vector<4x128xf32> -> vector<4x128xf32>
    %112 = arith.addf %106, %111 : vector<4x128xf32>
    %c0_128 = arith.constant 0 : index
    %c4 = arith.constant 4 : index
    %c0_129 = arith.constant 0 : index
    %c0_130 = arith.constant 0 : index
    %113 = vector.load %arg1[%c0_128, %c4, %c0_129, %c0_130] : memref<1x5x5x512xbf16, #tpu.memory_space<vmem>>, vector<1x1x4x512xbf16>
    %114 = vector.shape_cast %113 : vector<1x1x4x512xbf16> to vector<4x512xbf16>
    %c2_131 = arith.constant 2 : index
    %c0_132 = arith.constant 0 : index
    %c0_133 = arith.constant 0 : index
    %115 = vector.load %arg2[%c2_131, %c0_132, %c0_133] : memref<4x512x128xbf16, #tpu.memory_space<vmem>>, vector<1x512x128xbf16>
    %116 = vector.shape_cast %115 : vector<1x512x128xbf16> to vector<512x128xbf16>
    %cst_134 = arith.constant dense<0.000000e+00> : vector<4x128xf32>
    %117 = tpu.matmul %114, %116, %cst_134 {dimension_numbers = #tpu.dot_dimension_numbers<[1], [0], [0], [1], [0, 0, 1, 1], [], []>} : vector<4x512xbf16>, vector<512x128xbf16>, vector<4x128xf32> -> vector<4x128xf32>
    %118 = arith.addf %112, %117 : vector<4x128xf32>
    %c0_135 = arith.constant 0 : index
    %c4_136 = arith.constant 4 : index
    %c1_137 = arith.constant 1 : index
    %c0_138 = arith.constant 0 : index
    %119 = vector.load %arg1[%c0_135, %c4_136, %c1_137, %c0_138] : memref<1x5x5x512xbf16, #tpu.memory_space<vmem>>, vector<1x1x4x512xbf16>
    %120 = vector.shape_cast %119 : vector<1x1x4x512xbf16> to vector<4x512xbf16>
    %c3_139 = arith.constant 3 : index
    %c0_140 = arith.constant 0 : index
    %c0_141 = arith.constant 0 : index
    %121 = vector.load %arg2[%c3_139, %c0_140, %c0_141] : memref<4x512x128xbf16, #tpu.memory_space<vmem>>, vector<1x512x128xbf16>
    %122 = vector.shape_cast %121 : vector<1x512x128xbf16> to vector<512x128xbf16>
    %cst_142 = arith.constant dense<0.000000e+00> : vector<4x128xf32>
    %123 = tpu.matmul %120, %122, %cst_142 {dimension_numbers = #tpu.dot_dimension_numbers<[1], [0], [0], [1], [0, 0, 1, 1], [], []>} : vector<4x512xbf16>, vector<512x128xbf16>, vector<4x128xf32> -> vector<4x128xf32>
    %124 = arith.addf %118, %123 : vector<4x128xf32>
    %125 = vector.broadcast %0 : vector<1x128xf32> to vector<4x128xf32>
    %126 = arith.addf %124, %125 : vector<4x128xf32>
    %cst_143 = arith.constant 0.000000e+00 : f32
    %127 = vector.broadcast %cst_143 : f32 to vector<4x128xf32>
    %128 = arith.maximumf %126, %127 : vector<4x128xf32>
    %129 = arith.truncf %128 : vector<4x128xf32> to vector<4x128xbf16>
    %c0_144 = arith.constant 0 : index
    %c3_145 = arith.constant 3 : index
    %c0_146 = arith.constant 0 : index
    %c0_147 = arith.constant 0 : index
    %130 = vector.load %arg4[%c0_144, %c3_145, %c0_146, %c0_147] : memref<1x4x4x128xbf16, #tpu.memory_space<vmem>>, vector<1x1x4x128xbf16>
    %131 = vector.shape_cast %130 : vector<1x1x4x128xbf16> to vector<4x128xbf16>
    %132 = vector.shape_cast %129 : vector<4x128xbf16> to vector<1x1x4x128xbf16>
    tpu.vector_store %arg4[%c0_144, %c3_145, %c0_146, %c0_147], %132 {strides = array<i32>} : memref<1x4x4x128xbf16, #tpu.memory_space<vmem>>, vector<1x1x4x128xbf16>,
    return
  }
  func.func @transform_0(%arg0: i32) -> (i32, i32, i32, i32) {
    %c0_i32 = arith.constant 0 : i32
    %c0_i32_0 = arith.constant 0 : i32
    %c0_i32_1 = arith.constant 0 : i32
    %c0_i32_2 = arith.constant 0 : i32
    return %arg0, %c0_i32, %c0_i32_0, %c0_i32_1 : i32, i32, i32, i32
  }
  func.func @transform_1(%arg0: i32) -> (i32, i32, i32) {
    %c0_i32 = arith.constant 0 : i32
    %c0_i32_0 = arith.constant 0 : i32
    %c0_i32_1 = arith.constant 0 : i32
    %c0_i32_2 = arith.constant 0 : i32
    return %c0_i32, %c0_i32_0, %c0_i32_1 : i32, i32, i32
  }
  func.func @transform_2(%arg0: i32) -> (i32, i32) {
    %c0_i32 = arith.constant 0 : i32
    %c0_i32_0 = arith.constant 0 : i32
    %c0_i32_1 = arith.constant 0 : i32
    return %c0_i32, %c0_i32_0 : i32, i32
  }
  func.func @transform_3(%arg0: i32) -> (i32, i32, i32, i32) {
    %c0_i32 = arith.constant 0 : i32
    %c0_i32_0 = arith.constant 0 : i32
    %c0_i32_1 = arith.constant 0 : i32
    %c0_i32_2 = arith.constant 0 : i32
    return %arg0, %c0_i32, %c0_i32_0, %c0_i32_1 : i32, i32, i32, i32
  }
}

module attributes {stable_mosaic.version = 11 : i64} {
  func.func @_neck_head_kernel(%arg0: i32, %arg1: memref<1x4x4x128xbf16, #tpu.memory_space<vmem>>, %arg2: memref<128x256xbf16, #tpu.memory_space<vmem>>, %arg3: memref<1x256xf32, #tpu.memory_space<vmem>>, %arg4: memref<9x256x128xbf16, #tpu.memory_space<vmem>>, %arg5: memref<1x128xf32, #tpu.memory_space<vmem>>, %arg6: memref<1x4x4x128xf32, #tpu.memory_space<vmem>>, %arg7: memref<6x6x256xbf16, #tpu.memory_space<vmem>>) attributes {dimension_semantics = [#tpu.dimension_semantics<parallel>], iteration_bounds = array<i64: 2>, scalar_prefetch = 0 : i64, scratch_operands = 1 : i64, tpu.core_type = #tpu.core_type<tc>, window_params = [{transform_indices = @transform_0, window_bounds = array<i64: 1, 4, 4, 128>}, {pipeline_mode = #tpu.pipeline_mode<synchronous>, transform_indices = @transform_1, window_bounds = array<i64: 128, 256>}, {pipeline_mode = #tpu.pipeline_mode<synchronous>, transform_indices = @transform_2, window_bounds = array<i64: 1, 256>}, {pipeline_mode = #tpu.pipeline_mode<synchronous>, transform_indices = @transform_3, window_bounds = array<i64: 9, 256, 128>}, {pipeline_mode = #tpu.pipeline_mode<synchronous>, transform_indices = @transform_4, window_bounds = array<i64: 1, 128>}, {transform_indices = @transform_5, window_bounds = array<i64: 1, 4, 4, 128>}]} {
    %cst = arith.constant 0.000000e+00 : bf16
    %0 = vector.broadcast %cst : bf16 to vector<6x6x256xbf16>
    %c0 = arith.constant 0 : index
    %c0_0 = arith.constant 0 : index
    %c0_1 = arith.constant 0 : index
    %1 = vector.load %arg7[%c0, %c0_0, %c0_1] : memref<6x6x256xbf16, #tpu.memory_space<vmem>>, vector<6x6x256xbf16>
    tpu.vector_store %arg7[%c0, %c0_0, %c0_1], %0 {strides = array<i32>} : memref<6x6x256xbf16, #tpu.memory_space<vmem>>, vector<6x6x256xbf16>,
    %c0_2 = arith.constant 0 : index
    %c0_3 = arith.constant 0 : index
    %2 = vector.load %arg3[%c0_2, %c0_3] : memref<1x256xf32, #tpu.memory_space<vmem>>, vector<1x256xf32>
    %c0_4 = arith.constant 0 : index
    %c0_5 = arith.constant 0 : index
    %c0_6 = arith.constant 0 : index
    %c0_7 = arith.constant 0 : index
    %3 = vector.load %arg1[%c0_4, %c0_5, %c0_6, %c0_7] : memref<1x4x4x128xbf16, #tpu.memory_space<vmem>>, vector<1x1x4x128xbf16>
    %4 = vector.shape_cast %3 : vector<1x1x4x128xbf16> to vector<4x128xbf16>
    %c0_8 = arith.constant 0 : index
    %c0_9 = arith.constant 0 : index
    %5 = vector.load %arg2[%c0_8, %c0_9] : memref<128x256xbf16, #tpu.memory_space<vmem>>, vector<128x256xbf16>
    %cst_10 = arith.constant dense<0.000000e+00> : vector<4x256xf32>
    %6 = tpu.matmul %4, %5, %cst_10 {dimension_numbers = #tpu.dot_dimension_numbers<[1], [0], [0], [1], [0, 0, 1, 1], [], []>} : vector<4x128xbf16>, vector<128x256xbf16>, vector<4x256xf32> -> vector<4x256xf32>
    %7 = vector.broadcast %2 : vector<1x256xf32> to vector<4x256xf32>
    %8 = arith.addf %6, %7 : vector<4x256xf32>
    %cst_11 = arith.constant 0.000000e+00 : f32
    %9 = vector.broadcast %cst_11 : f32 to vector<4x256xf32>
    %10 = arith.maximumf %8, %9 : vector<4x256xf32>
    %11 = arith.truncf %10 : vector<4x256xf32> to vector<4x256xbf16>
    %c1 = arith.constant 1 : index
    %c1_12 = arith.constant 1 : index
    %c0_13 = arith.constant 0 : index
    %12 = vector.load %arg7[%c1, %c1_12, %c0_13] : memref<6x6x256xbf16, #tpu.memory_space<vmem>>, vector<1x4x256xbf16>
    %13 = vector.shape_cast %12 : vector<1x4x256xbf16> to vector<4x256xbf16>
    %14 = vector.shape_cast %11 : vector<4x256xbf16> to vector<1x4x256xbf16>
    tpu.vector_store %arg7[%c1, %c1_12, %c0_13], %14 {strides = array<i32>} : memref<6x6x256xbf16, #tpu.memory_space<vmem>>, vector<1x4x256xbf16>,
    %c0_14 = arith.constant 0 : index
    %c1_15 = arith.constant 1 : index
    %c0_16 = arith.constant 0 : index
    %c0_17 = arith.constant 0 : index
    %15 = vector.load %arg1[%c0_14, %c1_15, %c0_16, %c0_17] : memref<1x4x4x128xbf16, #tpu.memory_space<vmem>>, vector<1x1x4x128xbf16>
    %16 = vector.shape_cast %15 : vector<1x1x4x128xbf16> to vector<4x128xbf16>
    %c0_18 = arith.constant 0 : index
    %c0_19 = arith.constant 0 : index
    %17 = vector.load %arg2[%c0_18, %c0_19] : memref<128x256xbf16, #tpu.memory_space<vmem>>, vector<128x256xbf16>
    %cst_20 = arith.constant dense<0.000000e+00> : vector<4x256xf32>
    %18 = tpu.matmul %16, %17, %cst_20 {dimension_numbers = #tpu.dot_dimension_numbers<[1], [0], [0], [1], [0, 0, 1, 1], [], []>} : vector<4x128xbf16>, vector<128x256xbf16>, vector<4x256xf32> -> vector<4x256xf32>
    %19 = vector.broadcast %2 : vector<1x256xf32> to vector<4x256xf32>
    %20 = arith.addf %18, %19 : vector<4x256xf32>
    %cst_21 = arith.constant 0.000000e+00 : f32
    %21 = vector.broadcast %cst_21 : f32 to vector<4x256xf32>
    %22 = arith.maximumf %20, %21 : vector<4x256xf32>
    %23 = arith.truncf %22 : vector<4x256xf32> to vector<4x256xbf16>
    %c2 = arith.constant 2 : index
    %c1_22 = arith.constant 1 : index
    %c0_23 = arith.constant 0 : index
    %24 = vector.load %arg7[%c2, %c1_22, %c0_23] : memref<6x6x256xbf16, #tpu.memory_space<vmem>>, vector<1x4x256xbf16>
    %25 = vector.shape_cast %24 : vector<1x4x256xbf16> to vector<4x256xbf16>
    %26 = vector.shape_cast %23 : vector<4x256xbf16> to vector<1x4x256xbf16>
    tpu.vector_store %arg7[%c2, %c1_22, %c0_23], %26 {strides = array<i32>} : memref<6x6x256xbf16, #tpu.memory_space<vmem>>, vector<1x4x256xbf16>,
    %c0_24 = arith.constant 0 : index
    %c2_25 = arith.constant 2 : index
    %c0_26 = arith.constant 0 : index
    %c0_27 = arith.constant 0 : index
    %27 = vector.load %arg1[%c0_24, %c2_25, %c0_26, %c0_27] : memref<1x4x4x128xbf16, #tpu.memory_space<vmem>>, vector<1x1x4x128xbf16>
    %28 = vector.shape_cast %27 : vector<1x1x4x128xbf16> to vector<4x128xbf16>
    %c0_28 = arith.constant 0 : index
    %c0_29 = arith.constant 0 : index
    %29 = vector.load %arg2[%c0_28, %c0_29] : memref<128x256xbf16, #tpu.memory_space<vmem>>, vector<128x256xbf16>
    %cst_30 = arith.constant dense<0.000000e+00> : vector<4x256xf32>
    %30 = tpu.matmul %28, %29, %cst_30 {dimension_numbers = #tpu.dot_dimension_numbers<[1], [0], [0], [1], [0, 0, 1, 1], [], []>} : vector<4x128xbf16>, vector<128x256xbf16>, vector<4x256xf32> -> vector<4x256xf32>
    %31 = vector.broadcast %2 : vector<1x256xf32> to vector<4x256xf32>
    %32 = arith.addf %30, %31 : vector<4x256xf32>
    %cst_31 = arith.constant 0.000000e+00 : f32
    %33 = vector.broadcast %cst_31 : f32 to vector<4x256xf32>
    %34 = arith.maximumf %32, %33 : vector<4x256xf32>
    %35 = arith.truncf %34 : vector<4x256xf32> to vector<4x256xbf16>
    %c3 = arith.constant 3 : index
    %c1_32 = arith.constant 1 : index
    %c0_33 = arith.constant 0 : index
    %36 = vector.load %arg7[%c3, %c1_32, %c0_33] : memref<6x6x256xbf16, #tpu.memory_space<vmem>>, vector<1x4x256xbf16>
    %37 = vector.shape_cast %36 : vector<1x4x256xbf16> to vector<4x256xbf16>
    %38 = vector.shape_cast %35 : vector<4x256xbf16> to vector<1x4x256xbf16>
    tpu.vector_store %arg7[%c3, %c1_32, %c0_33], %38 {strides = array<i32>} : memref<6x6x256xbf16, #tpu.memory_space<vmem>>, vector<1x4x256xbf16>,
    %c0_34 = arith.constant 0 : index
    %c3_35 = arith.constant 3 : index
    %c0_36 = arith.constant 0 : index
    %c0_37 = arith.constant 0 : index
    %39 = vector.load %arg1[%c0_34, %c3_35, %c0_36, %c0_37] : memref<1x4x4x128xbf16, #tpu.memory_space<vmem>>, vector<1x1x4x128xbf16>
    %40 = vector.shape_cast %39 : vector<1x1x4x128xbf16> to vector<4x128xbf16>
    %c0_38 = arith.constant 0 : index
    %c0_39 = arith.constant 0 : index
    %41 = vector.load %arg2[%c0_38, %c0_39] : memref<128x256xbf16, #tpu.memory_space<vmem>>, vector<128x256xbf16>
    %cst_40 = arith.constant dense<0.000000e+00> : vector<4x256xf32>
    %42 = tpu.matmul %40, %41, %cst_40 {dimension_numbers = #tpu.dot_dimension_numbers<[1], [0], [0], [1], [0, 0, 1, 1], [], []>} : vector<4x128xbf16>, vector<128x256xbf16>, vector<4x256xf32> -> vector<4x256xf32>
    %43 = vector.broadcast %2 : vector<1x256xf32> to vector<4x256xf32>
    %44 = arith.addf %42, %43 : vector<4x256xf32>
    %cst_41 = arith.constant 0.000000e+00 : f32
    %45 = vector.broadcast %cst_41 : f32 to vector<4x256xf32>
    %46 = arith.maximumf %44, %45 : vector<4x256xf32>
    %47 = arith.truncf %46 : vector<4x256xf32> to vector<4x256xbf16>
    %c4 = arith.constant 4 : index
    %c1_42 = arith.constant 1 : index
    %c0_43 = arith.constant 0 : index
    %48 = vector.load %arg7[%c4, %c1_42, %c0_43] : memref<6x6x256xbf16, #tpu.memory_space<vmem>>, vector<1x4x256xbf16>
    %49 = vector.shape_cast %48 : vector<1x4x256xbf16> to vector<4x256xbf16>
    %50 = vector.shape_cast %47 : vector<4x256xbf16> to vector<1x4x256xbf16>
    tpu.vector_store %arg7[%c4, %c1_42, %c0_43], %50 {strides = array<i32>} : memref<6x6x256xbf16, #tpu.memory_space<vmem>>, vector<1x4x256xbf16>,
    %c0_44 = arith.constant 0 : index
    %c0_45 = arith.constant 0 : index
    %51 = vector.load %arg5[%c0_44, %c0_45] : memref<1x128xf32, #tpu.memory_space<vmem>>, vector<1x128xf32>
    %cst_46 = arith.constant 0.000000e+00 : f32
    %52 = vector.broadcast %cst_46 : f32 to vector<4x128xf32>
    %c0_47 = arith.constant 0 : index
    %c0_48 = arith.constant 0 : index
    %c0_49 = arith.constant 0 : index
    %53 = vector.load %arg7[%c0_47, %c0_48, %c0_49] : memref<6x6x256xbf16, #tpu.memory_space<vmem>>, vector<1x4x256xbf16>
    %54 = vector.shape_cast %53 : vector<1x4x256xbf16> to vector<4x256xbf16>
    %c0_50 = arith.constant 0 : index
    %c0_51 = arith.constant 0 : index
    %c0_52 = arith.constant 0 : index
    %55 = vector.load %arg4[%c0_50, %c0_51, %c0_52] : memref<9x256x128xbf16, #tpu.memory_space<vmem>>, vector<1x256x128xbf16>
    %56 = vector.shape_cast %55 : vector<1x256x128xbf16> to vector<256x128xbf16>
    %cst_53 = arith.constant dense<0.000000e+00> : vector<4x128xf32>
    %57 = tpu.matmul %54, %56, %cst_53 {dimension_numbers = #tpu.dot_dimension_numbers<[1], [0], [0], [1], [0, 0, 1, 1], [], []>} : vector<4x256xbf16>, vector<256x128xbf16>, vector<4x128xf32> -> vector<4x128xf32>
    %58 = arith.addf %52, %57 : vector<4x128xf32>
    %c0_54 = arith.constant 0 : index
    %c1_55 = arith.constant 1 : index
    %c0_56 = arith.constant 0 : index
    %59 = vector.load %arg7[%c0_54, %c1_55, %c0_56] : memref<6x6x256xbf16, #tpu.memory_space<vmem>>, vector<1x4x256xbf16>
    %60 = vector.shape_cast %59 : vector<1x4x256xbf16> to vector<4x256xbf16>
    %c1_57 = arith.constant 1 : index
    %c0_58 = arith.constant 0 : index
    %c0_59 = arith.constant 0 : index
    %61 = vector.load %arg4[%c1_57, %c0_58, %c0_59] : memref<9x256x128xbf16, #tpu.memory_space<vmem>>, vector<1x256x128xbf16>
    %62 = vector.shape_cast %61 : vector<1x256x128xbf16> to vector<256x128xbf16>
    %cst_60 = arith.constant dense<0.000000e+00> : vector<4x128xf32>
    %63 = tpu.matmul %60, %62, %cst_60 {dimension_numbers = #tpu.dot_dimension_numbers<[1], [0], [0], [1], [0, 0, 1, 1], [], []>} : vector<4x256xbf16>, vector<256x128xbf16>, vector<4x128xf32> -> vector<4x128xf32>
    %64 = arith.addf %58, %63 : vector<4x128xf32>
    %c0_61 = arith.constant 0 : index
    %c2_62 = arith.constant 2 : index
    %c0_63 = arith.constant 0 : index
    %65 = vector.load %arg7[%c0_61, %c2_62, %c0_63] : memref<6x6x256xbf16, #tpu.memory_space<vmem>>, vector<1x4x256xbf16>
    %66 = vector.shape_cast %65 : vector<1x4x256xbf16> to vector<4x256xbf16>
    %c2_64 = arith.constant 2 : index
    %c0_65 = arith.constant 0 : index
    %c0_66 = arith.constant 0 : index
    %67 = vector.load %arg4[%c2_64, %c0_65, %c0_66] : memref<9x256x128xbf16, #tpu.memory_space<vmem>>, vector<1x256x128xbf16>
    %68 = vector.shape_cast %67 : vector<1x256x128xbf16> to vector<256x128xbf16>
    %cst_67 = arith.constant dense<0.000000e+00> : vector<4x128xf32>
    %69 = tpu.matmul %66, %68, %cst_67 {dimension_numbers = #tpu.dot_dimension_numbers<[1], [0], [0], [1], [0, 0, 1, 1], [], []>} : vector<4x256xbf16>, vector<256x128xbf16>, vector<4x128xf32> -> vector<4x128xf32>
    %70 = arith.addf %64, %69 : vector<4x128xf32>
    %c1_68 = arith.constant 1 : index
    %c0_69 = arith.constant 0 : index
    %c0_70 = arith.constant 0 : index
    %71 = vector.load %arg7[%c1_68, %c0_69, %c0_70] : memref<6x6x256xbf16, #tpu.memory_space<vmem>>, vector<1x4x256xbf16>
    %72 = vector.shape_cast %71 : vector<1x4x256xbf16> to vector<4x256xbf16>
    %c3_71 = arith.constant 3 : index
    %c0_72 = arith.constant 0 : index
    %c0_73 = arith.constant 0 : index
    %73 = vector.load %arg4[%c3_71, %c0_72, %c0_73] : memref<9x256x128xbf16, #tpu.memory_space<vmem>>, vector<1x256x128xbf16>
    %74 = vector.shape_cast %73 : vector<1x256x128xbf16> to vector<256x128xbf16>
    %cst_74 = arith.constant dense<0.000000e+00> : vector<4x128xf32>
    %75 = tpu.matmul %72, %74, %cst_74 {dimension_numbers = #tpu.dot_dimension_numbers<[1], [0], [0], [1], [0, 0, 1, 1], [], []>} : vector<4x256xbf16>, vector<256x128xbf16>, vector<4x128xf32> -> vector<4x128xf32>
    %76 = arith.addf %70, %75 : vector<4x128xf32>
    %c1_75 = arith.constant 1 : index
    %c1_76 = arith.constant 1 : index
    %c0_77 = arith.constant 0 : index
    %77 = vector.load %arg7[%c1_75, %c1_76, %c0_77] : memref<6x6x256xbf16, #tpu.memory_space<vmem>>, vector<1x4x256xbf16>
    %78 = vector.shape_cast %77 : vector<1x4x256xbf16> to vector<4x256xbf16>
    %c4_78 = arith.constant 4 : index
    %c0_79 = arith.constant 0 : index
    %c0_80 = arith.constant 0 : index
    %79 = vector.load %arg4[%c4_78, %c0_79, %c0_80] : memref<9x256x128xbf16, #tpu.memory_space<vmem>>, vector<1x256x128xbf16>
    %80 = vector.shape_cast %79 : vector<1x256x128xbf16> to vector<256x128xbf16>
    %cst_81 = arith.constant dense<0.000000e+00> : vector<4x128xf32>
    %81 = tpu.matmul %78, %80, %cst_81 {dimension_numbers = #tpu.dot_dimension_numbers<[1], [0], [0], [1], [0, 0, 1, 1], [], []>} : vector<4x256xbf16>, vector<256x128xbf16>, vector<4x128xf32> -> vector<4x128xf32>
    %82 = arith.addf %76, %81 : vector<4x128xf32>
    %c1_82 = arith.constant 1 : index
    %c2_83 = arith.constant 2 : index
    %c0_84 = arith.constant 0 : index
    %83 = vector.load %arg7[%c1_82, %c2_83, %c0_84] : memref<6x6x256xbf16, #tpu.memory_space<vmem>>, vector<1x4x256xbf16>
    %84 = vector.shape_cast %83 : vector<1x4x256xbf16> to vector<4x256xbf16>
    %c5 = arith.constant 5 : index
    %c0_85 = arith.constant 0 : index
    %c0_86 = arith.constant 0 : index
    %85 = vector.load %arg4[%c5, %c0_85, %c0_86] : memref<9x256x128xbf16, #tpu.memory_space<vmem>>, vector<1x256x128xbf16>
    %86 = vector.shape_cast %85 : vector<1x256x128xbf16> to vector<256x128xbf16>
    %cst_87 = arith.constant dense<0.000000e+00> : vector<4x128xf32>
    %87 = tpu.matmul %84, %86, %cst_87 {dimension_numbers = #tpu.dot_dimension_numbers<[1], [0], [0], [1], [0, 0, 1, 1], [], []>} : vector<4x256xbf16>, vector<256x128xbf16>, vector<4x128xf32> -> vector<4x128xf32>
    %88 = arith.addf %82, %87 : vector<4x128xf32>
    %c2_88 = arith.constant 2 : index
    %c0_89 = arith.constant 0 : index
    %c0_90 = arith.constant 0 : index
    %89 = vector.load %arg7[%c2_88, %c0_89, %c0_90] : memref<6x6x256xbf16, #tpu.memory_space<vmem>>, vector<1x4x256xbf16>
    %90 = vector.shape_cast %89 : vector<1x4x256xbf16> to vector<4x256xbf16>
    %c6 = arith.constant 6 : index
    %c0_91 = arith.constant 0 : index
    %c0_92 = arith.constant 0 : index
    %91 = vector.load %arg4[%c6, %c0_91, %c0_92] : memref<9x256x128xbf16, #tpu.memory_space<vmem>>, vector<1x256x128xbf16>
    %92 = vector.shape_cast %91 : vector<1x256x128xbf16> to vector<256x128xbf16>
    %cst_93 = arith.constant dense<0.000000e+00> : vector<4x128xf32>
    %93 = tpu.matmul %90, %92, %cst_93 {dimension_numbers = #tpu.dot_dimension_numbers<[1], [0], [0], [1], [0, 0, 1, 1], [], []>} : vector<4x256xbf16>, vector<256x128xbf16>, vector<4x128xf32> -> vector<4x128xf32>
    %94 = arith.addf %88, %93 : vector<4x128xf32>
    %c2_94 = arith.constant 2 : index
    %c1_95 = arith.constant 1 : index
    %c0_96 = arith.constant 0 : index
    %95 = vector.load %arg7[%c2_94, %c1_95, %c0_96] : memref<6x6x256xbf16, #tpu.memory_space<vmem>>, vector<1x4x256xbf16>
    %96 = vector.shape_cast %95 : vector<1x4x256xbf16> to vector<4x256xbf16>
    %c7 = arith.constant 7 : index
    %c0_97 = arith.constant 0 : index
    %c0_98 = arith.constant 0 : index
    %97 = vector.load %arg4[%c7, %c0_97, %c0_98] : memref<9x256x128xbf16, #tpu.memory_space<vmem>>, vector<1x256x128xbf16>
    %98 = vector.shape_cast %97 : vector<1x256x128xbf16> to vector<256x128xbf16>
    %cst_99 = arith.constant dense<0.000000e+00> : vector<4x128xf32>
    %99 = tpu.matmul %96, %98, %cst_99 {dimension_numbers = #tpu.dot_dimension_numbers<[1], [0], [0], [1], [0, 0, 1, 1], [], []>} : vector<4x256xbf16>, vector<256x128xbf16>, vector<4x128xf32> -> vector<4x128xf32>
    %100 = arith.addf %94, %99 : vector<4x128xf32>
    %c2_100 = arith.constant 2 : index
    %c2_101 = arith.constant 2 : index
    %c0_102 = arith.constant 0 : index
    %101 = vector.load %arg7[%c2_100, %c2_101, %c0_102] : memref<6x6x256xbf16, #tpu.memory_space<vmem>>, vector<1x4x256xbf16>
    %102 = vector.shape_cast %101 : vector<1x4x256xbf16> to vector<4x256xbf16>
    %c8 = arith.constant 8 : index
    %c0_103 = arith.constant 0 : index
    %c0_104 = arith.constant 0 : index
    %103 = vector.load %arg4[%c8, %c0_103, %c0_104] : memref<9x256x128xbf16, #tpu.memory_space<vmem>>, vector<1x256x128xbf16>
    %104 = vector.shape_cast %103 : vector<1x256x128xbf16> to vector<256x128xbf16>
    %cst_105 = arith.constant dense<0.000000e+00> : vector<4x128xf32>
    %105 = tpu.matmul %102, %104, %cst_105 {dimension_numbers = #tpu.dot_dimension_numbers<[1], [0], [0], [1], [0, 0, 1, 1], [], []>} : vector<4x256xbf16>, vector<256x128xbf16>, vector<4x128xf32> -> vector<4x128xf32>
    %106 = arith.addf %100, %105 : vector<4x128xf32>
    %107 = vector.broadcast %51 : vector<1x128xf32> to vector<4x128xf32>
    %108 = arith.addf %106, %107 : vector<4x128xf32>
    %c0_106 = arith.constant 0 : index
    %c0_107 = arith.constant 0 : index
    %c0_108 = arith.constant 0 : index
    %c0_109 = arith.constant 0 : index
    %109 = vector.load %arg6[%c0_106, %c0_107, %c0_108, %c0_109] : memref<1x4x4x128xf32, #tpu.memory_space<vmem>>, vector<1x1x4x128xf32>
    %110 = vector.shape_cast %109 : vector<1x1x4x128xf32> to vector<4x128xf32>
    %111 = vector.shape_cast %108 : vector<4x128xf32> to vector<1x1x4x128xf32>
    tpu.vector_store %arg6[%c0_106, %c0_107, %c0_108, %c0_109], %111 {strides = array<i32>} : memref<1x4x4x128xf32, #tpu.memory_space<vmem>>, vector<1x1x4x128xf32>,
    %cst_110 = arith.constant 0.000000e+00 : f32
    %112 = vector.broadcast %cst_110 : f32 to vector<4x128xf32>
    %c1_111 = arith.constant 1 : index
    %c0_112 = arith.constant 0 : index
    %c0_113 = arith.constant 0 : index
    %113 = vector.load %arg7[%c1_111, %c0_112, %c0_113] : memref<6x6x256xbf16, #tpu.memory_space<vmem>>, vector<1x4x256xbf16>
    %114 = vector.shape_cast %113 : vector<1x4x256xbf16> to vector<4x256xbf16>
    %c0_114 = arith.constant 0 : index
    %c0_115 = arith.constant 0 : index
    %c0_116 = arith.constant 0 : index
    %115 = vector.load %arg4[%c0_114, %c0_115, %c0_116] : memref<9x256x128xbf16, #tpu.memory_space<vmem>>, vector<1x256x128xbf16>
    %116 = vector.shape_cast %115 : vector<1x256x128xbf16> to vector<256x128xbf16>
    %cst_117 = arith.constant dense<0.000000e+00> : vector<4x128xf32>
    %117 = tpu.matmul %114, %116, %cst_117 {dimension_numbers = #tpu.dot_dimension_numbers<[1], [0], [0], [1], [0, 0, 1, 1], [], []>} : vector<4x256xbf16>, vector<256x128xbf16>, vector<4x128xf32> -> vector<4x128xf32>
    %118 = arith.addf %112, %117 : vector<4x128xf32>
    %c1_118 = arith.constant 1 : index
    %c1_119 = arith.constant 1 : index
    %c0_120 = arith.constant 0 : index
    %119 = vector.load %arg7[%c1_118, %c1_119, %c0_120] : memref<6x6x256xbf16, #tpu.memory_space<vmem>>, vector<1x4x256xbf16>
    %120 = vector.shape_cast %119 : vector<1x4x256xbf16> to vector<4x256xbf16>
    %c1_121 = arith.constant 1 : index
    %c0_122 = arith.constant 0 : index
    %c0_123 = arith.constant 0 : index
    %121 = vector.load %arg4[%c1_121, %c0_122, %c0_123] : memref<9x256x128xbf16, #tpu.memory_space<vmem>>, vector<1x256x128xbf16>
    %122 = vector.shape_cast %121 : vector<1x256x128xbf16> to vector<256x128xbf16>
    %cst_124 = arith.constant dense<0.000000e+00> : vector<4x128xf32>
    %123 = tpu.matmul %120, %122, %cst_124 {dimension_numbers = #tpu.dot_dimension_numbers<[1], [0], [0], [1], [0, 0, 1, 1], [], []>} : vector<4x256xbf16>, vector<256x128xbf16>, vector<4x128xf32> -> vector<4x128xf32>
    %124 = arith.addf %118, %123 : vector<4x128xf32>
    %c1_125 = arith.constant 1 : index
    %c2_126 = arith.constant 2 : index
    %c0_127 = arith.constant 0 : index
    %125 = vector.load %arg7[%c1_125, %c2_126, %c0_127] : memref<6x6x256xbf16, #tpu.memory_space<vmem>>, vector<1x4x256xbf16>
    %126 = vector.shape_cast %125 : vector<1x4x256xbf16> to vector<4x256xbf16>
    %c2_128 = arith.constant 2 : index
    %c0_129 = arith.constant 0 : index
    %c0_130 = arith.constant 0 : index
    %127 = vector.load %arg4[%c2_128, %c0_129, %c0_130] : memref<9x256x128xbf16, #tpu.memory_space<vmem>>, vector<1x256x128xbf16>
    %128 = vector.shape_cast %127 : vector<1x256x128xbf16> to vector<256x128xbf16>
    %cst_131 = arith.constant dense<0.000000e+00> : vector<4x128xf32>
    %129 = tpu.matmul %126, %128, %cst_131 {dimension_numbers = #tpu.dot_dimension_numbers<[1], [0], [0], [1], [0, 0, 1, 1], [], []>} : vector<4x256xbf16>, vector<256x128xbf16>, vector<4x128xf32> -> vector<4x128xf32>
    %130 = arith.addf %124, %129 : vector<4x128xf32>
    %c2_132 = arith.constant 2 : index
    %c0_133 = arith.constant 0 : index
    %c0_134 = arith.constant 0 : index
    %131 = vector.load %arg7[%c2_132, %c0_133, %c0_134] : memref<6x6x256xbf16, #tpu.memory_space<vmem>>, vector<1x4x256xbf16>
    %132 = vector.shape_cast %131 : vector<1x4x256xbf16> to vector<4x256xbf16>
    %c3_135 = arith.constant 3 : index
    %c0_136 = arith.constant 0 : index
    %c0_137 = arith.constant 0 : index
    %133 = vector.load %arg4[%c3_135, %c0_136, %c0_137] : memref<9x256x128xbf16, #tpu.memory_space<vmem>>, vector<1x256x128xbf16>
    %134 = vector.shape_cast %133 : vector<1x256x128xbf16> to vector<256x128xbf16>
    %cst_138 = arith.constant dense<0.000000e+00> : vector<4x128xf32>
    %135 = tpu.matmul %132, %134, %cst_138 {dimension_numbers = #tpu.dot_dimension_numbers<[1], [0], [0], [1], [0, 0, 1, 1], [], []>} : vector<4x256xbf16>, vector<256x128xbf16>, vector<4x128xf32> -> vector<4x128xf32>
    %136 = arith.addf %130, %135 : vector<4x128xf32>
    %c2_139 = arith.constant 2 : index
    %c1_140 = arith.constant 1 : index
    %c0_141 = arith.constant 0 : index
    %137 = vector.load %arg7[%c2_139, %c1_140, %c0_141] : memref<6x6x256xbf16, #tpu.memory_space<vmem>>, vector<1x4x256xbf16>
    %138 = vector.shape_cast %137 : vector<1x4x256xbf16> to vector<4x256xbf16>
    %c4_142 = arith.constant 4 : index
    %c0_143 = arith.constant 0 : index
    %c0_144 = arith.constant 0 : index
    %139 = vector.load %arg4[%c4_142, %c0_143, %c0_144] : memref<9x256x128xbf16, #tpu.memory_space<vmem>>, vector<1x256x128xbf16>
    %140 = vector.shape_cast %139 : vector<1x256x128xbf16> to vector<256x128xbf16>
    %cst_145 = arith.constant dense<0.000000e+00> : vector<4x128xf32>
    %141 = tpu.matmul %138, %140, %cst_145 {dimension_numbers = #tpu.dot_dimension_numbers<[1], [0], [0], [1], [0, 0, 1, 1], [], []>} : vector<4x256xbf16>, vector<256x128xbf16>, vector<4x128xf32> -> vector<4x128xf32>
    %142 = arith.addf %136, %141 : vector<4x128xf32>
    %c2_146 = arith.constant 2 : index
    %c2_147 = arith.constant 2 : index
    %c0_148 = arith.constant 0 : index
    %143 = vector.load %arg7[%c2_146, %c2_147, %c0_148] : memref<6x6x256xbf16, #tpu.memory_space<vmem>>, vector<1x4x256xbf16>
    %144 = vector.shape_cast %143 : vector<1x4x256xbf16> to vector<4x256xbf16>
    %c5_149 = arith.constant 5 : index
    %c0_150 = arith.constant 0 : index
    %c0_151 = arith.constant 0 : index
    %145 = vector.load %arg4[%c5_149, %c0_150, %c0_151] : memref<9x256x128xbf16, #tpu.memory_space<vmem>>, vector<1x256x128xbf16>
    %146 = vector.shape_cast %145 : vector<1x256x128xbf16> to vector<256x128xbf16>
    %cst_152 = arith.constant dense<0.000000e+00> : vector<4x128xf32>
    %147 = tpu.matmul %144, %146, %cst_152 {dimension_numbers = #tpu.dot_dimension_numbers<[1], [0], [0], [1], [0, 0, 1, 1], [], []>} : vector<4x256xbf16>, vector<256x128xbf16>, vector<4x128xf32> -> vector<4x128xf32>
    %148 = arith.addf %142, %147 : vector<4x128xf32>
    %c3_153 = arith.constant 3 : index
    %c0_154 = arith.constant 0 : index
    %c0_155 = arith.constant 0 : index
    %149 = vector.load %arg7[%c3_153, %c0_154, %c0_155] : memref<6x6x256xbf16, #tpu.memory_space<vmem>>, vector<1x4x256xbf16>
    %150 = vector.shape_cast %149 : vector<1x4x256xbf16> to vector<4x256xbf16>
    %c6_156 = arith.constant 6 : index
    %c0_157 = arith.constant 0 : index
    %c0_158 = arith.constant 0 : index
    %151 = vector.load %arg4[%c6_156, %c0_157, %c0_158] : memref<9x256x128xbf16, #tpu.memory_space<vmem>>, vector<1x256x128xbf16>
    %152 = vector.shape_cast %151 : vector<1x256x128xbf16> to vector<256x128xbf16>
    %cst_159 = arith.constant dense<0.000000e+00> : vector<4x128xf32>
    %153 = tpu.matmul %150, %152, %cst_159 {dimension_numbers = #tpu.dot_dimension_numbers<[1], [0], [0], [1], [0, 0, 1, 1], [], []>} : vector<4x256xbf16>, vector<256x128xbf16>, vector<4x128xf32> -> vector<4x128xf32>
    %154 = arith.addf %148, %153 : vector<4x128xf32>
    %c3_160 = arith.constant 3 : index
    %c1_161 = arith.constant 1 : index
    %c0_162 = arith.constant 0 : index
    %155 = vector.load %arg7[%c3_160, %c1_161, %c0_162] : memref<6x6x256xbf16, #tpu.memory_space<vmem>>, vector<1x4x256xbf16>
    %156 = vector.shape_cast %155 : vector<1x4x256xbf16> to vector<4x256xbf16>
    %c7_163 = arith.constant 7 : index
    %c0_164 = arith.constant 0 : index
    %c0_165 = arith.constant 0 : index
    %157 = vector.load %arg4[%c7_163, %c0_164, %c0_165] : memref<9x256x128xbf16, #tpu.memory_space<vmem>>, vector<1x256x128xbf16>
    %158 = vector.shape_cast %157 : vector<1x256x128xbf16> to vector<256x128xbf16>
    %cst_166 = arith.constant dense<0.000000e+00> : vector<4x128xf32>
    %159 = tpu.matmul %156, %158, %cst_166 {dimension_numbers = #tpu.dot_dimension_numbers<[1], [0], [0], [1], [0, 0, 1, 1], [], []>} : vector<4x256xbf16>, vector<256x128xbf16>, vector<4x128xf32> -> vector<4x128xf32>
    %160 = arith.addf %154, %159 : vector<4x128xf32>
    %c3_167 = arith.constant 3 : index
    %c2_168 = arith.constant 2 : index
    %c0_169 = arith.constant 0 : index
    %161 = vector.load %arg7[%c3_167, %c2_168, %c0_169] : memref<6x6x256xbf16, #tpu.memory_space<vmem>>, vector<1x4x256xbf16>
    %162 = vector.shape_cast %161 : vector<1x4x256xbf16> to vector<4x256xbf16>
    %c8_170 = arith.constant 8 : index
    %c0_171 = arith.constant 0 : index
    %c0_172 = arith.constant 0 : index
    %163 = vector.load %arg4[%c8_170, %c0_171, %c0_172] : memref<9x256x128xbf16, #tpu.memory_space<vmem>>, vector<1x256x128xbf16>
    %164 = vector.shape_cast %163 : vector<1x256x128xbf16> to vector<256x128xbf16>
    %cst_173 = arith.constant dense<0.000000e+00> : vector<4x128xf32>
    %165 = tpu.matmul %162, %164, %cst_173 {dimension_numbers = #tpu.dot_dimension_numbers<[1], [0], [0], [1], [0, 0, 1, 1], [], []>} : vector<4x256xbf16>, vector<256x128xbf16>, vector<4x128xf32> -> vector<4x128xf32>
    %166 = arith.addf %160, %165 : vector<4x128xf32>
    %167 = vector.broadcast %51 : vector<1x128xf32> to vector<4x128xf32>
    %168 = arith.addf %166, %167 : vector<4x128xf32>
    %c0_174 = arith.constant 0 : index
    %c1_175 = arith.constant 1 : index
    %c0_176 = arith.constant 0 : index
    %c0_177 = arith.constant 0 : index
    %169 = vector.load %arg6[%c0_174, %c1_175, %c0_176, %c0_177] : memref<1x4x4x128xf32, #tpu.memory_space<vmem>>, vector<1x1x4x128xf32>
    %170 = vector.shape_cast %169 : vector<1x1x4x128xf32> to vector<4x128xf32>
    %171 = vector.shape_cast %168 : vector<4x128xf32> to vector<1x1x4x128xf32>
    tpu.vector_store %arg6[%c0_174, %c1_175, %c0_176, %c0_177], %171 {strides = array<i32>} : memref<1x4x4x128xf32, #tpu.memory_space<vmem>>, vector<1x1x4x128xf32>,
    %cst_178 = arith.constant 0.000000e+00 : f32
    %172 = vector.broadcast %cst_178 : f32 to vector<4x128xf32>
    %c2_179 = arith.constant 2 : index
    %c0_180 = arith.constant 0 : index
    %c0_181 = arith.constant 0 : index
    %173 = vector.load %arg7[%c2_179, %c0_180, %c0_181] : memref<6x6x256xbf16, #tpu.memory_space<vmem>>, vector<1x4x256xbf16>
    %174 = vector.shape_cast %173 : vector<1x4x256xbf16> to vector<4x256xbf16>
    %c0_182 = arith.constant 0 : index
    %c0_183 = arith.constant 0 : index
    %c0_184 = arith.constant 0 : index
    %175 = vector.load %arg4[%c0_182, %c0_183, %c0_184] : memref<9x256x128xbf16, #tpu.memory_space<vmem>>, vector<1x256x128xbf16>
    %176 = vector.shape_cast %175 : vector<1x256x128xbf16> to vector<256x128xbf16>
    %cst_185 = arith.constant dense<0.000000e+00> : vector<4x128xf32>
    %177 = tpu.matmul %174, %176, %cst_185 {dimension_numbers = #tpu.dot_dimension_numbers<[1], [0], [0], [1], [0, 0, 1, 1], [], []>} : vector<4x256xbf16>, vector<256x128xbf16>, vector<4x128xf32> -> vector<4x128xf32>
    %178 = arith.addf %172, %177 : vector<4x128xf32>
    %c2_186 = arith.constant 2 : index
    %c1_187 = arith.constant 1 : index
    %c0_188 = arith.constant 0 : index
    %179 = vector.load %arg7[%c2_186, %c1_187, %c0_188] : memref<6x6x256xbf16, #tpu.memory_space<vmem>>, vector<1x4x256xbf16>
    %180 = vector.shape_cast %179 : vector<1x4x256xbf16> to vector<4x256xbf16>
    %c1_189 = arith.constant 1 : index
    %c0_190 = arith.constant 0 : index
    %c0_191 = arith.constant 0 : index
    %181 = vector.load %arg4[%c1_189, %c0_190, %c0_191] : memref<9x256x128xbf16, #tpu.memory_space<vmem>>, vector<1x256x128xbf16>
    %182 = vector.shape_cast %181 : vector<1x256x128xbf16> to vector<256x128xbf16>
    %cst_192 = arith.constant dense<0.000000e+00> : vector<4x128xf32>
    %183 = tpu.matmul %180, %182, %cst_192 {dimension_numbers = #tpu.dot_dimension_numbers<[1], [0], [0], [1], [0, 0, 1, 1], [], []>} : vector<4x256xbf16>, vector<256x128xbf16>, vector<4x128xf32> -> vector<4x128xf32>
    %184 = arith.addf %178, %183 : vector<4x128xf32>
    %c2_193 = arith.constant 2 : index
    %c2_194 = arith.constant 2 : index
    %c0_195 = arith.constant 0 : index
    %185 = vector.load %arg7[%c2_193, %c2_194, %c0_195] : memref<6x6x256xbf16, #tpu.memory_space<vmem>>, vector<1x4x256xbf16>
    %186 = vector.shape_cast %185 : vector<1x4x256xbf16> to vector<4x256xbf16>
    %c2_196 = arith.constant 2 : index
    %c0_197 = arith.constant 0 : index
    %c0_198 = arith.constant 0 : index
    %187 = vector.load %arg4[%c2_196, %c0_197, %c0_198] : memref<9x256x128xbf16, #tpu.memory_space<vmem>>, vector<1x256x128xbf16>
    %188 = vector.shape_cast %187 : vector<1x256x128xbf16> to vector<256x128xbf16>
    %cst_199 = arith.constant dense<0.000000e+00> : vector<4x128xf32>
    %189 = tpu.matmul %186, %188, %cst_199 {dimension_numbers = #tpu.dot_dimension_numbers<[1], [0], [0], [1], [0, 0, 1, 1], [], []>} : vector<4x256xbf16>, vector<256x128xbf16>, vector<4x128xf32> -> vector<4x128xf32>
    %190 = arith.addf %184, %189 : vector<4x128xf32>
    %c3_200 = arith.constant 3 : index
    %c0_201 = arith.constant 0 : index
    %c0_202 = arith.constant 0 : index
    %191 = vector.load %arg7[%c3_200, %c0_201, %c0_202] : memref<6x6x256xbf16, #tpu.memory_space<vmem>>, vector<1x4x256xbf16>
    %192 = vector.shape_cast %191 : vector<1x4x256xbf16> to vector<4x256xbf16>
    %c3_203 = arith.constant 3 : index
    %c0_204 = arith.constant 0 : index
    %c0_205 = arith.constant 0 : index
    %193 = vector.load %arg4[%c3_203, %c0_204, %c0_205] : memref<9x256x128xbf16, #tpu.memory_space<vmem>>, vector<1x256x128xbf16>
    %194 = vector.shape_cast %193 : vector<1x256x128xbf16> to vector<256x128xbf16>
    %cst_206 = arith.constant dense<0.000000e+00> : vector<4x128xf32>
    %195 = tpu.matmul %192, %194, %cst_206 {dimension_numbers = #tpu.dot_dimension_numbers<[1], [0], [0], [1], [0, 0, 1, 1], [], []>} : vector<4x256xbf16>, vector<256x128xbf16>, vector<4x128xf32> -> vector<4x128xf32>
    %196 = arith.addf %190, %195 : vector<4x128xf32>
    %c3_207 = arith.constant 3 : index
    %c1_208 = arith.constant 1 : index
    %c0_209 = arith.constant 0 : index
    %197 = vector.load %arg7[%c3_207, %c1_208, %c0_209] : memref<6x6x256xbf16, #tpu.memory_space<vmem>>, vector<1x4x256xbf16>
    %198 = vector.shape_cast %197 : vector<1x4x256xbf16> to vector<4x256xbf16>
    %c4_210 = arith.constant 4 : index
    %c0_211 = arith.constant 0 : index
    %c0_212 = arith.constant 0 : index
    %199 = vector.load %arg4[%c4_210, %c0_211, %c0_212] : memref<9x256x128xbf16, #tpu.memory_space<vmem>>, vector<1x256x128xbf16>
    %200 = vector.shape_cast %199 : vector<1x256x128xbf16> to vector<256x128xbf16>
    %cst_213 = arith.constant dense<0.000000e+00> : vector<4x128xf32>
    %201 = tpu.matmul %198, %200, %cst_213 {dimension_numbers = #tpu.dot_dimension_numbers<[1], [0], [0], [1], [0, 0, 1, 1], [], []>} : vector<4x256xbf16>, vector<256x128xbf16>, vector<4x128xf32> -> vector<4x128xf32>
    %202 = arith.addf %196, %201 : vector<4x128xf32>
    %c3_214 = arith.constant 3 : index
    %c2_215 = arith.constant 2 : index
    %c0_216 = arith.constant 0 : index
    %203 = vector.load %arg7[%c3_214, %c2_215, %c0_216] : memref<6x6x256xbf16, #tpu.memory_space<vmem>>, vector<1x4x256xbf16>
    %204 = vector.shape_cast %203 : vector<1x4x256xbf16> to vector<4x256xbf16>
    %c5_217 = arith.constant 5 : index
    %c0_218 = arith.constant 0 : index
    %c0_219 = arith.constant 0 : index
    %205 = vector.load %arg4[%c5_217, %c0_218, %c0_219] : memref<9x256x128xbf16, #tpu.memory_space<vmem>>, vector<1x256x128xbf16>
    %206 = vector.shape_cast %205 : vector<1x256x128xbf16> to vector<256x128xbf16>
    %cst_220 = arith.constant dense<0.000000e+00> : vector<4x128xf32>
    %207 = tpu.matmul %204, %206, %cst_220 {dimension_numbers = #tpu.dot_dimension_numbers<[1], [0], [0], [1], [0, 0, 1, 1], [], []>} : vector<4x256xbf16>, vector<256x128xbf16>, vector<4x128xf32> -> vector<4x128xf32>
    %208 = arith.addf %202, %207 : vector<4x128xf32>
    %c4_221 = arith.constant 4 : index
    %c0_222 = arith.constant 0 : index
    %c0_223 = arith.constant 0 : index
    %209 = vector.load %arg7[%c4_221, %c0_222, %c0_223] : memref<6x6x256xbf16, #tpu.memory_space<vmem>>, vector<1x4x256xbf16>
    %210 = vector.shape_cast %209 : vector<1x4x256xbf16> to vector<4x256xbf16>
    %c6_224 = arith.constant 6 : index
    %c0_225 = arith.constant 0 : index
    %c0_226 = arith.constant 0 : index
    %211 = vector.load %arg4[%c6_224, %c0_225, %c0_226] : memref<9x256x128xbf16, #tpu.memory_space<vmem>>, vector<1x256x128xbf16>
    %212 = vector.shape_cast %211 : vector<1x256x128xbf16> to vector<256x128xbf16>
    %cst_227 = arith.constant dense<0.000000e+00> : vector<4x128xf32>
    %213 = tpu.matmul %210, %212, %cst_227 {dimension_numbers = #tpu.dot_dimension_numbers<[1], [0], [0], [1], [0, 0, 1, 1], [], []>} : vector<4x256xbf16>, vector<256x128xbf16>, vector<4x128xf32> -> vector<4x128xf32>
    %214 = arith.addf %208, %213 : vector<4x128xf32>
    %c4_228 = arith.constant 4 : index
    %c1_229 = arith.constant 1 : index
    %c0_230 = arith.constant 0 : index
    %215 = vector.load %arg7[%c4_228, %c1_229, %c0_230] : memref<6x6x256xbf16, #tpu.memory_space<vmem>>, vector<1x4x256xbf16>
    %216 = vector.shape_cast %215 : vector<1x4x256xbf16> to vector<4x256xbf16>
    %c7_231 = arith.constant 7 : index
    %c0_232 = arith.constant 0 : index
    %c0_233 = arith.constant 0 : index
    %217 = vector.load %arg4[%c7_231, %c0_232, %c0_233] : memref<9x256x128xbf16, #tpu.memory_space<vmem>>, vector<1x256x128xbf16>
    %218 = vector.shape_cast %217 : vector<1x256x128xbf16> to vector<256x128xbf16>
    %cst_234 = arith.constant dense<0.000000e+00> : vector<4x128xf32>
    %219 = tpu.matmul %216, %218, %cst_234 {dimension_numbers = #tpu.dot_dimension_numbers<[1], [0], [0], [1], [0, 0, 1, 1], [], []>} : vector<4x256xbf16>, vector<256x128xbf16>, vector<4x128xf32> -> vector<4x128xf32>
    %220 = arith.addf %214, %219 : vector<4x128xf32>
    %c4_235 = arith.constant 4 : index
    %c2_236 = arith.constant 2 : index
    %c0_237 = arith.constant 0 : index
    %221 = vector.load %arg7[%c4_235, %c2_236, %c0_237] : memref<6x6x256xbf16, #tpu.memory_space<vmem>>, vector<1x4x256xbf16>
    %222 = vector.shape_cast %221 : vector<1x4x256xbf16> to vector<4x256xbf16>
    %c8_238 = arith.constant 8 : index
    %c0_239 = arith.constant 0 : index
    %c0_240 = arith.constant 0 : index
    %223 = vector.load %arg4[%c8_238, %c0_239, %c0_240] : memref<9x256x128xbf16, #tpu.memory_space<vmem>>, vector<1x256x128xbf16>
    %224 = vector.shape_cast %223 : vector<1x256x128xbf16> to vector<256x128xbf16>
    %cst_241 = arith.constant dense<0.000000e+00> : vector<4x128xf32>
    %225 = tpu.matmul %222, %224, %cst_241 {dimension_numbers = #tpu.dot_dimension_numbers<[1], [0], [0], [1], [0, 0, 1, 1], [], []>} : vector<4x256xbf16>, vector<256x128xbf16>, vector<4x128xf32> -> vector<4x128xf32>
    %226 = arith.addf %220, %225 : vector<4x128xf32>
    %227 = vector.broadcast %51 : vector<1x128xf32> to vector<4x128xf32>
    %228 = arith.addf %226, %227 : vector<4x128xf32>
    %c0_242 = arith.constant 0 : index
    %c2_243 = arith.constant 2 : index
    %c0_244 = arith.constant 0 : index
    %c0_245 = arith.constant 0 : index
    %229 = vector.load %arg6[%c0_242, %c2_243, %c0_244, %c0_245] : memref<1x4x4x128xf32, #tpu.memory_space<vmem>>, vector<1x1x4x128xf32>
    %230 = vector.shape_cast %229 : vector<1x1x4x128xf32> to vector<4x128xf32>
    %231 = vector.shape_cast %228 : vector<4x128xf32> to vector<1x1x4x128xf32>
    tpu.vector_store %arg6[%c0_242, %c2_243, %c0_244, %c0_245], %231 {strides = array<i32>} : memref<1x4x4x128xf32, #tpu.memory_space<vmem>>, vector<1x1x4x128xf32>,
    %cst_246 = arith.constant 0.000000e+00 : f32
    %232 = vector.broadcast %cst_246 : f32 to vector<4x128xf32>
    %c3_247 = arith.constant 3 : index
    %c0_248 = arith.constant 0 : index
    %c0_249 = arith.constant 0 : index
    %233 = vector.load %arg7[%c3_247, %c0_248, %c0_249] : memref<6x6x256xbf16, #tpu.memory_space<vmem>>, vector<1x4x256xbf16>
    %234 = vector.shape_cast %233 : vector<1x4x256xbf16> to vector<4x256xbf16>
    %c0_250 = arith.constant 0 : index
    %c0_251 = arith.constant 0 : index
    %c0_252 = arith.constant 0 : index
    %235 = vector.load %arg4[%c0_250, %c0_251, %c0_252] : memref<9x256x128xbf16, #tpu.memory_space<vmem>>, vector<1x256x128xbf16>
    %236 = vector.shape_cast %235 : vector<1x256x128xbf16> to vector<256x128xbf16>
    %cst_253 = arith.constant dense<0.000000e+00> : vector<4x128xf32>
    %237 = tpu.matmul %234, %236, %cst_253 {dimension_numbers = #tpu.dot_dimension_numbers<[1], [0], [0], [1], [0, 0, 1, 1], [], []>} : vector<4x256xbf16>, vector<256x128xbf16>, vector<4x128xf32> -> vector<4x128xf32>
    %238 = arith.addf %232, %237 : vector<4x128xf32>
    %c3_254 = arith.constant 3 : index
    %c1_255 = arith.constant 1 : index
    %c0_256 = arith.constant 0 : index
    %239 = vector.load %arg7[%c3_254, %c1_255, %c0_256] : memref<6x6x256xbf16, #tpu.memory_space<vmem>>, vector<1x4x256xbf16>
    %240 = vector.shape_cast %239 : vector<1x4x256xbf16> to vector<4x256xbf16>
    %c1_257 = arith.constant 1 : index
    %c0_258 = arith.constant 0 : index
    %c0_259 = arith.constant 0 : index
    %241 = vector.load %arg4[%c1_257, %c0_258, %c0_259] : memref<9x256x128xbf16, #tpu.memory_space<vmem>>, vector<1x256x128xbf16>
    %242 = vector.shape_cast %241 : vector<1x256x128xbf16> to vector<256x128xbf16>
    %cst_260 = arith.constant dense<0.000000e+00> : vector<4x128xf32>
    %243 = tpu.matmul %240, %242, %cst_260 {dimension_numbers = #tpu.dot_dimension_numbers<[1], [0], [0], [1], [0, 0, 1, 1], [], []>} : vector<4x256xbf16>, vector<256x128xbf16>, vector<4x128xf32> -> vector<4x128xf32>
    %244 = arith.addf %238, %243 : vector<4x128xf32>
    %c3_261 = arith.constant 3 : index
    %c2_262 = arith.constant 2 : index
    %c0_263 = arith.constant 0 : index
    %245 = vector.load %arg7[%c3_261, %c2_262, %c0_263] : memref<6x6x256xbf16, #tpu.memory_space<vmem>>, vector<1x4x256xbf16>
    %246 = vector.shape_cast %245 : vector<1x4x256xbf16> to vector<4x256xbf16>
    %c2_264 = arith.constant 2 : index
    %c0_265 = arith.constant 0 : index
    %c0_266 = arith.constant 0 : index
    %247 = vector.load %arg4[%c2_264, %c0_265, %c0_266] : memref<9x256x128xbf16, #tpu.memory_space<vmem>>, vector<1x256x128xbf16>
    %248 = vector.shape_cast %247 : vector<1x256x128xbf16> to vector<256x128xbf16>
    %cst_267 = arith.constant dense<0.000000e+00> : vector<4x128xf32>
    %249 = tpu.matmul %246, %248, %cst_267 {dimension_numbers = #tpu.dot_dimension_numbers<[1], [0], [0], [1], [0, 0, 1, 1], [], []>} : vector<4x256xbf16>, vector<256x128xbf16>, vector<4x128xf32> -> vector<4x128xf32>
    %250 = arith.addf %244, %249 : vector<4x128xf32>
    %c4_268 = arith.constant 4 : index
    %c0_269 = arith.constant 0 : index
    %c0_270 = arith.constant 0 : index
    %251 = vector.load %arg7[%c4_268, %c0_269, %c0_270] : memref<6x6x256xbf16, #tpu.memory_space<vmem>>, vector<1x4x256xbf16>
    %252 = vector.shape_cast %251 : vector<1x4x256xbf16> to vector<4x256xbf16>
    %c3_271 = arith.constant 3 : index
    %c0_272 = arith.constant 0 : index
    %c0_273 = arith.constant 0 : index
    %253 = vector.load %arg4[%c3_271, %c0_272, %c0_273] : memref<9x256x128xbf16, #tpu.memory_space<vmem>>, vector<1x256x128xbf16>
    %254 = vector.shape_cast %253 : vector<1x256x128xbf16> to vector<256x128xbf16>
    %cst_274 = arith.constant dense<0.000000e+00> : vector<4x128xf32>
    %255 = tpu.matmul %252, %254, %cst_274 {dimension_numbers = #tpu.dot_dimension_numbers<[1], [0], [0], [1], [0, 0, 1, 1], [], []>} : vector<4x256xbf16>, vector<256x128xbf16>, vector<4x128xf32> -> vector<4x128xf32>
    %256 = arith.addf %250, %255 : vector<4x128xf32>
    %c4_275 = arith.constant 4 : index
    %c1_276 = arith.constant 1 : index
    %c0_277 = arith.constant 0 : index
    %257 = vector.load %arg7[%c4_275, %c1_276, %c0_277] : memref<6x6x256xbf16, #tpu.memory_space<vmem>>, vector<1x4x256xbf16>
    %258 = vector.shape_cast %257 : vector<1x4x256xbf16> to vector<4x256xbf16>
    %c4_278 = arith.constant 4 : index
    %c0_279 = arith.constant 0 : index
    %c0_280 = arith.constant 0 : index
    %259 = vector.load %arg4[%c4_278, %c0_279, %c0_280] : memref<9x256x128xbf16, #tpu.memory_space<vmem>>, vector<1x256x128xbf16>
    %260 = vector.shape_cast %259 : vector<1x256x128xbf16> to vector<256x128xbf16>
    %cst_281 = arith.constant dense<0.000000e+00> : vector<4x128xf32>
    %261 = tpu.matmul %258, %260, %cst_281 {dimension_numbers = #tpu.dot_dimension_numbers<[1], [0], [0], [1], [0, 0, 1, 1], [], []>} : vector<4x256xbf16>, vector<256x128xbf16>, vector<4x128xf32> -> vector<4x128xf32>
    %262 = arith.addf %256, %261 : vector<4x128xf32>
    %c4_282 = arith.constant 4 : index
    %c2_283 = arith.constant 2 : index
    %c0_284 = arith.constant 0 : index
    %263 = vector.load %arg7[%c4_282, %c2_283, %c0_284] : memref<6x6x256xbf16, #tpu.memory_space<vmem>>, vector<1x4x256xbf16>
    %264 = vector.shape_cast %263 : vector<1x4x256xbf16> to vector<4x256xbf16>
    %c5_285 = arith.constant 5 : index
    %c0_286 = arith.constant 0 : index
    %c0_287 = arith.constant 0 : index
    %265 = vector.load %arg4[%c5_285, %c0_286, %c0_287] : memref<9x256x128xbf16, #tpu.memory_space<vmem>>, vector<1x256x128xbf16>
    %266 = vector.shape_cast %265 : vector<1x256x128xbf16> to vector<256x128xbf16>
    %cst_288 = arith.constant dense<0.000000e+00> : vector<4x128xf32>
    %267 = tpu.matmul %264, %266, %cst_288 {dimension_numbers = #tpu.dot_dimension_numbers<[1], [0], [0], [1], [0, 0, 1, 1], [], []>} : vector<4x256xbf16>, vector<256x128xbf16>, vector<4x128xf32> -> vector<4x128xf32>
    %268 = arith.addf %262, %267 : vector<4x128xf32>
    %c5_289 = arith.constant 5 : index
    %c0_290 = arith.constant 0 : index
    %c0_291 = arith.constant 0 : index
    %269 = vector.load %arg7[%c5_289, %c0_290, %c0_291] : memref<6x6x256xbf16, #tpu.memory_space<vmem>>, vector<1x4x256xbf16>
    %270 = vector.shape_cast %269 : vector<1x4x256xbf16> to vector<4x256xbf16>
    %c6_292 = arith.constant 6 : index
    %c0_293 = arith.constant 0 : index
    %c0_294 = arith.constant 0 : index
    %271 = vector.load %arg4[%c6_292, %c0_293, %c0_294] : memref<9x256x128xbf16, #tpu.memory_space<vmem>>, vector<1x256x128xbf16>
    %272 = vector.shape_cast %271 : vector<1x256x128xbf16> to vector<256x128xbf16>
    %cst_295 = arith.constant dense<0.000000e+00> : vector<4x128xf32>
    %273 = tpu.matmul %270, %272, %cst_295 {dimension_numbers = #tpu.dot_dimension_numbers<[1], [0], [0], [1], [0, 0, 1, 1], [], []>} : vector<4x256xbf16>, vector<256x128xbf16>, vector<4x128xf32> -> vector<4x128xf32>
    %274 = arith.addf %268, %273 : vector<4x128xf32>
    %c5_296 = arith.constant 5 : index
    %c1_297 = arith.constant 1 : index
    %c0_298 = arith.constant 0 : index
    %275 = vector.load %arg7[%c5_296, %c1_297, %c0_298] : memref<6x6x256xbf16, #tpu.memory_space<vmem>>, vector<1x4x256xbf16>
    %276 = vector.shape_cast %275 : vector<1x4x256xbf16> to vector<4x256xbf16>
    %c7_299 = arith.constant 7 : index
    %c0_300 = arith.constant 0 : index
    %c0_301 = arith.constant 0 : index
    %277 = vector.load %arg4[%c7_299, %c0_300, %c0_301] : memref<9x256x128xbf16, #tpu.memory_space<vmem>>, vector<1x256x128xbf16>
    %278 = vector.shape_cast %277 : vector<1x256x128xbf16> to vector<256x128xbf16>
    %cst_302 = arith.constant dense<0.000000e+00> : vector<4x128xf32>
    %279 = tpu.matmul %276, %278, %cst_302 {dimension_numbers = #tpu.dot_dimension_numbers<[1], [0], [0], [1], [0, 0, 1, 1], [], []>} : vector<4x256xbf16>, vector<256x128xbf16>, vector<4x128xf32> -> vector<4x128xf32>
    %280 = arith.addf %274, %279 : vector<4x128xf32>
    %c5_303 = arith.constant 5 : index
    %c2_304 = arith.constant 2 : index
    %c0_305 = arith.constant 0 : index
    %281 = vector.load %arg7[%c5_303, %c2_304, %c0_305] : memref<6x6x256xbf16, #tpu.memory_space<vmem>>, vector<1x4x256xbf16>
    %282 = vector.shape_cast %281 : vector<1x4x256xbf16> to vector<4x256xbf16>
    %c8_306 = arith.constant 8 : index
    %c0_307 = arith.constant 0 : index
    %c0_308 = arith.constant 0 : index
    %283 = vector.load %arg4[%c8_306, %c0_307, %c0_308] : memref<9x256x128xbf16, #tpu.memory_space<vmem>>, vector<1x256x128xbf16>
    %284 = vector.shape_cast %283 : vector<1x256x128xbf16> to vector<256x128xbf16>
    %cst_309 = arith.constant dense<0.000000e+00> : vector<4x128xf32>
    %285 = tpu.matmul %282, %284, %cst_309 {dimension_numbers = #tpu.dot_dimension_numbers<[1], [0], [0], [1], [0, 0, 1, 1], [], []>} : vector<4x256xbf16>, vector<256x128xbf16>, vector<4x128xf32> -> vector<4x128xf32>
    %286 = arith.addf %280, %285 : vector<4x128xf32>
    %287 = vector.broadcast %51 : vector<1x128xf32> to vector<4x128xf32>
    %288 = arith.addf %286, %287 : vector<4x128xf32>
    %c0_310 = arith.constant 0 : index
    %c3_311 = arith.constant 3 : index
    %c0_312 = arith.constant 0 : index
    %c0_313 = arith.constant 0 : index
    %289 = vector.load %arg6[%c0_310, %c3_311, %c0_312, %c0_313] : memref<1x4x4x128xf32, #tpu.memory_space<vmem>>, vector<1x1x4x128xf32>
    %290 = vector.shape_cast %289 : vector<1x1x4x128xf32> to vector<4x128xf32>
    %291 = vector.shape_cast %288 : vector<4x128xf32> to vector<1x1x4x128xf32>
    tpu.vector_store %arg6[%c0_310, %c3_311, %c0_312, %c0_313], %291 {strides = array<i32>} : memref<1x4x4x128xf32, #tpu.memory_space<vmem>>, vector<1x1x4x128xf32>,
    return
  }
  func.func @transform_0(%arg0: i32) -> (i32, i32, i32, i32) {
    %c0_i32 = arith.constant 0 : i32
    %c0_i32_0 = arith.constant 0 : i32
    %c0_i32_1 = arith.constant 0 : i32
    %c0_i32_2 = arith.constant 0 : i32
    return %arg0, %c0_i32, %c0_i32_0, %c0_i32_1 : i32, i32, i32, i32
  }
  func.func @transform_1(%arg0: i32) -> (i32, i32) {
    %c0_i32 = arith.constant 0 : i32
    %c0_i32_0 = arith.constant 0 : i32
    %c0_i32_1 = arith.constant 0 : i32
    return %c0_i32, %c0_i32_0 : i32, i32
  }
  func.func @transform_2(%arg0: i32) -> (i32, i32) {
    %c0_i32 = arith.constant 0 : i32
    %c0_i32_0 = arith.constant 0 : i32
    %c0_i32_1 = arith.constant 0 : i32
    return %c0_i32, %c0_i32_0 : i32, i32
  }
  func.func @transform_3(%arg0: i32) -> (i32, i32, i32) {
    %c0_i32 = arith.constant 0 : i32
    %c0_i32_0 = arith.constant 0 : i32
    %c0_i32_1 = arith.constant 0 : i32
    %c0_i32_2 = arith.constant 0 : i32
    return %c0_i32, %c0_i32_0, %c0_i32_1 : i32, i32, i32
  }
  func.func @transform_4(%arg0: i32) -> (i32, i32) {
    %c0_i32 = arith.constant 0 : i32
    %c0_i32_0 = arith.constant 0 : i32
    %c0_i32_1 = arith.constant 0 : i32
    return %c0_i32, %c0_i32_0 : i32, i32
  }
  func.func @transform_5(%arg0: i32) -> (i32, i32, i32, i32) {
    %c0_i32 = arith.constant 0 : i32
    %c0_i32_0 = arith.constant 0 : i32
    %c0_i32_1 = arith.constant 0 : i32
    %c0_i32_2 = arith.constant 0 : i32
    return %arg0, %c0_i32, %c0_i32_0, %c0_i32_1 : i32, i32, i32, i32
  }
}

</mosaic_0001>

<bundles_post_ra>
// kernel: model_forward.3
= control target key start
LH: loop header
LB: loop body
LE: loop exit
PB: predicated region body
PF: predicated region fallthrough
CT: control target
= control target key end

     0   :  { %s2695_s12 = smov 0   ;;  %s2997_s0 = inlined_call_operand.vmem [shape: bf16[2,9,9,16], index: 0, kind: input, shape index: {}]   ;;  %s2998_s1 = inlined_call_operand.vmem [shape: bf16[4,16,128], index: 1, kind: input, shape index: {}]   ;;  %s2999_s2 = inlined_call_operand.vmem [shape: f32[1,128], index: 2, kind: input, shape index: {}]   ;;  %s3000_s3 = inlined_call_operand.vmem [shape: bf16[2,8,8,128], index: 3, kind: output, shape index: {}]  }
   0x1 LB: > { %s2165_s13 = sadd.s32 4294967295, %s2671_s12   ;;  %p2169_p0 = scmp.ge.s32.totalorder %s2671_s12, 1  ;;  %s2671_s12 = sphi %s2695_s12, %s13_s12  }
   0x2   : > { %p137_p1 = scmp.lt.s32.totalorder %s2671_s12, 3 }
   0x4   : > { %p138_p2 = pnand %p2169_p0, %p137_p1 }
   0x5   : > { %v2617_v0 = vld [vmem:[%s2998_s1 + $0x8] sm:$0xff] (!%p138_p2)   ;;  %v2673_v1 = vmov (!%p138_p2), 0.0   ;;  %v2618_v2 = vld [vmem:[%s2998_s1] sm:$0xff] (!%p138_p2)   ;;  %vm2674_vm0 = vmmov (!%p138_p2), 0   ;;  %p161_p3 = scmp.lt.s32.totalorder (!%p138_p2), %s2165_s13, 1  ;;  %vm198_vm1 = vcmask (!%p138_p2), 130048  }
   0x6   : > { %141 = sbr.rel (%p138_p2) target bundleno = 369 (0x171), region = 32  ;;  %2414 = vmatprep.subr.bf16.mxu0 (!%p138_p2), %v2673_v1  ;;  %2420 = vmatprep.subr.bf16.mxu1 (!%p138_p2), %v2673_v1  ;;  %v2621_v3 = vld [vmem:[%s2998_s1 + $0x18] sm:$0xff] (!%p138_p2)   ;;  %v2620_v14 = vld [vmem:[%s2998_s1 + $0x10] sm:$0xff] (!%p138_p2)   ;;  %v2624_v19 = vld [vmem:[%s2998_s1] sm:$0xff] (!%p138_p2)  }
   0x7   : > { %2415 = vmatpush3.bf16.msra.mxu0 (!%p138_p2), %v2617_v0  ;;  %2422 = vmatprep.mubr.msk.bf16.mxu1 (!%p138_p2), %vm2674_vm0, %v2673_v1  ;;  %v2623_v22 = vld [vmem:[%s2998_s1 + $0x8] sm:$0xff] (!%p138_p2)   ;;  %v2627_v26 = vld [vmem:[%s2998_s1 + $0x18] sm:$0xff] (!%p138_p2)   ;;  %v2626_v35 = vld [vmem:[%s2998_s1 + $0x10] sm:$0xff] (!%p138_p2)  }
   0x8   : > { %2421 = vmatpush3.bf16.msra.mxu1 (!%p138_p2), %v2618_v2  ;;  %2416 = vmatprep.mubr.msk.bf16.mxu0 (!%p138_p2), %vm2674_vm0, %v2673_v1  ;;  %v2630_v36 = vld [vmem:[%s2998_s1] sm:$0xff] (!%p138_p2)   ;;  %v2629_v42 = vld [vmem:[%s2998_s1 + $0x8] sm:$0xff] (!%p138_p2)   ;;  %v2633_v43 = vld [vmem:[%s2998_s1 + $0x18] sm:$0xff] (!%p138_p2)  }
   0x9   : > { %2426 = vmatprep.subr.bf16.mxu0 (!%p138_p2), %v2673_v1  ;;  %2432 = vmatprep.subr.bf16.mxu1 (!%p138_p2), %v2673_v1  ;;  %v2632_v49 = vld [vmem:[%s2998_s1 + $0x10] sm:$0xff] (!%p138_p2)   ;;  %v2636_v53 = vld [vmem:[%s2998_s1] sm:$0xff] (!%p138_p2)   ;;  %v2635_v59 = vld [vmem:[%s2998_s1 + $0x8] sm:$0xff] (!%p138_p2)  }
   0xa   : > { %v2639_v60 = vld [vmem:[%s2998_s1 + $0x18] sm:$0xff] (!%p138_p2)  }
   0xd   : > { %s3002_s13 = smov (!%p161_p3, %s2165_s13), 1 }
   0xe   : > { %s2606_s18 = smul.u32 72, %s3002_s13  ;;  %s2349_s8 = sshll.u32 %s3002_s13, 5 }
   0xf   : > { %s2977_s11 = scalar_lea.vmem %s3000_s3, %s2349_s8 }
  0x10   : > { %s2726_s23 = scalar_lea.vmem %s2997_s0, %s2606_s18 }
  0x11   : > { %v173_v4 = vld [vmem:[%s2726_s23] sm:$0xf]  ;;  %v176_v5 = vld [vmem:[%s2726_s23 + $0x4] sm:$0x1]  ;;  %v2622_v7 = vld [vmem:[%s2726_s23 + $0x8] sm:$0x1f]  }
  0x12   : > { %v2175_v6 = vcombine.low %v173_v4, %v176_v5  ;;  %2423 = vmatmul.mubr.msk.bf16.vlgmr.msra.gmra.mrb[0].mxu1 %vm198_vm1, %v173_v4  ;;  %v357_v10 = vshrl.u32 %v2622_v7, 16  ;;  %v359_v11 = vshll.u32 %v2622_v7, 16  ;;  %v2193_v15 = vld [vmem:[%s2726_s23 + $0x8] sm:$0xf]  ;;  %v2194_v16 = vld [vmem:[%s2726_s23 + $0xc] sm:$0x1] }
  0x13   : > { %2433 = vmatpush3.bf16.msra.mxu1 %v2621_v3  ;;  %2434 = vmatprep.mubr.msk.bf16.mxu1 %vm2674_vm0, %v2673_v1  ;;  %v2197_v20 = vcombine.low %v2193_v15, %v2194_v16  ;;  %v2628_v21 = vld [vmem:[%s2726_s23 + $0x10] sm:$0x1f]   ;;  %v2180_v25 = vld [vmem:[%s2726_s23 + $0x8] sm:$0xf]  ;;  %v2634_v38 = vld [vmem:[%s2726_s23 + $0x18] sm:$0x1f]  }
  0x14   : > { %v186_v8 = vshrl.u32 %v2175_v6, 16  ;;  %v188_v9 = vshll.u32 %v2175_v6, 16  ;;  %2444 = vmatprep.subr.bf16.mxu1 %v2673_v1  ;;  %v361_v13 = vrot.slane %v359_v11, 1  ;;  %v605_v24 = vshll.u32 %v2628_v21, 16  ;;  %v2215_v31 = vld [vmem:[%s2726_s23 + $0x10] sm:$0xf] }
  0x15   : > { %v437_v23 = vshll.u32 %v2197_v20, 16  ;;  %v435_v27 = vshrl.u32 %v2197_v20, 16  ;;  %v603_v29 = vshrl.u32 %v2628_v21, 16  ;;  %v2216_v34 = vld [vmem:[%s2726_s23 + $0x14] sm:$0x1]  ;;  %v846_v40 = vshll.u32 %v2634_v38, 16 }
  0x16   : > { %v190_v12 = vrot.slane %v188_v9, 1  ;;  %v362_v18 = vor.u32 %v361_v13, %v357_v10  ;;  %v607_v30 = vrot.slane %v605_v24, 1  ;;  %v2219_v37 = vcombine.low %v2215_v31, %v2216_v34  ;;  %v2202_v41 = vld [vmem:[%s2726_s23 + $0x10] sm:$0xf]  ;;  %v2237_v51 = vld [vmem:[%s2726_s23 + $0x18] sm:$0xf] }
  0x17   : > { %v439_v28 = vrot.slane %v437_v23, 1  ;;  %v844_v46 = vshrl.u32 %v2634_v38, 16  ;;  %v848_v47 = vrot.slane %v846_v40, 1  ;;  %v2238_v52 = vld [vmem:[%s2726_s23 + $0x1c] sm:$0x1]  ;;  %v2638_v4 = vld [vmem:[%s2998_s1 + $0x10] sm:$0xff]  }
  0x18   : > { %v191_v17 = vor.u32 %v190_v12, %v186_v8  ;;  %v608_v33 = vor.u32 %v607_v30, %v603_v29  ;;  %v678_v39 = vshll.u32 %v2219_v37, 16  ;;  %v676_v44 = vshrl.u32 %v2219_v37, 16  ;;  %v2640_v55 = vld [vmem:[%s2726_s23 + $0x20] sm:$0x1f]   ;;  %v2224_v58 = vld [vmem:[%s2726_s23 + $0x18] sm:$0xf] }
  0x19   : > { %v440_v32 = vor.u32 %v439_v28, %v435_v27  ;;  %v849_v50 = vor.u32 %v848_v47, %v844_v46  ;;  %v2241_v54 = vcombine.low %v2237_v51, %v2238_v52  ;;  %v1087_v57 = vshll.u32 %v2640_v55, 16  ;;  %v2259_v5 = vld [vmem:[%s2726_s23 + $0x20] sm:$0xf]  ;;  %v2260_v6 = vld [vmem:[%s2726_s23 + $0x24] sm:$0x1]  ;;  %v2641_v13 = vld [vmem:[%s2998_s1 + $0x8] sm:$0xff]  }
  0x1a   : > { %2417 = vmatmul.mubr.msk.bf16.vlgmr.msra.gmra.mrb[0].mxu0 %vm198_vm1, %v191_v17  ;;  %2435 = vmatmul.mubr.msk.bf16.vlgmr.msra.gmra.mrb[4].mxu1 %vm198_vm1, %v362_v18  ;;  %v680_v45 = vrot.slane %v678_v39, 1  ;;  %v1085_v63 = vshrl.u32 %v2640_v55, 16  ;;  %v2642_v7 = vld [vmem:[%s2998_s1] sm:$0xff]   ;;  %v2263_v8 = vcombine.low %v2259_v5, %v2260_v6  ;;  %v2646_v9 = vld [vmem:[%s2726_s23 + $0x28] sm:$0x1f]   ;;  %v2644_v21 = vld [vmem:[%s2998_s1 + $0x10] sm:$0xff]  }
  0x1b   : > { %2427 = vmatpush3.bf16.msra.mxu0 %v2620_v14  ;;  %2428 = vmatprep.mubr.msk.bf16.mxu0 %vm2674_vm0, %v2673_v1  ;;  %v919_v56 = vshll.u32 %v2241_v54, 16  ;;  %v917_v61 = vshrl.u32 %v2241_v54, 16  ;;  %v1089_v0 = vrot.slane %v1087_v57, 1  ;;  %v1328_v11 = vshll.u32 %v2646_v9, 16  ;;  %v2246_v12 = vld [vmem:[%s2726_s23 + $0x20] sm:$0xf] }
  0x1c   : > { %2438 = vmatprep.subr.bf16.mxu0 %v2673_v1  ;;  %2445 = vmatpush3.bf16.msra.mxu1 %v2624_v19  ;;  %v681_v48 = vor.u32 %v680_v45, %v676_v44  ;;  %v1160_v10 = vshll.u32 %v2263_v8, 16  ;;  %v2645_v14 = vld [vmem:[%s2998_s1 + $0x18] sm:$0xff]   ;;  %v1326_v17 = vshrl.u32 %v2646_v9, 16  ;;  %v2282_v23 = vld [vmem:[%s2726_s23 + $0x2c] sm:$0x1]  ;;  %v2648_v24 = vld [vmem:[%s2998_s1] sm:$0xff]  }
  0x1d   : > { %2446 = vmatprep.mubr.msk.bf16.mxu1 %vm2674_vm0, %v2673_v1  ;;  %2456 = vmatprep.subr.bf16.mxu1 %v2673_v1  ;;  %v921_v62 = vrot.slane %v919_v56, 1  ;;  %v1090_v3 = vor.u32 %v1089_v0, %v1085_v63  ;;  %v1330_v18 = vrot.slane %v1328_v11, 1  ;;  %v2268_v29 = vld [vmem:[%s2726_s23 + $0x28] sm:$0xf]  ;;  %v2650_v38 = vld [vmem:[%s2998_s1 + $0x10] sm:$0xff]  }
  0x1e   : > { %v1162_v16 = vrot.slane %v1160_v10, 1  ;;  %v2647_v30 = vld [vmem:[%s2998_s1 + $0x8] sm:$0xff]   ;;  %v2303_v39 = vld [vmem:[%s2726_s23 + $0x30] sm:$0xf]  ;;  %v2304_v40 = vld [vmem:[%s2726_s23 + $0x34] sm:$0x1] }
  0x1f   : > { %v922_v2 = vor.u32 %v921_v62, %v917_v61  ;;  %v1331_v20 = vor.u32 %v1330_v18, %v1326_v17  ;;  %v2290_v46 = vld [vmem:[%s2726_s23 + $0x30] sm:$0xf]  ;;  %v2653_v47 = vld [vmem:[%s2998_s1 + $0x8] sm:$0xff]   ;;  %v2325_v56 = vld [vmem:[%s2726_s23 + $0x38] sm:$0xf] }
  0x20   : > { %v2656_v55 = vld [vmem:[%s2998_s1 + $0x10] sm:$0xff]   ;;  %v2326_v57 = vld [vmem:[%s2726_s23 + $0x3c] sm:$0x1]  ;;  %v2312_v63 = vld [vmem:[%s2726_s23 + $0x38] sm:$0xf] }
  0x21   : > { %v2659_v0 = vld [vmem:[%s2998_s1 + $0x8] sm:$0xff]   ;;  %v2662_v9 = vld [vmem:[%s2998_s1 + $0x10] sm:$0xff]   ;;  %v2334_v10 = vld [vmem:[%s2726_s23 + $0x40] sm:$0xf] }
  0x22   : > { %2429 = vmatmul.mubr.msk.bf16.vlgmr.msra.gmra.mrb[4].mxu0 %vm198_vm1, %v2180_v25  ;;  %2447 = vmatmul.mubr.msk.bf16.vlgmr.msra.gmra.mrb[8].mxu1 %vm198_vm1, %v2193_v15  ;;  %v1158_v15 = vshrl.u32 %v2263_v8, 16 }
  0x23   : > { %2439 = vmatpush3.bf16.msra.mxu0 %v2623_v22  ;;  %2440 = vmatprep.mubr.msk.bf16.mxu0 %vm2674_vm0, %v2673_v1  ;;  %v2281_v22 = vld [vmem:[%s2726_s23 + $0x28] sm:$0xf] }
  0x24   : > { %2450 = vmatprep.subr.bf16.mxu0 %v2673_v1  ;;  %2457 = vmatpush3.bf16.msra.mxu1 %v2627_v26  ;;  %v1163_v19 = vor.u32 %v1162_v16, %v1158_v15  ;;  %v2285_v25 = vcombine.low %v2281_v22, %v2282_v23  ;;  %v2652_v26 = vld [vmem:[%s2726_s23 + $0x30] sm:$0x1f]  }
  0x25   : > { %2458 = vmatprep.mubr.msk.bf16.mxu1 %vm2674_vm0, %v2673_v1  ;;  %2468 = vmatprep.subr.bf16.mxu1 %v2673_v1  ;;  %v1569_v28 = vshll.u32 %v2652_v26, 16  ;;  %v1567_v34 = vshrl.u32 %v2652_v26, 16 }
  0x26   : > { %v1401_v27 = vshll.u32 %v2285_v25, 16 }
  0x2a   : > { %2441 = vmatmul.mubr.msk.bf16.vlgmr.msra.gmra.mrb[8].mxu0 %vm198_vm1, %v440_v32  ;;  %2459 = vmatmul.mubr.msk.bf16.vlgmr.msra.gmra.mrb[12].mxu1 %vm198_vm1, %v608_v33  ;;  %v1399_v32 = vshrl.u32 %v2285_v25, 16  ;;  %v1403_v33 = vrot.slane %v1401_v27, 1 }
  0x2b   : > { %2451 = vmatpush3.bf16.msra.mxu0 %v2626_v35  ;;  %2452 = vmatprep.mubr.msk.bf16.mxu0 %vm2674_vm0, %v2673_v1  ;;  %v1571_v35 = vrot.slane %v1569_v28, 1  ;;  %v2970_v28 = vld [vmem:[%s2999_s2] ss:$0 sm:$0xff] }
  0x2c   : > { %2462 = vmatprep.subr.bf16.mxu0 %v2673_v1  ;;  %2469 = vmatpush3.bf16.msra.mxu1 %v2630_v36  ;;  %v1404_v36 = vor.u32 %v1403_v33, %v1399_v32 }
  0x2d   : > { %2470 = vmatprep.mubr.msk.bf16.mxu1 %vm2674_vm0, %v2673_v1  ;;  %2480 = vmatprep.subr.bf16.mxu1 %v2673_v1  ;;  %v1572_v37 = vor.u32 %v1571_v35, %v1567_v34 }
  0x32   : > { %2453 = vmatmul.mubr.msk.bf16.vlgmr.msra.gmra.mrb[12].mxu0 %vm198_vm1, %v2202_v41  ;;  %2471 = vmatmul.mubr.msk.bf16.vlgmr.msra.gmra.mrb[16].mxu1 %vm198_vm1, %v2215_v31  ;;  %v2651_v31 = vld [vmem:[%s2998_s1 + $0x18] sm:$0xff]   ;;  %v2654_v41 = vld [vmem:[%s2998_s1] sm:$0xff]  }
  0x33   : > { %2463 = vmatpush3.bf16.msra.mxu0 %v2629_v42  ;;  %2464 = vmatprep.mubr.msk.bf16.mxu0 %vm2674_vm0, %v2673_v1  ;;  %v2307_v42 = vcombine.low %v2303_v39, %v2304_v40 }
  0x34   : > { %2474 = vmatprep.subr.bf16.mxu0 %v2673_v1  ;;  %2481 = vmatpush3.bf16.msra.mxu1 %v2633_v43  ;;  %v2658_v43 = vld [vmem:[%s2726_s23 + $0x38] sm:$0x1f]  }
  0x35   : > { %2482 = vmatprep.mubr.msk.bf16.mxu1 %vm2674_vm0, %v2673_v1  ;;  %2492 = vmatprep.subr.bf16.mxu1 %v2673_v1  ;;  %v1642_v44 = vshll.u32 %v2307_v42, 16  ;;  %v1810_v45 = vshll.u32 %v2658_v43, 16 }
  0x37   : > { %v1812_v52 = vrot.slane %v1810_v45, 1 }
  0x3a   : > { %2465 = vmatmul.mubr.msk.bf16.vlgmr.msra.gmra.mrb[16].mxu0 %vm198_vm1, %v681_v48  ;;  %2483 = vmatmul.mubr.msk.bf16.vlgmr.msra.gmra.mrb[20].mxu1 %vm198_vm1, %v849_v50  ;;  %v2657_v48 = vld [vmem:[%s2998_s1 + $0x18] sm:$0xff]   ;;  %v1644_v50 = vrot.slane %v1642_v44, 1 }
  0x3b   : > { %2475 = vmatpush3.bf16.msra.mxu0 %v2632_v49  ;;  %2476 = vmatprep.mubr.msk.bf16.mxu0 %vm2674_vm0, %v2673_v1  ;;  %v1640_v49 = vshrl.u32 %v2307_v42, 16 }
  0x3c   : > { %2486 = vmatprep.subr.bf16.mxu0 %v2673_v1  ;;  %2493 = vmatpush3.bf16.msra.mxu1 %v2636_v53 }
  0x3d   : > { %2494 = vmatprep.mubr.msk.bf16.mxu1 %vm2674_vm0, %v2673_v1  ;;  %2504 = vmatprep.subr.bf16.mxu1 %v2673_v1  ;;  %v1645_v53 = vor.u32 %v1644_v50, %v1640_v49 }
  0x42   : > { %2477 = vmatmul.mubr.msk.bf16.vlgmr.msra.gmra.mrb[20].mxu0 %vm198_vm1, %v2224_v58  ;;  %2495 = vmatmul.mubr.msk.bf16.vlgmr.msra.gmra.mrb[24].mxu1 %vm198_vm1, %v2237_v51  ;;  %v1808_v51 = vshrl.u32 %v2658_v43, 16  ;;  %v2660_v58 = vld [vmem:[%s2998_s1] sm:$0xff]  }
  0x43   : > { %2487 = vmatpush3.bf16.msra.mxu0 %v2635_v59  ;;  %2488 = vmatprep.mubr.msk.bf16.mxu0 %vm2674_vm0, %v2673_v1  ;;  %v2329_v59 = vcombine.low %v2325_v56, %v2326_v57 }
  0x44   : > { %2498 = vmatprep.subr.bf16.mxu0 %v2673_v1  ;;  %2505 = vmatpush3.bf16.msra.mxu1 %v2639_v60  ;;  %v1813_v54 = vor.u32 %v1812_v52, %v1808_v51  ;;  %v2664_v60 = vld [vmem:[%s2726_s23 + $0x40] sm:$0x1f]  }
  0x45   : > { %2506 = vmatprep.mubr.msk.bf16.mxu1 %vm2674_vm0, %v2673_v1  ;;  %2516 = vmatprep.subr.bf16.mxu1 %v2673_v1  ;;  %v1883_v61 = vshll.u32 %v2329_v59, 16  ;;  %v2051_v62 = vshll.u32 %v2664_v60, 16 }
  0x47   : > { %v2053_v6 = vrot.slane %v2051_v62, 1 }
  0x4a   : > { %2489 = vmatmul.mubr.msk.bf16.vlgmr.msra.gmra.mrb[24].mxu0 %vm198_vm1, %v922_v2  ;;  %2507 = vmatmul.mubr.msk.bf16.vlgmr.msra.gmra.mrb[28].mxu1 %vm198_vm1, %v1090_v3  ;;  %v2663_v2 = vld [vmem:[%s2998_s1 + $0x18] sm:$0xff]   ;;  %v1881_v3 = vshrl.u32 %v2329_v59, 16 }
  0x4b   : > { %2499 = vmatpush3.bf16.msra.mxu0 %v2638_v4  ;;  %2500 = vmatprep.mubr.msk.bf16.mxu0 %vm2674_vm0, %v2673_v1  ;;  %v1885_v4 = vrot.slane %v1883_v61, 1 }
  0x4c   : > { %2510 = vmatprep.subr.bf16.mxu0 %v2673_v1  ;;  %2517 = vmatpush3.bf16.msra.mxu1 %v2642_v7 }
  0x4d   : > { %2518 = vmatprep.mubr.msk.bf16.mxu1 %vm2674_vm0, %v2673_v1  ;;  %2528 = vmatprep.subr.bf16.mxu1 %v2673_v1  ;;  %v1886_v7 = vor.u32 %v1885_v4, %v1881_v3 }
  0x52   : > { %2501 = vmatmul.mubr.msk.bf16.vlgmr.msra.gmra.mrb[28].mxu0 %vm198_vm1, %v2246_v12  ;;  %2519 = vmatmul.mubr.msk.bf16.vlgmr.msra.gmra.mrb[32].mxu1 %vm198_vm1, %v2259_v5  ;;  %v2049_v5 = vshrl.u32 %v2664_v60, 16 }
  0x53   : > { %2511 = vmatpush3.bf16.msra.mxu0 %v2641_v13  ;;  %2512 = vmatprep.mubr.msk.bf16.mxu0 %vm2674_vm0, %v2673_v1 }
  0x54   : > { %2522 = vmatprep.subr.bf16.mxu0 %v2673_v1  ;;  %2529 = vmatpush3.bf16.msra.mxu1 %v2645_v14  ;;  %v2054_v8 = vor.u32 %v2053_v6, %v2049_v5 }
  0x55   : > { %2530 = vmatprep.mubr.msk.bf16.mxu1 %vm2674_vm0, %v2673_v1  ;;  %2540 = vmatprep.subr.bf16.mxu1 %v2673_v1 }
  0x5a   : > { %2513 = vmatmul.mubr.msk.bf16.vlgmr.msra.gmra.mrb[32].mxu0 %vm198_vm1, %v1163_v19  ;;  %2531 = vmatmul.mubr.msk.bf16.vlgmr.msra.gmra.mrb[36].mxu1 %vm198_vm1, %v1331_v20 }
  0x5b   : > { %2523 = vmatpush3.bf16.msra.mxu0 %v2644_v21  ;;  %2524 = vmatprep.mubr.msk.bf16.mxu0 %vm2674_vm0, %v2673_v1 }
  0x5c   : > { %2534 = vmatprep.subr.bf16.mxu0 %v2673_v1  ;;  %2541 = vmatpush3.bf16.msra.mxu1 %v2648_v24 }
  0x5d   : > { %2542 = vmatprep.mubr.msk.bf16.mxu1 %vm2674_vm0, %v2673_v1  ;;  %2552 = vmatprep.subr.bf16.mxu1 %v2673_v1 }
  0x62   : > { %2525 = vmatmul.mubr.msk.bf16.vlgmr.msra.gmra.mrb[36].mxu0 %vm198_vm1, %v2268_v29  ;;  %2543 = vmatmul.mubr.msk.bf16.vlgmr.msra.gmra.mrb[40].mxu1 %vm198_vm1, %v2281_v22 }
  0x63   : > { %2535 = vmatpush3.bf16.msra.mxu0 %v2647_v30  ;;  %2536 = vmatprep.mubr.msk.bf16.mxu0 %vm2674_vm0, %v2673_v1 }
  0x64   : > { %2546 = vmatprep.subr.bf16.mxu0 %v2673_v1  ;;  %2553 = vmatpush3.bf16.msra.mxu1 %v2651_v31 }
  0x65   : > { %2554 = vmatprep.mubr.msk.bf16.mxu1 %vm2674_vm0, %v2673_v1  ;;  %2564 = vmatprep.subr.bf16.mxu1 %v2673_v1 }
  0x6a   : > { %2537 = vmatmul.mubr.msk.bf16.vlgmr.msra.gmra.mrb[40].mxu0 %vm198_vm1, %v1404_v36  ;;  %2555 = vmatmul.mubr.msk.bf16.vlgmr.msra.gmra.mrb[44].mxu1 %vm198_vm1, %v1572_v37 }
  0x6b   : > { %2547 = vmatpush3.bf16.msra.mxu0 %v2650_v38  ;;  %2548 = vmatprep.mubr.msk.bf16.mxu0 %vm2674_vm0, %v2673_v1 }
  0x6c   : > { %2558 = vmatprep.subr.bf16.mxu0 %v2673_v1  ;;  %2565 = vmatpush3.bf16.msra.mxu1 %v2654_v41 }
  0x6d   : > { %2566 = vmatprep.mubr.msk.bf16.mxu1 %vm2674_vm0, %v2673_v1  ;;  %2576 = vmatprep.subr.bf16.mxu1 %v2673_v1 }
  0x72   : > { %2549 = vmatmul.mubr.msk.bf16.vlgmr.msra.gmra.mrb[44].mxu0 %vm198_vm1, %v2290_v46  ;;  %2567 = vmatmul.mubr.msk.bf16.vlgmr.msra.gmra.mrb[48].mxu1 %vm198_vm1, %v2303_v39 }
  0x73   : > { %2559 = vmatpush3.bf16.msra.mxu0 %v2653_v47  ;;  %2560 = vmatprep.mubr.msk.bf16.mxu0 %vm2674_vm0, %v2673_v1 }
  0x74   : > { %2570 = vmatprep.subr.bf16.mxu0 %v2673_v1  ;;  %2577 = vmatpush3.bf16.msra.mxu1 %v2657_v48 }
  0x75   : > { %2578 = vmatprep.mubr.msk.bf16.mxu1 %vm2674_vm0, %v2673_v1  ;;  %2588 = vmatprep.subr.bf16.mxu1 %v2673_v1 }
  0x7a   : > { %2561 = vmatmul.mubr.msk.bf16.vlgmr.msra.gmra.mrb[48].mxu0 %vm198_vm1, %v1645_v53  ;;  %2579 = vmatmul.mubr.msk.bf16.vlgmr.msra.gmra.mrb[52].mxu1 %vm198_vm1, %v1813_v54 }
  0x7b   : > { %2571 = vmatpush3.bf16.msra.mxu0 %v2656_v55  ;;  %2572 = vmatprep.mubr.msk.bf16.mxu0 %vm2674_vm0, %v2673_v1 }
  0x7c   : > { %2582 = vmatprep.subr.bf16.mxu0 %v2673_v1  ;;  %2589 = vmatpush3.bf16.msra.mxu1 %v2660_v58 }
  0x7d   : > { %2590 = vmatprep.mubr.msk.bf16.mxu1 %vm2674_vm0, %v2673_v1  ;;  %2600 = vmatprep.subr.bf16.mxu1 %v2673_v1 }
  0x82   : > { %2573 = vmatmul.mubr.msk.bf16.vlgmr.msra.gmra.mrb[52].mxu0 %vm198_vm1, %v2312_v63  ;;  %2591 = vmatmul.mubr.msk.bf16.vlgmr.msra.gmra.mrb[56].mxu1 %vm198_vm1, %v2325_v56 }
  0x83   : > { %2583 = vmatpush3.bf16.msra.mxu0 %v2659_v0  ;;  %2584 = vmatprep.mubr.msk.bf16.mxu0 %vm2674_vm0, %v2673_v1 }
  0x84   : > { %2594 = vmatprep.subr.bf16.mxu0 %v2673_v1  ;;  %2601 = vmatpush3.bf16.msra.mxu1 %v2663_v2 }
  0x85   : > { %2602 = vmatprep.mubr.msk.bf16.mxu1 %vm2674_vm0, %v2673_v1 }
  0x8a   : > { %2585 = vmatmul.mubr.msk.bf16.vlgmr.msra.gmra.mrb[56].mxu0 %vm198_vm1, %v1886_v7  ;;  %2603 = vmatmul.mubr.msk.bf16.vlgmr.msra.gmra.mrb[60].mxu1 %vm198_vm1, %v2054_v8 }
  0x8b   : > { %2595 = vmatpush3.bf16.msra.mxu0 %v2662_v9  ;;  %2596 = vmatprep.mubr.msk.bf16.mxu0 %vm2674_vm0, %v2673_v1 }
  0x92   : > { %2597 = vmatmul.mubr.msk.bf16.vlgmr.msra.gmra.mrb[60].mxu0 %vm198_vm1, %v2334_v10 }
  0xe5   : > { %v285_v11 = vpop.f32.mrb[0].mxu1 }
  0xe6   : > { %v2424_v12 = vpop.f32.mrb[1].mxu1 }
  0xe7   : > { %v288_v13 = vpop.f32.mrb[2].mxu1 }
  0xe8   : > { %v2425_v14 = vpop.f32.mrb[3].mxu1 }
  0xed   : > { %v236_v15 = vpop.f32.mrb[0].mxu0  ;;  %v406_v16 = vpop.f32.mrb[4].mxu1 }
  0xee   : > { %v286_v17 = vadd.f32 %v285_v11, %v236_v15  ;;  %v2418_v18 = vpop.f32.mrb[1].mxu0  ;;  %v2436_v19 = vpop.f32.mrb[5].mxu1 }
  0xef   : > { %v239_v20 = vpop.f32.mrb[2].mxu0  ;;  %v409_v21 = vpop.f32.mrb[6].mxu1 }
  0xf0   : > { %v2419_v22 = vpop.f32.mrb[3].mxu0  ;;  %v2437_v23 = vpop.f32.mrb[7].mxu1 }
  0xf5   : > { %v339_v24 = vpop.f32.mrb[4].mxu0  ;;  %v533_v25 = vpop.f32.mrb[8].mxu1 }
  0xf6   : > { %v345_v1 = vadd.f32 %v339_v24, %v286_v17  ;;  %v2430_v26 = vpop.f32.mrb[5].mxu0  ;;  %v2448_v27 = vpop.f32.mrb[9].mxu1 }
  0xf7   : > { %v342_v29 = vpop.f32.mrb[6].mxu0  ;;  %v536_v30 = vpop.f32.mrb[10].mxu1 }
  0xf8   : > { %v412_v31 = vadd.f32 %v406_v16, %v345_v1  ;;  %v2431_v32 = vpop.f32.mrb[7].mxu0  ;;  %v2449_v33 = vpop.f32.mrb[11].mxu1 }
  0xfa   : > { %v419_v34 = vadd.f32 %v2970_v28, %v412_v31 }
  0xfc   : > { %v420_v35 = vmax.f32 %v419_v34, 0.0 }
  0xfd   : > { %v484_v36 = vpop.f32.mrb[8].mxu0  ;;  %v652_v37 = vpop.f32.mrb[12].mxu1 }
  0xfe   : > { %v421_v38 = vpack.c.bf16 %v420_v35, %v420_v35  ;;  %v534_v39 = vadd.f32 %v533_v25, %v484_v36  ;;  %v2442_v40 = vpop.f32.mrb[9].mxu0  ;;  %v2460_v41 = vpop.f32.mrb[13].mxu1 }
  0xff   : > { %v487_v42 = vpop.f32.mrb[10].mxu0  ;;  %v655_v43 = vpop.f32.mrb[14].mxu1 }
 0x100   : > { %422 = vst [vmem:[%s2977_s11] sm:$0xf] %v421_v38  ;;  %v2443_v44 = vpop.f32.mrb[11].mxu0  ;;  %v2461_v45 = vpop.f32.mrb[15].mxu1 }
 0x105   : > { %v586_v46 = vpop.f32.mrb[12].mxu0  ;;  %v774_v47 = vpop.f32.mrb[16].mxu1 }
 0x106   : > { %v592_v48 = vadd.f32 %v586_v46, %v534_v39  ;;  %v2454_v49 = vpop.f32.mrb[13].mxu0  ;;  %v2472_v50 = vpop.f32.mrb[17].mxu1 }
 0x107   : > { %v589_v51 = vpop.f32.mrb[14].mxu0  ;;  %v777_v52 = vpop.f32.mrb[18].mxu1 }
 0x108   : > { %v658_v53 = vadd.f32 %v652_v37, %v592_v48  ;;  %v2455_v54 = vpop.f32.mrb[15].mxu0  ;;  %v2473_v55 = vpop.f32.mrb[19].mxu1 }
 0x10a   : > { %v659_v56 = vadd.f32 %v2970_v28, %v658_v53 }
 0x10c   : > { %v660_v57 = vmax.f32 %v659_v56, 0.0 }
 0x10d   : > { %v725_v58 = vpop.f32.mrb[16].mxu0  ;;  %v893_v59 = vpop.f32.mrb[20].mxu1 }
 0x10e   : > { %v661_v60 = vpack.c.bf16 %v660_v57, %v660_v57  ;;  %v775_v61 = vadd.f32 %v774_v47, %v725_v58  ;;  %v2466_v62 = vpop.f32.mrb[17].mxu0  ;;  %v2484_v63 = vpop.f32.mrb[21].mxu1 }
 0x10f   : > { %v728_v0 = vpop.f32.mrb[18].mxu0  ;;  %v896_v2 = vpop.f32.mrb[22].mxu1 }
 0x110   : > { %2214 = vst [vmem:[%s2977_s11 + $0x4] sm:$0xf] %v661_v60  ;;  %v2467_v3 = vpop.f32.mrb[19].mxu0  ;;  %v2485_v4 = vpop.f32.mrb[23].mxu1 }
 0x115   : > { %v827_v5 = vpop.f32.mrb[20].mxu0  ;;  %v1015_v6 = vpop.f32.mrb[24].mxu1 }
 0x116   : > { %v833_v7 = vadd.f32 %v827_v5, %v775_v61  ;;  %v2478_v8 = vpop.f32.mrb[21].mxu0  ;;  %v2496_v9 = vpop.f32.mrb[25].mxu1 }
 0x117   : > { %v830_v10 = vpop.f32.mrb[22].mxu0  ;;  %v1018_v11 = vpop.f32.mrb[26].mxu1 }
 0x118   : > { %v899_v12 = vadd.f32 %v893_v59, %v833_v7  ;;  %v2479_v13 = vpop.f32.mrb[23].mxu0  ;;  %v2497_v14 = vpop.f32.mrb[27].mxu1 }
 0x11a   : > { %v900_v15 = vadd.f32 %v2970_v28, %v899_v12 }
 0x11c   : > { %v901_v16 = vmax.f32 %v900_v15, 0.0 }
 0x11d   : > { %v966_v17 = vpop.f32.mrb[24].mxu0  ;;  %v1134_v18 = vpop.f32.mrb[28].mxu1 }
 0x11e   : > { %v902_v19 = vpack.c.bf16 %v901_v16, %v901_v16  ;;  %v1016_v20 = vadd.f32 %v1015_v6, %v966_v17  ;;  %v2490_v21 = vpop.f32.mrb[25].mxu0  ;;  %v2508_v22 = vpop.f32.mrb[29].mxu1 }
 0x11f   : > { %v969_v23 = vpop.f32.mrb[26].mxu0  ;;  %v1137_v24 = vpop.f32.mrb[30].mxu1 }
 0x120   : > { %2236 = vst [vmem:[%s2977_s11 + $0x8] sm:$0xf] %v902_v19  ;;  %v2491_v25 = vpop.f32.mrb[27].mxu0  ;;  %v2509_v1 = vpop.f32.mrb[31].mxu1 }
 0x125   : > { %v1068_v26 = vpop.f32.mrb[28].mxu0  ;;  %v1256_v27 = vpop.f32.mrb[32].mxu1 }
 0x126   : > { %v1074_v29 = vadd.f32 %v1068_v26, %v1016_v20  ;;  %v2502_v30 = vpop.f32.mrb[29].mxu0  ;;  %v2520_v31 = vpop.f32.mrb[33].mxu1 }
 0x127   : > { %v1071_v32 = vpop.f32.mrb[30].mxu0  ;;  %v1259_v33 = vpop.f32.mrb[34].mxu1 }
 0x128   : > { %v1140_v34 = vadd.f32 %v1134_v18, %v1074_v29  ;;  %v2503_v35 = vpop.f32.mrb[31].mxu0  ;;  %v2521_v36 = vpop.f32.mrb[35].mxu1 }
 0x12a   : > { %v1141_v37 = vadd.f32 %v2970_v28, %v1140_v34 }
 0x12c   : > { %v1142_v38 = vmax.f32 %v1141_v37, 0.0 }
 0x12d   : > { %v1207_v39 = vpop.f32.mrb[32].mxu0  ;;  %v1375_v40 = vpop.f32.mrb[36].mxu1 }
 0x12e   : > { %v1143_v41 = vpack.c.bf16 %v1142_v38, %v1142_v38  ;;  %v1257_v42 = vadd.f32 %v1256_v27, %v1207_v39  ;;  %v2514_v43 = vpop.f32.mrb[33].mxu0  ;;  %v2532_v44 = vpop.f32.mrb[37].mxu1 }
 0x12f   : > { %v1210_v45 = vpop.f32.mrb[34].mxu0  ;;  %v1378_v46 = vpop.f32.mrb[38].mxu1 }
 0x130   : > { %2258 = vst [vmem:[%s2977_s11 + $0xc] sm:$0xf] %v1143_v41  ;;  %v2515_v47 = vpop.f32.mrb[35].mxu0  ;;  %v2533_v48 = vpop.f32.mrb[39].mxu1 }
 0x135   : > { %v1309_v49 = vpop.f32.mrb[36].mxu0  ;;  %v1497_v50 = vpop.f32.mrb[40].mxu1 }
 0x136   : > { %v1315_v51 = vadd.f32 %v1309_v49, %v1257_v42  ;;  %v2526_v52 = vpop.f32.mrb[37].mxu0  ;;  %v2544_v53 = vpop.f32.mrb[41].mxu1 }
 0x137   : > { %v1312_v54 = vpop.f32.mrb[38].mxu0  ;;  %v1500_v55 = vpop.f32.mrb[42].mxu1 }
 0x138   : > { %v1381_v56 = vadd.f32 %v1375_v40, %v1315_v51  ;;  %v2527_v57 = vpop.f32.mrb[39].mxu0  ;;  %v2545_v58 = vpop.f32.mrb[43].mxu1 }
 0x13a   : > { %v1382_v59 = vadd.f32 %v2970_v28, %v1381_v56 }
 0x13c   : > { %v1383_v60 = vmax.f32 %v1382_v59, 0.0 }
 0x13d   : > { %v1448_v61 = vpop.f32.mrb[40].mxu0  ;;  %v1616_v62 = vpop.f32.mrb[44].mxu1 }
 0x13e   : > { %v1384_v63 = vpack.c.bf16 %v1383_v60, %v1383_v60  ;;  %v1498_v0 = vadd.f32 %v1497_v50, %v1448_v61  ;;  %v2538_v2 = vpop.f32.mrb[41].mxu0  ;;  %v2556_v3 = vpop.f32.mrb[45].mxu1 }
 0x13f   : > { %v1451_v4 = vpop.f32.mrb[42].mxu0  ;;  %v1619_v5 = vpop.f32.mrb[46].mxu1 }
 0x140   : > { %2280 = vst [vmem:[%s2977_s11 + $0x10] sm:$0xf] %v1384_v63  ;;  %v2539_v6 = vpop.f32.mrb[43].mxu0  ;;  %v2557_v7 = vpop.f32.mrb[47].mxu1 }
 0x145   : > { %v1550_v8 = vpop.f32.mrb[44].mxu0  ;;  %v1738_v9 = vpop.f32.mrb[48].mxu1 }
 0x146   : > { %v1556_v10 = vadd.f32 %v1550_v8, %v1498_v0  ;;  %v2550_v11 = vpop.f32.mrb[45].mxu0  ;;  %v2568_v12 = vpop.f32.mrb[49].mxu1 }
 0x147   : > { %v1553_v13 = vpop.f32.mrb[46].mxu0  ;;  %v1741_v14 = vpop.f32.mrb[50].mxu1 }
 0x148   : > { %v1622_v15 = vadd.f32 %v1616_v62, %v1556_v10  ;;  %v2551_v16 = vpop.f32.mrb[47].mxu0  ;;  %v2569_v17 = vpop.f32.mrb[51].mxu1 }
 0x14a   : > { %v1623_v18 = vadd.f32 %v2970_v28, %v1622_v15 }
 0x14c   : > { %v1624_v19 = vmax.f32 %v1623_v18, 0.0 }
 0x14d   : > { %v1689_v20 = vpop.f32.mrb[48].mxu0  ;;  %v1857_v21 = vpop.f32.mrb[52].mxu1 }
 0x14e   : > { %v1625_v22 = vpack.c.bf16 %v1624_v19, %v1624_v19  ;;  %v1739_v23 = vadd.f32 %v1738_v9, %v1689_v20  ;;  %v2562_v24 = vpop.f32.mrb[49].mxu0  ;;  %v2580_v25 = vpop.f32.mrb[53].mxu1 }
 0x14f   : > { %v1692_v1 = vpop.f32.mrb[50].mxu0  ;;  %v1860_v26 = vpop.f32.mrb[54].mxu1 }
 0x150   : > { %2302 = vst [vmem:[%s2977_s11 + $0x14] sm:$0xf] %v1625_v22  ;;  %v2563_v27 = vpop.f32.mrb[51].mxu0  ;;  %v2581_v29 = vpop.f32.mrb[55].mxu1 }
 0x155   : > { %v1791_v30 = vpop.f32.mrb[52].mxu0  ;;  %v1979_v31 = vpop.f32.mrb[56].mxu1 }
 0x156   : > { %v1797_v32 = vadd.f32 %v1791_v30, %v1739_v23  ;;  %v2574_v33 = vpop.f32.mrb[53].mxu0  ;;  %v2592_v34 = vpop.f32.mrb[57].mxu1 }
 0x157   : > { %v1794_v35 = vpop.f32.mrb[54].mxu0  ;;  %v1982_v36 = vpop.f32.mrb[58].mxu1 }
 0x158   : > { %v1863_v37 = vadd.f32 %v1857_v21, %v1797_v32  ;;  %v2575_v38 = vpop.f32.mrb[55].mxu0  ;;  %v2593_v39 = vpop.f32.mrb[59].mxu1 }
 0x15a   : > { %v1864_v40 = vadd.f32 %v2970_v28, %v1863_v37 }
 0x15c   : > { %v1865_v41 = vmax.f32 %v1864_v40, 0.0 }
 0x15d   : > { %v1930_v42 = vpop.f32.mrb[56].mxu0  ;;  %v2098_v43 = vpop.f32.mrb[60].mxu1 }
 0x15e   : > { %v1866_v44 = vpack.c.bf16 %v1865_v41, %v1865_v41  ;;  %v1980_v45 = vadd.f32 %v1979_v31, %v1930_v42  ;;  %v2586_v46 = vpop.f32.mrb[57].mxu0  ;;  %v2604_v47 = vpop.f32.mrb[61].mxu1 }
 0x15f   : > { %v1933_v48 = vpop.f32.mrb[58].mxu0  ;;  %v2101_v49 = vpop.f32.mrb[62].mxu1 }
 0x160   : > { %2324 = vst [vmem:[%s2977_s11 + $0x18] sm:$0xf] %v1866_v44  ;;  %v2587_v50 = vpop.f32.mrb[59].mxu0  ;;  %v2605_v51 = vpop.f32.mrb[63].mxu1 }
 0x165   : > { %v2032_v52 = vpop.f32.mrb[60].mxu0 }
 0x166   : > { %v2038_v53 = vadd.f32 %v2032_v52, %v1980_v45  ;;  %v2598_v54 = vpop.f32.mrb[61].mxu0 }
 0x167   : > { %v2035_v55 = vpop.f32.mrb[62].mxu0 }
 0x168   : > { %v2104_v56 = vadd.f32 %v2098_v43, %v2038_v53  ;;  %v2599_v57 = vpop.f32.mrb[63].mxu0 }
 0x16a   : > { %v2105_v58 = vadd.f32 %v2970_v28, %v2104_v56 }
 0x16c   : > { %v2106_v59 = vmax.f32 %v2105_v58, 0.0 }
 0x16e   : > { %v2107_v60 = vpack.c.bf16 %v2106_v59, %v2106_v59 }
 0x170   : > { %2346 = vst [vmem:[%s2977_s11 + $0x1c] sm:$0xf] %v2107_v60 }
 0x171 PF: > { %s13_s12 = sadd.s32 1, %s2671_s12  }
 0x172   : > { %p10_p4 = scmp.ge.s32.totalorder %s13_s12, 4  }
 0x174   :  { %12 = sbr.rel (!%p10_p4) target bundleno = 1 (0x1), region = 80 }

// kernel: model_forward.4
= control target key start
LH: loop header
LB: loop body
LE: loop exit
PB: predicated region body
PF: predicated region fallthrough
CT: control target
= control target key end

     0   :  { %s8829_s12 = smov 0   ;;  %s10459_s0 = inlined_call_operand.vmem [shape: bf16[2,5,5,512], index: 0, kind: input, shape index: {}]   ;;  %s10460_s1 = inlined_call_operand.vmem [shape: bf16[4,512,128], index: 1, kind: input, shape index: {}]   ;;  %s10461_s2 = inlined_call_operand.vmem [shape: f32[1,128], index: 2, kind: input, shape index: {}]   ;;  %s10462_s3 = inlined_call_operand.vmem [shape: bf16[2,4,4,128], index: 3, kind: output, shape index: {}]  }
   0x1 LB: > { %s6124_s13 = sadd.s32 4294967295, %s8807_s12   ;;  %p6128_p0 = scmp.ge.s32.totalorder %s8807_s12, 1  ;;  %s8807_s12 = sphi %s8829_s12, %s13_s12  }
   0x2   : > { %p137_p1 = scmp.lt.s32.totalorder %s8807_s12, 3 }
   0x4   : > { %p138_p2 = pnand %p6128_p0, %p137_p1 }
   0x5   : > { %v8224_v0 = vld [vmem:[%s10460_s1 + $0x140] sm:$0xff] (!%p138_p2)   ;;  %v8228_v4 = vld [vmem:[%s10460_s1 + $0x148] sm:$0xff] (!%p138_p2)   ;;  %v8232_v8 = vld [vmem:[%s10460_s1 + $0x150] sm:$0xff] (!%p138_p2)   ;;  %p161_p3 = scmp.lt.s32.totalorder (!%p138_p2), %s6124_s13, 1 }
   0x6   : > { %141 = sbr.rel (%p138_p2) target bundleno = 748 (0x2ec), region = 32  ;;  %v8225_v1 = vld [vmem:[%s10460_s1 + $0x1c0] sm:$0xff] (!%p138_p2)   ;;  %7511 = vmatprep.subr.bf16.mxu0 (!%p138_p2), %v8224_v0  ;;  %v8229_v5 = vld [vmem:[%s10460_s1 + $0x1c8] sm:$0xff] (!%p138_p2)   ;;  %v8233_v9 = vld [vmem:[%s10460_s1 + $0x1d0] sm:$0xff] (!%p138_p2)  }
   0x7   : > { %v8226_v2 = vld [vmem:[%s10460_s1 + $0x100] sm:$0xff] (!%p138_p2)   ;;  %7533 = vmatprep.subr.bf16.mxu1 (!%p138_p2), %v8225_v1  ;;  %v8230_v6 = vld [vmem:[%s10460_s1 + $0x108] sm:$0xff] (!%p138_p2)   ;;  %v8234_v10 = vld [vmem:[%s10460_s1 + $0x110] sm:$0xff] (!%p138_p2)  }
   0x8   : > { %v8227_v3 = vld [vmem:[%s10460_s1 + $0x180] sm:$0xff] (!%p138_p2)   ;;  %7512 = vmatpush3.bf16.msra.mxu0 (!%p138_p2), %v8226_v2  ;;  %v8231_v7 = vld [vmem:[%s10460_s1 + $0x188] sm:$0xff] (!%p138_p2)   ;;  %v8235_v11 = vld [vmem:[%s10460_s1 + $0x190] sm:$0xff] (!%p138_p2)  }
   0x9   : > { %7534 = vmatpush3.bf16.msra.mxu1 (!%p138_p2), %v8227_v3  ;;  %7513 = vmatprep.subr.bf16.mxu0 (!%p138_p2), %v8228_v4  ;;  %v8236_v12 = vld [vmem:[%s10460_s1 + $0x158] sm:$0xff] (!%p138_p2)   ;;  %v8240_v16 = vld [vmem:[%s10460_s1 + $0x160] sm:$0xff] (!%p138_p2)   ;;  %v8244_v20 = vld [vmem:[%s10460_s1 + $0x168] sm:$0xff] (!%p138_p2)  }
   0xa   : > { %7535 = vmatprep.subr.bf16.mxu1 (!%p138_p2), %v8229_v5  ;;  %v8237_v13 = vld [vmem:[%s10460_s1 + $0x1d8] sm:$0xff] (!%p138_p2)   ;;  %v8241_v17 = vld [vmem:[%s10460_s1 + $0x1e0] sm:$0xff] (!%p138_p2)   ;;  %v8245_v21 = vld [vmem:[%s10460_s1 + $0x1e8] sm:$0xff] (!%p138_p2)  }
   0xb   : > { %v8238_v14 = vld [vmem:[%s10460_s1 + $0x118] sm:$0xff] (!%p138_p2)   ;;  %v8242_v18 = vld [vmem:[%s10460_s1 + $0x120] sm:$0xff] (!%p138_p2)   ;;  %v8246_v22 = vld [vmem:[%s10460_s1 + $0x128] sm:$0xff] (!%p138_p2)  }
   0xc   : > { %7514 = vmatpush3.bf16.msra.mxu0 (!%p138_p2), %v8230_v6  ;;  %v8239_v15 = vld [vmem:[%s10460_s1 + $0x198] sm:$0xff] (!%p138_p2)   ;;  %v8243_v19 = vld [vmem:[%s10460_s1 + $0x1a0] sm:$0xff] (!%p138_p2)   ;;  %v8247_v23 = vld [vmem:[%s10460_s1 + $0x1a8] sm:$0xff] (!%p138_p2)  }
   0xd   : > { %7536 = vmatpush3.bf16.msra.mxu1 %v8231_v7  ;;  %7515 = vmatprep.subr.bf16.mxu0 %v8232_v8  ;;  %s10464_s13 = smov (!%p161_p3, %s6124_s13), 1  ;;  %v8248_v24 = vld [vmem:[%s10460_s1 + $0x170] sm:$0xff]   ;;  %v8252_v28 = vld [vmem:[%s10460_s1 + $0x178] sm:$0xff]   ;;  %v8260_v38 = vld [vmem:[%s10460_s1 + $0x40] sm:$0xff]  }
   0xe   : > { %7537 = vmatprep.subr.bf16.mxu1 %v8233_v9  ;;  %v8249_v25 = vld [vmem:[%s10460_s1 + $0x1f0] sm:$0xff]   ;;  %s8215_s16 = smul.u32 80, %s10464_s13  ;;  %v8253_v29 = vld [vmem:[%s10460_s1 + $0x1f8] sm:$0xff]   ;;  %v8261_v39 = vld [vmem:[%s10460_s1 + $0xc0] sm:$0xff]   ;;  %s7510_s11 = sshll.u32 %s10464_s13, 3 }
   0xf   : > { %v8250_v26 = vld [vmem:[%s10460_s1 + $0x130] sm:$0xff]   ;;  %v8254_v30 = vld [vmem:[%s10460_s1 + $0x138] sm:$0xff]   ;;  %v8262_v50 = vld [vmem:[%s10460_s1] sm:$0xff]   ;;  %s9932_s21 = scalar_lea.vmem %s10462_s3, %s7510_s11 }
  0x10   : > { %7516 = vmatpush3.bf16.msra.mxu0 %v8234_v10  ;;  %v8251_v27 = vld [vmem:[%s10460_s1 + $0x1b0] sm:$0xff]   ;;  %s8937_s27 = scalar_lea.vmem %s10459_s0, %s8215_s16  ;;  %v8255_v31 = vld [vmem:[%s10460_s1 + $0x1b8] sm:$0xff]   ;;  %v8263_v51 = vld [vmem:[%s10460_s1 + $0x80] sm:$0xff]  }
  0x11   : > { %7538 = vmatpush3.bf16.msra.mxu1 %v8235_v11  ;;  %7517 = vmatprep.subr.bf16.mxu0 %v8236_v12  ;;  %v239_v32 = vld [vmem:[%s8937_s27] sm:$0x77]  ;;  %v240_v33 = vld [vmem:[%s8937_s27 + $0x8] sm:$0x77]  ;;  %v8268_v62 = vld [vmem:[%s10460_s1 + $0x50] sm:$0xff]  }
  0x12   : > { %7539 = vmatprep.subr.bf16.mxu1 %v8237_v13  ;;  %v6196_v34 = vcombine.low %v239_v32, %v239_v32  ;;  %v6197_v35 = vcombine.high %v239_v32, %v239_v32  ;;  %v6198_v36 = vcombine.low %v240_v33, %v240_v33  ;;  %v6199_v37 = vcombine.high %v240_v33, %v240_v33  ;;  %v8264_v56 = vld [vmem:[%s10460_s1 + $0x48] sm:$0xff]   ;;  %v8269_v63 = vld [vmem:[%s10460_s1 + $0xd0] sm:$0xff]   ;;  %v8272_v2 = vld [vmem:[%s10460_s1 + $0x58] sm:$0xff]  }
  0x13   : > { %v8265_v59 = vld [vmem:[%s10460_s1 + $0xc8] sm:$0xff]   ;;  %v8270_v0 = vld [vmem:[%s10460_s1 + $0x10] sm:$0xff]   ;;  %v8273_v3 = vld [vmem:[%s10460_s1 + $0xd8] sm:$0xff]  }
  0x14   : > { %7518 = vmatpush3.bf16.msra.mxu0 %v8238_v14  ;;  %v324_v40 = vshrl.u32 %v6197_v35, 16  ;;  %v326_v41 = vshll.u32 %v6197_v35, 16  ;;  %v338_v42 = vshrl.u32 %v6199_v37, 16  ;;  %v340_v43 = vshll.u32 %v6199_v37, 16  ;;  %v8266_v60 = vld [vmem:[%s10460_s1 + $0x8] sm:$0xff]   ;;  %v8271_v1 = vld [vmem:[%s10460_s1 + $0x90] sm:$0xff]  }
  0x15   : > { %7540 = vmatpush3.bf16.msra.mxu1 %v8239_v15  ;;  %7519 = vmatprep.subr.bf16.mxu0 %v8240_v16  ;;  %v317_v44 = vshrl.u32 %v6196_v34, 16  ;;  %v319_v45 = vshll.u32 %v6196_v34, 16  ;;  %v331_v46 = vshrl.u32 %v6198_v36, 16  ;;  %v333_v47 = vshll.u32 %v6198_v36, 16  ;;  %v8267_v61 = vld [vmem:[%s10460_s1 + $0x88] sm:$0xff]   ;;  %v8274_v4 = vld [vmem:[%s10460_s1 + $0x18] sm:$0xff]  }
  0x16   : > { %7541 = vmatprep.subr.bf16.mxu1 %v8241_v17  ;;  %v328_v48 = vrot.slane %v326_v41, 1  ;;  %v342_v49 = vrot.slane %v340_v43, 1  ;;  %v8275_v5 = vld [vmem:[%s10460_s1 + $0x98] sm:$0xff]   ;;  %v8276_v6 = vld [vmem:[%s10460_s1 + $0x60] sm:$0xff]   ;;  %v8280_v10 = vld [vmem:[%s10460_s1 + $0x68] sm:$0xff]  }
  0x17   : > { %v321_v52 = vrot.slane %v319_v45, 1  ;;  %v335_v53 = vrot.slane %v333_v47, 1  ;;  %v8277_v7 = vld [vmem:[%s10460_s1 + $0xe0] sm:$0xff]   ;;  %v8281_v11 = vld [vmem:[%s10460_s1 + $0xe8] sm:$0xff]   ;;  %v8284_v14 = vld [vmem:[%s10460_s1 + $0x70] sm:$0xff]  }
  0x18   : > { %7520 = vmatpush3.bf16.msra.mxu0 %v8242_v18  ;;  %v329_v54 = vor.u32 %v328_v48, %v324_v40  ;;  %v343_v55 = vor.u32 %v342_v49, %v338_v42  ;;  %v8278_v8 = vld [vmem:[%s10460_s1 + $0x20] sm:$0xff]   ;;  %v8282_v12 = vld [vmem:[%s10460_s1 + $0x28] sm:$0xff]   ;;  %v8285_v15 = vld [vmem:[%s10460_s1 + $0xf0] sm:$0xff]  }
  0x19   : > { %7542 = vmatpush3.bf16.msra.mxu1 %v8243_v19  ;;  %7521 = vmatprep.subr.bf16.mxu0 %v8244_v20  ;;  %v322_v57 = vor.u32 %v321_v52, %v317_v44  ;;  %v336_v58 = vor.u32 %v335_v53, %v331_v46  ;;  %v8279_v9 = vld [vmem:[%s10460_s1 + $0xa0] sm:$0xff]   ;;  %v8283_v13 = vld [vmem:[%s10460_s1 + $0xa8] sm:$0xff]   ;;  %v8286_v16 = vld [vmem:[%s10460_s1 + $0x30] sm:$0xff]  }
  0x1a   : > { %7543 = vmatprep.subr.bf16.mxu1 %v8245_v21  ;;  %572 = vmatprep.mubr.bf16.mxu0 %v329_v54  ;;  %v8287_v17 = vld [vmem:[%s10460_s1 + $0xb0] sm:$0xff]   ;;  %v8288_v18 = vld [vmem:[%s10460_s1 + $0x78] sm:$0xff]   ;;  %v8300_v32 = vld [vmem:[%s10460_s1 + $0x248] sm:$0xff]  }
  0x1b   : > { %612 = vmatprep.mubr.bf16.mxu1 %v343_v55  ;;  %v8289_v19 = vld [vmem:[%s10460_s1 + $0xf8] sm:$0xff]   ;;  %v8301_v33 = vld [vmem:[%s10460_s1 + $0x2c8] sm:$0xff]   ;;  %v8304_v36 = vld [vmem:[%s10460_s1 + $0x250] sm:$0xff]  }
  0x1c   : > { %7522 = vmatpush3.bf16.msra.mxu0 %v8246_v22  ;;  %v8290_v20 = vld [vmem:[%s10460_s1 + $0x38] sm:$0xff]   ;;  %v173_v22 = vld [vmem:[%s8937_s27] sm:$0x33]  ;;  %v8302_v34 = vld [vmem:[%s10460_s1 + $0x208] sm:$0xff]  }
  0x1d   : > { %7544 = vmatpush3.bf16.msra.mxu1 %v8247_v23  ;;  %7523 = vmatprep.subr.bf16.mxu0 %v8248_v24  ;;  %v8291_v21 = vld [vmem:[%s10460_s1 + $0xb8] sm:$0xff]   ;;  %v174_v23 = vld [vmem:[%s8937_s27 + $0x8] sm:$0x33]  ;;  %v6233_v24 = vcombine.high %v173_v22, %v173_v22  ;;  %v8305_v37 = vld [vmem:[%s10460_s1 + $0x2d0] sm:$0xff]  }
  0x1e   : > { %7545 = vmatprep.subr.bf16.mxu1 %v8249_v25  ;;  %v8296_v25 = vld [vmem:[%s10460_s1 + $0x240] sm:$0xff]   ;;  %v8303_v35 = vld [vmem:[%s10460_s1 + $0x288] sm:$0xff]   ;;  %v8308_v40 = vld [vmem:[%s10460_s1 + $0x258] sm:$0xff]  }
  0x1f   : > { %v8309_v41 = vld [vmem:[%s10460_s1 + $0x2d8] sm:$0xff]   ;;  %v8312_v44 = vld [vmem:[%s10460_s1 + $0x260] sm:$0xff]   ;;  %v8316_v48 = vld [vmem:[%s10460_s1 + $0x268] sm:$0xff]  }
  0x20   : > { %7524 = vmatpush3.bf16.msra.mxu0 %v8250_v26  ;;  %v6235_v26 = vcombine.high %v174_v23, %v174_v23  ;;  %v8310_v42 = vld [vmem:[%s10460_s1 + $0x218] sm:$0xff]   ;;  %v8313_v45 = vld [vmem:[%s10460_s1 + $0x2e0] sm:$0xff]   ;;  %v8317_v49 = vld [vmem:[%s10460_s1 + $0x2e8] sm:$0xff]  }
  0x21   : > { %7546 = vmatpush3.bf16.msra.mxu1 %v8251_v27  ;;  %7525 = vmatprep.subr.bf16.mxu0 %v8252_v28  ;;  %v8297_v27 = vld [vmem:[%s10460_s1 + $0x2c0] sm:$0xff]   ;;  %v8311_v43 = vld [vmem:[%s10460_s1 + $0x298] sm:$0xff]   ;;  %v8320_v52 = vld [vmem:[%s10460_s1 + $0x270] sm:$0xff]  }
  0x22   : > { %7547 = vmatprep.subr.bf16.mxu1 %v8253_v29  ;;  %v8298_v28 = vld [vmem:[%s10460_s1 + $0x200] sm:$0xff]   ;;  %v6232_v29 = vcombine.low %v173_v22, %v173_v22  ;;  %v8321_v53 = vld [vmem:[%s10460_s1 + $0x2f0] sm:$0xff]   ;;  %v8352_v22 = vld [vmem:[%s10460_s1 + $0x368] sm:$0xff]  }
  0x23   : > { %v8314_v46 = vld [vmem:[%s10460_s1 + $0x220] sm:$0xff]   ;;  %v8322_v54 = vld [vmem:[%s10460_s1 + $0x230] sm:$0xff]  }
  0x24   : > { %7526 = vmatpush3.bf16.msra.mxu0 %v8254_v30  ;;  %v6234_v30 = vcombine.low %v174_v23, %v174_v23  ;;  %v8315_v47 = vld [vmem:[%s10460_s1 + $0x2a0] sm:$0xff]   ;;  %v8323_v55 = vld [vmem:[%s10460_s1 + $0x2b0] sm:$0xff]   ;;  %v8353_v23 = vld [vmem:[%s10460_s1 + $0x3e8] sm:$0xff]  }
  0x25   : > { %7548 = vmatpush3.bf16.msra.mxu1 %v8255_v31  ;;  %7555 = vmatprep.subr.bf16.mxu0 %v8260_v38  ;;  %v8299_v31 = vld [vmem:[%s10460_s1 + $0x280] sm:$0xff]   ;;  %v8306_v38 = vld [vmem:[%s10460_s1 + $0x210] sm:$0xff]  }
  0x26   : > { %7577 = vmatprep.subr.bf16.mxu1 %v8261_v39  ;;  %v8307_v39 = vld [vmem:[%s10460_s1 + $0x290] sm:$0xff]  }
  0x27   : > { %573 = vmatmul.mubr.bf16.vlgmr.msra.gmra.mrb[0].mxu0 %v322_v57  ;;  %v8325_v57 = vld [vmem:[%s10460_s1 + $0x2f8] sm:$0xff]  }
  0x28   : > { %613 = vmatmul.mubr.bf16.vlgmr.msra.gmra.mrb[0].mxu1 %v336_v58  ;;  %7556 = vmatpush3.bf16.msra.mxu0 %v8262_v50  ;;  %v8318_v50 = vld [vmem:[%s10460_s1 + $0x228] sm:$0xff]   ;;  %v8326_v58 = vld [vmem:[%s10460_s1 + $0x238] sm:$0xff]  }
  0x29   : > { %7578 = vmatpush3.bf16.msra.mxu1 %v8263_v51  ;;  %7557 = vmatprep.subr.bf16.mxu0 %v8264_v56  ;;  %v8319_v51 = vld [vmem:[%s10460_s1 + $0x2a8] sm:$0xff]   ;;  %v8324_v56 = vld [vmem:[%s10460_s1 + $0x278] sm:$0xff]  }
  0x2a   : > { %7579 = vmatprep.subr.bf16.mxu1 %v8265_v59  ;;  %858 = vmatprep.mubr.bf16.mxu0 %v6233_v24  ;;  %v8327_v59 = vld [vmem:[%s10460_s1 + $0x2b8] sm:$0xff]   ;;  %v8354_v24 = vld [vmem:[%s10460_s1 + $0x328] sm:$0xff]  }
  0x2b   : > { %898 = vmatprep.mubr.bf16.mxu1 %v6235_v26  ;;  %v8356_v26 = vld [vmem:[%s10460_s1 + $0x370] sm:$0xff]  }
  0x2c   : > { %7558 = vmatpush3.bf16.msra.mxu0 %v8266_v60  ;;  %v6268_v60 = vld [vmem:[%s8937_s27 + $0x10] sm:$0x33] }
  0x2d   : > { %7580 = vmatpush3.bf16.msra.mxu1 %v8267_v61  ;;  %7559 = vmatprep.subr.bf16.mxu0 %v8268_v62  ;;  %v6269_v61 = vld [vmem:[%s8937_s27 + $0x18] sm:$0x33]  ;;  %v6335_v62 = vcombine.high %v6268_v60, %v6268_v60 }
  0x2e   : > { %7581 = vmatprep.subr.bf16.mxu1 %v8269_v63  ;;  %v8332_v63 = vld [vmem:[%s10460_s1 + $0x340] sm:$0xff]  }
  0x30   : > { %7560 = vmatpush3.bf16.msra.mxu0 %v8270_v0  ;;  %v6337_v0 = vcombine.high %v6269_v61, %v6269_v61 }
  0x31   : > { %7582 = vmatpush3.bf16.msra.mxu1 %v8271_v1  ;;  %7561 = vmatprep.subr.bf16.mxu0 %v8272_v2  ;;  %v8333_v1 = vld [vmem:[%s10460_s1 + $0x3c0] sm:$0xff]   ;;  %v6334_v2 = vcombine.low %v6268_v60, %v6268_v60 }
  0x32   : > { %7583 = vmatprep.subr.bf16.mxu1 %v8273_v3  ;;  %v6336_v3 = vcombine.low %v6269_v61, %v6269_v61  ;;  %v8373_v61 = vld [vmem:[%s10460_s1 + $0x1c8] sm:$0xff]  }
  0x34   : > { %7562 = vmatpush3.bf16.msra.mxu0 %v8274_v4  ;;  %v8334_v4 = vld [vmem:[%s10460_s1 + $0x300] sm:$0xff]  }
  0x35   : > { %7584 = vmatpush3.bf16.msra.mxu1 %v8275_v5  ;;  %7563 = vmatprep.subr.bf16.mxu0 %v8276_v6  ;;  %v8335_v5 = vld [vmem:[%s10460_s1 + $0x380] sm:$0xff]   ;;  %v8336_v6 = vld [vmem:[%s10460_s1 + $0x348] sm:$0xff]  }
  0x36   : > { %7585 = vmatprep.subr.bf16.mxu1 %v8277_v7  ;;  %v8337_v7 = vld [vmem:[%s10460_s1 + $0x3c8] sm:$0xff]  }
  0x38   : > { %7564 = vmatpush3.bf16.msra.mxu0 %v8278_v8  ;;  %v8338_v8 = vld [vmem:[%s10460_s1 + $0x308] sm:$0xff]  }
  0x39   : > { %7586 = vmatpush3.bf16.msra.mxu1 %v8279_v9  ;;  %7565 = vmatprep.subr.bf16.mxu0 %v8280_v10  ;;  %v8339_v9 = vld [vmem:[%s10460_s1 + $0x388] sm:$0xff]   ;;  %v8340_v10 = vld [vmem:[%s10460_s1 + $0x350] sm:$0xff]  }
  0x3a   : > { %7587 = vmatprep.subr.bf16.mxu1 %v8281_v11  ;;  %v8341_v11 = vld [vmem:[%s10460_s1 + $0x3d0] sm:$0xff]  }
  0x3c   : > { %7566 = vmatpush3.bf16.msra.mxu0 %v8282_v12  ;;  %v8342_v12 = vld [vmem:[%s10460_s1 + $0x310] sm:$0xff]  }
  0x3d   : > { %7588 = vmatpush3.bf16.msra.mxu1 %v8283_v13  ;;  %7567 = vmatprep.subr.bf16.mxu0 %v8284_v14  ;;  %v8343_v13 = vld [vmem:[%s10460_s1 + $0x390] sm:$0xff]   ;;  %v8344_v14 = vld [vmem:[%s10460_s1 + $0x358] sm:$0xff]  }
  0x3e   : > { %7589 = vmatprep.subr.bf16.mxu1 %v8285_v15  ;;  %v8345_v15 = vld [vmem:[%s10460_s1 + $0x3d8] sm:$0xff]  }
  0x40   : > { %7568 = vmatpush3.bf16.msra.mxu0 %v8286_v16  ;;  %v8346_v16 = vld [vmem:[%s10460_s1 + $0x318] sm:$0xff]  }
  0x41   : > { %7590 = vmatpush3.bf16.msra.mxu1 %v8287_v17  ;;  %7569 = vmatprep.subr.bf16.mxu0 %v8288_v18  ;;  %v8347_v17 = vld [vmem:[%s10460_s1 + $0x398] sm:$0xff]   ;;  %v8348_v18 = vld [vmem:[%s10460_s1 + $0x360] sm:$0xff]  }
  0x42   : > { %7591 = vmatprep.subr.bf16.mxu1 %v8289_v19  ;;  %v8349_v19 = vld [vmem:[%s10460_s1 + $0x3e0] sm:$0xff]  }
  0x44   : > { %7570 = vmatpush3.bf16.msra.mxu0 %v8290_v20  ;;  %v8350_v20 = vld [vmem:[%s10460_s1 + $0x320] sm:$0xff]  }
  0x45   : > { %7592 = vmatpush3.bf16.msra.mxu1 %v8291_v21  ;;  %7599 = vmatprep.subr.bf16.mxu0 %v8296_v25  ;;  %v8351_v21 = vld [vmem:[%s10460_s1 + $0x3a0] sm:$0xff]   ;;  %v8355_v25 = vld [vmem:[%s10460_s1 + $0x3a8] sm:$0xff]  }
  0x46   : > { %7621 = vmatprep.subr.bf16.mxu1 %v8297_v27  ;;  %v8357_v27 = vld [vmem:[%s10460_s1 + $0x3f0] sm:$0xff]  }
  0x47   : > { %859 = vmatmul.mubr.bf16.vlgmr.msra.gmra.mrb[4].mxu0 %v6232_v29  ;;  %v8359_v29 = vld [vmem:[%s10460_s1 + $0x3b0] sm:$0xff]  }
  0x48   : > { %899 = vmatmul.mubr.bf16.vlgmr.msra.gmra.mrb[4].mxu1 %v6234_v30  ;;  %7600 = vmatpush3.bf16.msra.mxu0 %v8298_v28  ;;  %v8358_v28 = vld [vmem:[%s10460_s1 + $0x330] sm:$0xff]   ;;  %v8360_v30 = vld [vmem:[%s10460_s1 + $0x378] sm:$0xff]  }
  0x49   : > { %7622 = vmatpush3.bf16.msra.mxu1 %v8299_v31  ;;  %7601 = vmatprep.subr.bf16.mxu0 %v8300_v32  ;;  %v8361_v31 = vld [vmem:[%s10460_s1 + $0x3f8] sm:$0xff]  }
  0x4a   : > { %7623 = vmatprep.subr.bf16.mxu1 %v8301_v33  ;;  %1212 = vmatprep.mubr.bf16.mxu0 %v6335_v62  ;;  %v8362_v32 = vld [vmem:[%s10460_s1 + $0x338] sm:$0xff]   ;;  %v8374_v62 = vld [vmem:[%s10460_s1 + $0x108] sm:$0xff]  }
  0x4b   : > { %1252 = vmatprep.mubr.bf16.mxu1 %v6337_v0  ;;  %v8363_v33 = vld [vmem:[%s10460_s1 + $0x3b8] sm:$0xff]   ;;  %v8376_v0 = vld [vmem:[%s10460_s1 + $0x150] sm:$0xff]  }
  0x4c   : > { %7602 = vmatpush3.bf16.msra.mxu0 %v8302_v34  ;;  %v6370_v34 = vld [vmem:[%s8937_s27 + $0x10] sm:$0x77] }
  0x4d   : > { %7624 = vmatpush3.bf16.msra.mxu1 %v8303_v35  ;;  %7603 = vmatprep.subr.bf16.mxu0 %v8304_v36  ;;  %v6436_v35 = vcombine.low %v6370_v34, %v6370_v34  ;;  %v6437_v36 = vcombine.high %v6370_v34, %v6370_v34 }
  0x4e   : > { %7625 = vmatprep.subr.bf16.mxu1 %v8305_v37  ;;  %v6371_v37 = vld [vmem:[%s8937_s27 + $0x18] sm:$0x77] }
  0x50   : > { %7604 = vmatpush3.bf16.msra.mxu0 %v8306_v38  ;;  %v6438_v38 = vcombine.low %v6371_v37, %v6371_v37 }
  0x51   : > { %7626 = vmatpush3.bf16.msra.mxu1 %v8307_v39  ;;  %7605 = vmatprep.subr.bf16.mxu0 %v8308_v40  ;;  %v6439_v39 = vcombine.high %v6371_v37, %v6371_v37  ;;  %v8368_v40 = vld [vmem:[%s10460_s1 + $0x140] sm:$0xff]  }
  0x52   : > { %7627 = vmatprep.subr.bf16.mxu1 %v8309_v41  ;;  %v1346_v41 = vshrl.u32 %v6437_v36, 16 }
  0x54   : > { %7606 = vmatpush3.bf16.msra.mxu0 %v8310_v42  ;;  %v1348_v42 = vshll.u32 %v6437_v36, 16 }
  0x55   : > { %7628 = vmatpush3.bf16.msra.mxu1 %v8311_v43  ;;  %7607 = vmatprep.subr.bf16.mxu0 %v8312_v44  ;;  %v1339_v43 = vshrl.u32 %v6436_v35, 16  ;;  %v1341_v44 = vshll.u32 %v6436_v35, 16  ;;  %v8405_v35 = vld [vmem:[%s10460_s1 + $0xc0] sm:$0xff]  }
  0x56   : > { %7629 = vmatprep.subr.bf16.mxu1 %v8313_v45  ;;  %v8369_v45 = vld [vmem:[%s10460_s1 + $0x1c0] sm:$0xff]  }
  0x58   : > { %7608 = vmatpush3.bf16.msra.mxu0 %v8314_v46  ;;  %v1360_v46 = vshrl.u32 %v6439_v39, 16 }
  0x59   : > { %7630 = vmatpush3.bf16.msra.mxu1 %v8315_v47  ;;  %7609 = vmatprep.subr.bf16.mxu0 %v8316_v48  ;;  %v1362_v47 = vshll.u32 %v6439_v39, 16  ;;  %v1353_v48 = vshrl.u32 %v6438_v38, 16 }
  0x5a   : > { %7631 = vmatprep.subr.bf16.mxu1 %v8317_v49  ;;  %v1355_v49 = vshll.u32 %v6438_v38, 16 }
  0x5c   : > { %7610 = vmatpush3.bf16.msra.mxu0 %v8318_v50  ;;  %v1350_v50 = vrot.slane %v1348_v42, 1  ;;  %v8406_v42 = vld [vmem:[%s10460_s1] sm:$0xff]  }
  0x5d   : > { %7632 = vmatpush3.bf16.msra.mxu1 %v8319_v51  ;;  %7611 = vmatprep.subr.bf16.mxu0 %v8320_v52  ;;  %v1343_v51 = vrot.slane %v1341_v44, 1  ;;  %v8370_v52 = vld [vmem:[%s10460_s1 + $0x100] sm:$0xff]  }
  0x5e   : > { %7633 = vmatprep.subr.bf16.mxu1 %v8321_v53  ;;  %v1364_v53 = vrot.slane %v1362_v47, 1 }
  0x60   : > { %7612 = vmatpush3.bf16.msra.mxu0 %v8322_v54  ;;  %v1357_v54 = vrot.slane %v1355_v49, 1 }
  0x61   : > { %7634 = vmatpush3.bf16.msra.mxu1 %v8323_v55  ;;  %7613 = vmatprep.subr.bf16.mxu0 %v8324_v56  ;;  %v8371_v55 = vld [vmem:[%s10460_s1 + $0x180] sm:$0xff]   ;;  %v8372_v56 = vld [vmem:[%s10460_s1 + $0x148] sm:$0xff]  }
  0x62   : > { %7635 = vmatprep.subr.bf16.mxu1 %v8325_v57  ;;  %v1351_v57 = vor.u32 %v1350_v50, %v1346_v41  ;;  %v1358_v60 = vor.u32 %v1357_v54, %v1353_v48  ;;  %v8412_v54 = vld [vmem:[%s10460_s1 + $0x50] sm:$0xff]  }
  0x64   : > { %7614 = vmatpush3.bf16.msra.mxu0 %v8326_v58  ;;  %v1344_v58 = vor.u32 %v1343_v51, %v1339_v43  ;;  %v8409_v51 = vld [vmem:[%s10460_s1 + $0xc8] sm:$0xff]  }
  0x65   : > { %7636 = vmatpush3.bf16.msra.mxu1 %v8327_v59  ;;  %7643 = vmatprep.subr.bf16.mxu0 %v8332_v63  ;;  %v1365_v59 = vor.u32 %v1364_v53, %v1360_v46  ;;  %v8375_v63 = vld [vmem:[%s10460_s1 + $0x188] sm:$0xff]  }
  0x66   : > { %7665 = vmatprep.subr.bf16.mxu1 %v8333_v1  ;;  %v8377_v1 = vld [vmem:[%s10460_s1 + $0x1d0] sm:$0xff]   ;;  %v8408_v46 = vld [vmem:[%s10460_s1 + $0x48] sm:$0xff]  }
  0x67   : > { %1213 = vmatmul.mubr.bf16.vlgmr.msra.gmra.mrb[8].mxu0 %v6334_v2  ;;  %v8378_v2 = vld [vmem:[%s10460_s1 + $0x110] sm:$0xff]   ;;  %v8411_v53 = vld [vmem:[%s10460_s1 + $0x88] sm:$0xff]  }
  0x68   : > { %1253 = vmatmul.mubr.bf16.vlgmr.msra.gmra.mrb[8].mxu1 %v6336_v3  ;;  %7644 = vmatpush3.bf16.msra.mxu0 %v8334_v4  ;;  %v8379_v3 = vld [vmem:[%s10460_s1 + $0x190] sm:$0xff]   ;;  %v8380_v4 = vld [vmem:[%s10460_s1 + $0x158] sm:$0xff]  }
  0x69   : > { %7666 = vmatpush3.bf16.msra.mxu1 %v8335_v5  ;;  %7645 = vmatprep.subr.bf16.mxu0 %v8336_v6  ;;  %v8381_v5 = vld [vmem:[%s10460_s1 + $0x1d8] sm:$0xff]  }
  0x6a   : > { %7667 = vmatprep.subr.bf16.mxu1 %v8337_v7  ;;  %1594 = vmatprep.mubr.bf16.mxu0 %v1351_v57  ;;  %v8382_v6 = vld [vmem:[%s10460_s1 + $0x118] sm:$0xff]   ;;  %v8415_v57 = vld [vmem:[%s10460_s1 + $0x90] sm:$0xff]  }
  0x6b   : > { %1634 = vmatprep.mubr.bf16.mxu1 %v1365_v59  ;;  %v8383_v7 = vld [vmem:[%s10460_s1 + $0x198] sm:$0xff]  }
  0x6c   : > { %7646 = vmatpush3.bf16.msra.mxu0 %v8338_v8  ;;  %v8384_v8 = vld [vmem:[%s10460_s1 + $0x160] sm:$0xff]   ;;  %v8417_v59 = vld [vmem:[%s10460_s1 + $0xd8] sm:$0xff]  }
  0x6d   : > { %7668 = vmatpush3.bf16.msra.mxu1 %v8339_v9  ;;  %7647 = vmatprep.subr.bf16.mxu0 %v8340_v10  ;;  %v8385_v9 = vld [vmem:[%s10460_s1 + $0x1e0] sm:$0xff]  }
  0x6e   : > { %7669 = vmatprep.subr.bf16.mxu1 %v8341_v11  ;;  %v8386_v10 = vld [vmem:[%s10460_s1 + $0x120] sm:$0xff]  }
  0x6f   : > { %v8387_v11 = vld [vmem:[%s10460_s1 + $0x1a0] sm:$0xff]  }
  0x70   : > { %7648 = vmatpush3.bf16.msra.mxu0 %v8342_v12  ;;  %v8388_v12 = vld [vmem:[%s10460_s1 + $0x168] sm:$0xff]  }
  0x71   : > { %7670 = vmatpush3.bf16.msra.mxu1 %v8343_v13  ;;  %7649 = vmatprep.subr.bf16.mxu0 %v8344_v14  ;;  %v8389_v13 = vld [vmem:[%s10460_s1 + $0x1e8] sm:$0xff]  }
  0x72   : > { %7671 = vmatprep.subr.bf16.mxu1 %v8345_v15  ;;  %v8390_v14 = vld [vmem:[%s10460_s1 + $0x128] sm:$0xff]  }
  0x73   : > { %v8391_v15 = vld [vmem:[%s10460_s1 + $0x1a8] sm:$0xff]  }
  0x74   : > { %7650 = vmatpush3.bf16.msra.mxu0 %v8346_v16  ;;  %v8392_v16 = vld [vmem:[%s10460_s1 + $0x170] sm:$0xff]  }
  0x75   : > { %7672 = vmatpush3.bf16.msra.mxu1 %v8347_v17  ;;  %7651 = vmatprep.subr.bf16.mxu0 %v8348_v18  ;;  %v8393_v17 = vld [vmem:[%s10460_s1 + $0x1f0] sm:$0xff]  }
  0x76   : > { %7673 = vmatprep.subr.bf16.mxu1 %v8349_v19  ;;  %v8394_v18 = vld [vmem:[%s10460_s1 + $0x130] sm:$0xff]  }
  0x77   : > { %v8395_v19 = vld [vmem:[%s10460_s1 + $0x1b0] sm:$0xff]  }
  0x78   : > { %7652 = vmatpush3.bf16.msra.mxu0 %v8350_v20  ;;  %v8396_v20 = vld [vmem:[%s10460_s1 + $0x178] sm:$0xff]  }
  0x79   : > { %7674 = vmatpush3.bf16.msra.mxu1 %v8351_v21  ;;  %7653 = vmatprep.subr.bf16.mxu0 %v8352_v22  ;;  %v8397_v21 = vld [vmem:[%s10460_s1 + $0x1f8] sm:$0xff]  }
  0x7a   : > { %7675 = vmatprep.subr.bf16.mxu1 %v8353_v23  ;;  %v8398_v22 = vld [vmem:[%s10460_s1 + $0x138] sm:$0xff]  }
  0x7b   : > { %v8399_v23 = vld [vmem:[%s10460_s1 + $0x1b8] sm:$0xff]  }
  0x7c   : > { %7654 = vmatpush3.bf16.msra.mxu0 %v8354_v24  ;;  %v6475_v24 = vld [vmem:[%s8937_s27 + $0x10] sm:$0x77] }
  0x7d   : > { %7676 = vmatpush3.bf16.msra.mxu1 %v8355_v25  ;;  %7655 = vmatprep.subr.bf16.mxu0 %v8356_v26  ;;  %v6541_v25 = vcombine.low %v6475_v24, %v6475_v24  ;;  %v6542_v26 = vcombine.high %v6475_v24, %v6475_v24  ;;  %v8444_v24 = vld [vmem:[%s10460_s1 + $0x248] sm:$0xff]  }
  0x7e   : > { %7677 = vmatprep.subr.bf16.mxu1 %v8357_v27  ;;  %v6476_v27 = vld [vmem:[%s8937_s27 + $0x18] sm:$0x77] }
  0x7f   : > { %v1798_v34 = vshll.u32 %v6541_v25, 16 }
  0x80   : > { %7656 = vmatpush3.bf16.msra.mxu0 %v8358_v28  ;;  %v6543_v28 = vcombine.low %v6476_v27, %v6476_v27 }
  0x81   : > { %7678 = vmatpush3.bf16.msra.mxu1 %v8359_v29  ;;  %7657 = vmatprep.subr.bf16.mxu0 %v8360_v30  ;;  %v6544_v29 = vcombine.high %v6476_v27, %v6476_v27  ;;  %v8404_v30 = vld [vmem:[%s10460_s1 + $0x40] sm:$0xff]   ;;  %v1800_v41 = vrot.slane %v1798_v34, 1  ;;  %v8447_v27 = vld [vmem:[%s10460_s1 + $0x288] sm:$0xff]   ;;  %v8454_v34 = vld [vmem:[%s10460_s1 + $0x218] sm:$0xff]  }
  0x82   : > { %7679 = vmatprep.subr.bf16.mxu1 %v8361_v31  ;;  %v1803_v31 = vshrl.u32 %v6542_v26, 16  ;;  %v1810_v38 = vshrl.u32 %v6543_v28, 16  ;;  %v1812_v39 = vshll.u32 %v6543_v28, 16  ;;  %v8448_v28 = vld [vmem:[%s10460_s1 + $0x250] sm:$0xff]  }
  0x83   : > { %v1817_v36 = vshrl.u32 %v6544_v29, 16  ;;  %v1819_v37 = vshll.u32 %v6544_v29, 16  ;;  %v8449_v29 = vld [vmem:[%s10460_s1 + $0x2d0] sm:$0xff]  }
  0x84   : > { %7658 = vmatpush3.bf16.msra.mxu0 %v8362_v32  ;;  %v1805_v32 = vshll.u32 %v6542_v26, 16  ;;  %v1814_v44 = vrot.slane %v1812_v39, 1  ;;  %v8446_v26 = vld [vmem:[%s10460_s1 + $0x208] sm:$0xff]   ;;  %v8459_v39 = vld [vmem:[%s10460_s1 + $0x2a0] sm:$0xff]  }
  0x85   : > { %7680 = vmatpush3.bf16.msra.mxu1 %v8363_v33  ;;  %7687 = vmatprep.subr.bf16.mxu0 %v8368_v40  ;;  %v1796_v33 = vshrl.u32 %v6541_v25, 16  ;;  %v1821_v43 = vrot.slane %v1819_v37, 1  ;;  %v8445_v25 = vld [vmem:[%s10460_s1 + $0x2c8] sm:$0xff]   ;;  %v8457_v37 = vld [vmem:[%s10460_s1 + $0x2e0] sm:$0xff]  }
  0x86   : > { %7709 = vmatprep.subr.bf16.mxu1 %v8369_v45  ;;  %v1807_v40 = vrot.slane %v1805_v32, 1  ;;  %v8407_v45 = vld [vmem:[%s10460_s1 + $0x80] sm:$0xff]   ;;  %v1815_v50 = vor.u32 %v1814_v44, %v1810_v38  ;;  %v8452_v32 = vld [vmem:[%s10460_s1 + $0x258] sm:$0xff]   ;;  %v8464_v44 = vld [vmem:[%s10460_s1 + $0x270] sm:$0xff]  }
  0x87   : > { %1595 = vmatmul.mubr.bf16.vlgmr.msra.gmra.mrb[12].mxu0 %v1344_v58  ;;  %v1801_v48 = vor.u32 %v1800_v41, %v1796_v33  ;;  %v1822_v49 = vor.u32 %v1821_v43, %v1817_v36  ;;  %v8416_v58 = vld [vmem:[%s10460_s1 + $0x58] sm:$0xff]   ;;  %v8456_v36 = vld [vmem:[%s10460_s1 + $0x260] sm:$0xff]   ;;  %v8461_v41 = vld [vmem:[%s10460_s1 + $0x2e8] sm:$0xff]  }
  0x88   : > { %1635 = vmatmul.mubr.bf16.vlgmr.msra.gmra.mrb[12].mxu1 %v1358_v60  ;;  %7688 = vmatpush3.bf16.msra.mxu0 %v8370_v52  ;;  %v1808_v47 = vor.u32 %v1807_v40, %v1803_v31  ;;  %v8410_v52 = vld [vmem:[%s10460_s1 + $0x8] sm:$0xff]   ;;  %v8418_v60 = vld [vmem:[%s10460_s1 + $0x18] sm:$0xff]   ;;  %v8451_v31 = vld [vmem:[%s10460_s1 + $0x290] sm:$0xff]  }
  0x89   : > { %7710 = vmatpush3.bf16.msra.mxu1 %v8371_v55  ;;  %7689 = vmatprep.subr.bf16.mxu0 %v8372_v56  ;;  %v8413_v55 = vld [vmem:[%s10460_s1 + $0xd0] sm:$0xff]   ;;  %v8453_v33 = vld [vmem:[%s10460_s1 + $0x2d8] sm:$0xff]   ;;  %v8458_v38 = vld [vmem:[%s10460_s1 + $0x220] sm:$0xff]  }
  0x8a   : > { %7711 = vmatprep.subr.bf16.mxu1 %v8373_v61  ;;  %2051 = vmatprep.mubr.bf16.mxu0 %v1808_v47  ;;  %v8414_v56 = vld [vmem:[%s10460_s1 + $0x10] sm:$0xff]   ;;  %v8419_v61 = vld [vmem:[%s10460_s1 + $0x98] sm:$0xff]   ;;  %v8460_v40 = vld [vmem:[%s10460_s1 + $0x268] sm:$0xff]  }
  0x8b   : > { %2091 = vmatprep.mubr.bf16.mxu1 %v1822_v49  ;;  %v8463_v43 = vld [vmem:[%s10460_s1 + $0x2a8] sm:$0xff]   ;;  %v8467_v47 = vld [vmem:[%s10460_s1 + $0x2b0] sm:$0xff]   ;;  %v8469_v49 = vld [vmem:[%s10460_s1 + $0x2f8] sm:$0xff]  }
  0x8c   : > { %7690 = vmatpush3.bf16.msra.mxu0 %v8374_v62  ;;  %v8420_v62 = vld [vmem:[%s10460_s1 + $0x60] sm:$0xff]  }
  0x8d   : > { %7712 = vmatpush3.bf16.msra.mxu1 %v8375_v63  ;;  %7691 = vmatprep.subr.bf16.mxu0 %v8376_v0  ;;  %v8421_v63 = vld [vmem:[%s10460_s1 + $0xe0] sm:$0xff]  }
  0x8e   : > { %7713 = vmatprep.subr.bf16.mxu1 %v8377_v1  ;;  %v8422_v0 = vld [vmem:[%s10460_s1 + $0x20] sm:$0xff]  }
  0x8f   : > { %v8423_v1 = vld [vmem:[%s10460_s1 + $0xa0] sm:$0xff]  }
  0x90   : > { %7692 = vmatpush3.bf16.msra.mxu0 %v8378_v2  ;;  %v8424_v2 = vld [vmem:[%s10460_s1 + $0x68] sm:$0xff]  }
  0x91   : > { %7714 = vmatpush3.bf16.msra.mxu1 %v8379_v3  ;;  %7693 = vmatprep.subr.bf16.mxu0 %v8380_v4  ;;  %v8425_v3 = vld [vmem:[%s10460_s1 + $0xe8] sm:$0xff]  }
  0x92   : > { %7715 = vmatprep.subr.bf16.mxu1 %v8381_v5  ;;  %v8426_v4 = vld [vmem:[%s10460_s1 + $0x28] sm:$0xff]  }
  0x93   : > { %v8427_v5 = vld [vmem:[%s10460_s1 + $0xa8] sm:$0xff]  }
  0x94   : > { %7694 = vmatpush3.bf16.msra.mxu0 %v8382_v6  ;;  %v8428_v6 = vld [vmem:[%s10460_s1 + $0x70] sm:$0xff]  }
  0x95   : > { %7716 = vmatpush3.bf16.msra.mxu1 %v8383_v7  ;;  %7695 = vmatprep.subr.bf16.mxu0 %v8384_v8  ;;  %v8429_v7 = vld [vmem:[%s10460_s1 + $0xf0] sm:$0xff]  }
  0x96   : > { %7717 = vmatprep.subr.bf16.mxu1 %v8385_v9  ;;  %v8430_v8 = vld [vmem:[%s10460_s1 + $0x30] sm:$0xff]  }
  0x97   : > { %v8431_v9 = vld [vmem:[%s10460_s1 + $0xb0] sm:$0xff]  }
  0x98   : > { %7696 = vmatpush3.bf16.msra.mxu0 %v8386_v10  ;;  %v8432_v10 = vld [vmem:[%s10460_s1 + $0x78] sm:$0xff]  }
  0x99   : > { %7718 = vmatpush3.bf16.msra.mxu1 %v8387_v11  ;;  %7697 = vmatprep.subr.bf16.mxu0 %v8388_v12  ;;  %v8433_v11 = vld [vmem:[%s10460_s1 + $0xf8] sm:$0xff]  }
  0x9a   : > { %7719 = vmatprep.subr.bf16.mxu1 %v8389_v13  ;;  %v8434_v12 = vld [vmem:[%s10460_s1 + $0x38] sm:$0xff]  }
  0x9b   : > { %v8435_v13 = vld [vmem:[%s10460_s1 + $0xb8] sm:$0xff]  }
  0x9c   : > { %7698 = vmatpush3.bf16.msra.mxu0 %v8390_v14  ;;  %v6473_v14 = vld [vmem:[%s8937_s27 + $0x10] sm:$0x33] }
  0x9d   : > { %7720 = vmatpush3.bf16.msra.mxu1 %v8391_v15  ;;  %7699 = vmatprep.subr.bf16.mxu0 %v8392_v16  ;;  %v6578_v15 = vcombine.high %v6473_v14, %v6473_v14  ;;  %v6474_v16 = vld [vmem:[%s8937_s27 + $0x18] sm:$0x33] }
  0x9e   : > { %7721 = vmatprep.subr.bf16.mxu1 %v8393_v17  ;;  %v6580_v17 = vcombine.high %v6474_v16, %v6474_v16 }
  0xa0   : > { %7700 = vmatpush3.bf16.msra.mxu0 %v8394_v18  ;;  %v8440_v18 = vld [vmem:[%s10460_s1 + $0x240] sm:$0xff]  }
  0xa1   : > { %7722 = vmatpush3.bf16.msra.mxu1 %v8395_v19  ;;  %7701 = vmatprep.subr.bf16.mxu0 %v8396_v20  ;;  %v8441_v19 = vld [vmem:[%s10460_s1 + $0x2c0] sm:$0xff]   ;;  %v6577_v20 = vcombine.low %v6473_v14, %v6473_v14 }
  0xa2   : > { %7723 = vmatprep.subr.bf16.mxu1 %v8397_v21  ;;  %v8442_v21 = vld [vmem:[%s10460_s1 + $0x200] sm:$0xff]  }
  0xa4   : > { %7702 = vmatpush3.bf16.msra.mxu0 %v8398_v22  ;;  %v6579_v22 = vcombine.low %v6474_v16, %v6474_v16 }
  0xa5   : > { %7724 = vmatpush3.bf16.msra.mxu1 %v8399_v23  ;;  %7731 = vmatprep.subr.bf16.mxu0 %v8404_v30  ;;  %v8443_v23 = vld [vmem:[%s10460_s1 + $0x280] sm:$0xff]   ;;  %v8450_v30 = vld [vmem:[%s10460_s1 + $0x210] sm:$0xff]  }
  0xa6   : > { %7753 = vmatprep.subr.bf16.mxu1 %v8405_v35  ;;  %v8455_v35 = vld [vmem:[%s10460_s1 + $0x298] sm:$0xff]  }
  0xa7   : > { %2052 = vmatmul.mubr.bf16.vlgmr.msra.gmra.mrb[16].mxu0 %v1801_v48  ;;  %v8468_v48 = vld [vmem:[%s10460_s1 + $0x278] sm:$0xff]  }
  0xa8   : > { %2092 = vmatmul.mubr.bf16.vlgmr.msra.gmra.mrb[16].mxu1 %v1815_v50  ;;  %7732 = vmatpush3.bf16.msra.mxu0 %v8406_v42  ;;  %v8462_v42 = vld [vmem:[%s10460_s1 + $0x228] sm:$0xff]   ;;  %v8470_v50 = vld [vmem:[%s10460_s1 + $0x238] sm:$0xff]  }
  0xa9   : > { %7754 = vmatpush3.bf16.msra.mxu1 %v8407_v45  ;;  %7733 = vmatprep.subr.bf16.mxu0 %v8408_v46  ;;  %v8465_v45 = vld [vmem:[%s10460_s1 + $0x2f0] sm:$0xff]  }
  0xaa   : > { %7755 = vmatprep.subr.bf16.mxu1 %v8409_v51  ;;  %2337 = vmatprep.mubr.bf16.mxu0 %v6578_v15  ;;  %v8466_v46 = vld [vmem:[%s10460_s1 + $0x230] sm:$0xff]   ;;  %v8471_v51 = vld [vmem:[%s10460_s1 + $0x2b8] sm:$0xff]  }
  0xab   : > { %2377 = vmatprep.mubr.bf16.mxu1 %v6580_v17 }
  0xac   : > { %7734 = vmatpush3.bf16.msra.mxu0 %v8410_v52  ;;  %v6613_v52 = vld [vmem:[%s8937_s27 + $0x20] sm:$0x33] }
  0xad   : > { %7756 = vmatpush3.bf16.msra.mxu1 %v8411_v53  ;;  %7735 = vmatprep.subr.bf16.mxu0 %v8412_v54  ;;  %v6614_v53 = vld [vmem:[%s8937_s27 + $0x28] sm:$0x33]  ;;  %v6680_v54 = vcombine.high %v6613_v52, %v6613_v52 }
  0xae   : > { %7757 = vmatprep.subr.bf16.mxu1 %v8413_v55  ;;  %v8476_v55 = vld [vmem:[%s10460_s1 + $0x340] sm:$0xff]  }
  0xb0   : > { %7736 = vmatpush3.bf16.msra.mxu0 %v8414_v56  ;;  %v6682_v56 = vcombine.high %v6614_v53, %v6614_v53 }
  0xb1   : > { %7758 = vmatpush3.bf16.msra.mxu1 %v8415_v57  ;;  %7737 = vmatprep.subr.bf16.mxu0 %v8416_v58  ;;  %v8477_v57 = vld [vmem:[%s10460_s1 + $0x3c0] sm:$0xff]   ;;  %v6679_v58 = vcombine.low %v6613_v52, %v6613_v52 }
  0xb2   : > { %7759 = vmatprep.subr.bf16.mxu1 %v8417_v59  ;;  %v8478_v59 = vld [vmem:[%s10460_s1 + $0x300] sm:$0xff]  }
  0xb4   : > { %7738 = vmatpush3.bf16.msra.mxu0 %v8418_v60  ;;  %v6681_v60 = vcombine.low %v6614_v53, %v6614_v53 }
  0xb5   : > { %7760 = vmatpush3.bf16.msra.mxu1 %v8419_v61  ;;  %7739 = vmatprep.subr.bf16.mxu0 %v8420_v62  ;;  %v8479_v61 = vld [vmem:[%s10460_s1 + $0x380] sm:$0xff]   ;;  %v8480_v62 = vld [vmem:[%s10460_s1 + $0x348] sm:$0xff]  }
  0xb6   : > { %7761 = vmatprep.subr.bf16.mxu1 %v8421_v63  ;;  %v8481_v63 = vld [vmem:[%s10460_s1 + $0x3c8] sm:$0xff]  }
  0xb8   : > { %7740 = vmatpush3.bf16.msra.mxu0 %v8422_v0  ;;  %v8482_v0 = vld [vmem:[%s10460_s1 + $0x308] sm:$0xff]  }
  0xb9   : > { %7762 = vmatpush3.bf16.msra.mxu1 %v8423_v1  ;;  %7741 = vmatprep.subr.bf16.mxu0 %v8424_v2  ;;  %v8483_v1 = vld [vmem:[%s10460_s1 + $0x388] sm:$0xff]   ;;  %v8484_v2 = vld [vmem:[%s10460_s1 + $0x350] sm:$0xff]  }
  0xba   : > { %7763 = vmatprep.subr.bf16.mxu1 %v8425_v3  ;;  %v8485_v3 = vld [vmem:[%s10460_s1 + $0x3d0] sm:$0xff]  }
  0xbc   : > { %7742 = vmatpush3.bf16.msra.mxu0 %v8426_v4  ;;  %v8486_v4 = vld [vmem:[%s10460_s1 + $0x310] sm:$0xff]  }
  0xbd   : > { %7764 = vmatpush3.bf16.msra.mxu1 %v8427_v5  ;;  %7743 = vmatprep.subr.bf16.mxu0 %v8428_v6  ;;  %v8487_v5 = vld [vmem:[%s10460_s1 + $0x390] sm:$0xff]   ;;  %v8488_v6 = vld [vmem:[%s10460_s1 + $0x358] sm:$0xff]  }
  0xbe   : > { %7765 = vmatprep.subr.bf16.mxu1 %v8429_v7  ;;  %v8489_v7 = vld [vmem:[%s10460_s1 + $0x3d8] sm:$0xff]  }
  0xc0   : > { %7744 = vmatpush3.bf16.msra.mxu0 %v8430_v8  ;;  %v8490_v8 = vld [vmem:[%s10460_s1 + $0x318] sm:$0xff]  }
  0xc1   : > { %7766 = vmatpush3.bf16.msra.mxu1 %v8431_v9  ;;  %7745 = vmatprep.subr.bf16.mxu0 %v8432_v10  ;;  %v8491_v9 = vld [vmem:[%s10460_s1 + $0x398] sm:$0xff]   ;;  %v8492_v10 = vld [vmem:[%s10460_s1 + $0x360] sm:$0xff]  }
  0xc2   : > { %7767 = vmatprep.subr.bf16.mxu1 %v8433_v11  ;;  %v8493_v11 = vld [vmem:[%s10460_s1 + $0x3e0] sm:$0xff]  }
  0xc4   : > { %7746 = vmatpush3.bf16.msra.mxu0 %v8434_v12  ;;  %v8494_v12 = vld [vmem:[%s10460_s1 + $0x320] sm:$0xff]  }
  0xc5   : > { %7768 = vmatpush3.bf16.msra.mxu1 %v8435_v13  ;;  %7775 = vmatprep.subr.bf16.mxu0 %v8440_v18  ;;  %v8495_v13 = vld [vmem:[%s10460_s1 + $0x3a0] sm:$0xff]   ;;  %v8496_v18 = vld [vmem:[%s10460_s1 + $0x368] sm:$0xff]  }
  0xc6   : > { %7797 = vmatprep.subr.bf16.mxu1 %v8441_v19  ;;  %v8497_v19 = vld [vmem:[%s10460_s1 + $0x3e8] sm:$0xff]  }
  0xc7   : > { %2338 = vmatmul.mubr.bf16.vlgmr.msra.gmra.mrb[20].mxu0 %v6577_v20 }
  0xc8   : > { %2378 = vmatmul.mubr.bf16.vlgmr.msra.gmra.mrb[20].mxu1 %v6579_v22  ;;  %7776 = vmatpush3.bf16.msra.mxu0 %v8442_v21 }
  0xc9   : > { %7798 = vmatpush3.bf16.msra.mxu1 %v8443_v23  ;;  %7777 = vmatprep.subr.bf16.mxu0 %v8444_v24  ;;  %v8498_v24 = vld [vmem:[%s10460_s1 + $0x328] sm:$0xff]  }
  0xca   : > { %7799 = vmatprep.subr.bf16.mxu1 %v8445_v25  ;;  %2690 = vmatprep.mubr.bf16.mxu0 %v6680_v54 }
  0xcb   : > { %2730 = vmatprep.mubr.bf16.mxu1 %v6682_v56 }
  0xcc   : > { %7778 = vmatpush3.bf16.msra.mxu0 %v8446_v26 }
  0xcd   : > { %7800 = vmatpush3.bf16.msra.mxu1 %v8447_v27  ;;  %7779 = vmatprep.subr.bf16.mxu0 %v8448_v28  ;;  %v8499_v27 = vld [vmem:[%s10460_s1 + $0x3a8] sm:$0xff]  }
  0xce   : > { %7801 = vmatprep.subr.bf16.mxu1 %v8449_v29  ;;  %v8500_v29 = vld [vmem:[%s10460_s1 + $0x370] sm:$0xff]  }
  0xd0   : > { %7780 = vmatpush3.bf16.msra.mxu0 %v8450_v30  ;;  %v8501_v30 = vld [vmem:[%s10460_s1 + $0x3f0] sm:$0xff]  }
  0xd1   : > { %7802 = vmatpush3.bf16.msra.mxu1 %v8451_v31  ;;  %7781 = vmatprep.subr.bf16.mxu0 %v8452_v32  ;;  %v8502_v31 = vld [vmem:[%s10460_s1 + $0x330] sm:$0xff]  }
  0xd2   : > { %7803 = vmatprep.subr.bf16.mxu1 %v8453_v33  ;;  %v8503_v32 = vld [vmem:[%s10460_s1 + $0x3b0] sm:$0xff]   ;;  %v8504_v33 = vld [vmem:[%s10460_s1 + $0x378] sm:$0xff]  }
  0xd4   : > { %7782 = vmatpush3.bf16.msra.mxu0 %v8454_v34  ;;  %v8505_v34 = vld [vmem:[%s10460_s1 + $0x3f8] sm:$0xff]  }
  0xd5   : > { %7804 = vmatpush3.bf16.msra.mxu1 %v8455_v35  ;;  %7783 = vmatprep.subr.bf16.mxu0 %v8456_v36  ;;  %v8506_v35 = vld [vmem:[%s10460_s1 + $0x338] sm:$0xff]  }
  0xd6   : > { %7805 = vmatprep.subr.bf16.mxu1 %v8457_v37  ;;  %v8507_v36 = vld [vmem:[%s10460_s1 + $0x3b8] sm:$0xff]   ;;  %v6715_v37 = vld [vmem:[%s8937_s27 + $0x20] sm:$0x77] }
  0xd8   : > { %7784 = vmatpush3.bf16.msra.mxu0 %v8458_v38  ;;  %v6781_v38 = vcombine.low %v6715_v37, %v6715_v37 }
  0xd9   : > { %7806 = vmatpush3.bf16.msra.mxu1 %v8459_v39  ;;  %7785 = vmatprep.subr.bf16.mxu0 %v8460_v40  ;;  %v6782_v39 = vcombine.high %v6715_v37, %v6715_v37  ;;  %v6716_v40 = vld [vmem:[%s8937_s27 + $0x28] sm:$0x77]  ;;  %v8542_v37 = vld [vmem:[%s10460_s1 + $0x138] sm:$0xff]  }
  0xda   : > { %7807 = vmatprep.subr.bf16.mxu1 %v8461_v41  ;;  %v6783_v41 = vcombine.low %v6716_v40, %v6716_v40 }
  0xdc   : > { %7786 = vmatpush3.bf16.msra.mxu0 %v8462_v42  ;;  %v6784_v42 = vcombine.high %v6716_v40, %v6716_v40  ;;  %v2832_v52 = vshll.u32 %v6783_v41, 16 }
  0xdd   : > { %7808 = vmatpush3.bf16.msra.mxu1 %v8463_v43  ;;  %7787 = vmatprep.subr.bf16.mxu0 %v8464_v44  ;;  %v8512_v43 = vld [vmem:[%s10460_s1 + $0x140] sm:$0xff]   ;;  %v2823_v44 = vshrl.u32 %v6782_v39, 16 }
  0xde   : > { %7809 = vmatprep.subr.bf16.mxu1 %v8465_v45  ;;  %v2825_v45 = vshll.u32 %v6782_v39, 16  ;;  %v2834_v56 = vrot.slane %v2832_v52, 1  ;;  %v6820_v39 = vld [vmem:[%s8937_s27 + $0x20] sm:$0x77] }
  0xdf   : > { %v6886_v40 = vcombine.low %v6820_v39, %v6820_v39 }
  0xe0   : > { %7788 = vmatpush3.bf16.msra.mxu0 %v8466_v46  ;;  %v2816_v46 = vshrl.u32 %v6781_v38, 16  ;;  %v2827_v53 = vrot.slane %v2825_v45, 1  ;;  %v8548_v45 = vld [vmem:[%s10460_s1 + $0x40] sm:$0xff]  }
  0xe1   : > { %7810 = vmatpush3.bf16.msra.mxu1 %v8467_v47  ;;  %7789 = vmatprep.subr.bf16.mxu0 %v8468_v48  ;;  %v2818_v47 = vshll.u32 %v6781_v38, 16  ;;  %v8513_v48 = vld [vmem:[%s10460_s1 + $0x1c0] sm:$0xff]   ;;  %v8543_v38 = vld [vmem:[%s10460_s1 + $0x1b8] sm:$0xff]  }
  0xe2   : > { %7811 = vmatprep.subr.bf16.mxu1 %v8469_v49  ;;  %v2837_v49 = vshrl.u32 %v6784_v42, 16 }
  0xe3   : > { %v2820_v54 = vrot.slane %v2818_v47, 1 }
  0xe4   : > { %7790 = vmatpush3.bf16.msra.mxu0 %v8470_v50  ;;  %v2839_v50 = vshll.u32 %v6784_v42, 16  ;;  %v6821_v42 = vld [vmem:[%s8937_s27 + $0x28] sm:$0x77] }
  0xe5   : > { %7812 = vmatpush3.bf16.msra.mxu1 %v8471_v51  ;;  %7819 = vmatprep.subr.bf16.mxu0 %v8476_v55  ;;  %v2830_v51 = vshrl.u32 %v6783_v41, 16  ;;  %v6887_v41 = vcombine.high %v6820_v39, %v6820_v39  ;;  %v8578_v39 = vld [vmem:[%s10460_s1 + $0x38] sm:$0xff]  }
  0xe6   : > { %7841 = vmatprep.subr.bf16.mxu1 %v8477_v57  ;;  %v2841_v55 = vrot.slane %v2839_v50, 1  ;;  %v8514_v57 = vld [vmem:[%s10460_s1 + $0x100] sm:$0xff]  }
  0xe7   : > { %2691 = vmatmul.mubr.bf16.vlgmr.msra.gmra.mrb[24].mxu0 %v6679_v58  ;;  %v8515_v58 = vld [vmem:[%s10460_s1 + $0x180] sm:$0xff]   ;;  %v3277_v47 = vshll.u32 %v6887_v41, 16 }
  0xe8   : > { %2731 = vmatmul.mubr.bf16.vlgmr.msra.gmra.mrb[24].mxu1 %v6681_v60  ;;  %7820 = vmatpush3.bf16.msra.mxu0 %v8478_v59  ;;  %v2828_v59 = vor.u32 %v2827_v53, %v2823_v44  ;;  %v2821_v60 = vor.u32 %v2820_v54, %v2816_v46  ;;  %v6889_v44 = vcombine.high %v6821_v42, %v6821_v42  ;;  %v3275_v46 = vshrl.u32 %v6887_v41, 16  ;;  %v8549_v50 = vld [vmem:[%s10460_s1 + $0xc0] sm:$0xff]  }
  0xe9   : > { %7842 = vmatpush3.bf16.msra.mxu1 %v8479_v61  ;;  %7821 = vmatprep.subr.bf16.mxu0 %v8480_v62  ;;  %v2842_v61 = vor.u32 %v2841_v55, %v2837_v49  ;;  %v2835_v62 = vor.u32 %v2834_v56, %v2830_v51  ;;  %v3270_v49 = vshll.u32 %v6886_v40, 16  ;;  %v3279_v55 = vrot.slane %v3277_v47, 1  ;;  %v6818_v41 = vld [vmem:[%s8937_s27 + $0x20] sm:$0x33] }
  0xea   : > { %7843 = vmatprep.subr.bf16.mxu1 %v8481_v63  ;;  %v8516_v63 = vld [vmem:[%s10460_s1 + $0x148] sm:$0xff]   ;;  %3071 = vmatprep.mubr.bf16.mxu0 %v2828_v59  ;;  %v3289_v51 = vshrl.u32 %v6889_v44, 16  ;;  %v3291_v52 = vshll.u32 %v6889_v44, 16  ;;  %v6922_v47 = vcombine.low %v6818_v41, %v6818_v41 }
  0xeb   : > { %3111 = vmatprep.mubr.bf16.mxu1 %v2842_v61  ;;  %v3272_v56 = vrot.slane %v3270_v49, 1  ;;  %v8552_v61 = vld [vmem:[%s10460_s1 + $0x48] sm:$0xff]  }
  0xec   : > { %7822 = vmatpush3.bf16.msra.mxu0 %v8482_v0  ;;  %v8517_v0 = vld [vmem:[%s10460_s1 + $0x1c8] sm:$0xff]  }
  0xed   : > { %7844 = vmatpush3.bf16.msra.mxu1 %v8483_v1  ;;  %7823 = vmatprep.subr.bf16.mxu0 %v8484_v2  ;;  %v8518_v1 = vld [vmem:[%s10460_s1 + $0x108] sm:$0xff]  }
  0xee   : > { %7845 = vmatprep.subr.bf16.mxu1 %v8485_v3  ;;  %v8519_v2 = vld [vmem:[%s10460_s1 + $0x188] sm:$0xff]   ;;  %v8520_v3 = vld [vmem:[%s10460_s1 + $0x150] sm:$0xff]  }
  0xf0   : > { %7824 = vmatpush3.bf16.msra.mxu0 %v8486_v4  ;;  %v8521_v4 = vld [vmem:[%s10460_s1 + $0x1d0] sm:$0xff]  }
  0xf1   : > { %7846 = vmatpush3.bf16.msra.mxu1 %v8487_v5  ;;  %7825 = vmatprep.subr.bf16.mxu0 %v8488_v6  ;;  %v8522_v5 = vld [vmem:[%s10460_s1 + $0x110] sm:$0xff]  }
  0xf2   : > { %7847 = vmatprep.subr.bf16.mxu1 %v8489_v7  ;;  %v8523_v6 = vld [vmem:[%s10460_s1 + $0x190] sm:$0xff]   ;;  %v8524_v7 = vld [vmem:[%s10460_s1 + $0x158] sm:$0xff]  }
  0xf4   : > { %7826 = vmatpush3.bf16.msra.mxu0 %v8490_v8  ;;  %v8525_v8 = vld [vmem:[%s10460_s1 + $0x1d8] sm:$0xff]  }
  0xf5   : > { %7848 = vmatpush3.bf16.msra.mxu1 %v8491_v9  ;;  %7827 = vmatprep.subr.bf16.mxu0 %v8492_v10  ;;  %v8526_v9 = vld [vmem:[%s10460_s1 + $0x118] sm:$0xff]  }
  0xf6   : > { %7849 = vmatprep.subr.bf16.mxu1 %v8493_v11  ;;  %v8527_v10 = vld [vmem:[%s10460_s1 + $0x198] sm:$0xff]   ;;  %v8528_v11 = vld [vmem:[%s10460_s1 + $0x160] sm:$0xff]  }
  0xf8   : > { %7828 = vmatpush3.bf16.msra.mxu0 %v8494_v12 }
  0xf9   : > { %7850 = vmatpush3.bf16.msra.mxu1 %v8495_v13  ;;  %7829 = vmatprep.subr.bf16.mxu0 %v8496_v18  ;;  %v8529_v13 = vld [vmem:[%s10460_s1 + $0x1e0] sm:$0xff]  }
  0xfa   : > { %v7527_v14 = vpop.f32.mrb[0].mxu0  ;;  %7851 = vmatprep.subr.bf16.mxu1 %v8497_v19 }
  0xfb   : > { %v7549_v15 = vpop.f32.mrb[0].mxu1  ;;  %v7528_v16 = vpop.f32.mrb[1].mxu0 }
  0xfc   : > { %v7550_v17 = vpop.f32.mrb[1].mxu1  ;;  %v7529_v20 = vadd.f32 %v7528_v16, %v7527_v14  ;;  %v7530_v22 = vpop.f32.mrb[2].mxu0  ;;  %7830 = vmatpush3.bf16.msra.mxu0 %v8498_v24  ;;  %v8531_v16 = vld [vmem:[%s10460_s1 + $0x1a0] sm:$0xff]  }
  0xfd   : > { %v7551_v21 = vadd.f32 %v7550_v17, %v7549_v15  ;;  %v7552_v23 = vpop.f32.mrb[2].mxu1  ;;  %v7531_v25 = vpop.f32.mrb[3].mxu0  ;;  %7852 = vmatpush3.bf16.msra.mxu1 %v8499_v27  ;;  %7831 = vmatprep.subr.bf16.mxu0 %v8500_v29  ;;  %v8530_v15 = vld [vmem:[%s10460_s1 + $0x120] sm:$0xff]   ;;  %v8533_v22 = vld [vmem:[%s10460_s1 + $0x1e8] sm:$0xff]  }
  0xfe   : > { %v7553_v28 = vpop.f32.mrb[3].mxu1  ;;  %7853 = vmatprep.subr.bf16.mxu1 %v8501_v30  ;;  %v8534_v27 = vld [vmem:[%s10460_s1 + $0x128] sm:$0xff]  }
  0xff   : > { %v9604_v26 = vadd.f32 %v7551_v21, %v7529_v20  ;;  %v8532_v21 = vld [vmem:[%s10460_s1 + $0x168] sm:$0xff]  }
 0x100   : > { %7832 = vmatpush3.bf16.msra.mxu0 %v8502_v31  ;;  %v8535_v28 = vld [vmem:[%s10460_s1 + $0x1a8] sm:$0xff]   ;;  %v8536_v31 = vld [vmem:[%s10460_s1 + $0x170] sm:$0xff]  }
 0x101   : > { %7854 = vmatpush3.bf16.msra.mxu1 %v8503_v32  ;;  %7833 = vmatprep.subr.bf16.mxu0 %v8504_v33  ;;  %v8538_v33 = vld [vmem:[%s10460_s1 + $0x130] sm:$0xff]  }
 0x102   : > { %7855 = vmatprep.subr.bf16.mxu1 %v8505_v34  ;;  %v8539_v34 = vld [vmem:[%s10460_s1 + $0x1b0] sm:$0xff]  }
 0x104   : > { %7834 = vmatpush3.bf16.msra.mxu0 %v8506_v35  ;;  %v8540_v35 = vld [vmem:[%s10460_s1 + $0x178] sm:$0xff]  }
 0x105   : > { %7856 = vmatpush3.bf16.msra.mxu1 %v8507_v36  ;;  %7863 = vmatprep.subr.bf16.mxu0 %v8512_v43  ;;  %v8541_v36 = vld [vmem:[%s10460_s1 + $0x1f8] sm:$0xff]   ;;  %v6888_v43 = vcombine.low %v6821_v42, %v6821_v42  ;;  %v6923_v42 = vcombine.high %v6818_v41, %v6818_v41  ;;  %v8624_v41 = vld [vmem:[%s10460_s1 + $0x348] sm:$0xff]  }
 0x106   : > { %7885 = vmatprep.subr.bf16.mxu1 %v8513_v48  ;;  %v3268_v48 = vshrl.u32 %v6886_v40, 16  ;;  %v8579_v40 = vld [vmem:[%s10460_s1 + $0xb8] sm:$0xff]  }
 0x107   : > { %3072 = vmatmul.mubr.bf16.vlgmr.msra.gmra.mrb[28].mxu0 %v2821_v60  ;;  %v3282_v53 = vshrl.u32 %v6888_v43, 16  ;;  %v3284_v54 = vshll.u32 %v6888_v43, 16  ;;  %v8551_v60 = vld [vmem:[%s10460_s1 + $0x80] sm:$0xff]   ;;  %v6819_v43 = vld [vmem:[%s8937_s27 + $0x28] sm:$0x33] }
 0x108   : > { %3112 = vmatmul.mubr.bf16.vlgmr.msra.gmra.mrb[28].mxu1 %v2835_v62  ;;  %7864 = vmatpush3.bf16.msra.mxu0 %v8514_v57  ;;  %v8550_v57 = vld [vmem:[%s10460_s1] sm:$0xff]   ;;  %v3280_v62 = vor.u32 %v3279_v55, %v3275_v46  ;;  %v6925_v44 = vcombine.high %v6819_v43, %v6819_v43  ;;  %v6924_v49 = vcombine.low %v6819_v43, %v6819_v43  ;;  %v8592_v55 = vld [vmem:[%s10460_s1 + $0x250] sm:$0xff]   ;;  %v8626_v43 = vld [vmem:[%s10460_s1 + $0x308] sm:$0xff]  }
 0x109   : > { %7886 = vmatpush3.bf16.msra.mxu1 %v8515_v58  ;;  %7865 = vmatprep.subr.bf16.mxu0 %v8516_v63  ;;  %v3293_v58 = vrot.slane %v3291_v52, 1  ;;  %v3286_v59 = vrot.slane %v3284_v54, 1  ;;  %v3273_v63 = vor.u32 %v3272_v56, %v3268_v48  ;;  %v8585_v46 = vld [vmem:[%s10460_s1 + $0x2c0] sm:$0xff]   ;;  %v8589_v52 = vld [vmem:[%s10460_s1 + $0x2c8] sm:$0xff]   ;;  %v8593_v56 = vld [vmem:[%s10460_s1 + $0x2d0] sm:$0xff]  }
 0x10a   : > { %7887 = vmatprep.subr.bf16.mxu1 %v8517_v0  ;;  %3523 = vmatprep.mubr.bf16.mxu0 %v3280_v62  ;;  %v8586_v48 = vld [vmem:[%s10460_s1 + $0x200] sm:$0xff]   ;;  %v8591_v54 = vld [vmem:[%s10460_s1 + $0x288] sm:$0xff]   ;;  %v8599_v62 = vld [vmem:[%s10460_s1 + $0x298] sm:$0xff]  }
 0x10b   : > { %v3294_v0 = vor.u32 %v3293_v58, %v3289_v51  ;;  %v8588_v51 = vld [vmem:[%s10460_s1 + $0x248] sm:$0xff]   ;;  %v8595_v58 = vld [vmem:[%s10460_s1 + $0x290] sm:$0xff]  }
 0x10c   : > { %7866 = vmatpush3.bf16.msra.mxu0 %v8518_v1  ;;  %v3287_v1 = vor.u32 %v3286_v59, %v3282_v53  ;;  %v8590_v53 = vld [vmem:[%s10460_s1 + $0x208] sm:$0xff]   ;;  %v8596_v59 = vld [vmem:[%s10460_s1 + $0x258] sm:$0xff]  }
 0x10d   : > { %7888 = vmatpush3.bf16.msra.mxu1 %v8519_v2  ;;  %7867 = vmatprep.subr.bf16.mxu0 %v8520_v3  ;;  %v8553_v2 = vld [vmem:[%s10460_s1 + $0xc8] sm:$0xff]  }
 0x10e   : > { %7889 = vmatprep.subr.bf16.mxu1 %v8521_v4  ;;  %v8554_v3 = vld [vmem:[%s10460_s1 + $0x8] sm:$0xff]   ;;  %3563 = vmatprep.mubr.bf16.mxu1 %v3294_v0  ;;  %v8601_v0 = vld [vmem:[%s10460_s1 + $0x2e0] sm:$0xff]  }
 0x10f   : > { %v8555_v4 = vld [vmem:[%s10460_s1 + $0x88] sm:$0xff]  }
 0x110   : > { %7868 = vmatpush3.bf16.msra.mxu0 %v8522_v5  ;;  %v8556_v5 = vld [vmem:[%s10460_s1 + $0x50] sm:$0xff]  }
 0x111   : > { %7890 = vmatpush3.bf16.msra.mxu1 %v8523_v6  ;;  %7869 = vmatprep.subr.bf16.mxu0 %v8524_v7  ;;  %v8557_v6 = vld [vmem:[%s10460_s1 + $0xd0] sm:$0xff]  }
 0x112   : > { %7891 = vmatprep.subr.bf16.mxu1 %v8525_v8  ;;  %v8558_v7 = vld [vmem:[%s10460_s1 + $0x10] sm:$0xff]  }
 0x113   : > { %v8559_v8 = vld [vmem:[%s10460_s1 + $0x90] sm:$0xff]  }
 0x114   : > { %7870 = vmatpush3.bf16.msra.mxu0 %v8526_v9  ;;  %v8560_v9 = vld [vmem:[%s10460_s1 + $0x58] sm:$0xff]  }
 0x115   : > { %7892 = vmatpush3.bf16.msra.mxu1 %v8527_v10  ;;  %7871 = vmatprep.subr.bf16.mxu0 %v8528_v11  ;;  %v8561_v10 = vld [vmem:[%s10460_s1 + $0xd8] sm:$0xff]  }
 0x116   : > { %7893 = vmatprep.subr.bf16.mxu1 %v8529_v13  ;;  %v8562_v11 = vld [vmem:[%s10460_s1 + $0x18] sm:$0xff]  }
 0x118   : > { %7872 = vmatpush3.bf16.msra.mxu0 %v8530_v15 }
 0x119   : > { %7894 = vmatpush3.bf16.msra.mxu1 %v8531_v16  ;;  %7873 = vmatprep.subr.bf16.mxu0 %v8532_v21  ;;  %v8565_v16 = vld [vmem:[%s10460_s1 + $0xe0] sm:$0xff]  }
 0x11a   : > { %v7571_v12 = vpop.f32.mrb[4].mxu0  ;;  %7895 = vmatprep.subr.bf16.mxu1 %v8533_v22  ;;  %v8567_v21 = vld [vmem:[%s10460_s1 + $0xa0] sm:$0xff]  }
 0x11b   : > { %v7593_v14 = vpop.f32.mrb[4].mxu1  ;;  %v7572_v17 = vpop.f32.mrb[5].mxu0 }
 0x11c   : > { %v7594_v18 = vpop.f32.mrb[5].mxu1  ;;  %v7573_v19 = vadd.f32 %v7572_v17, %v7571_v12  ;;  %v7574_v23 = vpop.f32.mrb[6].mxu0  ;;  %7874 = vmatpush3.bf16.msra.mxu0 %v8534_v27  ;;  %v8563_v12 = vld [vmem:[%s10460_s1 + $0x98] sm:$0xff]  }
 0x11d   : > { %v7595_v20 = vadd.f32 %v7594_v18, %v7593_v14  ;;  %v7596_v24 = vpop.f32.mrb[6].mxu1  ;;  %v7575_v29 = vpop.f32.mrb[7].mxu0  ;;  %7896 = vmatpush3.bf16.msra.mxu1 %v8535_v28  ;;  %7875 = vmatprep.subr.bf16.mxu0 %v8536_v31  ;;  %v8564_v14 = vld [vmem:[%s10460_s1 + $0x60] sm:$0xff]   ;;  %v8569_v28 = vld [vmem:[%s10460_s1 + $0xe8] sm:$0xff]  }
 0x11e   : > { %v861_v25 = vadd.f32 %v7573_v19, %v9604_v26  ;;  %v7597_v30 = vpop.f32.mrb[7].mxu1  ;;  %v8537_v26 = vld [vmem:[%s10460_s1 + $0x1f0] sm:$0xff]   ;;  %v8566_v18 = vld [vmem:[%s10460_s1 + $0x20] sm:$0xff]   ;;  %v8568_v24 = vld [vmem:[%s10460_s1 + $0x68] sm:$0xff]  }
 0x11f   : > { %7897 = vmatprep.subr.bf16.mxu1 %v8537_v26  ;;  %v8570_v30 = vld [vmem:[%s10460_s1 + $0x28] sm:$0xff]  }
 0x120   : > { %v9711_v32 = vadd.f32 %v7595_v20, %v861_v25  ;;  %7876 = vmatpush3.bf16.msra.mxu0 %v8538_v33  ;;  %v8571_v33 = vld [vmem:[%s10460_s1 + $0xa8] sm:$0xff]  }
 0x121   : > { %7898 = vmatpush3.bf16.msra.mxu1 %v8539_v34  ;;  %7877 = vmatprep.subr.bf16.mxu0 %v8540_v35  ;;  %v8572_v34 = vld [vmem:[%s10460_s1 + $0x70] sm:$0xff]  }
 0x122   : > { %7899 = vmatprep.subr.bf16.mxu1 %v8541_v36  ;;  %v8573_v35 = vld [vmem:[%s10460_s1 + $0xf0] sm:$0xff]  }
 0x123   : > { %v8575_v36 = vld [vmem:[%s10460_s1 + $0xb0] sm:$0xff]  }
 0x124   : > { %7878 = vmatpush3.bf16.msra.mxu0 %v8542_v37  ;;  %v8576_v37 = vld [vmem:[%s10460_s1 + $0x78] sm:$0xff]  }
 0x125   : > { %7900 = vmatpush3.bf16.msra.mxu1 %v8543_v38  ;;  %7907 = vmatprep.subr.bf16.mxu0 %v8548_v45  ;;  %v8577_v38 = vld [vmem:[%s10460_s1 + $0xf8] sm:$0xff]   ;;  %v8584_v45 = vld [vmem:[%s10460_s1 + $0x240] sm:$0xff]  }
 0x126   : > { %7929 = vmatprep.subr.bf16.mxu1 %v8549_v50  ;;  %v8587_v50 = vld [vmem:[%s10460_s1 + $0x280] sm:$0xff]  }
 0x127   : > { %3524 = vmatmul.mubr.bf16.vlgmr.msra.gmra.mrb[32].mxu0 %v3273_v63  ;;  %v8600_v63 = vld [vmem:[%s10460_s1 + $0x260] sm:$0xff]  }
 0x128   : > { %3564 = vmatmul.mubr.bf16.vlgmr.msra.gmra.mrb[32].mxu1 %v3287_v1  ;;  %7908 = vmatpush3.bf16.msra.mxu0 %v8550_v57  ;;  %v8594_v57 = vld [vmem:[%s10460_s1 + $0x210] sm:$0xff]  }
 0x129   : > { %7930 = vmatpush3.bf16.msra.mxu1 %v8551_v60  ;;  %7909 = vmatprep.subr.bf16.mxu0 %v8552_v61  ;;  %v8597_v60 = vld [vmem:[%s10460_s1 + $0x2d8] sm:$0xff]  }
 0x12a   : > { %7931 = vmatprep.subr.bf16.mxu1 %v8553_v2  ;;  %3809 = vmatprep.mubr.bf16.mxu0 %v6923_v42  ;;  %v8598_v61 = vld [vmem:[%s10460_s1 + $0x218] sm:$0xff]   ;;  %v8625_v42 = vld [vmem:[%s10460_s1 + $0x3c8] sm:$0xff]  }
 0x12b   : > { %3849 = vmatprep.mubr.bf16.mxu1 %v6925_v44  ;;  %v8627_v44 = vld [vmem:[%s10460_s1 + $0x388] sm:$0xff]  }
 0x12c   : > { %7910 = vmatpush3.bf16.msra.mxu0 %v8554_v3  ;;  %v8602_v3 = vld [vmem:[%s10460_s1 + $0x220] sm:$0xff]  }
 0x12d   : > { %7932 = vmatpush3.bf16.msra.mxu1 %v8555_v4  ;;  %7911 = vmatprep.subr.bf16.mxu0 %v8556_v5  ;;  %v8603_v4 = vld [vmem:[%s10460_s1 + $0x2a0] sm:$0xff]  }
 0x12e   : > { %7933 = vmatprep.subr.bf16.mxu1 %v8557_v6 }
 0x130   : > { %7912 = vmatpush3.bf16.msra.mxu0 %v8558_v7  ;;  %v8604_v7 = vld [vmem:[%s10460_s1 + $0x268] sm:$0xff]  }
 0x131   : > { %7934 = vmatpush3.bf16.msra.mxu1 %v8559_v8  ;;  %7913 = vmatprep.subr.bf16.mxu0 %v8560_v9 }
 0x132   : > { %7935 = vmatprep.subr.bf16.mxu1 %v8561_v10  ;;  %v6472_v10 = vld [vmem:[%s10461_s2] ss:$0 sm:$0xff] }
 0x134   : > { %7914 = vmatpush3.bf16.msra.mxu0 %v8562_v11  ;;  %v8605_v11 = vld [vmem:[%s10460_s1 + $0x2e8] sm:$0xff]  }
 0x135   : > { %7936 = vmatpush3.bf16.msra.mxu1 %v8563_v12  ;;  %7915 = vmatprep.subr.bf16.mxu0 %v8564_v14  ;;  %v8606_v14 = vld [vmem:[%s10460_s1 + $0x228] sm:$0xff]  }
 0x136   : > { %7937 = vmatprep.subr.bf16.mxu1 %v8565_v16  ;;  %v8607_v16 = vld [vmem:[%s10460_s1 + $0x2a8] sm:$0xff]  }
 0x138   : > { %7916 = vmatpush3.bf16.msra.mxu0 %v8566_v18 }
 0x139   : > { %7938 = vmatpush3.bf16.msra.mxu1 %v8567_v21  ;;  %7917 = vmatprep.subr.bf16.mxu0 %v8568_v24  ;;  %v8609_v21 = vld [vmem:[%s10460_s1 + $0x2f0] sm:$0xff]  }
 0x13a   : > { %v7615_v13 = vpop.f32.mrb[8].mxu0  ;;  %7939 = vmatprep.subr.bf16.mxu1 %v8569_v28  ;;  %v8611_v24 = vld [vmem:[%s10460_s1 + $0x2b0] sm:$0xff]   ;;  %v8613_v28 = vld [vmem:[%s10460_s1 + $0x2f8] sm:$0xff]  }
 0x13b   : > { %v7637_v15 = vpop.f32.mrb[8].mxu1  ;;  %v7616_v17 = vpop.f32.mrb[9].mxu0 }
 0x13c   : > { %v7617_v19 = vadd.f32 %v7616_v17, %v7615_v13  ;;  %v7638_v20 = vpop.f32.mrb[9].mxu1  ;;  %v7618_v23 = vpop.f32.mrb[10].mxu0  ;;  %7918 = vmatpush3.bf16.msra.mxu0 %v8570_v30  ;;  %v8614_v30 = vld [vmem:[%s10460_s1 + $0x238] sm:$0xff]  }
 0x13d   : > { %v7639_v22 = vadd.f32 %v7638_v20, %v7637_v15  ;;  %v7640_v25 = vpop.f32.mrb[10].mxu1  ;;  %v7619_v29 = vpop.f32.mrb[11].mxu0  ;;  %7940 = vmatpush3.bf16.msra.mxu1 %v8571_v33  ;;  %7919 = vmatprep.subr.bf16.mxu0 %v8572_v34  ;;  %v8610_v23 = vld [vmem:[%s10460_s1 + $0x230] sm:$0xff]   ;;  %v6959_v34 = vld [vmem:[%s8937_s27 + $0x38] sm:$0x33] }
 0x13e   : > { %v7641_v31 = vpop.f32.mrb[11].mxu1  ;;  %7941 = vmatprep.subr.bf16.mxu1 %v8573_v35  ;;  %v7027_v35 = vcombine.high %v6959_v34, %v6959_v34 }
 0x13f   : > { %v1255_v27 = vadd.f32 %v7639_v22, %v7617_v19  ;;  %v8608_v19 = vld [vmem:[%s10460_s1 + $0x270] sm:$0xff]   ;;  %v8615_v31 = vld [vmem:[%s10460_s1 + $0x2b8] sm:$0xff]  }
 0x141   : > { %v9806_v26 = vadd.f32 %v1255_v27, %v9711_v32  ;;  %v8574_v32 = vld [vmem:[%s10460_s1 + $0x30] sm:$0xff]   ;;  %7942 = vmatpush3.bf16.msra.mxu1 %v8575_v36  ;;  %v8612_v27 = vld [vmem:[%s10460_s1 + $0x278] sm:$0xff]  }
 0x142   : > { %7920 = vmatpush3.bf16.msra.mxu0 %v8574_v32  ;;  %7943 = vmatprep.subr.bf16.mxu1 %v8577_v38  ;;  %v8620_v32 = vld [vmem:[%s10460_s1 + $0x340] sm:$0xff]   ;;  %v7026_v38 = vcombine.low %v6959_v34, %v6959_v34 }
 0x143   : > { %7921 = vmatprep.subr.bf16.mxu0 %v8576_v37  ;;  %v8621_v37 = vld [vmem:[%s10460_s1 + $0x3c0] sm:$0xff]  }
 0x145   : > { %7944 = vmatpush3.bf16.msra.mxu1 %v8579_v40  ;;  %v8623_v40 = vld [vmem:[%s10460_s1 + $0x380] sm:$0xff]  }
 0x146   : > { %7922 = vmatpush3.bf16.msra.mxu0 %v8578_v39  ;;  %7973 = vmatprep.subr.bf16.mxu1 %v8585_v46  ;;  %v8622_v39 = vld [vmem:[%s10460_s1 + $0x300] sm:$0xff]   ;;  %v8629_v46 = vld [vmem:[%s10460_s1 + $0x3d0] sm:$0xff]  }
 0x147   : > { %7951 = vmatprep.subr.bf16.mxu0 %v8584_v45  ;;  %v8628_v45 = vld [vmem:[%s10460_s1 + $0x350] sm:$0xff]  }
 0x148   : > { %3850 = vmatmul.mubr.bf16.vlgmr.msra.gmra.mrb[36].mxu1 %v6924_v49  ;;  %v8632_v49 = vld [vmem:[%s10460_s1 + $0x358] sm:$0xff]  }
 0x149   : > { %3810 = vmatmul.mubr.bf16.vlgmr.msra.gmra.mrb[36].mxu0 %v6922_v47  ;;  %7974 = vmatpush3.bf16.msra.mxu1 %v8587_v50  ;;  %v8630_v47 = vld [vmem:[%s10460_s1 + $0x310] sm:$0xff]   ;;  %v8633_v50 = vld [vmem:[%s10460_s1 + $0x3d8] sm:$0xff]  }
 0x14a   : > { %7952 = vmatpush3.bf16.msra.mxu0 %v8586_v48  ;;  %7975 = vmatprep.subr.bf16.mxu1 %v8589_v52  ;;  %v8631_v48 = vld [vmem:[%s10460_s1 + $0x390] sm:$0xff]   ;;  %v8635_v52 = vld [vmem:[%s10460_s1 + $0x398] sm:$0xff]  }
 0x14b   : > { %7953 = vmatprep.subr.bf16.mxu0 %v8588_v51  ;;  %4202 = vmatprep.mubr.bf16.mxu1 %v7027_v35  ;;  %v8634_v51 = vld [vmem:[%s10460_s1 + $0x318] sm:$0xff]   ;;  %v8658_v35 = vld [vmem:[%s10460_s1 + $0x100] sm:$0xff]  }
 0x14d   : > { %7976 = vmatpush3.bf16.msra.mxu1 %v8591_v54  ;;  %v8637_v54 = vld [vmem:[%s10460_s1 + $0x3e0] sm:$0xff]  }
 0x14e   : > { %7954 = vmatpush3.bf16.msra.mxu0 %v8590_v53  ;;  %7977 = vmatprep.subr.bf16.mxu1 %v8593_v56  ;;  %v8636_v53 = vld [vmem:[%s10460_s1 + $0x360] sm:$0xff]  }
 0x14f   : > { %7955 = vmatprep.subr.bf16.mxu0 %v8592_v55  ;;  %v8638_v55 = vld [vmem:[%s10460_s1 + $0x320] sm:$0xff]  }
 0x151   : > { %7978 = vmatpush3.bf16.msra.mxu1 %v8595_v58 }
 0x152   : > { %7956 = vmatpush3.bf16.msra.mxu0 %v8594_v57  ;;  %7979 = vmatprep.subr.bf16.mxu1 %v8597_v60  ;;  %v8639_v57 = vld [vmem:[%s10460_s1 + $0x3a0] sm:$0xff]   ;;  %v8640_v60 = vld [vmem:[%s10460_s1 + $0x368] sm:$0xff]  }
 0x153   : > { %7957 = vmatprep.subr.bf16.mxu0 %v8596_v59 }
 0x155   : > { %7980 = vmatpush3.bf16.msra.mxu1 %v8599_v62 }
 0x156   : > { %7958 = vmatpush3.bf16.msra.mxu0 %v8598_v61  ;;  %7981 = vmatprep.subr.bf16.mxu1 %v8601_v0 }
 0x157   : > { %7959 = vmatprep.subr.bf16.mxu0 %v8600_v63  ;;  %v8641_v63 = vld [vmem:[%s10460_s1 + $0x3e8] sm:$0xff]  }
 0x159   : > { %7982 = vmatpush3.bf16.msra.mxu1 %v8603_v4 }
 0x15a   : > { %v7659_v1 = vpop.f32.mrb[12].mxu0  ;;  %7960 = vmatpush3.bf16.msra.mxu0 %v8602_v3  ;;  %7983 = vmatprep.subr.bf16.mxu1 %v8605_v11  ;;  %v8642_v3 = vld [vmem:[%s10460_s1 + $0x328] sm:$0xff]   ;;  %v8647_v11 = vld [vmem:[%s10460_s1 + $0x3b0] sm:$0xff]  }
 0x15b   : > { %v7681_v2 = vpop.f32.mrb[12].mxu1  ;;  %v7660_v5 = vpop.f32.mrb[13].mxu0  ;;  %7961 = vmatprep.subr.bf16.mxu0 %v8604_v7 }
 0x15c   : > { %v7682_v6 = vpop.f32.mrb[13].mxu1  ;;  %v7661_v8 = vadd.f32 %v7660_v5, %v7659_v1  ;;  %v7662_v12 = vpop.f32.mrb[14].mxu0 }
 0x15d   : > { %v7683_v9 = vadd.f32 %v7682_v6, %v7681_v2  ;;  %v7684_v13 = vpop.f32.mrb[14].mxu1  ;;  %v7663_v17 = vpop.f32.mrb[15].mxu0  ;;  %7984 = vmatpush3.bf16.msra.mxu1 %v8607_v16  ;;  %v8643_v6 = vld [vmem:[%s10460_s1 + $0x3a8] sm:$0xff]   ;;  %v8648_v12 = vld [vmem:[%s10460_s1 + $0x378] sm:$0xff]   ;;  %v7060_v16 = vld [vmem:[%s8937_s27 + $0x30] sm:$0x77] }
 0x15e   : > { %v7685_v18 = vpop.f32.mrb[15].mxu1  ;;  %7962 = vmatpush3.bf16.msra.mxu0 %v8606_v14  ;;  %7985 = vmatprep.subr.bf16.mxu1 %v8609_v21  ;;  %v8649_v13 = vld [vmem:[%s10460_s1 + $0x3f8] sm:$0xff]   ;;  %v7126_v17 = vcombine.low %v7060_v16, %v7060_v16 }
 0x15f   : > { %v1637_v15 = vadd.f32 %v7683_v9, %v7661_v8  ;;  %7963 = vmatprep.subr.bf16.mxu0 %v8608_v19  ;;  %v8644_v8 = vld [vmem:[%s10460_s1 + $0x370] sm:$0xff]   ;;  %v8650_v14 = vld [vmem:[%s10460_s1 + $0x338] sm:$0xff]   ;;  %v7127_v18 = vcombine.high %v7060_v16, %v7060_v16 }
 0x160   : > { %v8645_v9 = vld [vmem:[%s10460_s1 + $0x3f0] sm:$0xff]   ;;  %v7061_v19 = vld [vmem:[%s8937_s27 + $0x38] sm:$0x77] }
 0x161   : > { %v1642_v20 = vadd.f32 %v1637_v15, %v9806_v26  ;;  %v6958_v26 = vld [vmem:[%s8937_s27 + $0x30] sm:$0x33]  ;;  %7986 = vmatpush3.bf16.msra.mxu1 %v8611_v24  ;;  %v8651_v15 = vld [vmem:[%s10460_s1 + $0x3b8] sm:$0xff]   ;;  %v7129_v21 = vcombine.high %v7061_v19, %v7061_v19  ;;  %v4297_v24 = vshll.u32 %v7127_v18, 16 }
 0x162   : > { %7964 = vmatpush3.bf16.msra.mxu0 %v8610_v23  ;;  %v7025_v33 = vcombine.high %v6958_v26, %v6958_v26  ;;  %7987 = vmatprep.subr.bf16.mxu1 %v8613_v28  ;;  %v7024_v36 = vcombine.low %v6958_v26, %v6958_v26  ;;  %v4295_v23 = vshrl.u32 %v7127_v18, 16  ;;  %v8657_v28 = vld [vmem:[%s10460_s1 + $0x1c0] sm:$0xff]   ;;  %v8686_v16 = vld [vmem:[%s10460_s1 + $0x138] sm:$0xff]   ;;  %v7165_v18 = vld [vmem:[%s8937_s27 + $0x30] sm:$0x77] }
 0x163   : > { %v1649_v22 = vadd.f32 %v6472_v10, %v1642_v20  ;;  %7965 = vmatprep.subr.bf16.mxu0 %v8612_v27  ;;  %v8646_v10 = vld [vmem:[%s10460_s1 + $0x330] sm:$0xff]   ;;  %v7128_v20 = vcombine.low %v7061_v19, %v7061_v19  ;;  %v4290_v27 = vshll.u32 %v7126_v17, 16  ;;  %v7231_v19 = vcombine.low %v7165_v18, %v7165_v18 }
 0x164   : > { %4162 = vmatprep.mubr.bf16.mxu0 %v7025_v33  ;;  %v4299_v33 = vrot.slane %v4297_v24, 1  ;;  %v8692_v24 = vld [vmem:[%s10460_s1 + $0x40] sm:$0xff]  }
 0x165   : > { %v1650_v25 = vmax.f32 %v1649_v22, 0.0  ;;  %7988 = vmatpush3.bf16.msra.mxu1 %v8615_v31  ;;  %v8656_v22 = vld [vmem:[%s10460_s1 + $0x140] sm:$0xff]   ;;  %v4302_v31 = vshrl.u32 %v7128_v20, 16  ;;  %v4304_v26 = vshll.u32 %v7128_v20, 16  ;;  %v4292_v34 = vrot.slane %v4290_v27, 1 }
 0x166   : > { %7966 = vmatpush3.bf16.msra.mxu0 %v8614_v30  ;;  %8017 = vmatprep.subr.bf16.mxu1 %v8621_v37  ;;  %v4311_v30 = vshll.u32 %v7129_v21, 16  ;;  %v8659_v37 = vld [vmem:[%s10460_s1 + $0x180] sm:$0xff]   ;;  %v7232_v20 = vcombine.high %v7165_v18, %v7165_v18  ;;  %v8722_v18 = vld [vmem:[%s10460_s1 + $0x38] sm:$0xff]  }
 0x167   : > { %v1651_v29 = vpack.c.bf16 %v1650_v25, %v1650_v25  ;;  %7995 = vmatprep.subr.bf16.mxu0 %v8620_v32  ;;  %v4288_v25 = vshrl.u32 %v7126_v17, 16  ;;  %v8687_v17 = vld [vmem:[%s10460_s1 + $0x1b8] sm:$0xff]  }
 0x168   : > { %4203 = vmatmul.mubr.bf16.vlgmr.msra.gmra.mrb[40].mxu1 %v7026_v38  ;;  %v4313_v32 = vrot.slane %v4311_v30, 1  ;;  %v8660_v38 = vld [vmem:[%s10460_s1 + $0x148] sm:$0xff]   ;;  %v4749_v27 = vshll.u32 %v7232_v20, 16  ;;  %v8693_v30 = vld [vmem:[%s10460_s1 + $0xc0] sm:$0xff]  }
 0x169   : > { %1652 = vst [vmem:[%s9932_s21] sm:$0x3] %v1651_v29  ;;  %4163 = vmatmul.mubr.bf16.vlgmr.msra.gmra.mrb[40].mxu0 %v7024_v36  ;;  %8018 = vmatpush3.bf16.msra.mxu1 %v8623_v40  ;;  %v4309_v29 = vshrl.u32 %v7129_v21, 16  ;;  %v4306_v36 = vrot.slane %v4304_v26, 1  ;;  %v4293_v40 = vor.u32 %v4292_v34, %v4288_v25  ;;  %v7166_v21 = vld [vmem:[%s8937_s27 + $0x38] sm:$0x77]  ;;  %v4747_v25 = vshrl.u32 %v7232_v20, 16 }
 0x16a   : > { %7996 = vmatpush3.bf16.msra.mxu0 %v8622_v39  ;;  %8019 = vmatprep.subr.bf16.mxu1 %v8625_v42  ;;  %v4300_v39 = vor.u32 %v4299_v33, %v4295_v23  ;;  %v7234_v23 = vcombine.high %v7166_v21, %v7166_v21  ;;  %v7163_v20 = vld [vmem:[%s8937_s27 + $0x30] sm:$0x33] }
 0x16b   : > { %7997 = vmatprep.subr.bf16.mxu0 %v8624_v41  ;;  %v4314_v41 = vor.u32 %v4313_v32, %v4309_v29  ;;  %v4307_v42 = vor.u32 %v4306_v36, %v4302_v31  ;;  %v4742_v29 = vshll.u32 %v7231_v19, 16  ;;  %v8694_v36 = vld [vmem:[%s10460_s1] sm:$0xff]  }
 0x16c   : > { %4543 = vmatprep.mubr.bf16.mxu0 %v4300_v39  ;;  %v4761_v31 = vshrl.u32 %v7234_v23, 16  ;;  %v4763_v26 = vshll.u32 %v7234_v23, 16  ;;  %v8695_v39 = vld [vmem:[%s10460_s1 + $0x80] sm:$0xff]  }
 0x16d   : > { %8020 = vmatpush3.bf16.msra.mxu1 %v8627_v44  ;;  %v8662_v44 = vld [vmem:[%s10460_s1 + $0x108] sm:$0xff]   ;;  %4583 = vmatprep.mubr.bf16.mxu1 %v4314_v41  ;;  %v4744_v32 = vrot.slane %v4742_v29, 1 }
 0x16e   : > { %7998 = vmatpush3.bf16.msra.mxu0 %v8626_v43  ;;  %8021 = vmatprep.subr.bf16.mxu1 %v8629_v46  ;;  %v8661_v43 = vld [vmem:[%s10460_s1 + $0x1c8] sm:$0xff]   ;;  %v8664_v46 = vld [vmem:[%s10460_s1 + $0x150] sm:$0xff]  }
 0x16f   : > { %7999 = vmatprep.subr.bf16.mxu0 %v8628_v45  ;;  %v8663_v45 = vld [vmem:[%s10460_s1 + $0x188] sm:$0xff]  }
 0x171   : > { %8022 = vmatpush3.bf16.msra.mxu1 %v8631_v48  ;;  %v8666_v48 = vld [vmem:[%s10460_s1 + $0x110] sm:$0xff]  }
 0x172   : > { %8000 = vmatpush3.bf16.msra.mxu0 %v8630_v47  ;;  %8023 = vmatprep.subr.bf16.mxu1 %v8633_v50  ;;  %v8665_v47 = vld [vmem:[%s10460_s1 + $0x1d0] sm:$0xff]   ;;  %v8668_v50 = vld [vmem:[%s10460_s1 + $0x158] sm:$0xff]  }
 0x173   : > { %8001 = vmatprep.subr.bf16.mxu0 %v8632_v49  ;;  %v8667_v49 = vld [vmem:[%s10460_s1 + $0x190] sm:$0xff]  }
 0x175   : > { %8024 = vmatpush3.bf16.msra.mxu1 %v8635_v52  ;;  %v8670_v52 = vld [vmem:[%s10460_s1 + $0x118] sm:$0xff]  }
 0x176   : > { %8002 = vmatpush3.bf16.msra.mxu0 %v8634_v51  ;;  %8025 = vmatprep.subr.bf16.mxu1 %v8637_v54  ;;  %v8669_v51 = vld [vmem:[%s10460_s1 + $0x1d8] sm:$0xff]   ;;  %v8672_v54 = vld [vmem:[%s10460_s1 + $0x160] sm:$0xff]  }
 0x177   : > { %8003 = vmatprep.subr.bf16.mxu0 %v8636_v53  ;;  %v8671_v53 = vld [vmem:[%s10460_s1 + $0x198] sm:$0xff]  }
 0x179   : > { %8026 = vmatpush3.bf16.msra.mxu1 %v8639_v57 }
 0x17a   : > { %v7703_v56 = vpop.f32.mrb[16].mxu0  ;;  %8004 = vmatpush3.bf16.msra.mxu0 %v8638_v55  ;;  %8027 = vmatprep.subr.bf16.mxu1 %v8641_v63 }
 0x17b   : > { %v7725_v58 = vpop.f32.mrb[16].mxu1  ;;  %v7704_v59 = vpop.f32.mrb[17].mxu0  ;;  %8005 = vmatprep.subr.bf16.mxu0 %v8640_v60  ;;  %v8675_v60 = vld [vmem:[%s10460_s1 + $0x1a0] sm:$0xff]  }
 0x17c   : > { %v7705_v61 = vadd.f32 %v7704_v59, %v7703_v56  ;;  %v7726_v62 = vpop.f32.mrb[17].mxu1  ;;  %v7706_v1 = vpop.f32.mrb[18].mxu0  ;;  %v8673_v56 = vld [vmem:[%s10460_s1 + $0x1e0] sm:$0xff]  }
 0x17d   : > { %v7727_v0 = vadd.f32 %v7726_v62, %v7725_v58  ;;  %v7728_v2 = vpop.f32.mrb[18].mxu1  ;;  %v7707_v4 = vpop.f32.mrb[19].mxu0  ;;  %8028 = vmatpush3.bf16.msra.mxu1 %v8643_v6  ;;  %v8674_v58 = vld [vmem:[%s10460_s1 + $0x120] sm:$0xff]   ;;  %v8678_v6 = vld [vmem:[%s10460_s1 + $0x128] sm:$0xff]  }
 0x17e   : > { %v7729_v7 = vpop.f32.mrb[19].mxu1  ;;  %8006 = vmatpush3.bf16.msra.mxu0 %v8642_v3  ;;  %8029 = vmatprep.subr.bf16.mxu1 %v8645_v9  ;;  %v8677_v3 = vld [vmem:[%s10460_s1 + $0x1e8] sm:$0xff]  }
 0x17f   : > { %v10015_v5 = vadd.f32 %v7727_v0, %v7705_v61  ;;  %8007 = vmatprep.subr.bf16.mxu0 %v8644_v8  ;;  %v8676_v0 = vld [vmem:[%s10460_s1 + $0x168] sm:$0xff]  }
 0x180   : > { %v8679_v9 = vld [vmem:[%s10460_s1 + $0x1a8] sm:$0xff]  }
 0x181   : > { %8030 = vmatpush3.bf16.msra.mxu1 %v8647_v11  ;;  %v8681_v11 = vld [vmem:[%s10460_s1 + $0x1f0] sm:$0xff]  }
 0x182   : > { %8008 = vmatpush3.bf16.msra.mxu0 %v8646_v10  ;;  %8031 = vmatprep.subr.bf16.mxu1 %v8649_v13  ;;  %v8683_v13 = vld [vmem:[%s10460_s1 + $0x1b0] sm:$0xff]  }
 0x183   : > { %8009 = vmatprep.subr.bf16.mxu0 %v8648_v12  ;;  %v8682_v12 = vld [vmem:[%s10460_s1 + $0x130] sm:$0xff]  }
 0x185   : > { %8032 = vmatpush3.bf16.msra.mxu1 %v8651_v15  ;;  %v8685_v15 = vld [vmem:[%s10460_s1 + $0x1f8] sm:$0xff]  }
 0x186   : > { %8010 = vmatpush3.bf16.msra.mxu0 %v8650_v14  ;;  %8061 = vmatprep.subr.bf16.mxu1 %v8657_v28  ;;  %v8684_v14 = vld [vmem:[%s10460_s1 + $0x178] sm:$0xff]   ;;  %v4740_v28 = vshrl.u32 %v7231_v19, 16 }
 0x187   : > { %8039 = vmatprep.subr.bf16.mxu0 %v8656_v22  ;;  %v7233_v22 = vcombine.low %v7166_v21, %v7166_v21  ;;  %v8723_v19 = vld [vmem:[%s10460_s1 + $0xb8] sm:$0xff]   ;;  %v7268_v21 = vcombine.high %v7163_v20, %v7163_v20 }
 0x188   : > { %4584 = vmatmul.mubr.bf16.vlgmr.msra.gmra.mrb[44].mxu1 %v4307_v42  ;;  %v4745_v42 = vor.u32 %v4744_v32, %v4740_v28  ;;  %v8730_v28 = vld [vmem:[%s10460_s1 + $0x200] sm:$0xff]   ;;  %v8737_v32 = vld [vmem:[%s10460_s1 + $0x2d0] sm:$0xff]  }
 0x189   : > { %4544 = vmatmul.mubr.bf16.vlgmr.msra.gmra.mrb[44].mxu0 %v4293_v40  ;;  %8062 = vmatpush3.bf16.msra.mxu1 %v8659_v37  ;;  %v4754_v33 = vshrl.u32 %v7233_v22, 16  ;;  %v4756_v34 = vshll.u32 %v7233_v22, 16  ;;  %v4765_v37 = vrot.slane %v4763_v26, 1  ;;  %v8696_v40 = vld [vmem:[%s10460_s1 + $0x48] sm:$0xff]   ;;  %v7164_v22 = vld [vmem:[%s8937_s27 + $0x38] sm:$0x33] }
 0x18a   : > { %8040 = vmatpush3.bf16.msra.mxu0 %v8658_v35  ;;  %8063 = vmatprep.subr.bf16.mxu1 %v8661_v43  ;;  %v4751_v35 = vrot.slane %v4749_v27, 1  ;;  %v7270_v23 = vcombine.high %v7164_v22, %v7164_v22  ;;  %v7267_v27 = vcombine.low %v7163_v20, %v7163_v20  ;;  %v7269_v29 = vcombine.low %v7164_v22, %v7164_v22  ;;  %v8733_v26 = vld [vmem:[%s10460_s1 + $0x2c8] sm:$0xff]  }
 0x18b   : > { %8041 = vmatprep.subr.bf16.mxu0 %v8660_v38  ;;  %v4758_v38 = vrot.slane %v4756_v34, 1  ;;  %v4766_v43 = vor.u32 %v4765_v37, %v4761_v31  ;;  %v8732_v31 = vld [vmem:[%s10460_s1 + $0x248] sm:$0xff]   ;;  %v8739_v37 = vld [vmem:[%s10460_s1 + $0x290] sm:$0xff]  }
 0x18c   : > { %v4752_v41 = vor.u32 %v4751_v35, %v4747_v25  ;;  %v8729_v25 = vld [vmem:[%s10460_s1 + $0x2c0] sm:$0xff]   ;;  %v8735_v34 = vld [vmem:[%s10460_s1 + $0x288] sm:$0xff]   ;;  %v8736_v35 = vld [vmem:[%s10460_s1 + $0x250] sm:$0xff]  }
 0x18d   : > { %8064 = vmatpush3.bf16.msra.mxu1 %v8663_v45  ;;  %v8697_v45 = vld [vmem:[%s10460_s1 + $0xc8] sm:$0xff]   ;;  %5035 = vmatprep.mubr.bf16.mxu1 %v4766_v43  ;;  %v8745_v43 = vld [vmem:[%s10460_s1 + $0x2e0] sm:$0xff]  }
 0x18e   : > { %8042 = vmatpush3.bf16.msra.mxu0 %v8662_v44  ;;  %8065 = vmatprep.subr.bf16.mxu1 %v8665_v47  ;;  %v4759_v44 = vor.u32 %v4758_v38, %v4754_v33  ;;  %v8699_v47 = vld [vmem:[%s10460_s1 + $0x88] sm:$0xff]   ;;  %v8740_v38 = vld [vmem:[%s10460_s1 + $0x258] sm:$0xff]  }
 0x18f   : > { %8043 = vmatprep.subr.bf16.mxu0 %v8664_v46  ;;  %4995 = vmatprep.mubr.bf16.mxu0 %v4752_v41  ;;  %v8698_v46 = vld [vmem:[%s10460_s1 + $0x8] sm:$0xff]   ;;  %v8743_v41 = vld [vmem:[%s10460_s1 + $0x298] sm:$0xff]  }
 0x190   : > { %v8734_v33 = vld [vmem:[%s10460_s1 + $0x208] sm:$0xff]  }
 0x191   : > { %8066 = vmatpush3.bf16.msra.mxu1 %v8667_v49  ;;  %v8701_v49 = vld [vmem:[%s10460_s1 + $0xd0] sm:$0xff]   ;;  %v8768_v20 = vld [vmem:[%s10460_s1 + $0x348] sm:$0xff]  }
 0x192   : > { %8044 = vmatpush3.bf16.msra.mxu0 %v8666_v48  ;;  %8067 = vmatprep.subr.bf16.mxu1 %v8669_v51  ;;  %v8700_v48 = vld [vmem:[%s10460_s1 + $0x50] sm:$0xff]   ;;  %v8770_v22 = vld [vmem:[%s10460_s1 + $0x308] sm:$0xff]  }
 0x193   : > { %8045 = vmatprep.subr.bf16.mxu0 %v8668_v50  ;;  %v8702_v50 = vld [vmem:[%s10460_s1 + $0x10] sm:$0xff]  }
 0x194   : > { %v8703_v51 = vld [vmem:[%s10460_s1 + $0x90] sm:$0xff]  }
 0x195   : > { %8068 = vmatpush3.bf16.msra.mxu1 %v8671_v53  ;;  %v8705_v53 = vld [vmem:[%s10460_s1 + $0xd8] sm:$0xff]  }
 0x196   : > { %8046 = vmatpush3.bf16.msra.mxu0 %v8670_v52  ;;  %8069 = vmatprep.subr.bf16.mxu1 %v8673_v56  ;;  %v8704_v52 = vld [vmem:[%s10460_s1 + $0x58] sm:$0xff]  }
 0x197   : > { %8047 = vmatprep.subr.bf16.mxu0 %v8672_v54  ;;  %v8706_v54 = vld [vmem:[%s10460_s1 + $0x18] sm:$0xff]  }
 0x198   : > { %v8707_v56 = vld [vmem:[%s10460_s1 + $0x98] sm:$0xff]  }
 0x199   : > { %8070 = vmatpush3.bf16.msra.mxu1 %v8675_v60  ;;  %v8709_v60 = vld [vmem:[%s10460_s1 + $0xe0] sm:$0xff]  }
 0x19a   : > { %v7747_v55 = vpop.f32.mrb[20].mxu0  ;;  %8048 = vmatpush3.bf16.msra.mxu0 %v8674_v58  ;;  %8071 = vmatprep.subr.bf16.mxu1 %v8677_v3  ;;  %v8708_v58 = vld [vmem:[%s10460_s1 + $0x60] sm:$0xff]  }
 0x19b   : > { %v7769_v57 = vpop.f32.mrb[20].mxu1  ;;  %v7748_v59 = vpop.f32.mrb[21].mxu0  ;;  %8049 = vmatprep.subr.bf16.mxu0 %v8676_v0 }
 0x19c   : > { %v7749_v61 = vadd.f32 %v7748_v59, %v7747_v55  ;;  %v7770_v62 = vpop.f32.mrb[21].mxu1  ;;  %v7750_v1 = vpop.f32.mrb[22].mxu0 }
 0x19d   : > { %v7771_v63 = vadd.f32 %v7770_v62, %v7769_v57  ;;  %v7772_v4 = vpop.f32.mrb[22].mxu1  ;;  %v7751_v7 = vpop.f32.mrb[23].mxu0  ;;  %8072 = vmatpush3.bf16.msra.mxu1 %v8679_v9  ;;  %v8713_v9 = vld [vmem:[%s10460_s1 + $0xe8] sm:$0xff]  }
 0x19e   : > { %v2340_v2 = vadd.f32 %v7749_v61, %v10015_v5  ;;  %v7773_v10 = vpop.f32.mrb[23].mxu1  ;;  %v8680_v5 = vld [vmem:[%s10460_s1 + $0x170] sm:$0xff]   ;;  %8050 = vmatpush3.bf16.msra.mxu0 %v8678_v6  ;;  %8073 = vmatprep.subr.bf16.mxu1 %v8681_v11  ;;  %v8712_v6 = vld [vmem:[%s10460_s1 + $0x68] sm:$0xff]  }
 0x19f   : > { %8051 = vmatprep.subr.bf16.mxu0 %v8680_v5  ;;  %v8714_v11 = vld [vmem:[%s10460_s1 + $0x28] sm:$0xff]  }
 0x1a0   : > { %v10116_v8 = vadd.f32 %v7771_v63, %v2340_v2  ;;  %v8710_v63 = vld [vmem:[%s10460_s1 + $0x20] sm:$0xff]  }
 0x1a1   : > { %8074 = vmatpush3.bf16.msra.mxu1 %v8683_v13  ;;  %v8711_v2 = vld [vmem:[%s10460_s1 + $0xa0] sm:$0xff]   ;;  %v8716_v13 = vld [vmem:[%s10460_s1 + $0x70] sm:$0xff]  }
 0x1a2   : > { %8052 = vmatpush3.bf16.msra.mxu0 %v8682_v12  ;;  %8075 = vmatprep.subr.bf16.mxu1 %v8685_v15  ;;  %v8715_v12 = vld [vmem:[%s10460_s1 + $0xa8] sm:$0xff]   ;;  %v8719_v15 = vld [vmem:[%s10460_s1 + $0xb0] sm:$0xff]  }
 0x1a3   : > { %8053 = vmatprep.subr.bf16.mxu0 %v8684_v14  ;;  %v8718_v14 = vld [vmem:[%s10460_s1 + $0x30] sm:$0xff]  }
 0x1a5   : > { %8076 = vmatpush3.bf16.msra.mxu1 %v8687_v17  ;;  %v8721_v17 = vld [vmem:[%s10460_s1 + $0xf8] sm:$0xff]  }
 0x1a6   : > { %8054 = vmatpush3.bf16.msra.mxu0 %v8686_v16  ;;  %8105 = vmatprep.subr.bf16.mxu1 %v8693_v30  ;;  %v8720_v16 = vld [vmem:[%s10460_s1 + $0x78] sm:$0xff]   ;;  %v8731_v30 = vld [vmem:[%s10460_s1 + $0x280] sm:$0xff]  }
 0x1a7   : > { %8083 = vmatprep.subr.bf16.mxu0 %v8692_v24  ;;  %v8728_v24 = vld [vmem:[%s10460_s1 + $0x240] sm:$0xff]  }
 0x1a8   : > { %5036 = vmatmul.mubr.bf16.vlgmr.msra.gmra.mrb[48].mxu1 %v4759_v44 }
 0x1a9   : > { %4996 = vmatmul.mubr.bf16.vlgmr.msra.gmra.mrb[48].mxu0 %v4745_v42  ;;  %8106 = vmatpush3.bf16.msra.mxu1 %v8695_v39  ;;  %v8741_v39 = vld [vmem:[%s10460_s1 + $0x2d8] sm:$0xff]   ;;  %v8744_v42 = vld [vmem:[%s10460_s1 + $0x260] sm:$0xff]  }
 0x1aa   : > { %8084 = vmatpush3.bf16.msra.mxu0 %v8694_v36  ;;  %8107 = vmatprep.subr.bf16.mxu1 %v8697_v45  ;;  %v8738_v36 = vld [vmem:[%s10460_s1 + $0x210] sm:$0xff]   ;;  %v8746_v45 = vld [vmem:[%s10460_s1 + $0x220] sm:$0xff]  }
 0x1ab   : > { %8085 = vmatprep.subr.bf16.mxu0 %v8696_v40  ;;  %5281 = vmatprep.mubr.bf16.mxu0 %v7268_v21  ;;  %v8742_v40 = vld [vmem:[%s10460_s1 + $0x218] sm:$0xff]   ;;  %v8769_v21 = vld [vmem:[%s10460_s1 + $0x3c8] sm:$0xff]  }
 0x1ac   : > { %5321 = vmatprep.mubr.bf16.mxu1 %v7270_v23  ;;  %v8771_v23 = vld [vmem:[%s10460_s1 + $0x388] sm:$0xff]  }
 0x1ad   : > { %8108 = vmatpush3.bf16.msra.mxu1 %v8699_v47  ;;  %v8747_v47 = vld [vmem:[%s10460_s1 + $0x2a0] sm:$0xff]  }
 0x1ae   : > { %8086 = vmatpush3.bf16.msra.mxu0 %v8698_v46  ;;  %8109 = vmatprep.subr.bf16.mxu1 %v8701_v49 }
 0x1af   : > { %8087 = vmatprep.subr.bf16.mxu0 %v8700_v48 }
 0x1b1   : > { %8110 = vmatpush3.bf16.msra.mxu1 %v8703_v51 }
 0x1b2   : > { %8088 = vmatpush3.bf16.msra.mxu0 %v8702_v50  ;;  %8111 = vmatprep.subr.bf16.mxu1 %v8705_v53  ;;  %v8748_v50 = vld [vmem:[%s10460_s1 + $0x268] sm:$0xff]  }
 0x1b3   : > { %8089 = vmatprep.subr.bf16.mxu0 %v8704_v52  ;;  %v8749_v53 = vld [vmem:[%s10460_s1 + $0x2e8] sm:$0xff]  }
 0x1b5   : > { %8112 = vmatpush3.bf16.msra.mxu1 %v8707_v56  ;;  %v8750_v56 = vld [vmem:[%s10460_s1 + $0x228] sm:$0xff]  }
 0x1b6   : > { %8090 = vmatpush3.bf16.msra.mxu0 %v8706_v54  ;;  %8113 = vmatprep.subr.bf16.mxu1 %v8709_v60 }
 0x1b7   : > { %8091 = vmatprep.subr.bf16.mxu0 %v8708_v58  ;;  %v8751_v58 = vld [vmem:[%s10460_s1 + $0x2a8] sm:$0xff]  }
 0x1b9   : > { %8114 = vmatpush3.bf16.msra.mxu1 %v8711_v2  ;;  %v8754_v2 = vld [vmem:[%s10460_s1 + $0x230] sm:$0xff]  }
 0x1ba   : > { %v7791_v55 = vpop.f32.mrb[24].mxu0  ;;  %8092 = vmatpush3.bf16.msra.mxu0 %v8710_v63  ;;  %8115 = vmatprep.subr.bf16.mxu1 %v8713_v9  ;;  %v8753_v63 = vld [vmem:[%s10460_s1 + $0x2f0] sm:$0xff]  }
 0x1bb   : > { %v7813_v57 = vpop.f32.mrb[24].mxu1  ;;  %v7792_v59 = vpop.f32.mrb[25].mxu0  ;;  %8093 = vmatprep.subr.bf16.mxu0 %v8712_v6  ;;  %v8756_v6 = vld [vmem:[%s10460_s1 + $0x278] sm:$0xff]  }
 0x1bc   : > { %v7793_v61 = vadd.f32 %v7792_v59, %v7791_v55  ;;  %v7814_v62 = vpop.f32.mrb[25].mxu1  ;;  %v7794_v1 = vpop.f32.mrb[26].mxu0 }
 0x1bd   : > { %v7815_v0 = vadd.f32 %v7814_v62, %v7813_v57  ;;  %v7816_v3 = vpop.f32.mrb[26].mxu1  ;;  %v7795_v7 = vpop.f32.mrb[27].mxu0  ;;  %8116 = vmatpush3.bf16.msra.mxu1 %v8715_v12  ;;  %v7304_v12 = vld [vmem:[%s8937_s27 + $0x48] sm:$0x33] }
 0x1be   : > { %v7817_v10 = vpop.f32.mrb[27].mxu1  ;;  %8094 = vmatpush3.bf16.msra.mxu0 %v8714_v11  ;;  %v8755_v3 = vld [vmem:[%s10460_s1 + $0x2b0] sm:$0xff]   ;;  %v8757_v7 = vld [vmem:[%s10460_s1 + $0x2f8] sm:$0xff]   ;;  %v7303_v11 = vld [vmem:[%s8937_s27 + $0x40] sm:$0x33] }
 0x1bf   : > { %v2733_v4 = vadd.f32 %v7815_v0, %v7793_v61  ;;  %8095 = vmatprep.subr.bf16.mxu0 %v8716_v13  ;;  %v8752_v61 = vld [vmem:[%s10460_s1 + $0x270] sm:$0xff]   ;;  %v10330_v0 = vld [vmem:[%s10461_s2] ss:$0 sm:$0xff]  ;;  %v8758_v10 = vld [vmem:[%s10460_s1 + $0x238] sm:$0xff]   ;;  %v7370_v13 = vcombine.high %v7303_v11, %v7303_v11 }
 0x1c1   : > { %v10214_v5 = vadd.f32 %v2733_v4, %v10116_v8  ;;  %v8717_v8 = vld [vmem:[%s10460_s1 + $0xf0] sm:$0xff]  }
 0x1c2   : > { %8117 = vmatprep.subr.bf16.mxu1 %v8717_v8  ;;  %8096 = vmatpush3.bf16.msra.mxu0 %v8718_v14  ;;  %v8764_v8 = vld [vmem:[%s10460_s1 + $0x340] sm:$0xff]   ;;  %v7372_v14 = vcombine.high %v7304_v12, %v7304_v12 }
 0x1c3   : > { %8118 = vmatpush3.bf16.msra.mxu1 %v8719_v15  ;;  %8097 = vmatprep.subr.bf16.mxu0 %v8720_v16  ;;  %v8765_v15 = vld [vmem:[%s10460_s1 + $0x3c0] sm:$0xff]   ;;  %v7369_v16 = vcombine.low %v7303_v11, %v7303_v11 }
 0x1c4   : > { %8119 = vmatprep.subr.bf16.mxu1 %v8721_v17  ;;  %v8766_v17 = vld [vmem:[%s10460_s1 + $0x300] sm:$0xff]  }
 0x1c6   : > { %8098 = vmatpush3.bf16.msra.mxu0 %v8722_v18  ;;  %v7371_v18 = vcombine.low %v7304_v12, %v7304_v12 }
 0x1c7   : > { %8120 = vmatpush3.bf16.msra.mxu1 %v8723_v19  ;;  %8127 = vmatprep.subr.bf16.mxu0 %v8728_v24  ;;  %v8767_v19 = vld [vmem:[%s10460_s1 + $0x380] sm:$0xff]   ;;  %v8772_v24 = vld [vmem:[%s10460_s1 + $0x350] sm:$0xff]  }
 0x1c8   : > { %8149 = vmatprep.subr.bf16.mxu1 %v8729_v25  ;;  %v8773_v25 = vld [vmem:[%s10460_s1 + $0x3d0] sm:$0xff]  }
 0x1c9   : > { %5282 = vmatmul.mubr.bf16.vlgmr.msra.gmra.mrb[52].mxu0 %v7267_v27  ;;  %v8774_v27 = vld [vmem:[%s10460_s1 + $0x310] sm:$0xff]  }
 0x1ca   : > { %5322 = vmatmul.mubr.bf16.vlgmr.msra.gmra.mrb[52].mxu1 %v7269_v29  ;;  %8128 = vmatpush3.bf16.msra.mxu0 %v8730_v28  ;;  %v8775_v28 = vld [vmem:[%s10460_s1 + $0x390] sm:$0xff]   ;;  %v8776_v29 = vld [vmem:[%s10460_s1 + $0x358] sm:$0xff]  }
 0x1cb   : > { %8150 = vmatpush3.bf16.msra.mxu1 %v8731_v30  ;;  %8129 = vmatprep.subr.bf16.mxu0 %v8732_v31  ;;  %v8777_v30 = vld [vmem:[%s10460_s1 + $0x3d8] sm:$0xff]  }
 0x1cc   : > { %8151 = vmatprep.subr.bf16.mxu1 %v8733_v26  ;;  %5634 = vmatprep.mubr.bf16.mxu0 %v7370_v13  ;;  %v8778_v31 = vld [vmem:[%s10460_s1 + $0x318] sm:$0xff]  }
 0x1cd   : > { %5674 = vmatprep.mubr.bf16.mxu1 %v7372_v14  ;;  %v8779_v26 = vld [vmem:[%s10460_s1 + $0x398] sm:$0xff]  }
 0x1ce   : > { %8130 = vmatpush3.bf16.msra.mxu0 %v8734_v33  ;;  %v8780_v33 = vld [vmem:[%s10460_s1 + $0x360] sm:$0xff]  }
 0x1cf   : > { %8152 = vmatpush3.bf16.msra.mxu1 %v8735_v34  ;;  %8131 = vmatprep.subr.bf16.mxu0 %v8736_v35  ;;  %v8781_v34 = vld [vmem:[%s10460_s1 + $0x3e0] sm:$0xff]  }
 0x1d0   : > { %8153 = vmatprep.subr.bf16.mxu1 %v8737_v32  ;;  %v8782_v35 = vld [vmem:[%s10460_s1 + $0x320] sm:$0xff]  }
 0x1d1   : > { %v8783_v32 = vld [vmem:[%s10460_s1 + $0x3a0] sm:$0xff]  }
 0x1d2   : > { %8132 = vmatpush3.bf16.msra.mxu0 %v8738_v36 }
 0x1d3   : > { %8154 = vmatpush3.bf16.msra.mxu1 %v8739_v37  ;;  %8133 = vmatprep.subr.bf16.mxu0 %v8740_v38 }
 0x1d4   : > { %8155 = vmatprep.subr.bf16.mxu1 %v8741_v39 }
 0x1d6   : > { %8134 = vmatpush3.bf16.msra.mxu0 %v8742_v40 }
 0x1d7   : > { %8156 = vmatpush3.bf16.msra.mxu1 %v8743_v41  ;;  %8135 = vmatprep.subr.bf16.mxu0 %v8744_v42  ;;  %v8784_v41 = vld [vmem:[%s10460_s1 + $0x368] sm:$0xff]  }
 0x1d8   : > { %8157 = vmatprep.subr.bf16.mxu1 %v8745_v43  ;;  %v8785_v43 = vld [vmem:[%s10460_s1 + $0x3e8] sm:$0xff]  }
 0x1da   : > { %v7835_v44 = vpop.f32.mrb[28].mxu0  ;;  %8136 = vmatpush3.bf16.msra.mxu0 %v8746_v45 }
 0x1db   : > { %v7857_v46 = vpop.f32.mrb[28].mxu1  ;;  %v7836_v48 = vpop.f32.mrb[29].mxu0  ;;  %8158 = vmatpush3.bf16.msra.mxu1 %v8747_v47  ;;  %8137 = vmatprep.subr.bf16.mxu0 %v8748_v50 }
 0x1dc   : > { %v7858_v49 = vpop.f32.mrb[29].mxu1  ;;  %v7837_v51 = vadd.f32 %v7836_v48, %v7835_v44  ;;  %v7838_v54 = vpop.f32.mrb[30].mxu0  ;;  %8159 = vmatprep.subr.bf16.mxu1 %v8749_v53  ;;  %v8787_v48 = vld [vmem:[%s10460_s1 + $0x3a8] sm:$0xff]   ;;  %v8790_v53 = vld [vmem:[%s10460_s1 + $0x330] sm:$0xff]  }
 0x1dd   : > { %v7859_v52 = vadd.f32 %v7858_v49, %v7857_v46  ;;  %v7860_v55 = vpop.f32.mrb[30].mxu1  ;;  %v7839_v59 = vpop.f32.mrb[31].mxu0  ;;  %v8786_v46 = vld [vmem:[%s10460_s1 + $0x328] sm:$0xff]   ;;  %v8791_v54 = vld [vmem:[%s10460_s1 + $0x3b0] sm:$0xff]  }
 0x1de   : > { %v7861_v60 = vpop.f32.mrb[31].mxu1  ;;  %8138 = vmatpush3.bf16.msra.mxu0 %v8750_v56  ;;  %v8792_v55 = vld [vmem:[%s10460_s1 + $0x378] sm:$0xff]   ;;  %v7405_v59 = vld [vmem:[%s8937_s27 + $0x40] sm:$0x77] }
 0x1df   : > { %v3114_v57 = vadd.f32 %v7859_v52, %v7837_v51  ;;  %8160 = vmatpush3.bf16.msra.mxu1 %v8751_v58  ;;  %8139 = vmatprep.subr.bf16.mxu0 %v8752_v61  ;;  %v8788_v51 = vld [vmem:[%s10460_s1 + $0x370] sm:$0xff]   ;;  %v8793_v56 = vld [vmem:[%s10460_s1 + $0x3f8] sm:$0xff]   ;;  %v7406_v60 = vld [vmem:[%s8937_s27 + $0x48] sm:$0x77]  ;;  %v7471_v61 = vcombine.low %v7405_v59, %v7405_v59 }
 0x1e0   : > { %8161 = vmatprep.subr.bf16.mxu1 %v8753_v63  ;;  %v8789_v52 = vld [vmem:[%s10460_s1 + $0x3f0] sm:$0xff]   ;;  %v8795_v58 = vld [vmem:[%s10460_s1 + $0x3b8] sm:$0xff]   ;;  %v7473_v63 = vcombine.low %v7406_v60, %v7406_v60 }
 0x1e1   : > { %v3119_v62 = vadd.f32 %v3114_v57, %v10214_v5  ;;  %v8759_v5 = vld [vmem:[%s10460_s1 + $0x2b8] sm:$0xff]  }
 0x1e2   : > { %8140 = vmatpush3.bf16.msra.mxu0 %v8754_v2  ;;  %v8794_v57 = vld [vmem:[%s10460_s1 + $0x338] sm:$0xff]  }
 0x1e3   : > { %v3120_v1 = vadd.f32 %v10330_v0, %v3119_v62  ;;  %8162 = vmatpush3.bf16.msra.mxu1 %v8755_v3  ;;  %8141 = vmatprep.subr.bf16.mxu0 %v8756_v6  ;;  %v7472_v62 = vcombine.high %v7405_v59, %v7405_v59 }
 0x1e4   : > { %8163 = vmatprep.subr.bf16.mxu1 %v8757_v7  ;;  %v5760_v7 = vshrl.u32 %v7471_v61, 16 }
 0x1e5   : > { %v3121_v4 = vmax.f32 %v3120_v1, 0.0  ;;  %v7474_v1 = vcombine.high %v7406_v60, %v7406_v60  ;;  %v5767_v2 = vshrl.u32 %v7472_v62, 16  ;;  %v5769_v3 = vshll.u32 %v7472_v62, 16 }
 0x1e6   : > { %8142 = vmatpush3.bf16.msra.mxu0 %v8758_v10  ;;  %v5774_v10 = vshrl.u32 %v7473_v63, 16 }
 0x1e7   : > { %v3122_v9 = vpack.c.bf16 %v3121_v4, %v3121_v4  ;;  %8164 = vmatpush3.bf16.msra.mxu1 %v8759_v5  ;;  %8171 = vmatprep.subr.bf16.mxu0 %v8764_v8  ;;  %v5781_v4 = vshrl.u32 %v7474_v1, 16  ;;  %v5783_v6 = vshll.u32 %v7474_v1, 16  ;;  %v5776_v5 = vshll.u32 %v7473_v63, 16 }
 0x1e8   : > { %8193 = vmatprep.subr.bf16.mxu1 %v8765_v15  ;;  %v5771_v11 = vrot.slane %v5769_v3, 1 }
 0x1e9   : > { %6817 = vst [vmem:[%s9932_s21 + $0x2] sm:$0x3] %v3122_v9  ;;  %5635 = vmatmul.mubr.bf16.vlgmr.msra.gmra.mrb[56].mxu0 %v7369_v16  ;;  %v5762_v9 = vshll.u32 %v7471_v61, 16  ;;  %v5785_v12 = vrot.slane %v5783_v6, 1  ;;  %v5778_v8 = vrot.slane %v5776_v5, 1 }
 0x1ea   : > { %5675 = vmatmul.mubr.bf16.vlgmr.msra.gmra.mrb[56].mxu1 %v7371_v18  ;;  %8172 = vmatpush3.bf16.msra.mxu0 %v8766_v17  ;;  %v5772_v14 = vor.u32 %v5771_v11, %v5767_v2 }
 0x1eb   : > { %8194 = vmatpush3.bf16.msra.mxu1 %v8767_v19  ;;  %8173 = vmatprep.subr.bf16.mxu0 %v8768_v20  ;;  %v5764_v13 = vrot.slane %v5762_v9, 1  ;;  %v5786_v15 = vor.u32 %v5785_v12, %v5781_v4  ;;  %v5779_v17 = vor.u32 %v5778_v8, %v5774_v10 }
 0x1ec   : > { %8195 = vmatprep.subr.bf16.mxu1 %v8769_v21  ;;  %6015 = vmatprep.mubr.bf16.mxu0 %v5772_v14 }
 0x1ed   : > { %v5765_v16 = vor.u32 %v5764_v13, %v5760_v7  ;;  %6055 = vmatprep.mubr.bf16.mxu1 %v5786_v15 }
 0x1ee   : > { %8174 = vmatpush3.bf16.msra.mxu0 %v8770_v22 }
 0x1ef   : > { %8196 = vmatpush3.bf16.msra.mxu1 %v8771_v23  ;;  %8175 = vmatprep.subr.bf16.mxu0 %v8772_v24 }
 0x1f0   : > { %8197 = vmatprep.subr.bf16.mxu1 %v8773_v25 }
 0x1f2   : > { %8176 = vmatpush3.bf16.msra.mxu0 %v8774_v27 }
 0x1f3   : > { %8198 = vmatpush3.bf16.msra.mxu1 %v8775_v28  ;;  %8177 = vmatprep.subr.bf16.mxu0 %v8776_v29 }
 0x1f4   : > { %8199 = vmatprep.subr.bf16.mxu1 %v8777_v30 }
 0x1f6   : > { %8178 = vmatpush3.bf16.msra.mxu0 %v8778_v31 }
 0x1f7   : > { %8200 = vmatpush3.bf16.msra.mxu1 %v8779_v26  ;;  %8179 = vmatprep.subr.bf16.mxu0 %v8780_v33 }
 0x1f8   : > { %8201 = vmatprep.subr.bf16.mxu1 %v8781_v34 }
 0x1fa   : > { %v7879_v36 = vpop.f32.mrb[32].mxu0  ;;  %8180 = vmatpush3.bf16.msra.mxu0 %v8782_v35 }
 0x1fb   : > { %v7901_v37 = vpop.f32.mrb[32].mxu1  ;;  %v7880_v38 = vpop.f32.mrb[33].mxu0  ;;  %8202 = vmatpush3.bf16.msra.mxu1 %v8783_v32  ;;  %8181 = vmatprep.subr.bf16.mxu0 %v8784_v41 }
 0x1fc   : > { %v7881_v39 = vadd.f32 %v7880_v38, %v7879_v36  ;;  %v7902_v40 = vpop.f32.mrb[33].mxu1  ;;  %v7882_v44 = vpop.f32.mrb[34].mxu0  ;;  %8203 = vmatprep.subr.bf16.mxu1 %v8785_v43 }
 0x1fd   : > { %v7903_v42 = vadd.f32 %v7902_v40, %v7901_v37  ;;  %v7904_v45 = vpop.f32.mrb[34].mxu1  ;;  %v7883_v49 = vpop.f32.mrb[35].mxu0 }
 0x1fe   : > { %v7905_v50 = vpop.f32.mrb[35].mxu1  ;;  %8182 = vmatpush3.bf16.msra.mxu0 %v8786_v46 }
 0x1ff   : > { %v3566_v47 = vadd.f32 %v7903_v42, %v7881_v39  ;;  %8204 = vmatpush3.bf16.msra.mxu1 %v8787_v48  ;;  %8183 = vmatprep.subr.bf16.mxu0 %v8788_v51 }
 0x200   : > { %8205 = vmatprep.subr.bf16.mxu1 %v8789_v52 }
 0x202   : > { %8184 = vmatpush3.bf16.msra.mxu0 %v8790_v53 }
 0x203   : > { %8206 = vmatpush3.bf16.msra.mxu1 %v8791_v54  ;;  %8185 = vmatprep.subr.bf16.mxu0 %v8792_v55 }
 0x204   : > { %8207 = vmatprep.subr.bf16.mxu1 %v8793_v56 }
 0x206   : > { %8186 = vmatpush3.bf16.msra.mxu0 %v8794_v57 }
 0x207   : > { %8208 = vmatpush3.bf16.msra.mxu1 %v8795_v58 }
 0x209   : > { %6016 = vmatmul.mubr.bf16.vlgmr.msra.gmra.mrb[60].mxu0 %v5765_v16 }
 0x20a   : > { %6056 = vmatmul.mubr.bf16.vlgmr.msra.gmra.mrb[60].mxu1 %v5779_v17 }
 0x21b   : > { %v7945_v19 = vpop.f32.mrb[36].mxu1 }
 0x21c   : > { %v7923_v18 = vpop.f32.mrb[36].mxu0  ;;  %v7946_v22 = vpop.f32.mrb[37].mxu1 }
 0x21d   : > { %v7924_v20 = vpop.f32.mrb[37].mxu0  ;;  %v7947_v24 = vadd.f32 %v7946_v22, %v7945_v19  ;;  %v7948_v25 = vpop.f32.mrb[38].mxu1 }
 0x21e   : > { %v7925_v21 = vadd.f32 %v7924_v20, %v7923_v18  ;;  %v7926_v23 = vpop.f32.mrb[38].mxu0  ;;  %v7949_v29 = vpop.f32.mrb[39].mxu1 }
 0x21f   : > { %v7927_v27 = vpop.f32.mrb[39].mxu0 }
 0x220   : > { %v3812_v28 = vadd.f32 %v7925_v21, %v3566_v47 }
 0x222   : > { %v3852_v30 = vadd.f32 %v7947_v24, %v3812_v28 }
 0x23b   : > { %v7989_v26 = vpop.f32.mrb[40].mxu1 }
 0x23c   : > { %v7967_v31 = vpop.f32.mrb[40].mxu0  ;;  %v7990_v35 = vpop.f32.mrb[41].mxu1 }
 0x23d   : > { %v7968_v33 = vpop.f32.mrb[41].mxu0  ;;  %v7991_v36 = vadd.f32 %v7990_v35, %v7989_v26  ;;  %v7992_v37 = vpop.f32.mrb[42].mxu1 }
 0x23e   : > { %v7969_v34 = vadd.f32 %v7968_v33, %v7967_v31  ;;  %v7970_v32 = vpop.f32.mrb[42].mxu0  ;;  %v7993_v39 = vpop.f32.mrb[43].mxu1 }
 0x23f   : > { %v7971_v38 = vpop.f32.mrb[43].mxu0 }
 0x240   : > { %v4205_v40 = vadd.f32 %v7991_v36, %v7969_v34 }
 0x242   : > { %v4210_v41 = vadd.f32 %v4205_v40, %v3852_v30 }
 0x25b   : > { %v8033_v43 = vpop.f32.mrb[44].mxu1 }
 0x25c   : > { %v8011_v42 = vpop.f32.mrb[44].mxu0  ;;  %v8034_v46 = vpop.f32.mrb[45].mxu1 }
 0x25d   : > { %v8012_v44 = vpop.f32.mrb[45].mxu0  ;;  %v8035_v48 = vadd.f32 %v8034_v46, %v8033_v43  ;;  %v8036_v49 = vpop.f32.mrb[46].mxu1 }
 0x25e   : > { %v8013_v45 = vadd.f32 %v8012_v44, %v8011_v42  ;;  %v8014_v47 = vpop.f32.mrb[46].mxu0  ;;  %v8037_v51 = vpop.f32.mrb[47].mxu1 }
 0x25f   : > { %v8015_v50 = vpop.f32.mrb[47].mxu0 }
 0x260   : > { %v4586_v52 = vadd.f32 %v8035_v48, %v8013_v45 }
 0x262   : > { %v4591_v53 = vadd.f32 %v4586_v52, %v4210_v41 }
 0x264   : > { %v4592_v54 = vadd.f32 %v10330_v0, %v4591_v53 }
 0x266   : > { %v4593_v55 = vmax.f32 %v4592_v54, 0.0 }
 0x268   : > { %v4594_v56 = vpack.c.bf16 %v4593_v55, %v4593_v55 }
 0x26a   : > { %7162 = vst [vmem:[%s9932_s21 + $0x4] sm:$0x3] %v4594_v56 }
 0x27b   : > { %v8077_v58 = vpop.f32.mrb[48].mxu1 }
 0x27c   : > { %v8055_v57 = vpop.f32.mrb[48].mxu0  ;;  %v8078_v61 = vpop.f32.mrb[49].mxu1 }
 0x27d   : > { %v8056_v59 = vpop.f32.mrb[49].mxu0  ;;  %v8079_v63 = vadd.f32 %v8078_v61, %v8077_v58  ;;  %v8080_v1 = vpop.f32.mrb[50].mxu1 }
 0x27e   : > { %v8057_v60 = vadd.f32 %v8056_v59, %v8055_v57  ;;  %v8058_v62 = vpop.f32.mrb[50].mxu0  ;;  %v8081_v3 = vpop.f32.mrb[51].mxu1 }
 0x27f   : > { %v8059_v2 = vpop.f32.mrb[51].mxu0 }
 0x280   : > { %v5038_v4 = vadd.f32 %v8079_v63, %v8057_v60 }
 0x29c   : > { %v8099_v6 = vpop.f32.mrb[52].mxu0 }
 0x29d   : > { %v8121_v7 = vpop.f32.mrb[52].mxu1  ;;  %v8100_v9 = vpop.f32.mrb[53].mxu0 }
 0x29e   : > { %v8101_v10 = vadd.f32 %v8100_v9, %v8099_v6  ;;  %v8122_v5 = vpop.f32.mrb[53].mxu1  ;;  %v8102_v11 = vpop.f32.mrb[54].mxu0 }
 0x29f   : > { %v8123_v12 = vadd.f32 %v8122_v5, %v8121_v7  ;;  %v8124_v13 = vpop.f32.mrb[54].mxu1  ;;  %v8103_v8 = vpop.f32.mrb[55].mxu0 }
 0x2a0   : > { %v5284_v14 = vadd.f32 %v8101_v10, %v5038_v4  ;;  %v8125_v15 = vpop.f32.mrb[55].mxu1 }
 0x2a2   : > { %v5324_v16 = vadd.f32 %v8123_v12, %v5284_v14 }
 0x2bc   : > { %v8143_v17 = vpop.f32.mrb[56].mxu0 }
 0x2bd   : > { %v8165_v18 = vpop.f32.mrb[56].mxu1  ;;  %v8144_v19 = vpop.f32.mrb[57].mxu0 }
 0x2be   : > { %v8145_v20 = vadd.f32 %v8144_v19, %v8143_v17  ;;  %v8166_v21 = vpop.f32.mrb[57].mxu1  ;;  %v8146_v22 = vpop.f32.mrb[58].mxu0 }
 0x2bf   : > { %v8167_v23 = vadd.f32 %v8166_v21, %v8165_v18  ;;  %v8168_v24 = vpop.f32.mrb[58].mxu1  ;;  %v8147_v25 = vpop.f32.mrb[59].mxu0 }
 0x2c0   : > { %v8169_v27 = vpop.f32.mrb[59].mxu1 }
 0x2c1   : > { %v5677_v28 = vadd.f32 %v8167_v23, %v8145_v20 }
 0x2c3   : > { %v5682_v29 = vadd.f32 %v5677_v28, %v5324_v16 }
 0x2dc   : > { %v8187_v30 = vpop.f32.mrb[60].mxu0 }
 0x2dd   : > { %v8209_v31 = vpop.f32.mrb[60].mxu1  ;;  %v8188_v26 = vpop.f32.mrb[61].mxu0 }
 0x2de   : > { %v8210_v33 = vpop.f32.mrb[61].mxu1  ;;  %v8189_v34 = vadd.f32 %v8188_v26, %v8187_v30  ;;  %v8190_v32 = vpop.f32.mrb[62].mxu0 }
 0x2df   : > { %v8211_v35 = vadd.f32 %v8210_v33, %v8209_v31  ;;  %v8212_v36 = vpop.f32.mrb[62].mxu1  ;;  %v8191_v37 = vpop.f32.mrb[63].mxu0 }
 0x2e0   : > { %v8213_v38 = vpop.f32.mrb[63].mxu1 }
 0x2e1   : > { %v6058_v39 = vadd.f32 %v8211_v35, %v8189_v34 }
 0x2e3   : > { %v6063_v40 = vadd.f32 %v6058_v39, %v5682_v29 }
 0x2e5   : > { %v6064_v41 = vadd.f32 %v10330_v0, %v6063_v40 }
 0x2e7   : > { %v6065_v42 = vmax.f32 %v6064_v41, 0.0 }
 0x2e9   : > { %v6066_v43 = vpack.c.bf16 %v6065_v42, %v6065_v42 }
 0x2eb   : > { %7507 = vst [vmem:[%s9932_s21 + $0x6] sm:$0x3] %v6066_v43 }
 0x2ec PF: > { %s13_s12 = sadd.s32 1, %s8807_s12  }
 0x2ed   : > { %p10_p4 = scmp.ge.s32.totalorder %s13_s12, 4  }
 0x2ef   :  { %12 = sbr.rel (!%p10_p4) target bundleno = 1 (0x1), region = 72 }

// kernel: model_forward.5
= control target key start
LH: loop header
LB: loop body
LE: loop exit
PB: predicated region body
PF: predicated region fallthrough
CT: control target
= control target key end

     0   :  { %s10805_s18 = smov 0   ;;  %s12914_s0 = inlined_call_operand.vmem [shape: bf16[2,4,4,128], index: 0, kind: input, shape index: {}]   ;;  %s12915_s1 = inlined_call_operand.vmem [shape: bf16[128,256], index: 1, kind: input, shape index: {}]   ;;  %s12916_s2 = inlined_call_operand.vmem [shape: f32[1,256], index: 2, kind: input, shape index: {}]   ;;  %s12917_s3 = inlined_call_operand.vmem [shape: bf16[9,256,128], index: 3, kind: input, shape index: {}]   ;;  %s12918_s4 = inlined_call_operand.vmem [shape: f32[1,128], index: 4, kind: input, shape index: {}]   ;;  %s12919_s5 = inlined_call_operand.vmem [shape: f32[2,4,4,128], index: 5, kind: output, shape index: {}]  }
   0x1 LB: > { %s7528_s19 = sadd.s32 4294967295, %s10772_s18   ;;  %p7532_p0 = scmp.ge.s32.totalorder %s10772_s18, 1  ;;  %s10772_s18 = sphi %s10805_s18, %s15_s18  }
   0x2   : > { %p187_p1 = scmp.lt.s32.totalorder %s10772_s18, 3 }
   0x4   : > { %p188_p2 = pnand %p7532_p0, %p187_p1 }
   0x5   : > { %v10816_v0 = vld [vmem:[%s12915_s1 + $0x4] ss:$8 sps:$4 sm:$0xff] (!%p188_p2)   ;;  %v10821_v1 = vld [vmem:[%s12915_s1] ss:$8 sps:$4 sm:$0xff] (!%p188_p2)   ;;  %v10774_v2 = vmov (!%p188_p2), 0   ;;  %p215_p3 = scmp.lt.s32.totalorder (!%p188_p2), %s7528_s19, 1 }
   0x6   : > { %191 = sbr.rel (%p188_p2) target bundleno = 1009 (0x3f1), region = 40  ;;  %373 = vmatprep.mubr.bf16.mxu0 (!%p188_p2), %v10774_v2  ;;  %226 = vst [vmem:[#allocation2] sm:$0x77] (!%p188_p2), %v10774_v2  ;;  %227 = vst [vmem:[#allocation2 + $0x8] sm:$0x77] (!%p188_p2), %v10774_v2  ;;  %540 = vmatprep.mubr.bf16.mxu1 (!%p188_p2), %v10774_v2  ;;  %v10117_v23 = vld [vmem:[%s12917_s3 + $0xc0] sm:$0xff] (!%p188_p2)  }
   0x7   : > { %228 = vst [vmem:[#allocation2 + $0x10] sm:$0x77] (!%p188_p2), %v10774_v2  ;;  %229 = vst [vmem:[#allocation2 + $0x18] sm:$0x77] (!%p188_p2), %v10774_v2  ;;  %341 = vmatprep.subr.bf16.mxu0 (!%p188_p2), %v10816_v0  ;;  %v10096_v3 = vld [vmem:[%s12915_s1 + $0x14] ss:$8 sps:$4 sm:$0xff] (!%p188_p2)   ;;  %508 = vmatprep.subr.bf16.mxu1 (!%p188_p2), %v10816_v0 }
   0x8   : > { %230 = vst [vmem:[#allocation2 + $0x20] sm:$0x77] (!%p188_p2), %v10774_v2  ;;  %231 = vst [vmem:[#allocation2 + $0x28] sm:$0x77] (!%p188_p2), %v10774_v2  ;;  %342 = vmatpush1.bf16.msra.mxu0 (!%p188_p2), %v10821_v1  ;;  %v10098_v4 = vld [vmem:[%s12915_s1 + $0x10] ss:$8 sps:$4 sm:$0xff] (!%p188_p2)   ;;  %509 = vmatpush1.bf16.msra.mxu1 (!%p188_p2), %v10821_v1 }
   0x9   : > { %343 = vmatprep.subr.bf16.mxu0 (!%p188_p2), %v10096_v3  ;;  %v10099_v5 = vld [vmem:[%s12915_s1 + $0x24] ss:$8 sps:$4 sm:$0xff] (!%p188_p2)   ;;  %510 = vmatprep.subr.bf16.mxu1 (!%p188_p2), %v10096_v3  ;;  %v10101_v6 = vld [vmem:[%s12915_s1 + $0x20] ss:$8 sps:$4 sm:$0xff] (!%p188_p2)   ;;  %v10102_v7 = vld [vmem:[%s12915_s1 + $0x34] ss:$8 sps:$4 sm:$0xff] (!%p188_p2)  }
   0xa   : > { %v10104_v8 = vld [vmem:[%s12915_s1 + $0x30] ss:$8 sps:$4 sm:$0xff] (!%p188_p2)   ;;  %v10105_v9 = vld [vmem:[%s12915_s1 + $0x44] ss:$8 sps:$4 sm:$0xff] (!%p188_p2)   ;;  %v10107_v10 = vld [vmem:[%s12915_s1 + $0x40] ss:$8 sps:$4 sm:$0xff] (!%p188_p2)  }
   0xb   : > { %v10108_v11 = vld [vmem:[%s12915_s1 + $0x54] ss:$8 sps:$4 sm:$0xff] (!%p188_p2)   ;;  %v10110_v12 = vld [vmem:[%s12915_s1 + $0x50] ss:$8 sps:$4 sm:$0xff] (!%p188_p2)   ;;  %v10111_v13 = vld [vmem:[%s12915_s1 + $0x64] ss:$8 sps:$4 sm:$0xff] (!%p188_p2)  }
   0xc   : > { %344 = vmatpush1.bf16.msra.mxu0 (!%p188_p2), %v10098_v4  ;;  %511 = vmatpush1.bf16.msra.mxu1 (!%p188_p2), %v10098_v4  ;;  %v10113_v14 = vld [vmem:[%s12915_s1 + $0x60] ss:$8 sps:$4 sm:$0xff] (!%p188_p2)   ;;  %v10114_v15 = vld [vmem:[%s12915_s1 + $0x74] ss:$8 sps:$4 sm:$0xff] (!%p188_p2)   ;;  %v10116_v16 = vld [vmem:[%s12915_s1 + $0x70] ss:$8 sps:$4 sm:$0xff] (!%p188_p2)  }
   0xd   : > { %345 = vmatprep.subr.bf16.mxu0 %v10099_v5  ;;  %512 = vmatprep.subr.bf16.mxu1 %v10099_v5  ;;  %s12923_s19 = smov (!%p215_p3, %s7528_s19), 1  ;;  %v924_v19 = vld [vmem:[#allocation2] sm:$0x77]  ;;  %v10119_v35 = vld [vmem:[%s12917_s3 + $0xc8] sm:$0xff]   ;;  %v10121_v41 = vld [vmem:[%s12917_s3 + $0xd0] sm:$0xff]   ;;  %vm400_vm1 = vcmask 1042432  }
   0xe   : > { %s9286_s23 = sshll.u32 %s12923_s19, 3  ;;  %v7641_v20 = vcombine.high %v924_v19, %v924_v19  ;;  %v10897_v21 = vcombine.low %v924_v19, %v924_v19  ;;  %v10133_v24 = vld [vmem:[%s12917_s3 + $0x40] sm:$0xff]   ;;  %v10139_v38 = vld [vmem:[%s12917_s3 + $0x48] sm:$0xff]   ;;  %v10143_v44 = vld [vmem:[%s12917_s3 + $0x50] sm:$0xff]   ;;  %vm401_vm0 = vsmask.f32 2306 }
   0xf   : > { %s10887_s7 = scalar_lea.vmem %s12914_s0, %s9286_s23  ;;  %v10118_v29 = vld [vmem:[%s12917_s3 + $0x80] sm:$0xff]   ;;  %v10120_v39 = vld [vmem:[%s12917_s3 + $0x88] sm:$0xff]   ;;  %v10122_v46 = vld [vmem:[%s12917_s3 + $0x90] sm:$0xff]   ;;  %vm403_vm2 = vcmask 1046532   ;;  %vm404_vm3 = vsmask.f32 6418 }
  0x10   : > { %346 = vmatpush1.bf16.msra.mxu0 %v10101_v6  ;;  %513 = vmatpush1.bf16.msra.mxu1 %v10101_v6  ;;  %v233_v17 = vld [vmem:[%s10887_s7] sm:$0x3]  ;;  %v7554_v18 = vld [vmem:[%s10887_s7 + $0x2] sm:$0x3]  ;;  %v973_v22 = vshll.u32 %v7641_v20, 16  ;;  %v971_v25 = vshrl.u32 %v7641_v20, 16  ;;  %vm402_vm4 = vmand %vm400_vm1, %vm401_vm0 }
  0x11   : > { %347 = vmatprep.subr.bf16.mxu0 %v10102_v7  ;;  %514 = vmatprep.subr.bf16.mxu1 %v10102_v7  ;;  %v966_v27 = vshll.u32 %v10897_v21, 16  ;;  %v7572_v28 = vld [vmem:[%s10887_s7 + $0x4] sm:$0x3]  ;;  %v7590_v30 = vld [vmem:[%s10887_s7 + $0x6] sm:$0x3]  ;;  %v964_v37 = vshrl.u32 %v10897_v21, 16  ;;  %vm405_vm5 = vmand %vm403_vm2, %vm404_vm3 }
  0x12   : > { %v975_v26 = vrot.slane %v973_v22, 1  ;;  %v10911_v31 = vld [vmem:[#allocation2] sm:$0x66]  ;;  %v10140_v43 = vld [vmem:[%s12917_s3 + $0x8] sm:$0xff]   ;;  %v10144_v47 = vld [vmem:[%s12917_s3 + $0x10] sm:$0xff]   ;;  %s9287_s25 = sshll.u32 %s12923_s19, 4 }
  0x13   : > { %v10913_v32 = vld [vmem:[#allocation2] sm:$0x33]  ;;  %v7709_v33 = vcombine.high %v10911_v31, %v10911_v31  ;;  %v968_v42 = vrot.slane %v966_v27, 1  ;;  %v10123_v48 = vld [vmem:[%s12917_s3 + $0xd8] sm:$0xff]   ;;  %v10127_v56 = vld [vmem:[%s12917_s3 + $0xe8] sm:$0xff]   ;;  %s12190_s20 = scalar_lea.vmem %s12919_s5, %s9287_s25 }
  0x14   : > { %348 = vmatpush1.bf16.msra.mxu0 %v10104_v8  ;;  %515 = vmatpush1.bf16.msra.mxu1 %v10104_v8  ;;  %v10134_v34 = vld [vmem:[%s12917_s3] sm:$0xff]   ;;  %v976_v36 = vor.u32 %v975_v26, %v971_v25  ;;  %v7659_v40 = vcombine.high %v10913_v32, %v10913_v32  ;;  %v10147_v49 = vld [vmem:[%s12917_s3 + $0x58] sm:$0xff]   ;;  %v10155_v57 = vld [vmem:[%s12917_s3 + $0x68] sm:$0xff]  }
  0x15   : > { %349 = vmatprep.subr.bf16.mxu0 %v10105_v9  ;;  %516 = vmatprep.subr.bf16.mxu1 %v10105_v9  ;;  %v10941_v45 = vrot.slane %v7709_v33, 1  ;;  %v10124_v50 = vld [vmem:[%s12917_s3 + $0x98] sm:$0xff]   ;;  %v10125_v52 = vld [vmem:[%s12917_s3 + $0xe0] sm:$0xff]   ;;  %v10128_v58 = vld [vmem:[%s12917_s3 + $0xa8] sm:$0xff]  }
  0x16   : > { %v10148_v51 = vld [vmem:[%s12917_s3 + $0x18] sm:$0xff]   ;;  %v10151_v53 = vld [vmem:[%s12917_s3 + $0x60] sm:$0xff]   ;;  %v10156_v59 = vld [vmem:[%s12917_s3 + $0x28] sm:$0xff]  }
  0x17   : > { %v10126_v54 = vld [vmem:[%s12917_s3 + $0xa0] sm:$0xff]   ;;  %v10129_v60 = vld [vmem:[%s12917_s3 + $0xf0] sm:$0xff]   ;;  %v10157_v20 = vld [vmem:[%s12917_s3 + $0x168] sm:$0xff]  }
  0x18   : > { %350 = vmatpush1.bf16.msra.mxu0 %v10107_v10  ;;  %517 = vmatpush1.bf16.msra.mxu1 %v10107_v10  ;;  %v10152_v55 = vld [vmem:[%s12917_s3 + $0x20] sm:$0xff]   ;;  %v10159_v61 = vld [vmem:[%s12917_s3 + $0x70] sm:$0xff]   ;;  %v10158_v21 = vld [vmem:[%s12917_s3 + $0x128] sm:$0xff]  }
  0x19   : > { %351 = vmatprep.subr.bf16.mxu0 %v10108_v11  ;;  %518 = vmatprep.subr.bf16.mxu1 %v10108_v11  ;;  %v10130_v62 = vld [vmem:[%s12917_s3 + $0xb0] sm:$0xff]   ;;  %v10154_v19 = vld [vmem:[%s12917_s3 + $0x120] sm:$0xff]   ;;  %v10165_v26 = vld [vmem:[%s12917_s3 + $0x178] sm:$0xff]  }
  0x1a   : > { %v10160_v63 = vld [vmem:[%s12917_s3 + $0x30] sm:$0xff]   ;;  %v10181_v27 = vld [vmem:[%s12917_s3 + $0x1d8] sm:$0xff]   ;;  %v10185_v33 = vld [vmem:[%s12917_s3 + $0x1e0] sm:$0xff]  }
  0x1b   : > { %v10161_v22 = vld [vmem:[%s12917_s3 + $0x170] sm:$0xff]   ;;  %vm11179_vm6 = vmor %vm405_vm5, %vm402_vm4 }
  0x1c   : > { %352 = vmatpush1.bf16.msra.mxu0 %v10110_v12  ;;  %519 = vmatpush1.bf16.msra.mxu1 %v10110_v12  ;;  %v10162_v25 = vld [vmem:[%s12917_s3 + $0x130] sm:$0xff]  }
  0x1d   : > { %353 = vmatprep.subr.bf16.mxu0 %v10111_v13  ;;  %520 = vmatprep.subr.bf16.mxu1 %v10111_v13 }
  0x20   : > { %354 = vmatpush1.bf16.msra.mxu0 %v10113_v14  ;;  %521 = vmatpush1.bf16.msra.mxu1 %v10113_v14 }
  0x21   : > { %355 = vmatprep.subr.bf16.mxu0 %v10114_v15  ;;  %522 = vmatprep.subr.bf16.mxu1 %v10114_v15 }
  0x24   : > { %356 = vmatpush1.bf16.msra.mxu0 %v10116_v16  ;;  %523 = vmatpush1.bf16.msra.mxu1 %v10116_v16 }
  0x25   : > { %668 = vmatprep.subr.bf16.mxu0 %v10816_v0  ;;  %828 = vmatprep.subr.bf16.mxu1 %v10816_v0  ;;  %v10131_v0 = vld [vmem:[%s12917_s3 + $0xf8] sm:$0xff]  }
  0x27   : > { %374 = vmatmul.mubr.bf16.vlgmr.msra.gmra.mrb[0].mxu0 %v233_v17  ;;  %541 = vmatmul.mubr.bf16.vlgmr.msra.gmra.mrb[0].mxu1 %v7554_v18  ;;  %v10150_v17 = vld [vmem:[%s12917_s3 + $0x118] sm:$0xff]   ;;  %v10153_v18 = vld [vmem:[%s12917_s3 + $0x160] sm:$0xff]  }
  0x28   : > { %669 = vmatpush1.bf16.msra.mxu0 %v10821_v1  ;;  %829 = vmatpush1.bf16.msra.mxu1 %v10821_v1  ;;  %v10163_v1 = vld [vmem:[%s12917_s3 + $0x78] sm:$0xff]  }
  0x29   : > { %670 = vmatprep.subr.bf16.mxu0 %v10096_v3  ;;  %700 = vmatprep.mubr.bf16.mxu0 %v10774_v2 }
  0x2a   : > { %830 = vmatprep.subr.bf16.mxu1 %v10096_v3  ;;  %860 = vmatprep.mubr.bf16.mxu1 %v10774_v2  ;;  %v10132_v2 = vld [vmem:[%s12917_s3 + $0xb8] sm:$0xff]  }
  0x2b   : > { %v10164_v3 = vld [vmem:[%s12917_s3 + $0x38] sm:$0xff]  }
  0x2c   : > { %671 = vmatpush1.bf16.msra.mxu0 %v10098_v4  ;;  %831 = vmatpush1.bf16.msra.mxu1 %v10098_v4  ;;  %v10137_v4 = vld [vmem:[%s12917_s3 + $0x140] sm:$0xff]  }
  0x2d   : > { %672 = vmatprep.subr.bf16.mxu0 %v10099_v5  ;;  %832 = vmatprep.subr.bf16.mxu1 %v10099_v5  ;;  %v10171_v5 = vld [vmem:[%s12917_s3 + $0x1c0] sm:$0xff]  }
  0x30   : > { %673 = vmatpush1.bf16.msra.mxu0 %v10101_v6  ;;  %833 = vmatpush1.bf16.msra.mxu1 %v10101_v6  ;;  %v10138_v6 = vld [vmem:[%s12917_s3 + $0x100] sm:$0xff]  }
  0x31   : > { %674 = vmatprep.subr.bf16.mxu0 %v10102_v7  ;;  %834 = vmatprep.subr.bf16.mxu1 %v10102_v7  ;;  %v969_v7 = vor.u32 %v968_v42, %v964_v37  ;;  %v10189_v37 = vld [vmem:[%s12917_s3 + $0x1e8] sm:$0xff]   ;;  %v10194_v42 = vld [vmem:[%s12917_s3 + $0x1b0] sm:$0xff]  }
  0x34   : > { %675 = vmatpush1.bf16.msra.mxu0 %v10104_v8  ;;  %835 = vmatpush1.bf16.msra.mxu1 %v10104_v8  ;;  %v10141_v8 = vld [vmem:[%s12917_s3 + $0x148] sm:$0xff]  }
  0x35   : > { %676 = vmatprep.subr.bf16.mxu0 %v10105_v9  ;;  %836 = vmatprep.subr.bf16.mxu1 %v10105_v9  ;;  %v7658_v9 = vcombine.low %v10913_v32, %v10913_v32  ;;  %v10175_v32 = vld [vmem:[%s12917_s3 + $0x240] sm:$0xff]  }
  0x38   : > { %677 = vmatpush1.bf16.msra.mxu0 %v10107_v10  ;;  %837 = vmatpush1.bf16.msra.mxu1 %v10107_v10  ;;  %v10172_v10 = vld [vmem:[%s12917_s3 + $0x180] sm:$0xff]  }
  0x39   : > { %678 = vmatprep.subr.bf16.mxu0 %v10108_v11  ;;  %838 = vmatprep.subr.bf16.mxu1 %v10108_v11  ;;  %v10173_v11 = vld [vmem:[%s12917_s3 + $0x1c8] sm:$0xff]  }
  0x3c   : > { %679 = vmatpush1.bf16.msra.mxu0 %v10110_v12  ;;  %839 = vmatpush1.bf16.msra.mxu1 %v10110_v12  ;;  %v10142_v12 = vld [vmem:[%s12917_s3 + $0x108] sm:$0xff]  }
  0x3d   : > { %680 = vmatprep.subr.bf16.mxu0 %v10111_v13  ;;  %840 = vmatprep.subr.bf16.mxu1 %v10111_v13  ;;  %v10145_v13 = vld [vmem:[%s12917_s3 + $0x150] sm:$0xff]  }
  0x40   : > { %681 = vmatpush1.bf16.msra.mxu0 %v10113_v14  ;;  %841 = vmatpush1.bf16.msra.mxu1 %v10113_v14  ;;  %v10174_v14 = vld [vmem:[%s12917_s3 + $0x188] sm:$0xff]  }
  0x41   : > { %682 = vmatprep.subr.bf16.mxu0 %v10114_v15  ;;  %842 = vmatprep.subr.bf16.mxu1 %v10114_v15  ;;  %v10146_v15 = vld [vmem:[%s12917_s3 + $0x110] sm:$0xff]  }
  0x44   : > { %683 = vmatpush1.bf16.msra.mxu0 %v10116_v16  ;;  %843 = vmatpush1.bf16.msra.mxu1 %v10116_v16  ;;  %v10149_v16 = vld [vmem:[%s12917_s3 + $0x158] sm:$0xff]  }
  0x45   : > { %9292 = vmatprep.subr.bf16.mxu0 %v10117_v23  ;;  %9314 = vmatprep.subr.bf16.mxu1 %v10133_v24  ;;  %v10177_v23 = vld [vmem:[%s12917_s3 + $0x1d0] sm:$0xff]  }
  0x46   : > { %v10178_v24 = vld [vmem:[%s12917_s3 + $0x190] sm:$0xff]  }
  0x47   : > { %701 = vmatmul.mubr.bf16.vlgmr.msra.gmra.mrb[4].mxu0 %v7572_v28  ;;  %861 = vmatmul.mubr.bf16.vlgmr.msra.gmra.mrb[4].mxu1 %v7590_v30  ;;  %v10182_v28 = vld [vmem:[%s12917_s3 + $0x198] sm:$0xff]   ;;  %v7708_v30 = vcombine.low %v10911_v31, %v10911_v31  ;;  %v10176_v31 = vld [vmem:[%s12917_s3 + $0x200] sm:$0xff]  }
  0x48   : > { %9293 = vmatpush3.bf16.msra.mxu0 %v10118_v29  ;;  %9315 = vmatpush3.bf16.msra.mxu1 %v10134_v34  ;;  %v10168_v29 = vld [vmem:[%s12917_s3 + $0x138] sm:$0xff]   ;;  %v10186_v34 = vld [vmem:[%s12917_s3 + $0x1a0] sm:$0xff]  }
  0x49   : > { %9294 = vmatprep.subr.bf16.mxu0 %v10119_v35  ;;  %1107 = vmatprep.mubr.bf16.mxu0 %v976_v36  ;;  %v1297_v35 = vrot.slane %v7708_v30, 1  ;;  %v10179_v36 = vld [vmem:[%s12917_s3 + $0x248] sm:$0xff]  }
  0x4a   : > { %9316 = vmatprep.subr.bf16.mxu1 %v10139_v38  ;;  %1250 = vmatprep.mubr.bf16.mxu1 %v7659_v40  ;;  %v10190_v38 = vld [vmem:[%s12917_s3 + $0x1a8] sm:$0xff]   ;;  %v10183_v40 = vld [vmem:[%s12917_s3 + $0x250] sm:$0xff]  }
  0x4c   : > { %9295 = vmatpush3.bf16.msra.mxu0 %v10120_v39  ;;  %9317 = vmatpush3.bf16.msra.mxu1 %v10140_v43  ;;  %v10180_v39 = vld [vmem:[%s12917_s3 + $0x208] sm:$0xff]   ;;  %v10184_v43 = vld [vmem:[%s12917_s3 + $0x210] sm:$0xff]  }
  0x4d   : > { %9296 = vmatprep.subr.bf16.mxu0 %v10121_v41  ;;  %9318 = vmatprep.subr.bf16.mxu1 %v10143_v44  ;;  %v10193_v41 = vld [vmem:[%s12917_s3 + $0x1f0] sm:$0xff]   ;;  %v10197_v44 = vld [vmem:[%s12917_s3 + $0x1f8] sm:$0xff]  }
  0x50   : > { %9297 = vmatpush3.bf16.msra.mxu0 %v10122_v46  ;;  %9319 = vmatpush3.bf16.msra.mxu1 %v10144_v47  ;;  %v10198_v46 = vld [vmem:[%s12917_s3 + $0x1b8] sm:$0xff]  }
  0x51   : > { %9298 = vmatprep.subr.bf16.mxu0 %v10123_v48  ;;  %9320 = vmatprep.subr.bf16.mxu1 %v10147_v49  ;;  %v10188_v47 = vld [vmem:[%s12917_s3 + $0x218] sm:$0xff]   ;;  %v10191_v48 = vld [vmem:[%s12917_s3 + $0x260] sm:$0xff]  }
  0x52   : > { %v10203_v49 = vld [vmem:[%s12917_s3 + $0x2c0] sm:$0xff]  }
  0x54   : > { %9299 = vmatpush3.bf16.msra.mxu0 %v10124_v50  ;;  %9321 = vmatpush3.bf16.msra.mxu1 %v10148_v51  ;;  %v10192_v50 = vld [vmem:[%s12917_s3 + $0x220] sm:$0xff]   ;;  %v10195_v51 = vld [vmem:[%s12917_s3 + $0x268] sm:$0xff]  }
  0x55   : > { %9300 = vmatprep.subr.bf16.mxu0 %v10125_v52  ;;  %9322 = vmatprep.subr.bf16.mxu1 %v10151_v53  ;;  %v10196_v52 = vld [vmem:[%s12917_s3 + $0x228] sm:$0xff]   ;;  %v10199_v53 = vld [vmem:[%s12917_s3 + $0x270] sm:$0xff]  }
  0x58   : > { %9301 = vmatpush3.bf16.msra.mxu0 %v10126_v54  ;;  %9323 = vmatpush3.bf16.msra.mxu1 %v10152_v55  ;;  %v10200_v54 = vld [vmem:[%s12917_s3 + $0x230] sm:$0xff]   ;;  %v10205_v55 = vld [vmem:[%s12917_s3 + $0x278] sm:$0xff]  }
  0x59   : > { %9302 = vmatprep.subr.bf16.mxu0 %v10127_v56  ;;  %9324 = vmatprep.subr.bf16.mxu1 %v10155_v57  ;;  %v10208_v56 = vld [vmem:[%s12917_s3 + $0x238] sm:$0xff]   ;;  %v10213_v57 = vld [vmem:[%s12917_s3 + $0x340] sm:$0xff]  }
  0x5c   : > { %9303 = vmatpush3.bf16.msra.mxu0 %v10128_v58  ;;  %9325 = vmatpush3.bf16.msra.mxu1 %v10156_v59  ;;  %v251_v58 = vlaneseq }
  0x5d   : > { %9304 = vmatprep.subr.bf16.mxu0 %v10129_v60  ;;  %9326 = vmatprep.subr.bf16.mxu1 %v10159_v61  ;;  %v232_v61 = vld [vmem:[%s12916_s2] sm:$0x3] }
  0x5e   : > { %v252_v59 = vshrl.u32 %v251_v58, 7  ;;  %v10219_v58 = vld [vmem:[%s12917_s3 + $0x2d8] sm:$0xff]  }
  0x60   : > { %9305 = vmatpush3.bf16.msra.mxu0 %v10130_v62  ;;  %9327 = vmatpush3.bf16.msra.mxu1 %v10160_v63  ;;  %v253_v60 = vsub.s32 0, %v252_v59  ;;  %v257_v62 = vsub.s32 1, %v252_v59  ;;  %v10218_v59 = vld [vmem:[%s12917_s3 + $0x308] sm:$0xff]  }
  0x61   : > { %9306 = vmatprep.subr.bf16.mxu0 %v10131_v0  ;;  %9328 = vmatprep.subr.bf16.mxu1 %v10163_v1 }
  0x62   : > { %v11169_v63 = vrot.slane %v232_v61, %v253_v60  ;;  %v11171_v0 = vrot.slane %v232_v61, %v257_v62  ;;  %v10220_v60 = vld [vmem:[%s12917_s3 + $0x298] sm:$0xff]   ;;  %v10221_v61 = vld [vmem:[%s12917_s3 + $0x350] sm:$0xff]   ;;  %v10223_v62 = vld [vmem:[%s12917_s3 + $0x2e0] sm:$0xff]  }
  0x64   : > { %9307 = vmatpush3.bf16.msra.mxu0 %v10132_v2  ;;  %9329 = vmatpush3.bf16.msra.mxu1 %v10164_v3 }
  0x65   : > { %9336 = vmatprep.subr.bf16.mxu0 %v10137_v4  ;;  %9358 = vmatprep.subr.bf16.mxu1 %v10171_v5 }
  0x67   : > { %1108 = vmatmul.mubr.bf16.vlgmr.msra.gmra.mrb[8].mxu0 %v969_v7  ;;  %1251 = vmatmul.mubr.bf16.vlgmr.msra.gmra.mrb[8].mxu1 %v7658_v9 }
  0x68   : > { %9337 = vmatpush3.bf16.msra.mxu0 %v10138_v6  ;;  %1429 = vmatprep.mubr.bf16.mxu0 %v10941_v45  ;;  %v10187_v45 = vld [vmem:[%s12917_s3 + $0x258] sm:$0xff]  }
  0x69   : > { %9338 = vmatprep.subr.bf16.mxu0 %v10141_v8  ;;  %9359 = vmatpush3.bf16.msra.mxu1 %v10172_v10 }
  0x6a   : > { %9360 = vmatprep.subr.bf16.mxu1 %v10173_v11 }
  0x6c   : > { %9339 = vmatpush3.bf16.msra.mxu0 %v10142_v12 }
  0x6d   : > { %9340 = vmatprep.subr.bf16.mxu0 %v10145_v13  ;;  %9361 = vmatpush3.bf16.msra.mxu1 %v10174_v14 }
  0x6e   : > { %9362 = vmatprep.subr.bf16.mxu1 %v10177_v23 }
  0x70   : > { %9341 = vmatpush3.bf16.msra.mxu0 %v10146_v15 }
  0x71   : > { %9342 = vmatprep.subr.bf16.mxu0 %v10149_v16  ;;  %9363 = vmatpush3.bf16.msra.mxu1 %v10178_v24 }
  0x72   : > { %9364 = vmatprep.subr.bf16.mxu1 %v10181_v27  ;;  %v567_v27 = vld [vmem:[#allocation2 + $0x10] sm:$0x77] }
  0x74   : > { %9343 = vmatpush3.bf16.msra.mxu0 %v10150_v17 }
  0x75   : > { %9344 = vmatprep.subr.bf16.mxu0 %v10153_v18  ;;  %9365 = vmatpush3.bf16.msra.mxu1 %v10182_v28 }
  0x76   : > { %9366 = vmatprep.subr.bf16.mxu1 %v10185_v33 }
  0x78   : > { %9345 = vmatpush3.bf16.msra.mxu0 %v10154_v19 }
  0x79   : > { %9346 = vmatprep.subr.bf16.mxu0 %v10157_v20  ;;  %9367 = vmatpush3.bf16.msra.mxu1 %v10186_v34 }
  0x7a   : > { %9368 = vmatprep.subr.bf16.mxu1 %v10189_v37  ;;  %v10204_v37 = vld [vmem:[%s12917_s3 + $0x280] sm:$0xff]  }
  0x7c   : > { %9347 = vmatpush3.bf16.msra.mxu0 %v10158_v21 }
  0x7d   : > { %9348 = vmatprep.subr.bf16.mxu0 %v10161_v22  ;;  %9369 = vmatpush3.bf16.msra.mxu1 %v10190_v38  ;;  %v407_v22 = vld [vmem:[#allocation2 + $0x8] sm:$0x77] }
  0x7e   : > { %9370 = vmatprep.subr.bf16.mxu1 %v10193_v41 }
  0x80   : > { %9349 = vmatpush3.bf16.msra.mxu0 %v10162_v25 }
  0x81   : > { %9350 = vmatprep.subr.bf16.mxu0 %v10165_v26  ;;  %9371 = vmatpush3.bf16.msra.mxu1 %v10194_v42  ;;  %v10247_v26 = vld [vmem:[%s12917_s3 + $0x440] sm:$0xff]  }
  0x82   : > { %9372 = vmatprep.subr.bf16.mxu1 %v10197_v44 }
  0x84   : > { %9351 = vmatpush3.bf16.msra.mxu0 %v10168_v29 }
  0x85   : > { %9380 = vmatprep.subr.bf16.mxu0 %v10175_v32  ;;  %9373 = vmatpush3.bf16.msra.mxu1 %v10198_v46 }
  0x86   : > { %9402 = vmatprep.subr.bf16.mxu1 %v10203_v49 }
  0x87   : > { %1430 = vmatmul.mubr.bf16.vlgmr.msra.gmra.mrb[12].mxu0 %v1297_v35 }
  0x88   : > { %9381 = vmatpush3.bf16.msra.mxu0 %v10176_v31 }
  0x89   : > { %9382 = vmatprep.subr.bf16.mxu0 %v10179_v36 }
  0x8c   : > { %9383 = vmatpush3.bf16.msra.mxu0 %v10180_v39  ;;  %v10209_v39 = vld [vmem:[%s12917_s3 + $0x2c8] sm:$0xff]  }
  0x8d   : > { %9384 = vmatprep.subr.bf16.mxu0 %v10183_v40 }
  0x90   : > { %9385 = vmatpush3.bf16.msra.mxu0 %v10184_v43 }
  0x91   : > { %9386 = vmatprep.subr.bf16.mxu0 %v10187_v45  ;;  %v10210_v45 = vld [vmem:[%s12917_s3 + $0x288] sm:$0xff]  }
  0x94   : > { %9387 = vmatpush3.bf16.msra.mxu0 %v10188_v47 }
  0x95   : > { %9388 = vmatprep.subr.bf16.mxu0 %v10191_v48 }
  0x98   : > { %9389 = vmatpush3.bf16.msra.mxu0 %v10192_v50 }
  0x99   : > { %9390 = vmatprep.subr.bf16.mxu0 %v10195_v51  ;;  %v10215_v51 = vld [vmem:[%s12917_s3 + $0x2d0] sm:$0xff]  }
  0x9c   : > { %9391 = vmatpush3.bf16.msra.mxu0 %v10196_v52 }
  0x9d   : > { %9392 = vmatprep.subr.bf16.mxu0 %v10199_v53 }
  0xa0   : > { %9393 = vmatpush3.bf16.msra.mxu0 %v10200_v54  ;;  %v10214_v54 = vld [vmem:[%s12917_s3 + $0x300] sm:$0xff]  }
  0xa1   : > { %9394 = vmatprep.subr.bf16.mxu0 %v10205_v55  ;;  %v10216_v55 = vld [vmem:[%s12917_s3 + $0x290] sm:$0xff]  }
  0xa4   : > { %9395 = vmatpush3.bf16.msra.mxu0 %v10208_v56 }
  0xa5   : > { %9424 = vmatprep.subr.bf16.mxu0 %v10213_v57  ;;  %v10217_v57 = vld [vmem:[%s12917_s3 + $0x348] sm:$0xff]  }
  0xfa   : > { %v375_v1 = vpop.f32.mrb[0].mxu0  ;;  %v542_v2 = vpop.f32.mrb[0].mxu1 }
  0xfb   : > { %v376_v3 = vadd.f32 %v375_v1, %v11169_v63  ;;  %v377_v4 = vpop.f32.mrb[1].mxu0  ;;  %v543_v5 = vadd.f32 %v542_v2, %v11169_v63  ;;  %v544_v6 = vpop.f32.mrb[1].mxu1  ;;  %v10222_v1 = vld [vmem:[%s12917_s3 + $0x310] sm:$0xff]  }
  0xfc   : > { %v378_v7 = vadd.f32 %v377_v4, %v11171_v0  ;;  %v379_v8 = vpop.f32.mrb[2].mxu0  ;;  %v545_v9 = vadd.f32 %v544_v6, %v11171_v0  ;;  %v546_v10 = vpop.f32.mrb[2].mxu1  ;;  %v10225_v4 = vld [vmem:[%s12917_s3 + $0x358] sm:$0xff]  }
  0xfd   : > { %v382_v11 = vmax.f32 %v376_v3, 0.0  ;;  %v380_v12 = vpop.f32.mrb[3].mxu0  ;;  %v549_v13 = vmax.f32 %v543_v5, 0.0  ;;  %v547_v14 = vpop.f32.mrb[3].mxu1  ;;  %v10224_v3 = vld [vmem:[%s12917_s3 + $0x2a0] sm:$0xff]   ;;  %v10227_v8 = vld [vmem:[%s12917_s3 + $0x2e8] sm:$0xff]  }
  0xfe   : > { %v383_v15 = vmax.f32 %v378_v7, 0.0  ;;  %v550_v16 = vmax.f32 %v545_v9, 0.0 }
 0x100   : > { %v9288_v17 = vpack.c.bf16 %v383_v15, %v382_v11  ;;  %v9289_v18 = vpack.c.bf16 %v550_v16, %v549_v13  ;;  %v10226_v15 = vld [vmem:[%s12917_s3 + $0x318] sm:$0xff]  }
 0x102   : > { %v392_v19 = vshrl.u32 %v9288_v17, 16  ;;  %v559_v20 = vshrl.u32 %v9289_v18, 16  ;;  %v562_v21 = vshll.u32 %v9289_v18, 16  ;;  %v395_v24 = vshll.u32 %v9288_v17, 16  ;;  %v10228_v18 = vld [vmem:[%s12917_s3 + $0x2a8] sm:$0xff]  }
 0x104   : > { %v394_v23 = vrot.slane %v392_v19, 7  ;;  %v561_v25 = vrot.slane %v559_v20, 7 }
 0x106   : > { %v397_v28 = vor.u32 %v395_v24, %v394_v23  ;;  %v564_v29 = vor.u32 %v562_v21, %v561_v25  ;;  %v10231_v23 = vld [vmem:[%s12917_s3 + $0x2f0] sm:$0xff]  }
 0x108   : > { %v408_v30 = vsel %vm11179_vm6, %v397_v28, %v407_v22  ;;  %v568_v32 = vsel %vm11179_vm6, %v564_v29, %v567_v27  ;;  %v10230_v28 = vld [vmem:[%s12917_s3 + $0x320] sm:$0xff]   ;;  %v10232_v29 = vld [vmem:[%s12917_s3 + $0x2b0] sm:$0xff]  }
 0x109   : > { %409 = vst [vmem:[#allocation2 + $0x8] sm:$0x77] %v408_v30  ;;  %569 = vst [vmem:[#allocation2 + $0x10] sm:$0x77] %v568_v32  ;;  %v10233_v32 = vld [vmem:[%s12917_s3 + $0x368] sm:$0xff]  }
 0x110   : > { %v1438_v33 = vld [vmem:[#allocation2 + $0x8] sm:$0x33]  ;;  %v11200_v46 = vld [vmem:[#allocation2 + $0x10] sm:$0x33] }
 0x111   : > { %v11187_v34 = vld [vmem:[#allocation2 + $0x8] sm:$0x66]  ;;  %v7758_v31 = vcombine.low %v1438_v33, %v1438_v33  ;;  %v7759_v36 = vcombine.high %v1438_v33, %v1438_v33  ;;  %v7909_v56 = vcombine.high %v11200_v46, %v11200_v46  ;;  %v11244_v9 = vld [vmem:[#allocation2 + $0x10] sm:$0x77] }
 0x112   : > { %v1616_v35 = vld [vmem:[#allocation2 + $0x8] sm:$0x77]  ;;  %v7859_v38 = vcombine.high %v11187_v34, %v11187_v34  ;;  %v7959_v19 = vcombine.high %v11244_v9, %v11244_v9 }
 0x113   : > { %v7808_v40 = vcombine.low %v1616_v35, %v1616_v35  ;;  %v7809_v41 = vcombine.high %v1616_v35, %v1616_v35  ;;  %1607 = vmatprep.mubr.bf16.mxu1 %v7759_v36  ;;  %v727_v35 = vld [vmem:[#allocation2 + $0x18] sm:$0x77]  ;;  %v10234_v36 = vld [vmem:[%s12917_s3 + $0x328] sm:$0xff]  }
 0x114   : > { %v1848_v42 = vrot.slane %v7859_v38, 1  ;;  %1608 = vmatmul.mubr.bf16.vlgmr.msra.gmra.mrb[12].mxu1 %v7758_v31  ;;  %v2215_v33 = vshll.u32 %v7959_v19, 16 }
 0x115   : > { %v1665_v43 = vshll.u32 %v7809_v41, 16  ;;  %v1658_v44 = vshll.u32 %v7808_v40, 16  ;;  %9403 = vmatpush3.bf16.msra.mxu1 %v10204_v37  ;;  %v1663_v47 = vshrl.u32 %v7809_v41, 16  ;;  %v1656_v49 = vshrl.u32 %v7808_v40, 16  ;;  %v10235_v37 = vld [vmem:[%s12917_s3 + $0x2f8] sm:$0xff]  }
 0x116   : > { %1979 = vmatprep.mubr.bf16.mxu1 %v1848_v42  ;;  %9404 = vmatprep.subr.bf16.mxu1 %v10209_v39  ;;  %v10236_v39 = vld [vmem:[%s12917_s3 + $0x2b8] sm:$0xff]   ;;  %v10237_v42 = vld [vmem:[%s12917_s3 + $0x370] sm:$0xff]  }
 0x117   : > { %v1667_v48 = vrot.slane %v1665_v43, 1  ;;  %v1660_v50 = vrot.slane %v1658_v44, 1  ;;  %v10239_v43 = vld [vmem:[%s12917_s3 + $0x3c0] sm:$0xff]   ;;  %v2213_v44 = vshrl.u32 %v7959_v19, 16 }
 0x119   : > { %v1668_v52 = vor.u32 %v1667_v48, %v1663_v47  ;;  %v1661_v53 = vor.u32 %v1660_v50, %v1656_v49  ;;  %9405 = vmatpush3.bf16.msra.mxu1 %v10210_v45  ;;  %v7858_v47 = vcombine.low %v11187_v34, %v11187_v34  ;;  %v2217_v48 = vrot.slane %v2215_v33, 1  ;;  %v887_v50 = vld [vmem:[#allocation2 + $0x20] sm:$0x77]  ;;  %v10266_v33 = vld [vmem:[%s12917_s3 + $0x3b0] sm:$0xff]  }
 0x11a   : > { %9406 = vmatprep.subr.bf16.mxu1 %v10215_v51  ;;  %v702_v2 = vpop.f32.mrb[4].mxu0  ;;  %v862_v7 = vpop.f32.mrb[4].mxu1  ;;  %v10238_v51 = vld [vmem:[%s12917_s3 + $0x330] sm:$0xff]   ;;  %v10240_v34 = vld [vmem:[%s12917_s3 + $0x380] sm:$0xff]  }
 0x11b   : > { %1799 = vmatprep.mubr.bf16.mxu0 %v1668_v52  ;;  %v703_v5 = vadd.f32 %v702_v2, %v11169_v63  ;;  %v704_v6 = vpop.f32.mrb[5].mxu0  ;;  %v863_v11 = vadd.f32 %v862_v7, %v11169_v63  ;;  %v864_v17 = vpop.f32.mrb[5].mxu1  ;;  %v10229_v63 = vld [vmem:[%s12917_s3 + $0x360] sm:$0xff]  }
 0x11c   : > { %1800 = vmatmul.mubr.bf16.vlgmr.msra.gmra.mrb[16].mxu0 %v1661_v53  ;;  %v705_v10 = vadd.f32 %v704_v6, %v11171_v0  ;;  %v706_v12 = vpop.f32.mrb[6].mxu0  ;;  %v865_v21 = vadd.f32 %v864_v17, %v11171_v0  ;;  %v866_v22 = vpop.f32.mrb[6].mxu1  ;;  %v10248_v2 = vld [vmem:[%s12917_s3 + $0x400] sm:$0xff]   ;;  %v10253_v6 = vld [vmem:[%s12917_s3 + $0x3d8] sm:$0xff]   ;;  %v11359_v17 = vld [vmem:[#allocation2 + $0x8] sm:$0x77] }
 0x11d   : > { %9425 = vmatpush3.bf16.msra.mxu0 %v10214_v54  ;;  %2157 = vmatprep.mubr.bf16.mxu0 %v7909_v56  ;;  %v709_v13 = vmax.f32 %v703_v5, 0.0  ;;  %v707_v14 = vpop.f32.mrb[7].mxu0  ;;  %v869_v20 = vmax.f32 %v863_v11, 0.0  ;;  %v867_v25 = vpop.f32.mrb[7].mxu1  ;;  %v10241_v54 = vld [vmem:[%s12917_s3 + $0x378] sm:$0xff]   ;;  %v10243_v56 = vld [vmem:[%s12917_s3 + $0x3c8] sm:$0xff]   ;;  %v7958_v22 = vcombine.low %v11244_v9, %v11244_v9 }
 0x11e   : > { %9407 = vmatpush3.bf16.msra.mxu1 %v10216_v55  ;;  %9426 = vmatprep.subr.bf16.mxu0 %v10217_v57  ;;  %v710_v16 = vmax.f32 %v705_v10, 0.0  ;;  %v870_v27 = vmax.f32 %v865_v21, 0.0  ;;  %v1847_v55 = vrot.slane %v7858_v47, 1  ;;  %v11303_v57 = vld [vmem:[#allocation2 + $0x10] sm:$0x66]  ;;  %v10251_v5 = vld [vmem:[%s12917_s3 + $0x448] sm:$0xff]  }
 0x11f   : > { %9408 = vmatprep.subr.bf16.mxu1 %v10219_v58  ;;  %v10255_v10 = vld [vmem:[%s12917_s3 + $0x450] sm:$0xff]   ;;  %v10257_v11 = vld [vmem:[%s12917_s3 + $0x3e0] sm:$0xff]   ;;  %v10259_v14 = vld [vmem:[%s12917_s3 + $0x458] sm:$0xff]  }
 0x120   : > { %v9290_v24 = vpack.c.bf16 %v710_v16, %v709_v13  ;;  %v9291_v31 = vpack.c.bf16 %v870_v27, %v869_v20  ;;  %v10256_v12 = vld [vmem:[%s12917_s3 + $0x410] sm:$0xff]   ;;  %v10258_v13 = vld [vmem:[%s12917_s3 + $0x3a0] sm:$0xff]   ;;  %v10261_v16 = vld [vmem:[%s12917_s3 + $0x3e8] sm:$0xff]  }
 0x121   : > { %9427 = vmatpush3.bf16.msra.mxu0 %v10218_v59  ;;  %v2218_v59 = vor.u32 %v2217_v48, %v2213_v44  ;;  %v10262_v20 = vld [vmem:[%s12917_s3 + $0x3a8] sm:$0xff]   ;;  %v10263_v21 = vld [vmem:[%s12917_s3 + $0x460] sm:$0xff]   ;;  %v10276_v47 = vld [vmem:[%s12917_s3 + $0x430] sm:$0xff]  }
 0x122   : > { %9409 = vmatpush3.bf16.msra.mxu1 %v10220_v60  ;;  %9428 = vmatprep.subr.bf16.mxu0 %v10221_v61  ;;  %v719_v30 = vshrl.u32 %v9290_v24, 16  ;;  %v722_v0 = vshll.u32 %v9290_v24, 16  ;;  %v879_v40 = vshrl.u32 %v9291_v31, 16  ;;  %v882_v41 = vshll.u32 %v9291_v31, 16  ;;  %v10242_v60 = vld [vmem:[%s12917_s3 + $0x338] sm:$0xff]   ;;  %v10246_v61 = vld [vmem:[%s12917_s3 + $0x388] sm:$0xff]  }
 0x123   : > { %9410 = vmatprep.subr.bf16.mxu1 %v10223_v62  ;;  %v8009_v62 = vcombine.high %v11303_v57, %v11303_v57  ;;  %v10264_v9 = vld [vmem:[%s12917_s3 + $0x420] sm:$0xff]   ;;  %v10269_v31 = vld [vmem:[%s12917_s3 + $0x468] sm:$0xff]  }
 0x124   : > { %v721_v38 = vrot.slane %v719_v30, 7  ;;  %v881_v49 = vrot.slane %v879_v40, 7  ;;  %v10274_v40 = vld [vmem:[%s12917_s3 + $0x3b8] sm:$0xff]   ;;  %v10278_v48 = vld [vmem:[%s12917_s3 + $0x80] sm:$0xff]  }
 0x125   : > { %9429 = vmatpush3.bf16.msra.mxu0 %v10222_v1  ;;  %v10249_v1 = vld [vmem:[%s12917_s3 + $0x3d0] sm:$0xff]   ;;  %v2398_v7 = vrot.slane %v8009_v62, 1  ;;  %v10291_v62 = vld [vmem:[%s12917_s3 + $0x48] sm:$0xff]  }
 0x126   : > { %9411 = vmatpush3.bf16.msra.mxu1 %v10224_v3  ;;  %9430 = vmatprep.subr.bf16.mxu0 %v10225_v4  ;;  %v724_v45 = vor.u32 %v722_v0, %v721_v38  ;;  %v884_v53 = vor.u32 %v882_v41, %v881_v49  ;;  %v7908_v3 = vcombine.low %v11200_v46, %v11200_v46  ;;  %v10250_v4 = vld [vmem:[%s12917_s3 + $0x390] sm:$0xff]   ;;  %v10252_v46 = vld [vmem:[%s12917_s3 + $0x408] sm:$0xff]  }
 0x127   : > { %9412 = vmatprep.subr.bf16.mxu1 %v10227_v8  ;;  %v10254_v8 = vld [vmem:[%s12917_s3 + $0x398] sm:$0xff]   ;;  %v10275_v41 = vld [vmem:[%s12917_s3 + $0x470] sm:$0xff]  }
 0x128   : > { %v728_v52 = vsel %vm11179_vm6, %v724_v45, %v727_v35  ;;  %v888_v58 = vsel %vm11179_vm6, %v884_v53, %v887_v50  ;;  %v10281_v50 = vld [vmem:[%s12917_s3 + $0x478] sm:$0xff]  }
 0x129   : > { %9431 = vmatpush3.bf16.msra.mxu0 %v10226_v15  ;;  %729 = vst [vmem:[#allocation2 + $0x18] sm:$0x77] %v728_v52  ;;  %889 = vst [vmem:[#allocation2 + $0x20] sm:$0x77] %v888_v58  ;;  %v10282_v53 = vld [vmem:[%s12917_s3 + $0x438] sm:$0xff]   ;;  %v10289_v58 = vld [vmem:[%s12917_s3 + $0xd0] sm:$0xff]  }
 0x12a   : > { %9413 = vmatpush3.bf16.msra.mxu1 %v10228_v18  ;;  %9432 = vmatprep.subr.bf16.mxu0 %v10229_v63  ;;  %v10260_v18 = vld [vmem:[%s12917_s3 + $0x418] sm:$0xff]  }
 0x12b   : > { %9414 = vmatprep.subr.bf16.mxu1 %v10231_v23  ;;  %v8060_v23 = vcombine.high %v11359_v17, %v11359_v17 }
 0x12d   : > { %9433 = vmatpush3.bf16.msra.mxu0 %v10230_v28  ;;  %v10265_v28 = vld [vmem:[%s12917_s3 + $0x3f0] sm:$0xff]   ;;  %v2627_v38 = vshll.u32 %v8060_v23, 16  ;;  %v2625_v49 = vshrl.u32 %v8060_v23, 16  ;;  %v10309_v23 = vld [vmem:[%s12917_s3 + $0xf8] sm:$0xff]  }
 0x12e   : > { %9415 = vmatpush3.bf16.msra.mxu1 %v10232_v29  ;;  %9434 = vmatprep.subr.bf16.mxu0 %v10233_v32 }
 0x12f   : > { %9416 = vmatprep.subr.bf16.mxu1 %v10235_v37  ;;  %v2208_v37 = vshll.u32 %v7958_v22, 16  ;;  %v2629_v45 = vrot.slane %v2627_v38, 1 }
 0x131   : > { %9435 = vmatpush3.bf16.msra.mxu0 %v10234_v36  ;;  %v10273_v36 = vld [vmem:[%s12917_s3 + $0x3f8] sm:$0xff]   ;;  %v2210_v44 = vrot.slane %v2208_v37, 1  ;;  %v10319_v37 = vld [vmem:[%s12917_s3 + $0x148] sm:$0xff]  }
 0x132   : > { %9417 = vmatpush3.bf16.msra.mxu1 %v10236_v39  ;;  %9436 = vmatprep.subr.bf16.mxu0 %v10237_v42  ;;  %v10272_v39 = vld [vmem:[%s12917_s3 + $0x428] sm:$0xff]   ;;  %v2206_v42 = vshrl.u32 %v7958_v22, 16 }
 0x133   : > { %9446 = vmatprep.subr.bf16.mxu1 %v10239_v43  ;;  %v10277_v43 = vld [vmem:[%s12917_s3 + $0xc0] sm:$0xff]   ;;  %v10307_v22 = vld [vmem:[%s12917_s3 + $0x68] sm:$0xff]  }
 0x134   : > { %v2211_v52 = vor.u32 %v2210_v44, %v2206_v42  ;;  %v10325_v42 = vld [vmem:[%s12917_s3 + $0x150] sm:$0xff]  }
 0x135   : > { %9437 = vmatpush3.bf16.msra.mxu0 %v10238_v51  ;;  %1980 = vmatmul.mubr.bf16.vlgmr.msra.gmra.mrb[16].mxu1 %v1847_v55  ;;  %v10283_v51 = vld [vmem:[%s12917_s3 + $0xc8] sm:$0xff]   ;;  %v11541_v44 = vld [vmem:[#allocation2 + $0x10] sm:$0x33] }
 0x136   : > { %9447 = vmatpush3.bf16.msra.mxu1 %v10240_v34  ;;  %9438 = vmatprep.subr.bf16.mxu0 %v10241_v54  ;;  %v2630_v34 = vor.u32 %v2629_v45, %v2625_v49  ;;  %v8008_v54 = vcombine.low %v11303_v57, %v11303_v57  ;;  %v10284_v55 = vld [vmem:[%s12917_s3 + $0x88] sm:$0xff]   ;;  %v10286_v57 = vld [vmem:[%s12917_s3] sm:$0xff]   ;;  %v10326_v45 = vld [vmem:[%s12917_s3 + $0x110] sm:$0xff]  }
 0x137   : > { %9448 = vmatprep.subr.bf16.mxu1 %v10243_v56  ;;  %2349 = vmatprep.mubr.bf16.mxu1 %v2218_v59  ;;  %v10285_v56 = vld [vmem:[%s12917_s3 + $0x40] sm:$0xff]   ;;  %v11432_v59 = vld [vmem:[#allocation2 + $0x8] sm:$0x33] }
 0x138   : > { %v8077_v49 = vcombine.low %v11432_v59, %v11432_v59 }
 0x139   : > { %9439 = vmatpush3.bf16.msra.mxu0 %v10242_v60  ;;  %v2397_v60 = vrot.slane %v8008_v54, 1  ;;  %v10332_v54 = vld [vmem:[%s12917_s3 + $0x190] sm:$0xff]  }
 0x13a   : > { %9449 = vmatpush3.bf16.msra.mxu1 %v10246_v61  ;;  %9468 = vmatprep.subr.bf16.mxu0 %v10247_v26  ;;  %v9308_v15 = vpop.f32.mrb[8].mxu0  ;;  %v9330_v19 = vpop.f32.mrb[8].mxu1  ;;  %v10290_v61 = vld [vmem:[%s12917_s3 + $0x90] sm:$0xff]   ;;  %v8078_v26 = vcombine.high %v11432_v59, %v11432_v59  ;;  %v10336_v59 = vld [vmem:[%s12917_s3 + $0x198] sm:$0xff]  }
 0x13b   : > { %9450 = vmatprep.subr.bf16.mxu1 %v10249_v1  ;;  %v9309_v63 = vpop.f32.mrb[9].mxu0  ;;  %v9331_v27 = vpop.f32.mrb[9].mxu1  ;;  %v10293_v1 = vld [vmem:[%s12917_s3 + $0xd8] sm:$0xff]  }
 0x13c   : > { %2158 = vmatmul.mubr.bf16.vlgmr.msra.gmra.mrb[20].mxu0 %v7908_v3  ;;  %v9310_v24 = vadd.f32 %v9309_v63, %v9308_v15  ;;  %v9311_v25 = vpop.f32.mrb[10].mxu0  ;;  %v9332_v30 = vadd.f32 %v9331_v27, %v9330_v19  ;;  %v9333_v0 = vpop.f32.mrb[10].mxu1  ;;  %v10301_v15 = vld [vmem:[%s12917_s3 + $0xe8] sm:$0xff]   ;;  %v10303_v19 = vld [vmem:[%s12917_s3 + $0x60] sm:$0xff]   ;;  %v10310_v27 = vld [vmem:[%s12917_s3 + $0xb8] sm:$0xff]  }
 0x13d   : > { %9469 = vmatpush3.bf16.msra.mxu0 %v10248_v2  ;;  %2529 = vmatprep.mubr.bf16.mxu0 %v2398_v7  ;;  %v9312_v29 = vpop.f32.mrb[11].mxu0  ;;  %v9334_v32 = vpop.f32.mrb[11].mxu1  ;;  %v10302_v63 = vld [vmem:[%s12917_s3 + $0xa8] sm:$0xff]  }
 0x13e   : > { %9451 = vmatpush3.bf16.msra.mxu1 %v10250_v4  ;;  %9470 = vmatprep.subr.bf16.mxu0 %v10251_v5  ;;  %v11383_v35 = vadd.f32 %v9332_v30, %v9310_v24  ;;  %v10292_v4 = vld [vmem:[%s12917_s3 + $0x8] sm:$0xff]   ;;  %v10294_v5 = vld [vmem:[%s12917_s3 + $0x98] sm:$0xff]   ;;  %v10311_v29 = vld [vmem:[%s12917_s3 + $0x70] sm:$0xff]  }
 0x13f   : > { %9452 = vmatprep.subr.bf16.mxu1 %v10253_v6  ;;  %v10308_v25 = vld [vmem:[%s12917_s3 + $0x28] sm:$0xff]   ;;  %v10312_v30 = vld [vmem:[%s12917_s3 + $0x30] sm:$0xff]   ;;  %v10313_v32 = vld [vmem:[%s12917_s3 + $0x140] sm:$0xff]  }
 0x141   : > { %9471 = vmatpush3.bf16.msra.mxu0 %v10252_v46  ;;  %v10295_v46 = vld [vmem:[%s12917_s3 + $0x50] sm:$0xff]  }
 0x142   : > { %9453 = vmatpush3.bf16.msra.mxu1 %v10254_v8  ;;  %9472 = vmatprep.subr.bf16.mxu0 %v10255_v10  ;;  %v10297_v8 = vld [vmem:[%s12917_s3 + $0xe0] sm:$0xff]  }
 0x143   : > { %9454 = vmatprep.subr.bf16.mxu1 %v10257_v11 }
 0x145   : > { %9473 = vmatpush3.bf16.msra.mxu0 %v10256_v12  ;;  %v10296_v12 = vld [vmem:[%s12917_s3 + $0x10] sm:$0xff]  }
 0x146   : > { %9455 = vmatpush3.bf16.msra.mxu1 %v10258_v13  ;;  %9474 = vmatprep.subr.bf16.mxu0 %v10259_v14  ;;  %v10298_v13 = vld [vmem:[%s12917_s3 + $0xa0] sm:$0xff]   ;;  %v10299_v14 = vld [vmem:[%s12917_s3 + $0x58] sm:$0xff]  }
 0x147   : > { %9456 = vmatprep.subr.bf16.mxu1 %v10261_v16  ;;  %v8059_v16 = vcombine.low %v11359_v17, %v11359_v17  ;;  %v10304_v17 = vld [vmem:[%s12917_s3 + $0x20] sm:$0xff]  }
 0x149   : > { %9475 = vmatpush3.bf16.msra.mxu0 %v10260_v18  ;;  %v10300_v18 = vld [vmem:[%s12917_s3 + $0x18] sm:$0xff]   ;;  %v2620_v24 = vshll.u32 %v8059_v16, 16 }
 0x14a   : > { %9457 = vmatpush3.bf16.msra.mxu1 %v10262_v20  ;;  %9476 = vmatprep.subr.bf16.mxu0 %v10263_v21  ;;  %v10305_v20 = vld [vmem:[%s12917_s3 + $0xf0] sm:$0xff]  }
 0x14b   : > { %9458 = vmatprep.subr.bf16.mxu1 %v10265_v28  ;;  %v10306_v21 = vld [vmem:[%s12917_s3 + $0xb0] sm:$0xff]   ;;  %v11504_v28 = vld [vmem:[#allocation2 + $0x8] sm:$0x66]  ;;  %v2622_v0 = vrot.slane %v2620_v24, 1  ;;  %v10358_v24 = vld [vmem:[%s12917_s3 + $0x280] sm:$0xff]  }
 0x14d   : > { %9477 = vmatpush3.bf16.msra.mxu0 %v10264_v9  ;;  %v8128_v9 = vcombine.high %v11504_v28, %v11504_v28 }
 0x14e   : > { %9459 = vmatpush3.bf16.msra.mxu1 %v10266_v33  ;;  %9478 = vmatprep.subr.bf16.mxu0 %v10269_v31  ;;  %v2618_v33 = vshrl.u32 %v8059_v16, 16  ;;  %v11628_v16 = vld [vmem:[#allocation2 + $0x10] sm:$0x66] }
 0x14f   : > { %9460 = vmatprep.subr.bf16.mxu1 %v10273_v36  ;;  %v10317_v36 = vld [vmem:[%s12917_s3 + $0x78] sm:$0xff]   ;;  %v2951_v38 = vrot.slane %v8128_v9, 1 }
 0x150   : > { %v2623_v31 = vor.u32 %v2622_v0, %v2618_v33  ;;  %v8177_v0 = vcombine.low %v11541_v44, %v11541_v44  ;;  %v10366_v9 = vld [vmem:[%s12917_s3 + $0x218] sm:$0xff]   ;;  %v10367_v33 = vld [vmem:[%s12917_s3 + $0x2d0] sm:$0xff]  }
 0x151   : > { %9479 = vmatpush3.bf16.msra.mxu0 %v10272_v39  ;;  %v10318_v39 = vld [vmem:[%s12917_s3 + $0x38] sm:$0xff]  }
 0x152   : > { %9461 = vmatpush3.bf16.msra.mxu1 %v10274_v40  ;;  %9480 = vmatprep.subr.bf16.mxu0 %v10275_v41  ;;  %v10320_v40 = vld [vmem:[%s12917_s3 + $0x108] sm:$0xff]   ;;  %v10321_v41 = vld [vmem:[%s12917_s3 + $0x1c0] sm:$0xff]  }
 0x153   : > { %9490 = vmatprep.subr.bf16.mxu1 %v10277_v43  ;;  %v10322_v43 = vld [vmem:[%s12917_s3 + $0x180] sm:$0xff]  }
 0x155   : > { %9481 = vmatpush3.bf16.msra.mxu0 %v10276_v47  ;;  %2350 = vmatmul.mubr.bf16.vlgmr.msra.gmra.mrb[20].mxu1 %v2211_v52  ;;  %v10327_v47 = vld [vmem:[%s12917_s3 + $0x1c8] sm:$0xff]   ;;  %v10330_v52 = vld [vmem:[%s12917_s3 + $0x118] sm:$0xff]  }
 0x156   : > { %9491 = vmatpush3.bf16.msra.mxu1 %v10278_v48  ;;  %2761 = vmatprep.mubr.bf16.mxu1 %v2630_v34  ;;  %v10329_v48 = vld [vmem:[%s12917_s3 + $0x158] sm:$0xff]   ;;  %v10333_v34 = vld [vmem:[%s12917_s3 + $0x160] sm:$0xff]  }
 0x157   : > { %9482 = vmatprep.subr.bf16.mxu0 %v10281_v50  ;;  %9492 = vmatprep.subr.bf16.mxu1 %v10283_v51  ;;  %v8178_v50 = vcombine.high %v11541_v44, %v11541_v44  ;;  %v10328_v51 = vld [vmem:[%s12917_s3 + $0x188] sm:$0xff]   ;;  %v10376_v44 = vld [vmem:[%s12917_s3 + $0x2a0] sm:$0xff]  }
 0x159   : > { %9483 = vmatpush3.bf16.msra.mxu0 %v10282_v53  ;;  %v10331_v53 = vld [vmem:[%s12917_s3 + $0x1d0] sm:$0xff]  }
 0x15a   : > { %9493 = vmatpush3.bf16.msra.mxu1 %v10284_v55  ;;  %9512 = vmatprep.subr.bf16.mxu0 %v10285_v56  ;;  %v9352_v2 = vpop.f32.mrb[12].mxu0  ;;  %v10334_v55 = vld [vmem:[%s12917_s3 + $0x120] sm:$0xff]   ;;  %v10335_v56 = vld [vmem:[%s12917_s3 + $0x1d8] sm:$0xff]  }
 0x15b   : > { %9494 = vmatprep.subr.bf16.mxu1 %v10289_v58  ;;  %v9353_v3 = vpop.f32.mrb[13].mxu0  ;;  %v10337_v58 = vld [vmem:[%s12917_s3 + $0x168] sm:$0xff]  }
 0x15c   : > { %2530 = vmatmul.mubr.bf16.vlgmr.msra.gmra.mrb[24].mxu0 %v2397_v60  ;;  %v9354_v6 = vadd.f32 %v9353_v3, %v9352_v2  ;;  %v9355_v7 = vpop.f32.mrb[14].mxu0  ;;  %v10338_v60 = vld [vmem:[%s12917_s3 + $0x128] sm:$0xff]   ;;  %v10342_v2 = vld [vmem:[%s12917_s3 + $0x130] sm:$0xff]  }
 0x15d   : > { %9513 = vmatpush3.bf16.msra.mxu0 %v10286_v57  ;;  %2904 = vmatprep.mubr.bf16.mxu0 %v8078_v26  ;;  %v9356_v10 = vpop.f32.mrb[15].mxu0  ;;  %v11580_v57 = vld [vmem:[#allocation2 + $0x10] sm:$0x77]  ;;  %v10343_v3 = vld [vmem:[%s12917_s3 + $0x1e8] sm:$0xff]   ;;  %v10346_v7 = vld [vmem:[%s12917_s3 + $0x138] sm:$0xff]  }
 0x15e   : > { %9495 = vmatpush3.bf16.msra.mxu1 %v10290_v61  ;;  %9514 = vmatprep.subr.bf16.mxu0 %v10291_v62  ;;  %v11458_v11 = vadd.f32 %v9354_v6, %v11383_v35  ;;  %v10314_v35 = vld [vmem:[%s12917_s3 + $0x100] sm:$0xff]   ;;  %v8228_v62 = vcombine.high %v11580_v57, %v11580_v57  ;;  %v10341_v26 = vld [vmem:[%s12917_s3 + $0x170] sm:$0xff]   ;;  %v10344_v6 = vld [vmem:[%s12917_s3 + $0x1a8] sm:$0xff]  }
 0x15f   : > { %9496 = vmatprep.subr.bf16.mxu1 %v10293_v1  ;;  %v10339_v61 = vld [vmem:[%s12917_s3 + $0x1e0] sm:$0xff]   ;;  %v10348_v10 = vld [vmem:[%s12917_s3 + $0x1b0] sm:$0xff]  }
 0x160   : > { %v10340_v1 = vld [vmem:[%s12917_s3 + $0x1a0] sm:$0xff]  }
 0x161   : > { %9515 = vmatpush3.bf16.msra.mxu0 %v10292_v4  ;;  %v10345_v4 = vld [vmem:[%s12917_s3 + $0x178] sm:$0xff]  }
 0x162   : > { %9497 = vmatpush3.bf16.msra.mxu1 %v10294_v5  ;;  %9516 = vmatprep.subr.bf16.mxu0 %v10295_v46  ;;  %v3316_v5 = vshll.u32 %v8228_v62, 16  ;;  %v10347_v46 = vld [vmem:[%s12917_s3 + $0x1f0] sm:$0xff]  }
 0x163   : > { %9498 = vmatprep.subr.bf16.mxu1 %v10297_v8  ;;  %v8127_v8 = vcombine.low %v11504_v28, %v11504_v28 }
 0x165   : > { %9517 = vmatpush3.bf16.msra.mxu0 %v10296_v12  ;;  %v10349_v12 = vld [vmem:[%s12917_s3 + $0x240] sm:$0xff]  }
 0x166   : > { %9499 = vmatpush3.bf16.msra.mxu1 %v10298_v13  ;;  %9518 = vmatprep.subr.bf16.mxu0 %v10299_v14  ;;  %v3314_v13 = vshrl.u32 %v8228_v62, 16  ;;  %v3318_v14 = vrot.slane %v3316_v5, 1  ;;  %v10389_v62 = vld [vmem:[%s12917_s3 + $0x348] sm:$0xff]  }
 0x167   : > { %9500 = vmatprep.subr.bf16.mxu1 %v10301_v15  ;;  %v10350_v15 = vld [vmem:[%s12917_s3 + $0x200] sm:$0xff]   ;;  %v10390_v5 = vld [vmem:[%s12917_s3 + $0x308] sm:$0xff]  }
 0x169   : > { %9519 = vmatpush3.bf16.msra.mxu0 %v10300_v18  ;;  %v2950_v18 = vrot.slane %v8127_v8, 1  ;;  %v10392_v8 = vld [vmem:[%s12917_s3 + $0x380] sm:$0xff]  }
 0x16a   : > { %9501 = vmatpush3.bf16.msra.mxu1 %v10302_v63  ;;  %9520 = vmatprep.subr.bf16.mxu0 %v10303_v19  ;;  %v10353_v63 = vld [vmem:[%s12917_s3 + $0x1f8] sm:$0xff]   ;;  %v10355_v19 = vld [vmem:[%s12917_s3 + $0x248] sm:$0xff]  }
 0x16b   : > { %9502 = vmatprep.subr.bf16.mxu1 %v10305_v20  ;;  %v3319_v20 = vor.u32 %v3318_v14, %v3314_v13  ;;  %v10397_v14 = vld [vmem:[%s12917_s3 + $0x3c8] sm:$0xff]  }
 0x16d   : > { %9521 = vmatpush3.bf16.msra.mxu0 %v10304_v17  ;;  %v10354_v17 = vld [vmem:[%s12917_s3 + $0x1b8] sm:$0xff]  }
 0x16e   : > { %9503 = vmatpush3.bf16.msra.mxu1 %v10306_v21  ;;  %9522 = vmatprep.subr.bf16.mxu0 %v10307_v22  ;;  %v10356_v21 = vld [vmem:[%s12917_s3 + $0x208] sm:$0xff]   ;;  %v8278_v22 = vcombine.high %v11628_v16, %v11628_v16 }
 0x16f   : > { %9504 = vmatprep.subr.bf16.mxu1 %v10309_v23  ;;  %v10357_v23 = vld [vmem:[%s12917_s3 + $0x2c0] sm:$0xff]  }
 0x170   : > { %v3498_v28 = vrot.slane %v8278_v22, 1  ;;  %v10409_v22 = vld [vmem:[%s12917_s3 + $0x368] sm:$0xff]  }
 0x171   : > { %9523 = vmatpush3.bf16.msra.mxu0 %v10308_v25  ;;  %v10361_v25 = vld [vmem:[%s12917_s3 + $0x250] sm:$0xff]  }
 0x172   : > { %9505 = vmatpush3.bf16.msra.mxu1 %v10310_v27  ;;  %9524 = vmatprep.subr.bf16.mxu0 %v10311_v29  ;;  %v10362_v27 = vld [vmem:[%s12917_s3 + $0x210] sm:$0xff]   ;;  %v10363_v29 = vld [vmem:[%s12917_s3 + $0x2c8] sm:$0xff]  }
 0x173   : > { %9534 = vmatprep.subr.bf16.mxu1 %v10313_v32  ;;  %v10364_v32 = vld [vmem:[%s12917_s3 + $0x288] sm:$0xff]  }
 0x175   : > { %9525 = vmatpush3.bf16.msra.mxu0 %v10312_v30  ;;  %2762 = vmatmul.mubr.bf16.vlgmr.msra.gmra.mrb[24].mxu1 %v2623_v31  ;;  %v10365_v30 = vld [vmem:[%s12917_s3 + $0x258] sm:$0xff]   ;;  %v10368_v31 = vld [vmem:[%s12917_s3 + $0x290] sm:$0xff]  }
 0x176   : > { %9535 = vmatpush3.bf16.msra.mxu1 %v10314_v35  ;;  %3082 = vmatprep.mubr.bf16.mxu1 %v2951_v38  ;;  %v10369_v35 = vld [vmem:[%s12917_s3 + $0x260] sm:$0xff]   ;;  %v10373_v38 = vld [vmem:[%s12917_s3 + $0x268] sm:$0xff]  }
 0x177   : > { %9526 = vmatprep.subr.bf16.mxu0 %v10317_v36  ;;  %9536 = vmatprep.subr.bf16.mxu1 %v10319_v37  ;;  %v10370_v36 = vld [vmem:[%s12917_s3 + $0x220] sm:$0xff]   ;;  %v10371_v37 = vld [vmem:[%s12917_s3 + $0x2d8] sm:$0xff]  }
 0x179   : > { %9527 = vmatpush3.bf16.msra.mxu0 %v10318_v39  ;;  %v10372_v39 = vld [vmem:[%s12917_s3 + $0x298] sm:$0xff]  }
 0x17a   : > { %9537 = vmatpush3.bf16.msra.mxu1 %v10320_v40  ;;  %9556 = vmatprep.subr.bf16.mxu0 %v10321_v41  ;;  %v10374_v40 = vld [vmem:[%s12917_s3 + $0x228] sm:$0xff]   ;;  %v10375_v41 = vld [vmem:[%s12917_s3 + $0x2e0] sm:$0xff]  }
 0x17b   : > { %9538 = vmatprep.subr.bf16.mxu1 %v10325_v42  ;;  %v8227_v42 = vcombine.low %v11580_v57, %v11580_v57 }
 0x17c   : > { %2905 = vmatmul.mubr.bf16.vlgmr.msra.gmra.mrb[28].mxu0 %v8077_v49  ;;  %v10381_v49 = vld [vmem:[%s12917_s3 + $0x278] sm:$0xff]  }
 0x17d   : > { %9557 = vmatpush3.bf16.msra.mxu0 %v10322_v43  ;;  %3259 = vmatprep.mubr.bf16.mxu0 %v8178_v50  ;;  %v10377_v43 = vld [vmem:[%s12917_s3 + $0x270] sm:$0xff]   ;;  %v3309_v50 = vshll.u32 %v8227_v42, 16 }
 0x17e   : > { %9539 = vmatpush3.bf16.msra.mxu1 %v10326_v45  ;;  %9558 = vmatprep.subr.bf16.mxu0 %v10327_v47  ;;  %v10378_v45 = vld [vmem:[%s12917_s3 + $0x230] sm:$0xff]   ;;  %v10379_v47 = vld [vmem:[%s12917_s3 + $0x2e8] sm:$0xff]  }
 0x17f   : > { %9540 = vmatprep.subr.bf16.mxu1 %v10329_v48  ;;  %v11711_v48 = vld [vmem:[#allocation2 + $0x18] sm:$0x77] }
 0x181   : > { %9559 = vmatpush3.bf16.msra.mxu0 %v10328_v51  ;;  %v8378_v51 = vcombine.high %v11711_v48, %v11711_v48 }
 0x182   : > { %9541 = vmatpush3.bf16.msra.mxu1 %v10330_v52  ;;  %9560 = vmatprep.subr.bf16.mxu0 %v10331_v53  ;;  %v10380_v52 = vld [vmem:[%s12917_s3 + $0x2a8] sm:$0xff]   ;;  %v10382_v53 = vld [vmem:[%s12917_s3 + $0x238] sm:$0xff]  }
 0x183   : > { %9542 = vmatprep.subr.bf16.mxu1 %v10333_v34  ;;  %v10383_v34 = vld [vmem:[%s12917_s3 + $0x2f0] sm:$0xff]   ;;  %v3863_v57 = vshll.u32 %v8378_v51, 16 }
 0x185   : > { %9561 = vmatpush3.bf16.msra.mxu0 %v10332_v54  ;;  %v3307_v54 = vshrl.u32 %v8227_v42, 16 }
 0x186   : > { %9543 = vmatpush3.bf16.msra.mxu1 %v10334_v55  ;;  %9562 = vmatprep.subr.bf16.mxu0 %v10335_v56  ;;  %v10384_v55 = vld [vmem:[%s12917_s3 + $0x2b0] sm:$0xff]   ;;  %v3311_v56 = vrot.slane %v3309_v50, 1  ;;  %v10428_v50 = vld [vmem:[%s12917_s3 + $0x408] sm:$0xff]  }
 0x187   : > { %9544 = vmatprep.subr.bf16.mxu1 %v10337_v58  ;;  %v10385_v58 = vld [vmem:[%s12917_s3 + $0x340] sm:$0xff]  }
 0x189   : > { %9563 = vmatpush3.bf16.msra.mxu0 %v10336_v59  ;;  %v10386_v59 = vld [vmem:[%s12917_s3 + $0x300] sm:$0xff]  }
 0x18a   : > { %9545 = vmatpush3.bf16.msra.mxu1 %v10338_v60  ;;  %9564 = vmatprep.subr.bf16.mxu0 %v10339_v61  ;;  %v10387_v60 = vld [vmem:[%s12917_s3 + $0x2f8] sm:$0xff]  }
 0x18b   : > { %9546 = vmatprep.subr.bf16.mxu1 %v10341_v26  ;;  %v11739_v61 = vld [vmem:[#allocation2 + $0x18] sm:$0x33]  ;;  %v3312_v26 = vor.u32 %v3311_v56, %v3307_v54  ;;  %v10430_v54 = vld [vmem:[%s12917_s3 + $0x80] sm:$0xff]   ;;  %v10433_v56 = vld [vmem:[%s12917_s3 + $0x450] sm:$0xff]  }
 0x18d   : > { %9565 = vmatpush3.bf16.msra.mxu0 %v10340_v1  ;;  %v10388_v1 = vld [vmem:[%s12917_s3 + $0x2b8] sm:$0xff]  }
 0x18e   : > { %9547 = vmatpush3.bf16.msra.mxu1 %v10342_v2  ;;  %9566 = vmatprep.subr.bf16.mxu0 %v10343_v3  ;;  %v8328_v2 = vcombine.high %v11739_v61, %v11739_v61  ;;  %v3861_v3 = vshrl.u32 %v8378_v51, 16 }
 0x18f   : > { %9548 = vmatprep.subr.bf16.mxu1 %v10345_v4  ;;  %v3865_v4 = vrot.slane %v3863_v57, 1  ;;  %v10435_v57 = vld [vmem:[%s12917_s3 + $0xc8] sm:$0xff]  }
 0x191   : > { %9567 = vmatpush3.bf16.msra.mxu0 %v10344_v6  ;;  %v8277_v6 = vcombine.low %v11628_v16, %v11628_v16  ;;  %v10398_v16 = vld [vmem:[%s12917_s3 + $0x388] sm:$0xff]  }
 0x192   : > { %9549 = vmatpush3.bf16.msra.mxu1 %v10346_v7  ;;  %9568 = vmatprep.subr.bf16.mxu0 %v10347_v46  ;;  %v10391_v7 = vld [vmem:[%s12917_s3 + $0x3c0] sm:$0xff]   ;;  %v10393_v46 = vld [vmem:[%s12917_s3 + $0x350] sm:$0xff]  }
 0x193   : > { %9578 = vmatprep.subr.bf16.mxu1 %v10349_v12  ;;  %v3866_v12 = vor.u32 %v3865_v4, %v3861_v3  ;;  %v3497_v13 = vrot.slane %v8277_v6, 1  ;;  %v10440_v3 = vld [vmem:[%s12917_s3 + $0x90] sm:$0xff]   ;;  %v10442_v4 = vld [vmem:[%s12917_s3 + $0x420] sm:$0xff]   ;;  %v10445_v6 = vld [vmem:[%s12917_s3 + $0x468] sm:$0xff]  }
 0x195   : > { %9569 = vmatpush3.bf16.msra.mxu0 %v10348_v10  ;;  %3083 = vmatmul.mubr.bf16.vlgmr.msra.gmra.mrb[28].mxu1 %v2950_v18  ;;  %v10396_v10 = vld [vmem:[%s12917_s3 + $0x310] sm:$0xff]   ;;  %v10402_v18 = vld [vmem:[%s12917_s3 + $0x318] sm:$0xff]  }
 0x196   : > { %9579 = vmatpush3.bf16.msra.mxu1 %v10350_v15  ;;  %3450 = vmatprep.mubr.bf16.mxu1 %v3319_v20  ;;  %v10399_v15 = vld [vmem:[%s12917_s3 + $0x358] sm:$0xff]   ;;  %v10404_v20 = vld [vmem:[%s12917_s3 + $0x390] sm:$0xff]  }
 0x197   : > { %9570 = vmatprep.subr.bf16.mxu0 %v10353_v63  ;;  %9580 = vmatprep.subr.bf16.mxu1 %v10355_v19  ;;  %v10403_v63 = vld [vmem:[%s12917_s3 + $0x3d0] sm:$0xff]   ;;  %v10405_v19 = vld [vmem:[%s12917_s3 + $0x360] sm:$0xff]  }
 0x199   : > { %9571 = vmatpush3.bf16.msra.mxu0 %v10354_v17  ;;  %v10406_v17 = vld [vmem:[%s12917_s3 + $0x320] sm:$0xff]  }
 0x19a   : > { %9581 = vmatpush3.bf16.msra.mxu1 %v10356_v21  ;;  %9600 = vmatprep.subr.bf16.mxu0 %v10357_v23  ;;  %v10407_v21 = vld [vmem:[%s12917_s3 + $0x3d8] sm:$0xff]  }
 0x19b   : > { %9582 = vmatprep.subr.bf16.mxu1 %v10361_v25  ;;  %v10408_v23 = vld [vmem:[%s12917_s3 + $0x398] sm:$0xff]   ;;  %v10411_v25 = vld [vmem:[%s12917_s3 + $0x3e0] sm:$0xff]  }
 0x19c   : > { %3260 = vmatmul.mubr.bf16.vlgmr.msra.gmra.mrb[32].mxu0 %v8177_v0  ;;  %v11817_v0 = vld [vmem:[#allocation2 + $0x10] sm:$0x77] }
 0x19d   : > { %9601 = vmatpush3.bf16.msra.mxu0 %v10358_v24  ;;  %3629 = vmatprep.mubr.bf16.mxu0 %v3498_v28  ;;  %v10410_v24 = vld [vmem:[%s12917_s3 + $0x328] sm:$0xff]   ;;  %v10412_v28 = vld [vmem:[%s12917_s3 + $0x3a0] sm:$0xff]  }
 0x19e   : > { %9583 = vmatpush3.bf16.msra.mxu1 %v10362_v27  ;;  %9602 = vmatprep.subr.bf16.mxu0 %v10363_v29  ;;  %v10413_v27 = vld [vmem:[%s12917_s3 + $0x370] sm:$0xff]  }
 0x19f   : > { %9584 = vmatprep.subr.bf16.mxu1 %v10365_v30  ;;  %v10414_v29 = vld [vmem:[%s12917_s3 + $0x330] sm:$0xff]   ;;  %v10415_v30 = vld [vmem:[%s12917_s3 + $0x3e8] sm:$0xff]  }
 0x1a1   : > { %9603 = vmatpush3.bf16.msra.mxu0 %v10364_v32  ;;  %v10416_v32 = vld [vmem:[%s12917_s3 + $0x3a8] sm:$0xff]  }
 0x1a2   : > { %9585 = vmatpush3.bf16.msra.mxu1 %v10366_v9  ;;  %9604 = vmatprep.subr.bf16.mxu0 %v10367_v33  ;;  %v10417_v9 = vld [vmem:[%s12917_s3 + $0x378] sm:$0xff]  }
 0x1a3   : > { %9586 = vmatprep.subr.bf16.mxu1 %v10369_v35  ;;  %v11825_v33 = vld [vmem:[#allocation2 + $0x18] sm:$0x66] }
 0x1a4   : > { %v10418_v35 = vld [vmem:[%s12917_s3 + $0x338] sm:$0xff]  }
 0x1a5   : > { %9605 = vmatpush3.bf16.msra.mxu0 %v10368_v31  ;;  %v10419_v31 = vld [vmem:[%s12917_s3 + $0x3f0] sm:$0xff]  }
 0x1a6   : > { %9587 = vmatpush3.bf16.msra.mxu1 %v10370_v36  ;;  %9606 = vmatprep.subr.bf16.mxu0 %v10371_v37  ;;  %v8377_v36 = vcombine.low %v11711_v48, %v11711_v48  ;;  %v10421_v37 = vld [vmem:[%s12917_s3 + $0x440] sm:$0xff]  }
 0x1a7   : > { %9588 = vmatprep.subr.bf16.mxu1 %v10373_v38  ;;  %v8479_v38 = vcombine.high %v11817_v0, %v11817_v0 }
 0x1a8   : > { %v3856_v42 = vshll.u32 %v8377_v36, 16  ;;  %v3854_v51 = vshrl.u32 %v8377_v36, 16 }
 0x1a9   : > { %9607 = vmatpush3.bf16.msra.mxu0 %v10372_v39  ;;  %v8428_v39 = vcombine.high %v11825_v33, %v11825_v33 }
 0x1aa   : > { %9589 = vmatpush3.bf16.msra.mxu1 %v10374_v40  ;;  %9608 = vmatprep.subr.bf16.mxu0 %v10375_v41  ;;  %v10420_v40 = vld [vmem:[%s12917_s3 + $0x3b0] sm:$0xff]   ;;  %v10422_v41 = vld [vmem:[%s12917_s3 + $0x400] sm:$0xff]  }
 0x1ab   : > { %9590 = vmatprep.subr.bf16.mxu1 %v10377_v43  ;;  %v8327_v43 = vcombine.low %v11739_v61, %v11739_v61  ;;  %v4045_v48 = vrot.slane %v8428_v39, 1  ;;  %v10463_v39 = vld [vmem:[%s12917_s3 + $0x48] sm:$0xff]  }
 0x1ad   : > { %9609 = vmatpush3.bf16.msra.mxu0 %v10376_v44  ;;  %v10425_v44 = vld [vmem:[%s12917_s3 + $0x3f8] sm:$0xff]  }
 0x1ae   : > { %9591 = vmatpush3.bf16.msra.mxu1 %v10378_v45  ;;  %9610 = vmatprep.subr.bf16.mxu0 %v10379_v47  ;;  %v10427_v45 = vld [vmem:[%s12917_s3 + $0x448] sm:$0xff]   ;;  %v4269_v47 = vshll.u32 %v8479_v38, 16 }
 0x1af   : > { %9592 = vmatprep.subr.bf16.mxu1 %v10381_v49  ;;  %v10426_v49 = vld [vmem:[%s12917_s3 + $0x3b8] sm:$0xff]  }
 0x1b1   : > { %9611 = vmatpush3.bf16.msra.mxu0 %v10380_v52  ;;  %v4267_v52 = vshrl.u32 %v8479_v38, 16  ;;  %v10461_v38 = vld [vmem:[%s12917_s3 + $0xf8] sm:$0xff]  }
 0x1b2   : > { %9593 = vmatpush3.bf16.msra.mxu1 %v10382_v53  ;;  %9612 = vmatprep.subr.bf16.mxu0 %v10383_v34  ;;  %v3858_v53 = vrot.slane %v3856_v42, 1  ;;  %v10429_v34 = vld [vmem:[%s12917_s3 + $0xc0] sm:$0xff]   ;;  %v10464_v42 = vld [vmem:[%s12917_s3 + $0x8] sm:$0xff]  }
 0x1b3   : > { %9622 = vmatprep.subr.bf16.mxu1 %v10385_v58  ;;  %v10434_v58 = vld [vmem:[%s12917_s3 + $0x410] sm:$0xff]  }
 0x1b5   : > { %9613 = vmatpush3.bf16.msra.mxu0 %v10384_v55  ;;  %3451 = vmatmul.mubr.bf16.vlgmr.msra.gmra.mrb[32].mxu1 %v3312_v26  ;;  %v4271_v55 = vrot.slane %v4269_v47, 1  ;;  %v10438_v26 = vld [vmem:[%s12917_s3 + $0x418] sm:$0xff]   ;;  %v10465_v47 = vld [vmem:[%s12917_s3 + $0x140] sm:$0xff]  }
 0x1b6   : > { %9623 = vmatpush3.bf16.msra.mxu1 %v10386_v59  ;;  %9614 = vmatprep.subr.bf16.mxu0 %v10387_v60  ;;  %v10437_v59 = vld [vmem:[%s12917_s3 + $0x458] sm:$0xff]   ;;  %v3859_v60 = vor.u32 %v3858_v53, %v3854_v51 }
 0x1b7   : > { %9624 = vmatprep.subr.bf16.mxu1 %v10389_v62  ;;  %3806 = vmatprep.mubr.bf16.mxu1 %v8328_v2  ;;  %v4272_v61 = vor.u32 %v4271_v55, %v4267_v52  ;;  %v10436_v62 = vld [vmem:[%s12917_s3 + $0x88] sm:$0xff]   ;;  %v10441_v2 = vld [vmem:[%s12917_s3 + $0x460] sm:$0xff]   ;;  %v10473_v53 = vld [vmem:[%s12917_s3 + $0x58] sm:$0xff]  }
 0x1b8   : > { %v10471_v52 = vld [vmem:[%s12917_s3 + $0x148] sm:$0xff]   ;;  %v10474_v55 = vld [vmem:[%s12917_s3 + $0x18] sm:$0xff]  }
 0x1b9   : > { %9615 = vmatpush3.bf16.msra.mxu0 %v10388_v1  ;;  %v10439_v1 = vld [vmem:[%s12917_s3 + $0xd0] sm:$0xff]  }
 0x1ba   : > { %9625 = vmatpush3.bf16.msra.mxu1 %v10390_v5  ;;  %9644 = vmatprep.subr.bf16.mxu0 %v10391_v7  ;;  %v10443_v5 = vld [vmem:[%s12917_s3 + $0xd8] sm:$0xff]  }
 0x1bb   : > { %9626 = vmatprep.subr.bf16.mxu1 %v10393_v46  ;;  %v10444_v7 = vld [vmem:[%s12917_s3 + $0x98] sm:$0xff]   ;;  %v10446_v46 = vld [vmem:[%s12917_s3 + $0x428] sm:$0xff]  }
 0x1bc   : > { %3630 = vmatmul.mubr.bf16.vlgmr.msra.gmra.mrb[36].mxu0 %v3497_v13  ;;  %v10448_v13 = vld [vmem:[%s12917_s3 + $0xa0] sm:$0xff]  }
 0x1bd   : > { %9645 = vmatpush3.bf16.msra.mxu0 %v10392_v8  ;;  %3997 = vmatprep.mubr.bf16.mxu0 %v3866_v12  ;;  %v10447_v8 = vld [vmem:[%s12917_s3 + $0xe0] sm:$0xff]  }
 0x1be   : > { %9627 = vmatpush3.bf16.msra.mxu1 %v10396_v10  ;;  %9646 = vmatprep.subr.bf16.mxu0 %v10397_v14  ;;  %v10449_v10 = vld [vmem:[%s12917_s3 + $0x470] sm:$0xff]  }
 0x1bf   : > { %9628 = vmatprep.subr.bf16.mxu1 %v10399_v15  ;;  %v10450_v15 = vld [vmem:[%s12917_s3 + $0x430] sm:$0xff]  }
 0x1c1   : > { %9647 = vmatpush3.bf16.msra.mxu0 %v10398_v16 }
 0x1c2   : > { %9629 = vmatpush3.bf16.msra.mxu1 %v10402_v18  ;;  %9648 = vmatprep.subr.bf16.mxu0 %v10403_v63  ;;  %v10451_v63 = vld [vmem:[%s12917_s3 + $0xe8] sm:$0xff]  }
 0x1c3   : > { %9630 = vmatprep.subr.bf16.mxu1 %v10405_v19 }
 0x1c5   : > { %9649 = vmatpush3.bf16.msra.mxu0 %v10404_v20  ;;  %v10453_v20 = vld [vmem:[%s12917_s3 + $0x478] sm:$0xff]  }
 0x1c6   : > { %9631 = vmatpush3.bf16.msra.mxu1 %v10406_v17  ;;  %9650 = vmatprep.subr.bf16.mxu0 %v10407_v21  ;;  %v8478_v17 = vcombine.low %v11817_v0, %v11817_v0 }
 0x1c7   : > { %9632 = vmatprep.subr.bf16.mxu1 %v10409_v22  ;;  %v10452_v22 = vld [vmem:[%s12917_s3 + $0xa8] sm:$0xff]  }
 0x1c9   : > { %9651 = vmatpush3.bf16.msra.mxu0 %v10408_v23  ;;  %v10454_v23 = vld [vmem:[%s12917_s3 + $0x438] sm:$0xff]  }
 0x1ca   : > { %9633 = vmatpush3.bf16.msra.mxu1 %v10410_v24  ;;  %9652 = vmatprep.subr.bf16.mxu0 %v10411_v25  ;;  %v10455_v24 = vld [vmem:[%s12917_s3 + $0xf0] sm:$0xff]   ;;  %v8427_v25 = vcombine.low %v11825_v33, %v11825_v33  ;;  %v10458_v33 = vld [vmem:[%s12917_s3] sm:$0xff]  }
 0x1cb   : > { %9634 = vmatprep.subr.bf16.mxu1 %v10413_v27 }
 0x1cc   : > { %v4044_v36 = vrot.slane %v8427_v25, 1  ;;  %v10494_v25 = vld [vmem:[%s12917_s3 + $0x180] sm:$0xff]  }
 0x1cd   : > { %9653 = vmatpush3.bf16.msra.mxu0 %v10412_v28  ;;  %v11945_v28 = vld [vmem:[#allocation2 + $0x10] sm:$0x33] }
 0x1ce   : > { %9635 = vmatpush3.bf16.msra.mxu1 %v10414_v29  ;;  %9654 = vmatprep.subr.bf16.mxu0 %v10415_v30  ;;  %v4262_v30 = vshll.u32 %v8478_v17, 16 }
 0x1cf   : > { %9636 = vmatprep.subr.bf16.mxu1 %v10417_v9  ;;  %v10456_v9 = vld [vmem:[%s12917_s3 + $0xb0] sm:$0xff]  }
 0x1d1   : > { %9655 = vmatpush3.bf16.msra.mxu0 %v10416_v32 }
 0x1d2   : > { %9637 = vmatpush3.bf16.msra.mxu1 %v10418_v35  ;;  %9656 = vmatprep.subr.bf16.mxu0 %v10419_v31  ;;  %v11953_v31 = vld [vmem:[#allocation2 + $0x10] sm:$0x66] }
 0x1d3   : > { %9666 = vmatprep.subr.bf16.mxu1 %v10421_v37 }
 0x1d5   : > { %9657 = vmatpush3.bf16.msra.mxu0 %v10420_v40  ;;  %3807 = vmatmul.mubr.bf16.vlgmr.msra.gmra.mrb[36].mxu1 %v8327_v43  ;;  %v8497_v40 = vcombine.high %v11945_v28, %v11945_v28  ;;  %v4260_v43 = vshrl.u32 %v8478_v17, 16 }
 0x1d6   : > { %9667 = vmatpush3.bf16.msra.mxu1 %v10422_v41  ;;  %4176 = vmatprep.mubr.bf16.mxu1 %v4045_v48  ;;  %v10462_v41 = vld [vmem:[%s12917_s3 + $0xb8] sm:$0xff]   ;;  %v10466_v48 = vld [vmem:[%s12917_s3 + $0x100] sm:$0xff]  }
 0x1d7   : > { %9658 = vmatprep.subr.bf16.mxu0 %v10425_v44  ;;  %9668 = vmatprep.subr.bf16.mxu1 %v10427_v45  ;;  %v8547_v44 = vcombine.high %v11953_v31, %v11953_v31  ;;  %v4264_v45 = vrot.slane %v4262_v30, 1  ;;  %v10497_v30 = vld [vmem:[%s12917_s3 + $0x178] sm:$0xff]  }
 0x1d9   : > { %9659 = vmatpush3.bf16.msra.mxu0 %v10426_v49  ;;  %v10469_v49 = vld [vmem:[%s12917_s3 + $0x50] sm:$0xff]   ;;  %v4593_v51 = vrot.slane %v8547_v44, 1  ;;  %v10509_v44 = vld [vmem:[%s12917_s3 + $0x1d8] sm:$0xff]  }
 0x1da   : > { %9669 = vmatpush3.bf16.msra.mxu1 %v10428_v50  ;;  %9688 = vmatprep.subr.bf16.mxu0 %v10429_v34  ;;  %v10470_v50 = vld [vmem:[%s12917_s3 + $0x10] sm:$0xff]   ;;  %v4265_v34 = vor.u32 %v4264_v45, %v4260_v43  ;;  %v10508_v45 = vld [vmem:[%s12917_s3 + $0x208] sm:$0xff]  }
 0x1db   : > { %9670 = vmatprep.subr.bf16.mxu1 %v10433_v56  ;;  %v10475_v56 = vld [vmem:[%s12917_s3 + $0x150] sm:$0xff]  }
 0x1dc   : > { %3998 = vmatmul.mubr.bf16.vlgmr.msra.gmra.mrb[40].mxu0 %v3859_v60  ;;  %v10479_v60 = vld [vmem:[%s12917_s3 + $0x158] sm:$0xff]  }
 0x1dd   : > { %9689 = vmatpush3.bf16.msra.mxu0 %v10430_v54  ;;  %4403 = vmatprep.mubr.bf16.mxu0 %v4272_v61  ;;  %v10472_v54 = vld [vmem:[%s12917_s3 + $0x108] sm:$0xff]  }
 0x1de   : > { %9671 = vmatpush3.bf16.msra.mxu1 %v10434_v58  ;;  %9690 = vmatprep.subr.bf16.mxu0 %v10435_v57  ;;  %v10477_v58 = vld [vmem:[%s12917_s3 + $0x60] sm:$0xff]   ;;  %v10476_v57 = vld [vmem:[%s12917_s3 + $0x110] sm:$0xff]   ;;  %v10481_v61 = vld [vmem:[%s12917_s3 + $0x68] sm:$0xff]  }
 0x1df   : > { %9672 = vmatprep.subr.bf16.mxu1 %v10437_v59  ;;  %v10478_v59 = vld [vmem:[%s12917_s3 + $0x20] sm:$0xff]  }
 0x1e1   : > { %9691 = vmatpush3.bf16.msra.mxu0 %v10436_v62  ;;  %v10480_v62 = vld [vmem:[%s12917_s3 + $0x118] sm:$0xff]  }
 0x1e2   : > { %9673 = vmatpush3.bf16.msra.mxu1 %v10438_v26  ;;  %9692 = vmatprep.subr.bf16.mxu0 %v10439_v1  ;;  %v10482_v26 = vld [vmem:[%s12917_s3 + $0x28] sm:$0xff]   ;;  %v10483_v1 = vld [vmem:[%s12917_s3 + $0x160] sm:$0xff]  }
 0x1e3   : > { %9674 = vmatprep.subr.bf16.mxu1 %v10441_v2  ;;  %v10485_v2 = vld [vmem:[%s12917_s3 + $0x70] sm:$0xff]  }
 0x1e5   : > { %9693 = vmatpush3.bf16.msra.mxu0 %v10440_v3 }
 0x1e6   : > { %9675 = vmatpush3.bf16.msra.mxu1 %v10442_v4  ;;  %9694 = vmatprep.subr.bf16.mxu0 %v10443_v5  ;;  %v10484_v4 = vld [vmem:[%s12917_s3 + $0x120] sm:$0xff]  }
 0x1e7   : > { %9676 = vmatprep.subr.bf16.mxu1 %v10445_v6  ;;  %v9374_v12 = vpop.f32.mrb[12].mxu1  ;;  %v10486_v6 = vld [vmem:[%s12917_s3 + $0x30] sm:$0xff]  }
 0x1e8   : > { %v9375_v14 = vpop.f32.mrb[13].mxu1 }
 0x1e9   : > { %9695 = vmatpush3.bf16.msra.mxu0 %v10444_v7  ;;  %v9376_v16 = vadd.f32 %v9375_v14, %v9374_v12  ;;  %v9377_v18 = vpop.f32.mrb[14].mxu1  ;;  %v10489_v12 = vld [vmem:[%s12917_s3 + $0x78] sm:$0xff]   ;;  %v10488_v14 = vld [vmem:[%s12917_s3 + $0x128] sm:$0xff]  }
 0x1ea   : > { %9677 = vmatpush3.bf16.msra.mxu1 %v10446_v46  ;;  %9696 = vmatprep.subr.bf16.mxu0 %v10447_v8  ;;  %v9378_v19 = vpop.f32.mrb[15].mxu1  ;;  %v10487_v8 = vld [vmem:[%s12917_s3 + $0x168] sm:$0xff]   ;;  %v10491_v18 = vld [vmem:[%s12917_s3 + $0x170] sm:$0xff]  }
 0x1eb   : > { %9678 = vmatprep.subr.bf16.mxu1 %v10449_v10  ;;  %v1615_v21 = vadd.f32 %v9376_v16, %v11458_v11  ;;  %v10457_v11 = vld [vmem:[%s12917_s3 + $0x40] sm:$0xff]   ;;  %v10490_v16 = vld [vmem:[%s12917_s3 + $0x38] sm:$0xff]  }
 0x1ec   : > { %v10493_v19 = vld [vmem:[%s12917_s3 + $0x1c0] sm:$0xff]  }
 0x1ed   : > { %9697 = vmatpush3.bf16.msra.mxu0 %v10448_v13 }
 0x1ee   : > { %9679 = vmatpush3.bf16.msra.mxu1 %v10450_v15  ;;  %9698 = vmatprep.subr.bf16.mxu0 %v10451_v63  ;;  %v12043_v15 = vld [vmem:[#allocation2 + $0x18] sm:$0x77] }
 0x1ef   : > { %v9396_v27 = vpop.f32.mrb[16].mxu0  ;;  %9680 = vmatprep.subr.bf16.mxu1 %v10453_v20  ;;  %v12054_v20 = vld [vmem:[#allocation2 + $0x18] sm:$0x33]  ;;  %v8647_v17 = vcombine.high %v12043_v15, %v12043_v15 }
 0x1f0   : > { %v9397_v29 = vpop.f32.mrb[17].mxu0 }
 0x1f1   : > { %v9398_v0 = vadd.f32 %v9397_v29, %v9396_v27  ;;  %9699 = vmatpush3.bf16.msra.mxu0 %v10452_v22  ;;  %v9399_v32 = vpop.f32.mrb[18].mxu0 }
 0x1f2   : > { %v9400_v35 = vpop.f32.mrb[19].mxu0  ;;  %9681 = vmatpush3.bf16.msra.mxu1 %v10454_v23  ;;  %9700 = vmatprep.subr.bf16.mxu0 %v10455_v24  ;;  %v10492_v23 = vld [vmem:[%s12917_s3 + $0x130] sm:$0xff]   ;;  %v4958_v32 = vshll.u32 %v8647_v17, 16 }
 0x1f3   : > { %v11955_v37 = vadd.f32 %v9398_v0, %v1615_v21  ;;  %9710 = vmatprep.subr.bf16.mxu1 %v10457_v11  ;;  %v8496_v11 = vcombine.low %v11945_v28, %v11945_v28  ;;  %v10499_v0 = vld [vmem:[%s12917_s3 + $0x1c8] sm:$0xff]   ;;  %v8546_v35 = vcombine.low %v11953_v31, %v11953_v31  ;;  %v10498_v28 = vld [vmem:[%s12917_s3 + $0x138] sm:$0xff]   ;;  %v10502_v31 = vld [vmem:[%s12917_s3 + $0x200] sm:$0xff]  }
 0x1f5   : > { %9701 = vmatpush3.bf16.msra.mxu0 %v10456_v9  ;;  %4177 = vmatmul.mubr.bf16.vlgmr.msra.gmra.mrb[40].mxu1 %v4044_v36  ;;  %v8597_v9 = vcombine.high %v12054_v20, %v12054_v20  ;;  %v10501_v36 = vld [vmem:[%s12917_s3 + $0x240] sm:$0xff]  }
 0x1f6   : > { %9711 = vmatpush3.bf16.msra.mxu1 %v10458_v33  ;;  %4546 = vmatprep.mubr.bf16.mxu1 %v8497_v40  ;;  %v10500_v33 = vld [vmem:[%s12917_s3 + $0x188] sm:$0xff]   ;;  %v4592_v40 = vrot.slane %v8546_v35, 1  ;;  %v10541_v35 = vld [vmem:[%s12917_s3 + $0x2d0] sm:$0xff]  }
 0x1f7   : > { %9702 = vmatprep.subr.bf16.mxu0 %v10461_v38  ;;  %9712 = vmatprep.subr.bf16.mxu1 %v10463_v39  ;;  %v4960_v38 = vrot.slane %v4958_v32, 1  ;;  %v10505_v39 = vld [vmem:[%s12917_s3 + $0x1d0] sm:$0xff]   ;;  %v12201_v32 = vld [vmem:[#allocation2 + $0x20] sm:$0x33] }
 0x1f9   : > { %9703 = vmatpush3.bf16.msra.mxu0 %v10462_v41  ;;  %v10506_v41 = vld [vmem:[%s12917_s3 + $0x190] sm:$0xff]  }
 0x1fa   : > { %9713 = vmatpush3.bf16.msra.mxu1 %v10464_v42  ;;  %9732 = vmatprep.subr.bf16.mxu0 %v10465_v47  ;;  %v10507_v42 = vld [vmem:[%s12917_s3 + $0x248] sm:$0xff]   ;;  %v10510_v47 = vld [vmem:[%s12917_s3 + $0x198] sm:$0xff]  }
 0x1fb   : > { %9714 = vmatprep.subr.bf16.mxu1 %v10469_v49  ;;  %v10513_v49 = vld [vmem:[%s12917_s3 + $0x1e0] sm:$0xff]  }
 0x1fc   : > { %4404 = vmatmul.mubr.bf16.vlgmr.msra.gmra.mrb[44].mxu0 %v4265_v34  ;;  %v10516_v34 = vld [vmem:[%s12917_s3 + $0x218] sm:$0xff]  }
 0x1fd   : > { %9733 = vmatpush3.bf16.msra.mxu0 %v10466_v48  ;;  %4724 = vmatprep.mubr.bf16.mxu0 %v4593_v51  ;;  %v10511_v48 = vld [vmem:[%s12917_s3 + $0x250] sm:$0xff]   ;;  %v10514_v51 = vld [vmem:[%s12917_s3 + $0x1a0] sm:$0xff]  }
 0x1fe   : > { %9715 = vmatpush3.bf16.msra.mxu1 %v10470_v50  ;;  %9734 = vmatprep.subr.bf16.mxu0 %v10471_v52  ;;  %v10512_v50 = vld [vmem:[%s12917_s3 + $0x210] sm:$0xff]   ;;  %v10515_v52 = vld [vmem:[%s12917_s3 + $0x258] sm:$0xff]  }
 0x1ff   : > { %9716 = vmatprep.subr.bf16.mxu1 %v10473_v53  ;;  %v10517_v53 = vld [vmem:[%s12917_s3 + $0x1e8] sm:$0xff]  }
 0x201   : > { %9735 = vmatpush3.bf16.msra.mxu0 %v10472_v54  ;;  %v10518_v54 = vld [vmem:[%s12917_s3 + $0x1a8] sm:$0xff]  }
 0x202   : > { %9717 = vmatpush3.bf16.msra.mxu1 %v10474_v55  ;;  %9736 = vmatprep.subr.bf16.mxu0 %v10475_v56  ;;  %v10519_v55 = vld [vmem:[%s12917_s3 + $0x260] sm:$0xff]   ;;  %v10521_v56 = vld [vmem:[%s12917_s3 + $0x1f0] sm:$0xff]  }
 0x203   : > { %9718 = vmatprep.subr.bf16.mxu1 %v10477_v58 }
 0x205   : > { %9737 = vmatpush3.bf16.msra.mxu0 %v10476_v57  ;;  %v10520_v57 = vld [vmem:[%s12917_s3 + $0x220] sm:$0xff]  }
 0x206   : > { %9719 = vmatpush3.bf16.msra.mxu1 %v10478_v59  ;;  %9738 = vmatprep.subr.bf16.mxu0 %v10479_v60  ;;  %v10522_v60 = vld [vmem:[%s12917_s3 + $0x1b0] sm:$0xff]  }
 0x207   : > { %9720 = vmatprep.subr.bf16.mxu1 %v10481_v61 }
 0x208   : > { %v9418_v3 = vpop.f32.mrb[16].mxu1 }
 0x209   : > { %9739 = vmatpush3.bf16.msra.mxu0 %v10480_v62  ;;  %v9419_v5 = vpop.f32.mrb[17].mxu1 }
 0x20a   : > { %v9420_v7 = vadd.f32 %v9419_v5, %v9418_v3  ;;  %v9421_v46 = vpop.f32.mrb[18].mxu1  ;;  %9721 = vmatpush3.bf16.msra.mxu1 %v10482_v26  ;;  %9740 = vmatprep.subr.bf16.mxu0 %v10483_v1  ;;  %v10523_v26 = vld [vmem:[%s12917_s3 + $0x268] sm:$0xff]   ;;  %v8646_v3 = vcombine.low %v12043_v15, %v12043_v15 }
 0x20b   : > { %v9422_v10 = vpop.f32.mrb[19].mxu1  ;;  %9722 = vmatprep.subr.bf16.mxu1 %v10485_v2  ;;  %v10525_v2 = vld [vmem:[%s12917_s3 + $0x1f8] sm:$0xff]   ;;  %v10524_v5 = vld [vmem:[%s12917_s3 + $0x228] sm:$0xff]   ;;  %v10527_v46 = vld [vmem:[%s12917_s3 + $0x270] sm:$0xff]  }
 0x20c   : > { %v1987_v13 = vadd.f32 %v9420_v7, %v11955_v37  ;;  %v4956_v37 = vshrl.u32 %v8647_v17, 16  ;;  %v10526_v7 = vld [vmem:[%s12917_s3 + $0x1b8] sm:$0xff]   ;;  %v10529_v10 = vld [vmem:[%s12917_s3 + $0x2c0] sm:$0xff]   ;;  %v4951_v15 = vshll.u32 %v8646_v3, 16 }
 0x20d   : > { %9741 = vmatpush3.bf16.msra.mxu0 %v10484_v4  ;;  %v10530_v17 = vld [vmem:[%s12917_s3 + $0x280] sm:$0xff]  }
 0x20e   : > { %9723 = vmatpush3.bf16.msra.mxu1 %v10486_v6  ;;  %9742 = vmatprep.subr.bf16.mxu0 %v10487_v8  ;;  %v4961_v43 = vor.u32 %v4960_v38, %v4956_v37  ;;  %v12156_v6 = vld [vmem:[#allocation2 + $0x18] sm:$0x66]  ;;  %v10544_v38 = vld [vmem:[%s12917_s3 + $0x308] sm:$0xff]  }
 0x20f   : > { %v9440_v63 = vpop.f32.mrb[20].mxu0  ;;  %9724 = vmatprep.subr.bf16.mxu1 %v10489_v12  ;;  %v8026_v12 = vld [vmem:[%s12918_s4] ss:$0 sm:$0xff] }
 0x210   : > { %v9441_v21 = vpop.f32.mrb[21].mxu0 }
 0x211   : > { %v9442_v22 = vadd.f32 %v9441_v21, %v9440_v63  ;;  %9743 = vmatpush3.bf16.msra.mxu0 %v10488_v14  ;;  %v9443_v24 = vpop.f32.mrb[22].mxu0  ;;  %v8697_v14 = vcombine.high %v12156_v6, %v12156_v6  ;;  %v10528_v63 = vld [vmem:[%s12917_s3 + $0x230] sm:$0xff]   ;;  %v8596_v21 = vcombine.low %v12054_v20, %v12054_v20  ;;  %v10534_v20 = vld [vmem:[%s12917_s3 + $0x238] sm:$0xff]  }
 0x212   : > { %9725 = vmatpush3.bf16.msra.mxu1 %v10490_v16  ;;  %9744 = vmatprep.subr.bf16.mxu0 %v10491_v18  ;;  %v9444_v27 = vpop.f32.mrb[23].mxu0  ;;  %v10535_v24 = vld [vmem:[%s12917_s3 + $0x2c8] sm:$0xff]  }
 0x213   : > { %v12066_v29 = vadd.f32 %v9442_v22, %v1987_v13  ;;  %9754 = vmatprep.subr.bf16.mxu1 %v10493_v19 }
 0x215   : > { %9745 = vmatpush3.bf16.msra.mxu0 %v10492_v23  ;;  %4547 = vmatmul.mubr.bf16.vlgmr.msra.gmra.mrb[44].mxu1 %v8496_v11  ;;  %v10533_v23 = vld [vmem:[%s12917_s3 + $0x278] sm:$0xff]   ;;  %v10536_v11 = vld [vmem:[%s12917_s3 + $0x288] sm:$0xff]  }
 0x216   : > { %9755 = vmatpush3.bf16.msra.mxu1 %v10494_v25  ;;  %4901 = vmatprep.mubr.bf16.mxu1 %v8597_v9  ;;  %v5140_v25 = vrot.slane %v8697_v14, 1  ;;  %v10538_v9 = vld [vmem:[%s12917_s3 + $0x300] sm:$0xff]  }
 0x217   : > { %9746 = vmatprep.subr.bf16.mxu0 %v10497_v30  ;;  %9756 = vmatprep.subr.bf16.mxu1 %v10499_v0  ;;  %v4953_v30 = vrot.slane %v4951_v15, 1  ;;  %v10537_v0 = vld [vmem:[%s12917_s3 + $0x340] sm:$0xff]  }
 0x218   : > { %v12293_v14 = vld [vmem:[#allocation2 + $0x20] sm:$0x66] }
 0x219   : > { %9747 = vmatpush3.bf16.msra.mxu0 %v10498_v28  ;;  %v10542_v28 = vld [vmem:[%s12917_s3 + $0x290] sm:$0xff]  }
 0x21a   : > { %9757 = vmatpush3.bf16.msra.mxu1 %v10500_v33  ;;  %9776 = vmatprep.subr.bf16.mxu0 %v10501_v36  ;;  %v10543_v33 = vld [vmem:[%s12917_s3 + $0x348] sm:$0xff]   ;;  %v10545_v36 = vld [vmem:[%s12917_s3 + $0x2d8] sm:$0xff]  }
 0x21b   : > { %9758 = vmatprep.subr.bf16.mxu1 %v10505_v39  ;;  %v10546_v39 = vld [vmem:[%s12917_s3 + $0x298] sm:$0xff]  }
 0x21c   : > { %4725 = vmatmul.mubr.bf16.vlgmr.msra.gmra.mrb[48].mxu0 %v4592_v40  ;;  %v12227_v40 = vld [vmem:[#allocation2 + $0x20] sm:$0x77] }
 0x21d   : > { %9777 = vmatpush3.bf16.msra.mxu0 %v10502_v31  ;;  %5092 = vmatprep.mubr.bf16.mxu0 %v4961_v43  ;;  %v8747_v31 = vcombine.high %v12201_v32, %v12201_v32  ;;  %v10548_v43 = vld [vmem:[%s12917_s3 + $0x310] sm:$0xff]  }
 0x21e   : > { %9759 = vmatpush3.bf16.msra.mxu1 %v10506_v41  ;;  %9778 = vmatprep.subr.bf16.mxu0 %v10507_v42  ;;  %v10547_v41 = vld [vmem:[%s12917_s3 + $0x350] sm:$0xff]   ;;  %v10549_v42 = vld [vmem:[%s12917_s3 + $0x2e0] sm:$0xff]  }
 0x21f   : > { %9760 = vmatprep.subr.bf16.mxu1 %v10509_v44  ;;  %v10550_v44 = vld [vmem:[%s12917_s3 + $0x2a0] sm:$0xff]  }
 0x221   : > { %9779 = vmatpush3.bf16.msra.mxu0 %v10508_v45  ;;  %v10551_v45 = vld [vmem:[%s12917_s3 + $0x358] sm:$0xff]  }
 0x222   : > { %9761 = vmatpush3.bf16.msra.mxu1 %v10510_v47  ;;  %9780 = vmatprep.subr.bf16.mxu0 %v10511_v48  ;;  %v10553_v47 = vld [vmem:[%s12917_s3 + $0x2e8] sm:$0xff]   ;;  %v8797_v48 = vcombine.high %v12227_v40, %v12227_v40 }
 0x223   : > { %9762 = vmatprep.subr.bf16.mxu1 %v10513_v49  ;;  %v10552_v49 = vld [vmem:[%s12917_s3 + $0x318] sm:$0xff]  }
 0x225   : > { %9781 = vmatpush3.bf16.msra.mxu0 %v10512_v50  ;;  %v10554_v50 = vld [vmem:[%s12917_s3 + $0x2a8] sm:$0xff]  }
 0x226   : > { %9763 = vmatpush3.bf16.msra.mxu1 %v10514_v51  ;;  %9782 = vmatprep.subr.bf16.mxu0 %v10515_v52  ;;  %v10555_v51 = vld [vmem:[%s12917_s3 + $0x360] sm:$0xff]   ;;  %v10557_v52 = vld [vmem:[%s12917_s3 + $0x2f0] sm:$0xff]  }
 0x227   : > { %9764 = vmatprep.subr.bf16.mxu1 %v10517_v53  ;;  %v5505_v53 = vshll.u32 %v8797_v48, 16 }
 0x228   : > { %v9462_v58 = vpop.f32.mrb[20].mxu1 }
 0x229   : > { %9783 = vmatpush3.bf16.msra.mxu0 %v10516_v34  ;;  %v9463_v59 = vpop.f32.mrb[21].mxu1 }
 0x22a   : > { %v9464_v61 = vadd.f32 %v9463_v59, %v9462_v58  ;;  %v9465_v62 = vpop.f32.mrb[22].mxu1  ;;  %9765 = vmatpush3.bf16.msra.mxu1 %v10518_v54  ;;  %9784 = vmatprep.subr.bf16.mxu0 %v10519_v55  ;;  %v10556_v54 = vld [vmem:[%s12917_s3 + $0x320] sm:$0xff]   ;;  %v10559_v59 = vld [vmem:[%s12917_s3 + $0x368] sm:$0xff]  }
 0x22b   : > { %v9466_v1 = vpop.f32.mrb[23].mxu1  ;;  %9766 = vmatprep.subr.bf16.mxu1 %v10521_v56  ;;  %v10558_v56 = vld [vmem:[%s12917_s3 + $0x2b0] sm:$0xff]   ;;  %v10561_v62 = vld [vmem:[%s12917_s3 + $0x2f8] sm:$0xff]  }
 0x22c   : > { %v2357_v4 = vadd.f32 %v9464_v61, %v12066_v29  ;;  %v4949_v29 = vshrl.u32 %v8646_v3, 16  ;;  %v10560_v61 = vld [vmem:[%s12917_s3 + $0x328] sm:$0xff]   ;;  %v10563_v1 = vld [vmem:[%s12917_s3 + $0x370] sm:$0xff]  }
 0x22d   : > { %9785 = vmatpush3.bf16.msra.mxu0 %v10520_v57 }
 0x22e   : > { %9767 = vmatpush3.bf16.msra.mxu1 %v10522_v60  ;;  %9786 = vmatprep.subr.bf16.mxu0 %v10523_v26  ;;  %v4954_v37 = vor.u32 %v4953_v30, %v4949_v29  ;;  %v10562_v26 = vld [vmem:[%s12917_s3 + $0x2b8] sm:$0xff]   ;;  %v8746_v30 = vcombine.low %v12201_v32, %v12201_v32  ;;  %v10583_v32 = vld [vmem:[%s12917_s3 + $0x450] sm:$0xff]  }
 0x22f   : > { %v9484_v8 = vpop.f32.mrb[24].mxu0  ;;  %9768 = vmatprep.subr.bf16.mxu1 %v10525_v2  ;;  %v8696_v2 = vcombine.low %v12156_v6, %v12156_v6  ;;  %v10566_v6 = vld [vmem:[%s12917_s3 + $0x380] sm:$0xff]   ;;  %v10581_v29 = vld [vmem:[%s12917_s3 + $0x3d8] sm:$0xff]  }
 0x230   : > { %v9485_v13 = vpop.f32.mrb[25].mxu0 }
 0x231   : > { %v9486_v16 = vadd.f32 %v9485_v13, %v9484_v8  ;;  %v9487_v18 = vpop.f32.mrb[26].mxu0  ;;  %9787 = vmatpush3.bf16.msra.mxu0 %v10524_v5  ;;  %v5139_v15 = vrot.slane %v8696_v2, 1 }
 0x232   : > { %v9488_v19 = vpop.f32.mrb[27].mxu0  ;;  %9769 = vmatpush3.bf16.msra.mxu1 %v10526_v7  ;;  %9788 = vmatprep.subr.bf16.mxu0 %v10527_v46  ;;  %v5503_v7 = vshrl.u32 %v8797_v48, 16  ;;  %v5507_v46 = vrot.slane %v5505_v53, 1  ;;  %v10569_v18 = vld [vmem:[%s12917_s3 + $0x378] sm:$0xff]  }
 0x233   : > { %v2537_v22 = vadd.f32 %v9486_v16, %v2357_v4  ;;  %9798 = vmatprep.subr.bf16.mxu1 %v10529_v10  ;;  %v10565_v4 = vld [vmem:[%s12917_s3 + $0x3c0] sm:$0xff]  }
 0x234   : > { %v5508_v19 = vor.u32 %v5507_v46, %v5503_v7  ;;  %v10602_v46 = vld [vmem:[%s12917_s3 + $0x80] sm:$0xff]  }
 0x235   : > { %v2544_v27 = vadd.f32 %v8026_v12, %v2537_v22  ;;  %9789 = vmatpush3.bf16.msra.mxu0 %v10528_v63  ;;  %4902 = vmatmul.mubr.bf16.vlgmr.msra.gmra.mrb[48].mxu1 %v8596_v21  ;;  %v10564_v12 = vld [vmem:[%s12917_s3 + $0x330] sm:$0xff]   ;;  %v10571_v63 = vld [vmem:[%s12917_s3 + $0x3c8] sm:$0xff]   ;;  %v8847_v22 = vcombine.high %v12293_v14, %v12293_v14 }
 0x236   : > { %9799 = vmatpush3.bf16.msra.mxu1 %v10530_v17  ;;  %5271 = vmatprep.mubr.bf16.mxu1 %v5140_v25  ;;  %v10570_v17 = vld [vmem:[%s12917_s3 + $0x338] sm:$0xff]   ;;  %v10572_v21 = vld [vmem:[%s12917_s3 + $0x388] sm:$0xff]   ;;  %v10574_v25 = vld [vmem:[%s12917_s3 + $0x400] sm:$0xff]  }
 0x237   : > { %2545 = vst [vmem:[%s12190_s20] sm:$0xf] %v2544_v27  ;;  %9790 = vmatprep.subr.bf16.mxu0 %v10533_v23  ;;  %9800 = vmatprep.subr.bf16.mxu1 %v10535_v24  ;;  %v10573_v23 = vld [vmem:[%s12917_s3 + $0x440] sm:$0xff]   ;;  %v10577_v24 = vld [vmem:[%s12917_s3 + $0x3d0] sm:$0xff]  }
 0x238   : > { %v10578_v27 = vld [vmem:[%s12917_s3 + $0x390] sm:$0xff]  }
 0x239   : > { %9791 = vmatpush3.bf16.msra.mxu0 %v10534_v20  ;;  %v5687_v20 = vrot.slane %v8847_v22, 1  ;;  %v10614_v22 = vld [vmem:[%s12917_s3 + $0x90] sm:$0xff]  }
 0x23a   : > { %9801 = vmatpush3.bf16.msra.mxu1 %v10536_v11  ;;  %9820 = vmatprep.subr.bf16.mxu0 %v10537_v0  ;;  %v10579_v11 = vld [vmem:[%s12917_s3 + $0x448] sm:$0xff]  }
 0x23b   : > { %9802 = vmatprep.subr.bf16.mxu1 %v10541_v35  ;;  %v10580_v0 = vld [vmem:[%s12917_s3 + $0x408] sm:$0xff]   ;;  %v10585_v35 = vld [vmem:[%s12917_s3 + $0x3e0] sm:$0xff]  }
 0x23c   : > { %5093 = vmatmul.mubr.bf16.vlgmr.msra.gmra.mrb[52].mxu0 %v4954_v37  ;;  %v10587_v37 = vld [vmem:[%s12917_s3 + $0x458] sm:$0xff]  }
 0x23d   : > { %9821 = vmatpush3.bf16.msra.mxu0 %v10538_v9  ;;  %5448 = vmatprep.mubr.bf16.mxu0 %v8747_v31  ;;  %v10582_v9 = vld [vmem:[%s12917_s3 + $0x398] sm:$0xff]   ;;  %v10589_v31 = vld [vmem:[%s12917_s3 + $0x3e8] sm:$0xff]  }
 0x23e   : > { %9803 = vmatpush3.bf16.msra.mxu1 %v10542_v28  ;;  %9822 = vmatprep.subr.bf16.mxu0 %v10543_v33  ;;  %v10584_v28 = vld [vmem:[%s12917_s3 + $0x410] sm:$0xff]   ;;  %v10586_v33 = vld [vmem:[%s12917_s3 + $0x3a0] sm:$0xff]  }
 0x23f   : > { %9804 = vmatprep.subr.bf16.mxu1 %v10545_v36  ;;  %v8796_v36 = vcombine.low %v12227_v40, %v12227_v40  ;;  %v10590_v40 = vld [vmem:[%s12917_s3 + $0x3a8] sm:$0xff]  }
 0x241   : > { %9823 = vmatpush3.bf16.msra.mxu0 %v10544_v38  ;;  %v10588_v38 = vld [vmem:[%s12917_s3 + $0x418] sm:$0xff]  }
 0x242   : > { %9805 = vmatpush3.bf16.msra.mxu1 %v10546_v39  ;;  %9824 = vmatprep.subr.bf16.mxu0 %v10547_v41  ;;  %v12360_v39 = vld [vmem:[#allocation2 + $0x18] sm:$0x77]  ;;  %v10591_v41 = vld [vmem:[%s12917_s3 + $0x460] sm:$0xff]  }
 0x243   : > { %9806 = vmatprep.subr.bf16.mxu1 %v10549_v42  ;;  %v10593_v42 = vld [vmem:[%s12917_s3 + $0x3f0] sm:$0xff]  }
 0x245   : > { %9825 = vmatpush3.bf16.msra.mxu0 %v10548_v43  ;;  %v5498_v43 = vshll.u32 %v8796_v36, 16 }
 0x246   : > { %9807 = vmatpush3.bf16.msra.mxu1 %v10550_v44  ;;  %9826 = vmatprep.subr.bf16.mxu0 %v10551_v45  ;;  %v10592_v45 = vld [vmem:[%s12917_s3 + $0x420] sm:$0xff]  }
 0x247   : > { %9808 = vmatprep.subr.bf16.mxu1 %v10553_v47  ;;  %v8898_v47 = vcombine.high %v12360_v39, %v12360_v39 }
 0x248   : > { %v9506_v34 = vpop.f32.mrb[24].mxu1 }
 0x249   : > { %9827 = vmatpush3.bf16.msra.mxu0 %v10552_v49  ;;  %v9507_v55 = vpop.f32.mrb[25].mxu1  ;;  %v10594_v49 = vld [vmem:[%s12917_s3 + $0x3b0] sm:$0xff]  }
 0x24a   : > { %v9508_v58 = vadd.f32 %v9507_v55, %v9506_v34  ;;  %v9509_v57 = vpop.f32.mrb[26].mxu1  ;;  %9809 = vmatpush3.bf16.msra.mxu1 %v10554_v50  ;;  %9828 = vmatprep.subr.bf16.mxu0 %v10555_v51  ;;  %v10597_v34 = vld [vmem:[%s12917_s3 + $0x3f8] sm:$0xff]   ;;  %v5911_v55 = vshll.u32 %v8898_v47, 16 }
 0x24b   : > { %v9510_v60 = vpop.f32.mrb[27].mxu1  ;;  %9810 = vmatprep.subr.bf16.mxu1 %v10557_v52  ;;  %v10595_v52 = vld [vmem:[%s12917_s3 + $0x468] sm:$0xff]   ;;  %v10599_v57 = vld [vmem:[%s12917_s3 + $0x470] sm:$0xff]  }
 0x24c   : > { %v5496_v60 = vshrl.u32 %v8796_v36, 16  ;;  %v5913_v2 = vrot.slane %v5911_v55, 1  ;;  %v8897_v36 = vcombine.low %v12360_v39, %v12360_v39  ;;  %v10630_v39 = vld [vmem:[%s12917_s3 + $0xb0] sm:$0xff]   ;;  %v10637_v55 = vld [vmem:[%s12917_s3 + $0x140] sm:$0xff]  }
 0x24d   : > { %9829 = vmatpush3.bf16.msra.mxu0 %v10556_v54 }
 0x24e   : > { %9811 = vmatpush3.bf16.msra.mxu1 %v10558_v56  ;;  %9830 = vmatprep.subr.bf16.mxu0 %v10559_v59  ;;  %v10596_v56 = vld [vmem:[%s12917_s3 + $0x428] sm:$0xff]  }
 0x24f   : > { %v9528_v3 = vpop.f32.mrb[28].mxu0  ;;  %9812 = vmatprep.subr.bf16.mxu1 %v10561_v62  ;;  %v10601_v62 = vld [vmem:[%s12917_s3 + $0xc0] sm:$0xff]  }
 0x250   : > { %v9529_v5 = vpop.f32.mrb[29].mxu0 }
 0x251   : > { %v9530_v8 = vadd.f32 %v9529_v5, %v9528_v3  ;;  %v9531_v10 = vpop.f32.mrb[30].mxu0  ;;  %9831 = vmatpush3.bf16.msra.mxu0 %v10560_v61  ;;  %v5500_v61 = vrot.slane %v5498_v43, 1  ;;  %v10600_v5 = vld [vmem:[%s12917_s3 + $0x430] sm:$0xff]   ;;  %v10631_v43 = vld [vmem:[%s12917_s3 + $0x68] sm:$0xff]  }
 0x252   : > { %v9532_v13 = vpop.f32.mrb[31].mxu0  ;;  %9813 = vmatpush3.bf16.msra.mxu1 %v10562_v26  ;;  %9832 = vmatprep.subr.bf16.mxu0 %v10563_v1  ;;  %v5909_v1 = vshrl.u32 %v8898_v47, 16  ;;  %v5904_v47 = vshll.u32 %v8897_v36, 16 }
 0x253   : > { %v12295_v16 = vadd.f32 %v9530_v8, %v9508_v58  ;;  %9842 = vmatprep.subr.bf16.mxu1 %v10565_v4  ;;  %v10598_v58 = vld [vmem:[%s12917_s3 + $0x3b8] sm:$0xff]   ;;  %v5501_v10 = vor.u32 %v5500_v61, %v5496_v60  ;;  %v10607_v13 = vld [vmem:[%s12917_s3 + $0xc8] sm:$0xff]   ;;  %v10636_v60 = vld [vmem:[%s12917_s3 + $0x30] sm:$0xff]  }
 0x255   : > { %9833 = vmatpush3.bf16.msra.mxu0 %v10564_v12  ;;  %5272 = vmatmul.mubr.bf16.vlgmr.msra.gmra.mrb[52].mxu1 %v5139_v15  ;;  %v10605_v12 = vld [vmem:[%s12917_s3 + $0x478] sm:$0xff]  }
 0x256   : > { %9843 = vmatpush3.bf16.msra.mxu1 %v10566_v6  ;;  %5639 = vmatprep.mubr.bf16.mxu1 %v5508_v19  ;;  %v5914_v6 = vor.u32 %v5913_v2, %v5909_v1  ;;  %v10606_v15 = vld [vmem:[%s12917_s3 + $0x438] sm:$0xff]   ;;  %v10613_v19 = vld [vmem:[%s12917_s3 + $0xd0] sm:$0xff]  }
 0x257   : > { %9834 = vmatprep.subr.bf16.mxu0 %v10569_v18  ;;  %9844 = vmatprep.subr.bf16.mxu1 %v10571_v63  ;;  %v10608_v18 = vld [vmem:[%s12917_s3 + $0x88] sm:$0xff]   ;;  %v10609_v63 = vld [vmem:[%s12917_s3 + $0x40] sm:$0xff]   ;;  %v10641_v2 = vld [vmem:[%s12917_s3 + $0x78] sm:$0xff]  }
 0x259   : > { %9835 = vmatpush3.bf16.msra.mxu0 %v10570_v17  ;;  %v12426_v17 = vld [vmem:[#allocation2 + $0x18] sm:$0x33] }
 0x25a   : > { %9845 = vmatpush3.bf16.msra.mxu1 %v10572_v21  ;;  %9864 = vmatprep.subr.bf16.mxu0 %v10573_v23  ;;  %v10615_v23 = vld [vmem:[%s12917_s3 + $0x48] sm:$0xff]  }
 0x25b   : > { %9846 = vmatprep.subr.bf16.mxu1 %v10577_v24  ;;  %v8916_v24 = vcombine.high %v12426_v17, %v12426_v17 }
 0x25c   : > { %5449 = vmatmul.mubr.bf16.vlgmr.msra.gmra.mrb[56].mxu0 %v8746_v30  ;;  %v10620_v30 = vld [vmem:[%s12917_s3 + $0x10] sm:$0xff]  }
 0x25d   : > { %9865 = vmatpush3.bf16.msra.mxu0 %v10574_v25  ;;  %5818 = vmatprep.mubr.bf16.mxu0 %v5687_v20  ;;  %v10617_v25 = vld [vmem:[%s12917_s3 + $0xd8] sm:$0xff]  }
 0x25e   : > { %9847 = vmatpush3.bf16.msra.mxu1 %v10578_v27  ;;  %9866 = vmatprep.subr.bf16.mxu0 %v10579_v11  ;;  %v10616_v27 = vld [vmem:[%s12917_s3 + $0x8] sm:$0xff]   ;;  %v10618_v20 = vld [vmem:[%s12917_s3 + $0x98] sm:$0xff]   ;;  %v10619_v11 = vld [vmem:[%s12917_s3 + $0x50] sm:$0xff]  }
 0x25f   : > { %9848 = vmatprep.subr.bf16.mxu1 %v10581_v29  ;;  %v10621_v29 = vld [vmem:[%s12917_s3 + $0xe0] sm:$0xff]  }
 0x261   : > { %9867 = vmatpush3.bf16.msra.mxu0 %v10580_v0  ;;  %v10622_v0 = vld [vmem:[%s12917_s3 + $0xa0] sm:$0xff]  }
 0x262   : > { %9849 = vmatpush3.bf16.msra.mxu1 %v10582_v9  ;;  %9868 = vmatprep.subr.bf16.mxu0 %v10583_v32  ;;  %v10623_v9 = vld [vmem:[%s12917_s3 + $0x58] sm:$0xff]   ;;  %v10625_v32 = vld [vmem:[%s12917_s3 + $0xe8] sm:$0xff]  }
 0x263   : > { %9850 = vmatprep.subr.bf16.mxu1 %v10585_v35  ;;  %v10624_v35 = vld [vmem:[%s12917_s3 + $0x18] sm:$0xff]  }
 0x265   : > { %9869 = vmatpush3.bf16.msra.mxu0 %v10584_v28  ;;  %v10626_v28 = vld [vmem:[%s12917_s3 + $0xa8] sm:$0xff]  }
 0x266   : > { %9851 = vmatpush3.bf16.msra.mxu1 %v10586_v33  ;;  %9870 = vmatprep.subr.bf16.mxu0 %v10587_v37  ;;  %v10627_v33 = vld [vmem:[%s12917_s3 + $0x60] sm:$0xff]   ;;  %v10629_v37 = vld [vmem:[%s12917_s3 + $0xf0] sm:$0xff]  }
 0x267   : > { %9852 = vmatprep.subr.bf16.mxu1 %v10589_v31 }
 0x268   : > { %v9550_v44 = vpop.f32.mrb[28].mxu1 }
 0x269   : > { %9871 = vmatpush3.bf16.msra.mxu0 %v10588_v38  ;;  %v9551_v48 = vpop.f32.mrb[29].mxu1 }
 0x26a   : > { %v9552_v50 = vadd.f32 %v9551_v48, %v9550_v44  ;;  %v9553_v51 = vpop.f32.mrb[30].mxu1  ;;  %9853 = vmatpush3.bf16.msra.mxu1 %v10590_v40  ;;  %9872 = vmatprep.subr.bf16.mxu0 %v10591_v41  ;;  %v10628_v40 = vld [vmem:[%s12917_s3 + $0x20] sm:$0xff]  }
 0x26b   : > { %v9554_v53 = vpop.f32.mrb[31].mxu1  ;;  %9854 = vmatprep.subr.bf16.mxu1 %v10593_v42  ;;  %v10634_v51 = vld [vmem:[%s12917_s3 + $0xb8] sm:$0xff]  }
 0x26c   : > { %v3090_v54 = vadd.f32 %v9552_v50, %v12295_v16  ;;  %v8846_v16 = vcombine.low %v12293_v14, %v12293_v14  ;;  %v10610_v14 = vld [vmem:[%s12917_s3] sm:$0xff]   ;;  %v12496_v50 = vld [vmem:[#allocation2 + $0x18] sm:$0x66] }
 0x26d   : > { %9873 = vmatpush3.bf16.msra.mxu0 %v10592_v45  ;;  %v10633_v45 = vld [vmem:[%s12917_s3 + $0xf8] sm:$0xff]  }
 0x26e   : > { %9855 = vmatpush3.bf16.msra.mxu1 %v10594_v49  ;;  %9874 = vmatprep.subr.bf16.mxu0 %v10595_v52  ;;  %v5686_v21 = vrot.slane %v8846_v16, 1  ;;  %v10632_v49 = vld [vmem:[%s12917_s3 + $0x28] sm:$0xff]   ;;  %v10635_v52 = vld [vmem:[%s12917_s3 + $0x70] sm:$0xff]  }
 0x26f   : > { %v9572_v59 = vpop.f32.mrb[32].mxu0  ;;  %9856 = vmatprep.subr.bf16.mxu1 %v10597_v34  ;;  %v5902_v34 = vshrl.u32 %v8897_v36, 16  ;;  %v10667_v36 = vld [vmem:[%s12917_s3 + $0x1e8] sm:$0xff]  }
 0x270   : > { %v9573_v26 = vpop.f32.mrb[33].mxu0 }
 0x271   : > { %v9574_v3 = vadd.f32 %v9573_v26, %v9572_v59  ;;  %v9575_v4 = vpop.f32.mrb[34].mxu0  ;;  %9875 = vmatpush3.bf16.msra.mxu0 %v10596_v56 }
 0x272   : > { %v9576_v7 = vpop.f32.mrb[35].mxu0  ;;  %9857 = vmatpush3.bf16.msra.mxu1 %v10598_v58  ;;  %9876 = vmatprep.subr.bf16.mxu0 %v10599_v57  ;;  %v8966_v58 = vcombine.high %v12496_v50, %v12496_v50 }
 0x273   : > { %v12404_v8 = vadd.f32 %v9574_v3, %v3090_v54  ;;  %9886 = vmatprep.subr.bf16.mxu1 %v10601_v62  ;;  %v5906_v54 = vrot.slane %v5904_v47, 1  ;;  %v10638_v62 = vld [vmem:[%s12917_s3 + $0x100] sm:$0xff]   ;;  %v10643_v3 = vld [vmem:[%s12917_s3 + $0x148] sm:$0xff]  }
 0x274   : > { %v6235_v4 = vrot.slane %v8966_v58, 1  ;;  %v10644_v7 = vld [vmem:[%s12917_s3 + $0x108] sm:$0xff]  }
 0x275   : > { %9877 = vmatpush3.bf16.msra.mxu0 %v10600_v5  ;;  %5640 = vmatmul.mubr.bf16.vlgmr.msra.gmra.mrb[56].mxu1 %v5501_v10  ;;  %v5907_v1 = vor.u32 %v5906_v54, %v5902_v34  ;;  %v10642_v5 = vld [vmem:[%s12917_s3 + $0x38] sm:$0xff]   ;;  %v12535_v10 = vld [vmem:[#allocation2 + $0x20] sm:$0x33]  ;;  %v10679_v58 = vld [vmem:[%s12917_s3 + $0x248] sm:$0xff]  }
 0x276   : > { %9887 = vmatpush3.bf16.msra.mxu1 %v10602_v46  ;;  %6045 = vmatprep.mubr.bf16.mxu1 %v5914_v6  ;;  %v10645_v46 = vld [vmem:[%s12917_s3 + $0x1c0] sm:$0xff]   ;;  %v10650_v6 = vld [vmem:[%s12917_s3 + $0x110] sm:$0xff]   ;;  %v9016_v16 = vcombine.high %v12535_v10, %v12535_v10 }
 0x277   : > { %9878 = vmatprep.subr.bf16.mxu0 %v10605_v12  ;;  %9888 = vmatprep.subr.bf16.mxu1 %v10607_v13  ;;  %v10646_v12 = vld [vmem:[%s12917_s3 + $0x180] sm:$0xff]   ;;  %v8915_v13 = vcombine.low %v12426_v17, %v12426_v17  ;;  %v10655_v17 = vld [vmem:[%s12917_s3 + $0x1d0] sm:$0xff]  }
 0x279   : > { %9879 = vmatpush3.bf16.msra.mxu0 %v10606_v15  ;;  %v10651_v15 = vld [vmem:[%s12917_s3 + $0x1c8] sm:$0xff]  }
 0x27a   : > { %9889 = vmatpush3.bf16.msra.mxu1 %v10608_v18  ;;  %9908 = vmatprep.subr.bf16.mxu0 %v10609_v63  ;;  %v10653_v18 = vld [vmem:[%s12917_s3 + $0x158] sm:$0xff]   ;;  %v10652_v63 = vld [vmem:[%s12917_s3 + $0x188] sm:$0xff]  }
 0x27b   : > { %9890 = vmatprep.subr.bf16.mxu1 %v10613_v19  ;;  %v10654_v19 = vld [vmem:[%s12917_s3 + $0x118] sm:$0xff]  }
 0x27c   : > { %5819 = vmatmul.mubr.bf16.vlgmr.msra.gmra.mrb[60].mxu0 %v5686_v21  ;;  %v10656_v21 = vld [vmem:[%s12917_s3 + $0x190] sm:$0xff]  }
 0x27d   : > { %9909 = vmatpush3.bf16.msra.mxu0 %v10610_v14  ;;  %6188 = vmatprep.mubr.bf16.mxu0 %v8916_v24  ;;  %v10657_v14 = vld [vmem:[%s12917_s3 + $0x160] sm:$0xff]   ;;  %v10661_v24 = vld [vmem:[%s12917_s3 + $0x168] sm:$0xff]  }
 0x27e   : > { %9891 = vmatpush3.bf16.msra.mxu1 %v10614_v22  ;;  %9910 = vmatprep.subr.bf16.mxu0 %v10615_v23  ;;  %v10658_v22 = vld [vmem:[%s12917_s3 + $0x120] sm:$0xff]   ;;  %v10659_v23 = vld [vmem:[%s12917_s3 + $0x1d8] sm:$0xff]  }
 0x27f   : > { %9892 = vmatprep.subr.bf16.mxu1 %v10617_v25  ;;  %v10660_v25 = vld [vmem:[%s12917_s3 + $0x198] sm:$0xff]  }
 0x281   : > { %9911 = vmatpush3.bf16.msra.mxu0 %v10616_v27  ;;  %v12580_v27 = vld [vmem:[#allocation2 + $0x20] sm:$0x77] }
 0x282   : > { %9893 = vmatpush3.bf16.msra.mxu1 %v10618_v20  ;;  %9912 = vmatprep.subr.bf16.mxu0 %v10619_v11  ;;  %v10662_v20 = vld [vmem:[%s12917_s3 + $0x128] sm:$0xff]   ;;  %v10663_v11 = vld [vmem:[%s12917_s3 + $0x1e0] sm:$0xff]  }
 0x283   : > { %9894 = vmatprep.subr.bf16.mxu1 %v10621_v29  ;;  %v10665_v29 = vld [vmem:[%s12917_s3 + $0x170] sm:$0xff]  }
 0x285   : > { %9913 = vmatpush3.bf16.msra.mxu0 %v10620_v30 }
 0x286   : > { %9895 = vmatpush3.bf16.msra.mxu1 %v10622_v0  ;;  %9914 = vmatprep.subr.bf16.mxu0 %v10623_v9  ;;  %v9066_v0 = vcombine.high %v12580_v27, %v12580_v27 }
 0x287   : > { %9896 = vmatprep.subr.bf16.mxu1 %v10625_v32  ;;  %v10664_v32 = vld [vmem:[%s12917_s3 + $0x1a0] sm:$0xff]  }
 0x288   : > { %v9594_v31 = vpop.f32.mrb[32].mxu1 }
 0x289   : > { %9915 = vmatpush3.bf16.msra.mxu0 %v10624_v35  ;;  %v9595_v38 = vpop.f32.mrb[33].mxu1 }
 0x28a   : > { %v9596_v41 = vadd.f32 %v9595_v38, %v9594_v31  ;;  %v9597_v42 = vpop.f32.mrb[34].mxu1  ;;  %9897 = vmatpush3.bf16.msra.mxu1 %v10626_v28  ;;  %9916 = vmatprep.subr.bf16.mxu0 %v10627_v33  ;;  %v10666_v33 = vld [vmem:[%s12917_s3 + $0x130] sm:$0xff]   ;;  %v10669_v31 = vld [vmem:[%s12917_s3 + $0x178] sm:$0xff]  }
 0x28b   : > { %v9598_v44 = vpop.f32.mrb[35].mxu1  ;;  %9898 = vmatprep.subr.bf16.mxu1 %v10629_v37  ;;  %v10670_v42 = vld [vmem:[%s12917_s3 + $0x138] sm:$0xff]  }
 0x28c   : > { %v3458_v48 = vadd.f32 %v9596_v41, %v12404_v8  ;;  %v10649_v8 = vld [vmem:[%s12917_s3 + $0x150] sm:$0xff]   ;;  %v10668_v41 = vld [vmem:[%s12917_s3 + $0x1a8] sm:$0xff]  }
 0x28d   : > { %9917 = vmatpush3.bf16.msra.mxu0 %v10628_v40  ;;  %v6600_v40 = vshll.u32 %v9066_v0, 16 }
 0x28e   : > { %9899 = vmatpush3.bf16.msra.mxu1 %v10630_v39  ;;  %9918 = vmatprep.subr.bf16.mxu0 %v10631_v43  ;;  %v10671_v39 = vld [vmem:[%s12917_s3 + $0x1f0] sm:$0xff]   ;;  %v8965_v43 = vcombine.low %v12496_v50, %v12496_v50  ;;  %v10674_v50 = vld [vmem:[%s12917_s3 + $0x200] sm:$0xff]  }
 0x28f   : > { %v9616_v53 = vpop.f32.mrb[36].mxu0  ;;  %9900 = vmatprep.subr.bf16.mxu1 %v10633_v45  ;;  %v10673_v45 = vld [vmem:[%s12917_s3 + $0x240] sm:$0xff]  }
 0x290   : > { %v9617_v56 = vpop.f32.mrb[37].mxu0  ;;  %v6234_v54 = vrot.slane %v8965_v43, 1  ;;  %v12738_v43 = vld [vmem:[#allocation2 + $0x28] sm:$0x33] }
 0x291   : > { %v9618_v57 = vadd.f32 %v9617_v56, %v9616_v53  ;;  %v9619_v59 = vpop.f32.mrb[38].mxu0  ;;  %9919 = vmatpush3.bf16.msra.mxu0 %v10632_v49  ;;  %v6602_v49 = vrot.slane %v6600_v40, 1  ;;  %v10672_v53 = vld [vmem:[%s12917_s3 + $0x1b0] sm:$0xff]   ;;  %v10677_v56 = vld [vmem:[%s12917_s3 + $0x1f8] sm:$0xff]  }
 0x292   : > { %v9620_v61 = vpop.f32.mrb[39].mxu0  ;;  %9901 = vmatpush3.bf16.msra.mxu1 %v10634_v51  ;;  %9920 = vmatprep.subr.bf16.mxu0 %v10635_v52  ;;  %v12634_v59 = vld [vmem:[#allocation2 + $0x20] sm:$0x66] }
 0x293   : > { %v12515_v26 = vadd.f32 %v9618_v57, %v3458_v48  ;;  %9930 = vmatprep.subr.bf16.mxu1 %v10637_v55  ;;  %v6598_v48 = vshrl.u32 %v9066_v0, 16  ;;  %v10680_v61 = vld [vmem:[%s12917_s3 + $0x208] sm:$0xff]   ;;  %v10705_v0 = vld [vmem:[%s12917_s3 + $0x278] sm:$0xff]  }
 0x295   : > { %9921 = vmatpush3.bf16.msra.mxu0 %v10636_v60  ;;  %6046 = vmatmul.mubr.bf16.vlgmr.msra.gmra.mrb[60].mxu1 %v5907_v1  ;;  %v6603_v57 = vor.u32 %v6602_v49, %v6598_v48  ;;  %v10678_v60 = vld [vmem:[%s12917_s3 + $0x1b8] sm:$0xff]   ;;  %v10685_v1 = vld [vmem:[%s12917_s3 + $0x250] sm:$0xff]  }
 0x296   : > { %9931 = vmatpush3.bf16.msra.mxu1 %v10638_v62  ;;  %6366 = vmatprep.mubr.bf16.mxu1 %v6235_v4  ;;  %v10681_v62 = vld [vmem:[%s12917_s3 + $0x2c0] sm:$0xff]   ;;  %v10686_v4 = vld [vmem:[%s12917_s3 + $0x210] sm:$0xff]  }
 0x297   : > { %9922 = vmatprep.subr.bf16.mxu0 %v10641_v2  ;;  %9932 = vmatprep.subr.bf16.mxu1 %v10643_v3  ;;  %v10682_v2 = vld [vmem:[%s12917_s3 + $0x280] sm:$0xff]   ;;  %v9015_v3 = vcombine.low %v12535_v10, %v12535_v10  ;;  %v10690_v10 = vld [vmem:[%s12917_s3 + $0x218] sm:$0xff]  }
 0x299   : > { %9923 = vmatpush3.bf16.msra.mxu0 %v10642_v5  ;;  %v10687_v5 = vld [vmem:[%s12917_s3 + $0x2c8] sm:$0xff]  }
 0x29a   : > { %9933 = vmatpush3.bf16.msra.mxu1 %v10644_v7  ;;  %9952 = vmatprep.subr.bf16.mxu0 %v10645_v46  ;;  %v10689_v46 = vld [vmem:[%s12917_s3 + $0x258] sm:$0xff]  }
 0x29b   : > { %9934 = vmatprep.subr.bf16.mxu1 %v10649_v8  ;;  %v10688_v8 = vld [vmem:[%s12917_s3 + $0x288] sm:$0xff]  }
 0x29c   : > { %6189 = vmatmul.mubr.bf16.vlgmr.msra.gmra.mrb[64].mxu0 %v8915_v13  ;;  %v10693_v13 = vld [vmem:[%s12917_s3 + $0x260] sm:$0xff]  }
 0x29d   : > { %9953 = vmatpush3.bf16.msra.mxu0 %v10646_v12  ;;  %6543 = vmatprep.mubr.bf16.mxu0 %v9016_v16  ;;  %v10691_v12 = vld [vmem:[%s12917_s3 + $0x2d0] sm:$0xff]   ;;  %v10695_v16 = vld [vmem:[%s12917_s3 + $0x2d8] sm:$0xff]  }
 0x29e   : > { %9935 = vmatpush3.bf16.msra.mxu1 %v10650_v6  ;;  %9954 = vmatprep.subr.bf16.mxu0 %v10651_v15  ;;  %v10692_v6 = vld [vmem:[%s12917_s3 + $0x290] sm:$0xff]   ;;  %v10694_v15 = vld [vmem:[%s12917_s3 + $0x220] sm:$0xff]  }
 0x29f   : > { %9936 = vmatprep.subr.bf16.mxu1 %v10653_v18  ;;  %v10697_v18 = vld [vmem:[%s12917_s3 + $0x268] sm:$0xff]  }
 0x2a1   : > { %9955 = vmatpush3.bf16.msra.mxu0 %v10652_v63  ;;  %v10696_v63 = vld [vmem:[%s12917_s3 + $0x298] sm:$0xff]  }
 0x2a2   : > { %9937 = vmatpush3.bf16.msra.mxu1 %v10654_v19  ;;  %9956 = vmatprep.subr.bf16.mxu0 %v10655_v17  ;;  %v10698_v19 = vld [vmem:[%s12917_s3 + $0x228] sm:$0xff]   ;;  %v10699_v17 = vld [vmem:[%s12917_s3 + $0x2e0] sm:$0xff]  }
 0x2a3   : > { %9938 = vmatprep.subr.bf16.mxu1 %v10657_v14  ;;  %v9065_v14 = vcombine.low %v12580_v27, %v12580_v27  ;;  %v10702_v27 = vld [vmem:[%s12917_s3 + $0x230] sm:$0xff]  }
 0x2a5   : > { %9957 = vmatpush3.bf16.msra.mxu0 %v10656_v21  ;;  %v10701_v21 = vld [vmem:[%s12917_s3 + $0x270] sm:$0xff]   ;;  %v6591_v40 = vshrl.u32 %v9065_v14, 16 }
 0x2a6   : > { %9939 = vmatpush3.bf16.msra.mxu1 %v10658_v22  ;;  %9958 = vmatprep.subr.bf16.mxu0 %v10659_v23 }
 0x2a7   : > { %9940 = vmatprep.subr.bf16.mxu1 %v10661_v24  ;;  %v10700_v24 = vld [vmem:[%s12917_s3 + $0x2a0] sm:$0xff]  }
 0x2a8   : > { %v9638_v30 = vpop.f32.mrb[36].mxu1 }
 0x2a9   : > { %9959 = vmatpush3.bf16.msra.mxu0 %v10660_v25  ;;  %v9639_v9 = vpop.f32.mrb[37].mxu1 }
 0x2aa   : > { %v9640_v35 = vadd.f32 %v9639_v9, %v9638_v30  ;;  %v9641_v28 = vpop.f32.mrb[38].mxu1  ;;  %9941 = vmatpush3.bf16.msra.mxu1 %v10662_v20  ;;  %9960 = vmatprep.subr.bf16.mxu0 %v10663_v11  ;;  %v10703_v11 = vld [vmem:[%s12917_s3 + $0x2e8] sm:$0xff]   ;;  %v6593_v9 = vshll.u32 %v9065_v14, 16 }
 0x2ab   : > { %v9642_v37 = vpop.f32.mrb[39].mxu1  ;;  %9942 = vmatprep.subr.bf16.mxu1 %v10665_v29  ;;  %v12711_v29 = vld [vmem:[#allocation2 + $0x28] sm:$0x77] }
 0x2ac   : > { %v3814_v38 = vadd.f32 %v9640_v35, %v12515_v26  ;;  %v9116_v26 = vcombine.high %v12634_v59, %v12634_v59  ;;  %v10704_v35 = vld [vmem:[%s12917_s3 + $0x2a8] sm:$0xff]   ;;  %v9216_v28 = vcombine.high %v12711_v29, %v12711_v29  ;;  %v10706_v37 = vld [vmem:[%s12917_s3 + $0x238] sm:$0xff]  }
 0x2ad   : > { %9961 = vmatpush3.bf16.msra.mxu0 %v10664_v32 }
 0x2ae   : > { %9943 = vmatpush3.bf16.msra.mxu1 %v10666_v33  ;;  %9962 = vmatprep.subr.bf16.mxu0 %v10667_v36  ;;  %v6782_v7 = vrot.slane %v9116_v26, 1  ;;  %v12725_v33 = vld [vmem:[%s12918_s4] ss:$0 sm:$0xff]  ;;  %v7148_v48 = vshll.u32 %v9216_v28, 16 }
 0x2af   : > { %v9660_v44 = vpop.f32.mrb[40].mxu0  ;;  %9944 = vmatprep.subr.bf16.mxu1 %v10669_v31  ;;  %v10707_v31 = vld [vmem:[%s12917_s3 + $0x2f0] sm:$0xff]  }
 0x2b0   : > { %v9661_v47 = vpop.f32.mrb[41].mxu0 }
 0x2b1   : > { %v9662_v51 = vadd.f32 %v9661_v47, %v9660_v44  ;;  %v9663_v52 = vpop.f32.mrb[42].mxu0  ;;  %9963 = vmatpush3.bf16.msra.mxu0 %v10668_v41  ;;  %v6595_v41 = vrot.slane %v6593_v9, 1  ;;  %v10708_v47 = vld [vmem:[%s12917_s3 + $0x2b0] sm:$0xff]  }
 0x2b2   : > { %v9664_v34 = vpop.f32.mrb[43].mxu0  ;;  %9945 = vmatpush3.bf16.msra.mxu1 %v10670_v42  ;;  %9964 = vmatprep.subr.bf16.mxu0 %v10671_v39  ;;  %v10709_v42 = vld [vmem:[%s12917_s3 + $0x340] sm:$0xff]   ;;  %v10711_v52 = vld [vmem:[%s12917_s3 + $0x2f8] sm:$0xff]   ;;  %v10739_v9 = vld [vmem:[%s12917_s3 + $0x3f0] sm:$0xff]  }
 0x2b3   : > { %v12626_v55 = vadd.f32 %v9662_v51, %v3814_v38  ;;  %9974 = vmatprep.subr.bf16.mxu1 %v10673_v45  ;;  %v10710_v51 = vld [vmem:[%s12917_s3 + $0x300] sm:$0xff]   ;;  %v10713_v34 = vld [vmem:[%s12917_s3 + $0x348] sm:$0xff]  }
 0x2b5   : > { %9965 = vmatpush3.bf16.msra.mxu0 %v10672_v53  ;;  %6367 = vmatmul.mubr.bf16.vlgmr.msra.gmra.mrb[64].mxu1 %v6234_v54  ;;  %v6596_v53 = vor.u32 %v6595_v41, %v6591_v40  ;;  %v10712_v54 = vld [vmem:[%s12917_s3 + $0x2b8] sm:$0xff]   ;;  %v10742_v40 = vld [vmem:[%s12917_s3 + $0x3b0] sm:$0xff]  }
 0x2b6   : > { %9975 = vmatpush3.bf16.msra.mxu1 %v10674_v50  ;;  %6734 = vmatprep.mubr.bf16.mxu1 %v6603_v57  ;;  %v9166_v50 = vcombine.high %v12738_v43, %v12738_v43  ;;  %v10714_v57 = vld [vmem:[%s12917_s3 + $0x308] sm:$0xff]  }
 0x2b7   : > { %9966 = vmatprep.subr.bf16.mxu0 %v10677_v56  ;;  %9976 = vmatprep.subr.bf16.mxu1 %v10679_v58  ;;  %v7150_v56 = vrot.slane %v7148_v48, 1  ;;  %v9115_v58 = vcombine.low %v12634_v59, %v12634_v59  ;;  %v10716_v59 = vld [vmem:[%s12917_s3 + $0x380] sm:$0xff]  }
 0x2b9   : > { %9967 = vmatpush3.bf16.msra.mxu0 %v10678_v60  ;;  %v10715_v60 = vld [vmem:[%s12917_s3 + $0x3c0] sm:$0xff]   ;;  %v6781_v26 = vrot.slane %v9115_v58, 1  ;;  %v10757_v58 = vld [vmem:[%s12917_s3 + $0x468] sm:$0xff]  }
 0x2ba   : > { %9977 = vmatpush3.bf16.msra.mxu1 %v10680_v61  ;;  %9996 = vmatprep.subr.bf16.mxu0 %v10681_v62  ;;  %v10717_v61 = vld [vmem:[%s12917_s3 + $0x350] sm:$0xff]  }
 0x2bb   : > { %9978 = vmatprep.subr.bf16.mxu1 %v10685_v1  ;;  %v10718_v1 = vld [vmem:[%s12917_s3 + $0x310] sm:$0xff]  }
 0x2bc   : > { %6544 = vmatmul.mubr.bf16.vlgmr.msra.gmra.mrb[68].mxu0 %v9015_v3  ;;  %v10721_v3 = vld [vmem:[%s12917_s3 + $0x358] sm:$0xff]  }
 0x2bd   : > { %9997 = vmatpush3.bf16.msra.mxu0 %v10682_v2  ;;  %6913 = vmatprep.mubr.bf16.mxu0 %v6782_v7  ;;  %v10719_v2 = vld [vmem:[%s12917_s3 + $0x3c8] sm:$0xff]   ;;  %v10723_v7 = vld [vmem:[%s12917_s3 + $0x3d0] sm:$0xff]  }
 0x2be   : > { %9979 = vmatpush3.bf16.msra.mxu1 %v10686_v4  ;;  %9998 = vmatprep.subr.bf16.mxu0 %v10687_v5  ;;  %v10720_v4 = vld [vmem:[%s12917_s3 + $0x388] sm:$0xff]   ;;  %v10722_v5 = vld [vmem:[%s12917_s3 + $0x318] sm:$0xff]  }
 0x2bf   : > { %9980 = vmatprep.subr.bf16.mxu1 %v10689_v46  ;;  %v10725_v46 = vld [vmem:[%s12917_s3 + $0x360] sm:$0xff]  }
 0x2c1   : > { %9999 = vmatpush3.bf16.msra.mxu0 %v10688_v8  ;;  %v10724_v8 = vld [vmem:[%s12917_s3 + $0x390] sm:$0xff]  }
 0x2c2   : > { %9981 = vmatpush3.bf16.msra.mxu1 %v10690_v10  ;;  %10000 = vmatprep.subr.bf16.mxu0 %v10691_v12  ;;  %v10726_v10 = vld [vmem:[%s12917_s3 + $0x320] sm:$0xff]   ;;  %v10727_v12 = vld [vmem:[%s12917_s3 + $0x3d8] sm:$0xff]  }
 0x2c3   : > { %9982 = vmatprep.subr.bf16.mxu1 %v10693_v13  ;;  %v10729_v13 = vld [vmem:[%s12917_s3 + $0x368] sm:$0xff]  }
 0x2c5   : > { %10001 = vmatpush3.bf16.msra.mxu0 %v10692_v6  ;;  %v10728_v6 = vld [vmem:[%s12917_s3 + $0x398] sm:$0xff]  }
 0x2c6   : > { %9983 = vmatpush3.bf16.msra.mxu1 %v10694_v15  ;;  %10002 = vmatprep.subr.bf16.mxu0 %v10695_v16  ;;  %v10730_v15 = vld [vmem:[%s12917_s3 + $0x328] sm:$0xff]   ;;  %v10731_v16 = vld [vmem:[%s12917_s3 + $0x3e0] sm:$0xff]  }
 0x2c7   : > { %9984 = vmatprep.subr.bf16.mxu1 %v10697_v18  ;;  %v10733_v18 = vld [vmem:[%s12917_s3 + $0x370] sm:$0xff]  }
 0x2c8   : > { %v9682_v22 = vpop.f32.mrb[40].mxu1 }
 0x2c9   : > { %10003 = vmatpush3.bf16.msra.mxu0 %v10696_v63  ;;  %v9683_v23 = vpop.f32.mrb[41].mxu1 }
 0x2ca   : > { %v9684_v25 = vadd.f32 %v9683_v23, %v9682_v22  ;;  %v9685_v20 = vpop.f32.mrb[42].mxu1  ;;  %9985 = vmatpush3.bf16.msra.mxu1 %v10698_v19  ;;  %10004 = vmatprep.subr.bf16.mxu0 %v10699_v17  ;;  %v10732_v17 = vld [vmem:[%s12917_s3 + $0x3a0] sm:$0xff]   ;;  %v10734_v22 = vld [vmem:[%s12917_s3 + $0x330] sm:$0xff]   ;;  %v10735_v23 = vld [vmem:[%s12917_s3 + $0x3e8] sm:$0xff]  }
 0x2cb   : > { %v9686_v30 = vpop.f32.mrb[43].mxu1  ;;  %9986 = vmatprep.subr.bf16.mxu1 %v10701_v21 }
 0x2cc   : > { %v4184_v32 = vadd.f32 %v9684_v25, %v12626_v55  ;;  %v7146_v55 = vshrl.u32 %v9216_v28, 16  ;;  %v10737_v25 = vld [vmem:[%s12917_s3 + $0x378] sm:$0xff]   ;;  %v10736_v30 = vld [vmem:[%s12917_s3 + $0x3a8] sm:$0xff]  }
 0x2cd   : > { %10005 = vmatpush3.bf16.msra.mxu0 %v10700_v24 }
 0x2ce   : > { %v4185_v36 = vadd.f32 %v12725_v33, %v4184_v32  ;;  %9987 = vmatpush3.bf16.msra.mxu1 %v10702_v27  ;;  %10006 = vmatprep.subr.bf16.mxu0 %v10703_v11  ;;  %v7151_v62 = vor.u32 %v7150_v56, %v7146_v55  ;;  %v9215_v27 = vcombine.low %v12711_v29, %v12711_v29  ;;  %v12833_v11 = vld [vmem:[#allocation2 + $0x28] sm:$0x66]  ;;  %v10743_v29 = vld [vmem:[%s12917_s3 + $0x440] sm:$0xff]  }
 0x2cf   : > { %v9704_v38 = vpop.f32.mrb[44].mxu0  ;;  %9988 = vmatprep.subr.bf16.mxu1 %v10705_v0  ;;  %v10738_v0 = vld [vmem:[%s12917_s3 + $0x338] sm:$0xff]   ;;  %v10755_v55 = vld [vmem:[%s12917_s3 + $0x460] sm:$0xff]  }
 0x2d0   : > { %8445 = vst [vmem:[%s12190_s20 + $0x4] sm:$0xf] %v4185_v36  ;;  %v9705_v39 = vpop.f32.mrb[45].mxu0  ;;  %v7141_v36 = vshll.u32 %v9215_v27, 16  ;;  %v10756_v56 = vld [vmem:[%s12917_s3 + $0x420] sm:$0xff]  }
 0x2d1   : > { %v12740_v44 = vadd.f32 %v9705_v39, %v9704_v38  ;;  %v9707_v45 = vpop.f32.mrb[46].mxu0  ;;  %10007 = vmatpush3.bf16.msra.mxu0 %v10704_v35  ;;  %v9266_v35 = vcombine.high %v12833_v11, %v12833_v11  ;;  %v9165_v38 = vcombine.low %v12738_v43, %v12738_v43  ;;  %v10745_v39 = vld [vmem:[%s12917_s3 + $0x3f8] sm:$0xff]   ;;  %v10747_v43 = vld [vmem:[%s12917_s3 + $0x448] sm:$0xff]  }
 0x2d2   : > { %v9708_v49 = vpop.f32.mrb[47].mxu0  ;;  %9989 = vmatpush3.bf16.msra.mxu1 %v10706_v37  ;;  %10008 = vmatprep.subr.bf16.mxu0 %v10707_v31  ;;  %v7143_v48 = vrot.slane %v7141_v36, 1 }
 0x2d3   : > { %10018 = vmatprep.subr.bf16.mxu1 %v10709_v42  ;;  %v10744_v42 = vld [vmem:[%s12917_s3 + $0x400] sm:$0xff]   ;;  %v7330_v45 = vrot.slane %v9266_v35, 1  ;;  %v10746_v49 = vld [vmem:[%s12917_s3 + $0x3b8] sm:$0xff]  }
 0x2d5   : > { %10009 = vmatpush3.bf16.msra.mxu0 %v10708_v47  ;;  %6735 = vmatmul.mubr.bf16.vlgmr.msra.gmra.mrb[68].mxu1 %v6596_v53  ;;  %v7139_v47 = vshrl.u32 %v9215_v27, 16 }
 0x2d6   : > { %10019 = vmatpush3.bf16.msra.mxu1 %v10710_v51  ;;  %10010 = vmatprep.subr.bf16.mxu0 %v10711_v52  ;;  %v10750_v51 = vld [vmem:[%s12917_s3 + $0x408] sm:$0xff]   ;;  %v10751_v52 = vld [vmem:[%s12917_s3 + $0x450] sm:$0xff]  }
 0x2d7   : > { %10020 = vmatprep.subr.bf16.mxu1 %v10713_v34  ;;  %7091 = vmatprep.mubr.bf16.mxu1 %v9166_v50  ;;  %v7144_v53 = vor.u32 %v7143_v48, %v7139_v47  ;;  %v10752_v34 = vld [vmem:[%s12917_s3 + $0x410] sm:$0xff]   ;;  %v10753_v50 = vld [vmem:[%s12917_s3 + $0x458] sm:$0xff]  }
 0x2d9   : > { %10011 = vmatpush3.bf16.msra.mxu0 %v10712_v54  ;;  %v10754_v54 = vld [vmem:[%s12917_s3 + $0x418] sm:$0xff]  }
 0x2da   : > { %10021 = vmatpush3.bf16.msra.mxu1 %v10714_v57  ;;  %10040 = vmatprep.subr.bf16.mxu0 %v10715_v60  ;;  %v10758_v57 = vld [vmem:[%s12917_s3 + $0x428] sm:$0xff]   ;;  %v10759_v60 = vld [vmem:[%s12917_s3 + $0x470] sm:$0xff]  }
 0x2db   : > { %10022 = vmatprep.subr.bf16.mxu1 %v10717_v61 }
 0x2dc   : > { %6914 = vmatmul.mubr.bf16.vlgmr.msra.gmra.mrb[72].mxu0 %v6781_v26 }
 0x2dd   : > { %10041 = vmatpush3.bf16.msra.mxu0 %v10716_v59  ;;  %7282 = vmatprep.mubr.bf16.mxu0 %v7151_v62 }
 0x2de   : > { %10023 = vmatpush3.bf16.msra.mxu1 %v10718_v1  ;;  %10042 = vmatprep.subr.bf16.mxu0 %v10719_v2  ;;  %v10760_v1 = vld [vmem:[%s12917_s3 + $0x430] sm:$0xff]  }
 0x2df   : > { %10024 = vmatprep.subr.bf16.mxu1 %v10721_v3  ;;  %v10761_v3 = vld [vmem:[%s12917_s3 + $0x478] sm:$0xff]  }
 0x2e1   : > { %10043 = vmatpush3.bf16.msra.mxu0 %v10720_v4 }
 0x2e2   : > { %10025 = vmatpush3.bf16.msra.mxu1 %v10722_v5  ;;  %10044 = vmatprep.subr.bf16.mxu0 %v10723_v7  ;;  %v9265_v5 = vcombine.low %v12833_v11, %v12833_v11  ;;  %v10762_v7 = vld [vmem:[%s12917_s3 + $0x438] sm:$0xff]  }
 0x2e3   : > { %10026 = vmatprep.subr.bf16.mxu1 %v10725_v46 }
 0x2e5   : > { %10045 = vmatpush3.bf16.msra.mxu0 %v10724_v8 }
 0x2e6   : > { %10027 = vmatpush3.bf16.msra.mxu1 %v10726_v10  ;;  %10046 = vmatprep.subr.bf16.mxu0 %v10727_v12 }
 0x2e7   : > { %10028 = vmatprep.subr.bf16.mxu1 %v10729_v13  ;;  %v7329_v13 = vrot.slane %v9265_v5, 1 }
 0x2e8   : > { %v9726_v63 = vpop.f32.mrb[44].mxu1 }
 0x2e9   : > { %10047 = vmatpush3.bf16.msra.mxu0 %v10728_v6  ;;  %v9727_v19 = vpop.f32.mrb[45].mxu1 }
 0x2ea   : > { %v9728_v14 = vadd.f32 %v9727_v19, %v9726_v63  ;;  %v9729_v21 = vpop.f32.mrb[46].mxu1  ;;  %10029 = vmatpush3.bf16.msra.mxu1 %v10730_v15  ;;  %10048 = vmatprep.subr.bf16.mxu0 %v10731_v16 }
 0x2eb   : > { %v9730_v24 = vpop.f32.mrb[47].mxu1  ;;  %10030 = vmatprep.subr.bf16.mxu1 %v10733_v18 }
 0x2ec   : > { %v4549_v20 = vadd.f32 %v9728_v14, %v12740_v44 }
 0x2ed   : > { %10049 = vmatpush3.bf16.msra.mxu0 %v10732_v17 }
 0x2ee   : > { %10031 = vmatpush3.bf16.msra.mxu1 %v10734_v22  ;;  %10050 = vmatprep.subr.bf16.mxu0 %v10735_v23 }
 0x2ef   : > { %v9748_v32 = vpop.f32.mrb[48].mxu0  ;;  %10032 = vmatprep.subr.bf16.mxu1 %v10737_v25 }
 0x2f0   : > { %v9749_v28 = vpop.f32.mrb[49].mxu0 }
 0x2f1   : > { %v9750_v37 = vadd.f32 %v9749_v28, %v9748_v32  ;;  %v9751_v31 = vpop.f32.mrb[50].mxu0  ;;  %10051 = vmatpush3.bf16.msra.mxu0 %v10736_v30 }
 0x2f2   : > { %v9752_v41 = vpop.f32.mrb[51].mxu0  ;;  %10033 = vmatpush3.bf16.msra.mxu1 %v10738_v0  ;;  %10052 = vmatprep.subr.bf16.mxu0 %v10739_v9 }
 0x2f3   : > { %v4732_v44 = vadd.f32 %v9750_v37, %v4549_v20  ;;  %10062 = vmatprep.subr.bf16.mxu1 %v10743_v29 }
 0x2f5   : > { %10053 = vmatpush3.bf16.msra.mxu0 %v10742_v40  ;;  %7092 = vmatmul.mubr.bf16.vlgmr.msra.gmra.mrb[72].mxu1 %v9165_v38 }
 0x2f6   : > { %10063 = vmatpush3.bf16.msra.mxu1 %v10744_v42  ;;  %10054 = vmatprep.subr.bf16.mxu0 %v10745_v39 }
 0x2f7   : > { %10064 = vmatprep.subr.bf16.mxu1 %v10747_v43  ;;  %7461 = vmatprep.mubr.bf16.mxu1 %v7330_v45 }
 0x2f9   : > { %10055 = vmatpush3.bf16.msra.mxu0 %v10746_v49 }
 0x2fa   : > { %10065 = vmatpush3.bf16.msra.mxu1 %v10750_v51 }
 0x2fb   : > { %10066 = vmatprep.subr.bf16.mxu1 %v10751_v52 }
 0x2fc   : > { %7283 = vmatmul.mubr.bf16.vlgmr.msra.gmra.mrb[76].mxu0 %v7144_v53 }
 0x2fe   : > { %10067 = vmatpush3.bf16.msra.mxu1 %v10752_v34 }
 0x2ff   : > { %10068 = vmatprep.subr.bf16.mxu1 %v10753_v50 }
 0x302   : > { %10069 = vmatpush3.bf16.msra.mxu1 %v10754_v54 }
 0x303   : > { %10070 = vmatprep.subr.bf16.mxu1 %v10755_v55 }
 0x306   : > { %10071 = vmatpush3.bf16.msra.mxu1 %v10756_v56 }
 0x307   : > { %10072 = vmatprep.subr.bf16.mxu1 %v10757_v58 }
 0x308   : > { %v9770_v61 = vpop.f32.mrb[48].mxu1 }
 0x309   : > { %v9771_v59 = vpop.f32.mrb[49].mxu1 }
 0x30a   : > { %v9772_v62 = vadd.f32 %v9771_v59, %v9770_v61  ;;  %v9773_v26 = vpop.f32.mrb[50].mxu1  ;;  %10073 = vmatpush3.bf16.msra.mxu1 %v10758_v57 }
 0x30b   : > { %v9774_v2 = vpop.f32.mrb[51].mxu1  ;;  %10074 = vmatprep.subr.bf16.mxu1 %v10759_v60 }
 0x30c   : > { %v4909_v4 = vadd.f32 %v9772_v62, %v4732_v44 }
 0x30e   : > { %10075 = vmatpush3.bf16.msra.mxu1 %v10760_v1 }
 0x30f   : > { %v9792_v46 = vpop.f32.mrb[52].mxu0  ;;  %10076 = vmatprep.subr.bf16.mxu1 %v10761_v3 }
 0x310   : > { %v9793_v8 = vpop.f32.mrb[53].mxu0 }
 0x311   : > { %v9794_v10 = vadd.f32 %v9793_v8, %v9792_v46  ;;  %v9795_v12 = vpop.f32.mrb[54].mxu0 }
 0x312   : > { %v9796_v6 = vpop.f32.mrb[55].mxu0  ;;  %10077 = vmatpush3.bf16.msra.mxu1 %v10762_v7 }
 0x313   : > { %v5100_v15 = vadd.f32 %v9794_v10, %v4909_v4 }
 0x315   : > { %7462 = vmatmul.mubr.bf16.vlgmr.msra.gmra.mrb[76].mxu1 %v7329_v13 }
 0x328   : > { %v9814_v16 = vpop.f32.mrb[52].mxu1 }
 0x329   : > { %v9815_v18 = vpop.f32.mrb[53].mxu1 }
 0x32a   : > { %v9816_v63 = vadd.f32 %v9815_v18, %v9814_v16  ;;  %v9817_v19 = vpop.f32.mrb[54].mxu1 }
 0x32b   : > { %v9818_v17 = vpop.f32.mrb[55].mxu1 }
 0x32c   : > { %v5279_v14 = vadd.f32 %v9816_v63, %v5100_v15 }
 0x32f   : > { %v9836_v21 = vpop.f32.mrb[56].mxu0 }
 0x330   : > { %v9837_v22 = vpop.f32.mrb[57].mxu0 }
 0x331   : > { %v9838_v23 = vadd.f32 %v9837_v22, %v9836_v21  ;;  %v9839_v24 = vpop.f32.mrb[58].mxu0 }
 0x332   : > { %v9840_v25 = vpop.f32.mrb[59].mxu0 }
 0x333   : > { %v5456_v20 = vadd.f32 %v9838_v23, %v5279_v14 }
 0x348   : > { %v9858_v27 = vpop.f32.mrb[56].mxu1 }
 0x349   : > { %v9859_v11 = vpop.f32.mrb[57].mxu1 }
 0x34a   : > { %v9860_v30 = vadd.f32 %v9859_v11, %v9858_v27  ;;  %v9861_v0 = vpop.f32.mrb[58].mxu1 }
 0x34b   : > { %v9862_v9 = vpop.f32.mrb[59].mxu1 }
 0x34c   : > { %v5647_v32 = vadd.f32 %v9860_v30, %v5456_v20 }
 0x34f   : > { %v9880_v29 = vpop.f32.mrb[60].mxu0 }
 0x350   : > { %v9881_v35 = vpop.f32.mrb[61].mxu0 }
 0x351   : > { %v9882_v28 = vadd.f32 %v9881_v35, %v9880_v29  ;;  %v9883_v36 = vpop.f32.mrb[62].mxu0 }
 0x352   : > { %v9884_v37 = vpop.f32.mrb[63].mxu0 }
 0x353   : > { %v5826_v31 = vadd.f32 %v9882_v28, %v5647_v32 }
 0x355   : > { %v5827_v38 = vadd.f32 %v12725_v33, %v5826_v31 }
 0x357   : > { %8864 = vst [vmem:[%s12190_s20 + $0x8] sm:$0xf] %v5827_v38 }
 0x368   : > { %v9902_v40 = vpop.f32.mrb[60].mxu1 }
 0x369   : > { %v9903_v41 = vpop.f32.mrb[61].mxu1 }
 0x36a   : > { %v9904_v42 = vadd.f32 %v9903_v41, %v9902_v40  ;;  %v9905_v39 = vpop.f32.mrb[62].mxu1 }
 0x36b   : > { %v9906_v44 = vpop.f32.mrb[63].mxu1 }
 0x36f   : > { %v9924_v43 = vpop.f32.mrb[64].mxu0 }
 0x370   : > { %v9925_v45 = vpop.f32.mrb[65].mxu0 }
 0x371   : > { %v9926_v47 = vadd.f32 %v9925_v45, %v9924_v43  ;;  %v9927_v48 = vpop.f32.mrb[66].mxu0 }
 0x372   : > { %v9928_v49 = vpop.f32.mrb[67].mxu0 }
 0x373   : > { %v6191_v51 = vadd.f32 %v9926_v47, %v9904_v42 }
 0x388   : > { %v9946_v52 = vpop.f32.mrb[64].mxu1 }
 0x389   : > { %v9947_v53 = vpop.f32.mrb[65].mxu1 }
 0x38a   : > { %v9948_v34 = vadd.f32 %v9947_v53, %v9946_v52  ;;  %v9949_v50 = vpop.f32.mrb[66].mxu1 }
 0x38b   : > { %v9950_v54 = vpop.f32.mrb[67].mxu1 }
 0x38c   : > { %v6374_v55 = vadd.f32 %v9948_v34, %v6191_v51 }
 0x38f   : > { %v9968_v56 = vpop.f32.mrb[68].mxu0 }
 0x390   : > { %v9969_v58 = vpop.f32.mrb[69].mxu0 }
 0x391   : > { %v9970_v57 = vadd.f32 %v9969_v58, %v9968_v56  ;;  %v9971_v60 = vpop.f32.mrb[70].mxu0 }
 0x392   : > { %v9972_v61 = vpop.f32.mrb[71].mxu0 }
 0x393   : > { %v6551_v59 = vadd.f32 %v9970_v57, %v6374_v55 }
 0x3a8   : > { %v9990_v62 = vpop.f32.mrb[68].mxu1 }
 0x3a9   : > { %v9991_v26 = vpop.f32.mrb[69].mxu1 }
 0x3aa   : > { %v9992_v1 = vadd.f32 %v9991_v26, %v9990_v62  ;;  %v9993_v2 = vpop.f32.mrb[70].mxu1 }
 0x3ab   : > { %v9994_v3 = vpop.f32.mrb[71].mxu1 }
 0x3ac   : > { %v6742_v4 = vadd.f32 %v9992_v1, %v6551_v59 }
 0x3af   : > { %v10012_v5 = vpop.f32.mrb[72].mxu0 }
 0x3b0   : > { %v10013_v7 = vpop.f32.mrb[73].mxu0 }
 0x3b1   : > { %v10014_v46 = vadd.f32 %v10013_v7, %v10012_v5  ;;  %v10015_v8 = vpop.f32.mrb[74].mxu0 }
 0x3b2   : > { %v10016_v10 = vpop.f32.mrb[75].mxu0 }
 0x3b3   : > { %v6921_v12 = vadd.f32 %v10014_v46, %v6742_v4 }
 0x3c8   : > { %v10034_v13 = vpop.f32.mrb[72].mxu1 }
 0x3c9   : > { %v10035_v6 = vpop.f32.mrb[73].mxu1 }
 0x3ca   : > { %v10036_v15 = vadd.f32 %v10035_v6, %v10034_v13  ;;  %v10037_v16 = vpop.f32.mrb[74].mxu1 }
 0x3cb   : > { %v10038_v18 = vpop.f32.mrb[75].mxu1 }
 0x3cc   : > { %v7099_v63 = vadd.f32 %v10036_v15, %v6921_v12 }
 0x3cf   : > { %v10056_v19 = vpop.f32.mrb[76].mxu0 }
 0x3d0   : > { %v10057_v17 = vpop.f32.mrb[77].mxu0 }
 0x3d1   : > { %v10058_v14 = vadd.f32 %v10057_v17, %v10056_v19  ;;  %v10059_v21 = vpop.f32.mrb[78].mxu0 }
 0x3d2   : > { %v10060_v22 = vpop.f32.mrb[79].mxu0 }
 0x3d3   : > { %v7290_v23 = vadd.f32 %v10058_v14, %v7099_v63 }
 0x3e8   : > { %v10078_v24 = vpop.f32.mrb[76].mxu1 }
 0x3e9   : > { %v10079_v25 = vpop.f32.mrb[77].mxu1 }
 0x3ea   : > { %v10080_v20 = vadd.f32 %v10079_v25, %v10078_v24  ;;  %v10081_v27 = vpop.f32.mrb[78].mxu1 }
 0x3eb   : > { %v10082_v11 = vpop.f32.mrb[79].mxu1 }
 0x3ec   : > { %v7469_v30 = vadd.f32 %v10080_v20, %v7290_v23 }
 0x3ee   : > { %v7470_v0 = vadd.f32 %v12725_v33, %v7469_v30 }
 0x3f0   : > { %9283 = vst [vmem:[%s12190_s20 + $0xc] sm:$0xf] %v7470_v0 }
 0x3f1 PF: > { %s15_s18 = sadd.s32 1, %s10772_s18  }
 0x3f2   : > { %p12_p4 = scmp.ge.s32.totalorder %s15_s18, 4  }
 0x3f4   :  { %14 = sbr.rel (!%p12_p4) target bundleno = 1 (0x1), region = 89 }

</bundles_post_ra>
